<compile_context>
chip_gen: v5e
topology: v5e:2x2
jax: 0.10.0
libtpu: 0.0.40
codegen_flags: <defaults>
</compile_context>

<pallas_src>
import math

import jax
import jax.numpy as jnp
from jax.experimental import pallas as pl
from jax.experimental.pallas import tpu as pltpu

# ----------------------------- model dimensions ------------------------------
B = 2            # batch
M_MEL = 16       # mel bins fed to the vocoder
T_MEL = 8        # mel frames
UPSAMPLE = 16    # waveform samples produced per mel frame by the synthetic vocoder
T_WAV = T_MEL * UPSAMPLE            # 128 waveform samples
FRAME = 16                          # WavLM feature-extractor frame (kernel == stride)
N_FRAMES = T_WAV // FRAME           # 8 tokens
D = 32                              # transformer hidden size
FFN = 64                            # feed-forward hidden size
N_LAYERS = 6                        # SPEAKER_INFORMATION_LAYER = 6
EPS = 1e-5                          # F.layer_norm default eps
NORMALIZE = True                    # cfg.normalize

N_TOWERS = 2                        # original + reconstruction, row-stacked
ROWS_PER_TOWER_WAV = B * T_MEL      # 16 vocoder rows (== feature frames) per tower
ROWS_PER_TOWER_FEAT = B * N_FRAMES  # 16 feature rows per tower
N_GROUPS = N_TOWERS * B             # 4 independent attention sequences of N_FRAMES
ATTN_SCALE = 1.0 / math.sqrt(D)

_VMEM = pl.BlockSpec(memory_space=pltpu.MemorySpace.VMEM)

# ------------------------- in-kernel helper functions -------------------------


def _erf(x):
    # Abramowitz & Stegun 7.1.26 polynomial (|err| < 1.5e-7): gives exact-erf
    # GELU parity with torch.nn.functional.gelu using only ops with guaranteed
    # Mosaic lowerings (exp, abs, cmp/select, mul, add).
    p = 0.3275911
    a1, a2, a3, a4, a5 = 0.254829592, -0.284496736, 1.421413741, -1.453152027, 1.061405429
    sgn = jnp.where(x >= 0.0, 1.0, -1.0)
    ax = jnp.abs(x)
    t = 1.0 / (1.0 + p * ax)
    poly = ((((a5 * t + a4) * t + a3) * t + a2) * t + a1) * t
    return sgn * (1.0 - poly * jnp.exp(-ax * ax))


def _gelu(x):
    # Exact (erf-based) GELU, matching PyTorch F.gelu default.
    return 0.5 * x * (1.0 + _erf(x * (1.0 / math.sqrt(2.0))))


def _ln_rows(x, g, b):
    # layer_norm over the last dim with affine params (1, n).
    m = jnp.mean(x, axis=-1, keepdims=True)
    c = x - m
    v = jnp.mean(c * c, axis=-1, keepdims=True)
    return c * jax.lax.rsqrt(v + EPS) * g + b


def _ln_all(x):
    # F.layer_norm(x, x.shape): normalize over ALL elements, no affine.
    m = jnp.mean(x)
    c = x - m
    v = jnp.mean(c * c)
    return c * jax.lax.rsqrt(v + EPS)


def _attn_group(q, k, v):
    # Single-head scaled-dot-product attention on one (N_FRAMES, D) sequence.
    s = jnp.dot(q, k.T, preferred_element_type=jnp.float32) * ATTN_SCALE
    s = s - jnp.max(s, axis=-1, keepdims=True)
    p = jnp.exp(s)
    p = p * pl.reciprocal(jnp.sum(p, axis=-1, keepdims=True), approx=True)
    return jnp.dot(p, v, preferred_element_type=jnp.float32)


# ------------------------------- fused kernel --------------------------------


def _wavlm_loss_kernel(
    mel_ref, voc_w_ref, voc_b_ref,
    fe_w_ref, fe_b_ref, fe_ln_g_ref, fe_ln_b_ref,
    ln1_g_ref, ln1_b_ref, wqkv_ref, bqkv_ref, wo_ref, bo_ref,
    ln2_g_ref, ln2_b_ref, w1_ref, b1_ref, w2_ref, b2_ref,
    o_ref,
):
    # ---- synthetic vocoder: per-mel-frame projection + tanh, both towers ----
    # rows = tower * (B*T_MEL) + b*T_MEL + t ; cols = UPSAMPLE samples of frame t
    wav = jnp.tanh(
        jnp.dot(mel_ref[...], voc_w_ref[...], preferred_element_type=jnp.float32)
        + voc_b_ref[...]
    )  # (32, 16)

    # ---- cfg.normalize: F.layer_norm over each tower's full (B, T_WAV) tensor ----
    if NORMALIZE:
        wav = jnp.concatenate(
            [
                _ln_all(wav[0:ROWS_PER_TOWER_WAV, :]),
                _ln_all(wav[ROWS_PER_TOWER_WAV:2 * ROWS_PER_TOWER_WAV, :]),
            ],
            axis=0,
        )

    # ---- WavLM feature extractor: framewise "conv" FRAME->D, exact GELU, LN ----
    # FRAME == UPSAMPLE, so each vocoder-output row is exactly one feature frame.
    x = _gelu(
        jnp.dot(wav, fe_w_ref[...], preferred_element_type=jnp.float32) + fe_b_ref[...]
    )
    x = _ln_rows(x, fe_ln_g_ref[...], fe_ln_b_ref[...])  # (32, D)

    # ---- 6 pre-LN encoder layers; fused QKV; attention per (tower, batch) seq ----
    # TODO(synk): real WavLM uses a 7-layer strided conv stack, multi-head
    # attention with gated relative position bias and a conv positional
    # embedding; here a single framewise projection + simplified single-head
    # encoder stands in.
    for l in range(N_LAYERS):
        h = _ln_rows(x, ln1_g_ref[l], ln1_b_ref[l])
        qkv = jnp.dot(h, wqkv_ref[l], preferred_element_type=jnp.float32) + bqkv_ref[l]
        q = qkv[:, 0:D]
        k = qkv[:, D:2 * D]
        v = qkv[:, 2 * D:3 * D]
        attn = jnp.concatenate(
            [
                _attn_group(
                    q[g * N_FRAMES:(g + 1) * N_FRAMES, :],
                    k[g * N_FRAMES:(g + 1) * N_FRAMES, :],
                    v[g * N_FRAMES:(g + 1) * N_FRAMES, :],
                )
                for g in range(N_GROUPS)
            ],
            axis=0,
        )
        x = x + jnp.dot(attn, wo_ref[l], preferred_element_type=jnp.float32) + bo_ref[l]

        h = _ln_rows(x, ln2_g_ref[l], ln2_b_ref[l])
        h = _gelu(jnp.dot(h, w1_ref[l], preferred_element_type=jnp.float32) + b1_ref[l])
        x = x + jnp.dot(h, w2_ref[l], preferred_element_type=jnp.float32) + b2_ref[l]

    # ---- MSE between the two towers' layer-6 features (nn.MSELoss: mean) ----
    d = x[0:ROWS_PER_TOWER_FEAT, :] - x[ROWS_PER_TOWER_FEAT:2 * ROWS_PER_TOWER_FEAT, :]
    o_ref[...] = jnp.full((1, 1), jnp.mean(d * d), dtype=o_ref.dtype)


# ------------------------------ parameter setup ------------------------------


def init_params(key):
    # TODO(synk): torch.load of the pretrained WavLM / vocoder checkpoints has
    # no equivalent here; weights are deterministic synthetic initializations.
    def nrm(k, shape, scale=0.02):
        return (scale * jax.random.normal(k, shape)).astype(jnp.float32)

    ks = jax.random.split(key, 6)
    return {
        # synthetic vocoder: per-mel-frame projection M_MEL -> UPSAMPLE, tanh
        "voc_w": nrm(ks[0], (M_MEL, UPSAMPLE), 0.2),
        "voc_b": jnp.zeros((1, UPSAMPLE), jnp.float32),
        # WavLM feature extractor: framewise "conv" FRAME -> D, gelu, LN
        "fe_w": nrm(ks[1], (FRAME, D), 0.1),
        "fe_b": jnp.zeros((1, D), jnp.float32),
        "fe_ln_g": jnp.ones((1, D), jnp.float32),
        "fe_ln_b": jnp.zeros((1, D), jnp.float32),
        # encoder layers, stacked over a leading layer axis
        "ln1_g": jnp.ones((N_LAYERS, 1, D), jnp.float32),
        "ln1_b": jnp.zeros((N_LAYERS, 1, D), jnp.float32),
        "wqkv": nrm(ks[2], (N_LAYERS, D, 3 * D)),          # fused Q|K|V
        "bqkv": jnp.zeros((N_LAYERS, 1, 3 * D), jnp.float32),
        "wo": nrm(ks[3], (N_LAYERS, D, D)),
        "bo": jnp.zeros((N_LAYERS, 1, D), jnp.float32),
        "ln2_g": jnp.ones((N_LAYERS, 1, D), jnp.float32),
        "ln2_b": jnp.zeros((N_LAYERS, 1, D), jnp.float32),
        "w1": nrm(ks[4], (N_LAYERS, D, FFN)),
        "b1": jnp.zeros((N_LAYERS, 1, FFN), jnp.float32),
        "w2": nrm(ks[5], (N_LAYERS, FFN, D)),
        "b2": jnp.zeros((N_LAYERS, 1, D), jnp.float32),
    }


# --------------------------------- forward -----------------------------------


def wavlm_loss(original, reconstruction, params):
    # mel: (B, M_MEL, T_MEL) PyTorch NCW -> framewise rows (B*T_MEL, M_MEL);
    # both towers row-stacked so one fused kernel processes them together.
    def frames(mel):
        return jnp.transpose(mel, (0, 2, 1)).reshape(B * T_MEL, M_MEL)

    x_mel = jnp.concatenate([frames(original), frames(reconstruction)], axis=0)

    out = pl.pallas_call(
        _wavlm_loss_kernel,
        out_shape=jax.ShapeDtypeStruct((1, 1), jnp.float32),
        in_specs=[_VMEM] * 19,
        out_specs=_VMEM,
    )(
        x_mel,
        params["voc_w"], params["voc_b"],
        params["fe_w"], params["fe_b"], params["fe_ln_g"], params["fe_ln_b"],
        params["ln1_g"], params["ln1_b"], params["wqkv"], params["bqkv"],
        params["wo"], params["bo"], params["ln2_g"], params["ln2_b"],
        params["w1"], params["b1"], params["w2"], params["b2"],
    )
    return out[0, 0]


# ----------------------------------- main -------------------------------------

if __name__ == "__main__":
    key = jax.random.PRNGKey(0)
    k_in, k_noise, k_params = jax.random.split(key, 3)

    params = init_params(k_params)

    original = jax.random.normal(k_in, (B, M_MEL, T_MEL), dtype=jnp.float32)
    reconstruction = original + 0.1 * jax.random.normal(
        k_noise, (B, M_MEL, T_MEL), dtype=jnp.float32
    )

    loss = jax.jit(wavlm_loss)(original, reconstruction, params)
    loss = jax.block_until_ready(loss)
    assert loss.shape == () and jnp.isfinite(loss)
    print("KERNEL_OK")
</pallas_src>

<mosaic_0001>
module attributes {stable_mosaic.version = 11 : i64} {
  func.func @_wavlm_loss_kernel(%arg0: memref<32x16xf32, #tpu.memory_space<vmem>>, %arg1: memref<16x16xf32, #tpu.memory_space<vmem>>, %arg2: memref<1x16xf32, #tpu.memory_space<vmem>>, %arg3: memref<16x32xf32, #tpu.memory_space<vmem>>, %arg4: memref<1x32xf32, #tpu.memory_space<vmem>>, %arg5: memref<1x32xf32, #tpu.memory_space<vmem>>, %arg6: memref<1x32xf32, #tpu.memory_space<vmem>>, %arg7: memref<6x1x32xf32, #tpu.memory_space<vmem>>, %arg8: memref<6x1x32xf32, #tpu.memory_space<vmem>>, %arg9: memref<6x32x96xf32, #tpu.memory_space<vmem>>, %arg10: memref<6x1x96xf32, #tpu.memory_space<vmem>>, %arg11: memref<6x32x32xf32, #tpu.memory_space<vmem>>, %arg12: memref<6x1x32xf32, #tpu.memory_space<vmem>>, %arg13: memref<6x1x32xf32, #tpu.memory_space<vmem>>, %arg14: memref<6x1x32xf32, #tpu.memory_space<vmem>>, %arg15: memref<6x32x64xf32, #tpu.memory_space<vmem>>, %arg16: memref<6x1x64xf32, #tpu.memory_space<vmem>>, %arg17: memref<6x64x32xf32, #tpu.memory_space<vmem>>, %arg18: memref<6x1x32xf32, #tpu.memory_space<vmem>>, %arg19: memref<1x1xf32, #tpu.memory_space<vmem>>) attributes {dimension_semantics = [], scalar_prefetch = 0 : i64, scratch_operands = 0 : i64, tpu.core_type = #tpu.core_type<tc>} {
    %c0 = arith.constant 0 : index
    %c0_0 = arith.constant 0 : index
    %0 = vector.load %arg0[%c0, %c0_0] : memref<32x16xf32, #tpu.memory_space<vmem>>, vector<32x16xf32>
    %c0_1 = arith.constant 0 : index
    %c0_2 = arith.constant 0 : index
    %1 = vector.load %arg1[%c0_1, %c0_2] : memref<16x16xf32, #tpu.memory_space<vmem>>, vector<16x16xf32>
    %cst = arith.constant dense<0.000000e+00> : vector<32x16xf32>
    %2 = tpu.matmul %0, %1, %cst {dimension_numbers = #tpu.dot_dimension_numbers<[1], [0], [0], [1], [0, 0, 1, 1], [], []>} : vector<32x16xf32>, vector<16x16xf32>, vector<32x16xf32> -> vector<32x16xf32>
    %c0_3 = arith.constant 0 : index
    %c0_4 = arith.constant 0 : index
    %3 = vector.load %arg2[%c0_3, %c0_4] : memref<1x16xf32, #tpu.memory_space<vmem>>, vector<1x16xf32>
    %4 = vector.broadcast %3 : vector<1x16xf32> to vector<32x16xf32>
    %5 = arith.addf %2, %4 : vector<32x16xf32>
    %6 = math.tanh %5 : vector<32x16xf32>
    %7 = vector.extract_strided_slice %6 {offsets = [0, 0], sizes = [16, 16], strides = [1, 1]} : vector<32x16xf32> to vector<16x16xf32>
    %8 = vector.shape_cast %7 : vector<16x16xf32> to vector<1x16x16xf32>
    %cst_5 = arith.constant dense<0.000000e+00> : vector<1xf32>
    %9 = vector.multi_reduction <add>, %8, %cst_5 [1, 2] : vector<1x16x16xf32> to vector<1xf32>
    %10 = vector.shape_cast %9 : vector<1xf32> to vector<1x1x1xf32>
    %11 = vector.extract %10[0, 0, 0] : f32 from vector<1x1x1xf32>
    %cst_6 = arith.constant 2.560000e+02 : f32
    %12 = arith.divf %11, %cst_6 : f32
    %13 = vector.broadcast %12 : f32 to vector<16x16xf32>
    %14 = arith.subf %7, %13 : vector<16x16xf32>
    %15 = arith.mulf %14, %14 : vector<16x16xf32>
    %16 = vector.shape_cast %15 : vector<16x16xf32> to vector<1x16x16xf32>
    %cst_7 = arith.constant dense<0.000000e+00> : vector<1xf32>
    %17 = vector.multi_reduction <add>, %16, %cst_7 [1, 2] : vector<1x16x16xf32> to vector<1xf32>
    %18 = vector.shape_cast %17 : vector<1xf32> to vector<1x1x1xf32>
    %19 = vector.extract %18[0, 0, 0] : f32 from vector<1x1x1xf32>
    %cst_8 = arith.constant 2.560000e+02 : f32
    %20 = arith.divf %19, %cst_8 : f32
    %cst_9 = arith.constant 9.99999974E-6 : f32
    %21 = arith.addf %20, %cst_9 : f32
    %22 = math.rsqrt %21 : f32
    %23 = vector.broadcast %22 : f32 to vector<16x16xf32>
    %24 = arith.mulf %14, %23 : vector<16x16xf32>
    %25 = vector.extract_strided_slice %6 {offsets = [16, 0], sizes = [16, 16], strides = [1, 1]} : vector<32x16xf32> to vector<16x16xf32>
    %26 = vector.shape_cast %25 : vector<16x16xf32> to vector<1x16x16xf32>
    %cst_10 = arith.constant dense<0.000000e+00> : vector<1xf32>
    %27 = vector.multi_reduction <add>, %26, %cst_10 [1, 2] : vector<1x16x16xf32> to vector<1xf32>
    %28 = vector.shape_cast %27 : vector<1xf32> to vector<1x1x1xf32>
    %29 = vector.extract %28[0, 0, 0] : f32 from vector<1x1x1xf32>
    %cst_11 = arith.constant 2.560000e+02 : f32
    %30 = arith.divf %29, %cst_11 : f32
    %31 = vector.broadcast %30 : f32 to vector<16x16xf32>
    %32 = arith.subf %25, %31 : vector<16x16xf32>
    %33 = arith.mulf %32, %32 : vector<16x16xf32>
    %34 = vector.shape_cast %33 : vector<16x16xf32> to vector<1x16x16xf32>
    %cst_12 = arith.constant dense<0.000000e+00> : vector<1xf32>
    %35 = vector.multi_reduction <add>, %34, %cst_12 [1, 2] : vector<1x16x16xf32> to vector<1xf32>
    %36 = vector.shape_cast %35 : vector<1xf32> to vector<1x1x1xf32>
    %37 = vector.extract %36[0, 0, 0] : f32 from vector<1x1x1xf32>
    %cst_13 = arith.constant 2.560000e+02 : f32
    %38 = arith.divf %37, %cst_13 : f32
    %cst_14 = arith.constant 9.99999974E-6 : f32
    %39 = arith.addf %38, %cst_14 : f32
    %40 = math.rsqrt %39 : f32
    %41 = vector.broadcast %40 : f32 to vector<16x16xf32>
    %42 = arith.mulf %32, %41 : vector<16x16xf32>
    %43 = tpu.concatenate %24, %42 in 0 : vector<16x16xf32>, vector<16x16xf32> -> vector<32x16xf32>
    %c0_15 = arith.constant 0 : index
    %c0_16 = arith.constant 0 : index
    %44 = vector.load %arg3[%c0_15, %c0_16] : memref<16x32xf32, #tpu.memory_space<vmem>>, vector<16x32xf32>
    %cst_17 = arith.constant dense<0.000000e+00> : vector<32x32xf32>
    %45 = tpu.matmul %43, %44, %cst_17 {dimension_numbers = #tpu.dot_dimension_numbers<[1], [0], [0], [1], [0, 0, 1, 1], [], []>} : vector<32x16xf32>, vector<16x32xf32>, vector<32x32xf32> -> vector<32x32xf32>
    %c0_18 = arith.constant 0 : index
    %c0_19 = arith.constant 0 : index
    %46 = vector.load %arg4[%c0_18, %c0_19] : memref<1x32xf32, #tpu.memory_space<vmem>>, vector<1x32xf32>
    %47 = vector.broadcast %46 : vector<1x32xf32> to vector<32x32xf32>
    %48 = arith.addf %45, %47 : vector<32x32xf32>
    %cst_20 = arith.constant 5.000000e-01 : f32
    %49 = vector.broadcast %cst_20 : f32 to vector<32x32xf32>
    %50 = arith.mulf %49, %48 : vector<32x32xf32>
    %cst_21 = arith.constant 0.707106769 : f32
    %51 = vector.broadcast %cst_21 : f32 to vector<32x32xf32>
    %52 = arith.mulf %48, %51 : vector<32x32xf32>
    %cst_22 = arith.constant 0.000000e+00 : f32
    %53 = vector.broadcast %cst_22 : f32 to vector<32x32xf32>
    %54 = arith.cmpf oge, %52, %53 : vector<32x32xf32>
    %cst_23 = arith.constant 1.000000e+00 : f32
    %cst_24 = arith.constant -1.000000e+00 : f32
    %55 = vector.broadcast %cst_23 : f32 to vector<32x32xf32>
    %56 = vector.broadcast %cst_24 : f32 to vector<32x32xf32>
    %57 = arith.select %54, %55, %56 : vector<32x32xi1>, vector<32x32xf32>
    %58 = math.absf %52 : vector<32x32xf32>
    %cst_25 = arith.constant 0.327591091 : f32
    %59 = vector.broadcast %cst_25 : f32 to vector<32x32xf32>
    %60 = arith.mulf %59, %58 : vector<32x32xf32>
    %cst_26 = arith.constant 1.000000e+00 : f32
    %61 = vector.broadcast %cst_26 : f32 to vector<32x32xf32>
    %62 = arith.addf %61, %60 : vector<32x32xf32>
    %cst_27 = arith.constant 1.000000e+00 : f32
    %63 = vector.broadcast %cst_27 : f32 to vector<32x32xf32>
    %64 = arith.divf %63, %62 : vector<32x32xf32>
    %cst_28 = arith.constant 1.06140542 : f32
    %65 = vector.broadcast %cst_28 : f32 to vector<32x32xf32>
    %66 = arith.mulf %65, %64 : vector<32x32xf32>
    %cst_29 = arith.constant -1.45315206 : f32
    %67 = vector.broadcast %cst_29 : f32 to vector<32x32xf32>
    %68 = arith.addf %66, %67 : vector<32x32xf32>
    %69 = arith.mulf %68, %64 : vector<32x32xf32>
    %cst_30 = arith.constant 1.42141378 : f32
    %70 = vector.broadcast %cst_30 : f32 to vector<32x32xf32>
    %71 = arith.addf %69, %70 : vector<32x32xf32>
    %72 = arith.mulf %71, %64 : vector<32x32xf32>
    %cst_31 = arith.constant -0.284496725 : f32
    %73 = vector.broadcast %cst_31 : f32 to vector<32x32xf32>
    %74 = arith.addf %72, %73 : vector<32x32xf32>
    %75 = arith.mulf %74, %64 : vector<32x32xf32>
    %cst_32 = arith.constant 0.254829586 : f32
    %76 = vector.broadcast %cst_32 : f32 to vector<32x32xf32>
    %77 = arith.addf %75, %76 : vector<32x32xf32>
    %78 = arith.mulf %77, %64 : vector<32x32xf32>
    %cst_33 = arith.constant 0.000000e+00 : f32
    %79 = vector.broadcast %cst_33 : f32 to vector<32x32xf32>
    %80 = arith.subf %79, %58 : vector<32x32xf32>
    %81 = arith.mulf %80, %58 : vector<32x32xf32>
    %82 = math.exp %81 : vector<32x32xf32>
    %83 = arith.mulf %78, %82 : vector<32x32xf32>
    %cst_34 = arith.constant 1.000000e+00 : f32
    %84 = vector.broadcast %cst_34 : f32 to vector<32x32xf32>
    %85 = arith.subf %84, %83 : vector<32x32xf32>
    %86 = arith.mulf %57, %85 : vector<32x32xf32>
    %cst_35 = arith.constant 1.000000e+00 : f32
    %87 = vector.broadcast %cst_35 : f32 to vector<32x32xf32>
    %88 = arith.addf %87, %86 : vector<32x32xf32>
    %89 = arith.mulf %50, %88 : vector<32x32xf32>
    %c0_36 = arith.constant 0 : index
    %c0_37 = arith.constant 0 : index
    %90 = vector.load %arg5[%c0_36, %c0_37] : memref<1x32xf32, #tpu.memory_space<vmem>>, vector<1x32xf32>
    %c0_38 = arith.constant 0 : index
    %c0_39 = arith.constant 0 : index
    %91 = vector.load %arg6[%c0_38, %c0_39] : memref<1x32xf32, #tpu.memory_space<vmem>>, vector<1x32xf32>
    %cst_40 = arith.constant dense<0.000000e+00> : vector<32xf32>
    %92 = vector.multi_reduction <add>, %89, %cst_40 [1] : vector<32x32xf32> to vector<32xf32>
    %93 = vector.shape_cast %92 : vector<32xf32> to vector<32x1xf32>
    %cst_41 = arith.constant 3.200000e+01 : f32
    %94 = vector.broadcast %cst_41 : f32 to vector<32x1xf32>
    %95 = arith.divf %93, %94 : vector<32x1xf32>
    %96 = vector.broadcast %95 : vector<32x1xf32> to vector<32x32xf32>
    %97 = arith.subf %89, %96 : vector<32x32xf32>
    %98 = arith.mulf %97, %97 : vector<32x32xf32>
    %cst_42 = arith.constant dense<0.000000e+00> : vector<32xf32>
    %99 = vector.multi_reduction <add>, %98, %cst_42 [1] : vector<32x32xf32> to vector<32xf32>
    %100 = vector.shape_cast %99 : vector<32xf32> to vector<32x1xf32>
    %cst_43 = arith.constant 3.200000e+01 : f32
    %101 = vector.broadcast %cst_43 : f32 to vector<32x1xf32>
    %102 = arith.divf %100, %101 : vector<32x1xf32>
    %cst_44 = arith.constant 9.99999974E-6 : f32
    %103 = vector.broadcast %cst_44 : f32 to vector<32x1xf32>
    %104 = arith.addf %102, %103 : vector<32x1xf32>
    %105 = math.rsqrt %104 : vector<32x1xf32>
    %106 = vector.broadcast %105 : vector<32x1xf32> to vector<32x32xf32>
    %107 = arith.mulf %97, %106 : vector<32x32xf32>
    %108 = vector.broadcast %90 : vector<1x32xf32> to vector<32x32xf32>
    %109 = arith.mulf %107, %108 : vector<32x32xf32>
    %110 = vector.broadcast %91 : vector<1x32xf32> to vector<32x32xf32>
    %111 = arith.addf %109, %110 : vector<32x32xf32>
    %c0_45 = arith.constant 0 : index
    %c0_46 = arith.constant 0 : index
    %c0_47 = arith.constant 0 : index
    %112 = vector.load %arg7[%c0_45, %c0_46, %c0_47] : memref<6x1x32xf32, #tpu.memory_space<vmem>>, vector<1x1x32xf32>
    %113 = vector.shape_cast %112 : vector<1x1x32xf32> to vector<1x32xf32>
    %c0_48 = arith.constant 0 : index
    %c0_49 = arith.constant 0 : index
    %c0_50 = arith.constant 0 : index
    %114 = vector.load %arg8[%c0_48, %c0_49, %c0_50] : memref<6x1x32xf32, #tpu.memory_space<vmem>>, vector<1x1x32xf32>
    %115 = vector.shape_cast %114 : vector<1x1x32xf32> to vector<1x32xf32>
    %cst_51 = arith.constant dense<0.000000e+00> : vector<32xf32>
    %116 = vector.multi_reduction <add>, %111, %cst_51 [1] : vector<32x32xf32> to vector<32xf32>
    %117 = vector.shape_cast %116 : vector<32xf32> to vector<32x1xf32>
    %cst_52 = arith.constant 3.200000e+01 : f32
    %118 = vector.broadcast %cst_52 : f32 to vector<32x1xf32>
    %119 = arith.divf %117, %118 : vector<32x1xf32>
    %120 = vector.broadcast %119 : vector<32x1xf32> to vector<32x32xf32>
    %121 = arith.subf %111, %120 : vector<32x32xf32>
    %122 = arith.mulf %121, %121 : vector<32x32xf32>
    %cst_53 = arith.constant dense<0.000000e+00> : vector<32xf32>
    %123 = vector.multi_reduction <add>, %122, %cst_53 [1] : vector<32x32xf32> to vector<32xf32>
    %124 = vector.shape_cast %123 : vector<32xf32> to vector<32x1xf32>
    %cst_54 = arith.constant 3.200000e+01 : f32
    %125 = vector.broadcast %cst_54 : f32 to vector<32x1xf32>
    %126 = arith.divf %124, %125 : vector<32x1xf32>
    %cst_55 = arith.constant 9.99999974E-6 : f32
    %127 = vector.broadcast %cst_55 : f32 to vector<32x1xf32>
    %128 = arith.addf %126, %127 : vector<32x1xf32>
    %129 = math.rsqrt %128 : vector<32x1xf32>
    %130 = vector.broadcast %129 : vector<32x1xf32> to vector<32x32xf32>
    %131 = arith.mulf %121, %130 : vector<32x32xf32>
    %132 = vector.broadcast %113 : vector<1x32xf32> to vector<32x32xf32>
    %133 = arith.mulf %131, %132 : vector<32x32xf32>
    %134 = vector.broadcast %115 : vector<1x32xf32> to vector<32x32xf32>
    %135 = arith.addf %133, %134 : vector<32x32xf32>
    %c0_56 = arith.constant 0 : index
    %c0_57 = arith.constant 0 : index
    %c0_58 = arith.constant 0 : index
    %136 = vector.load %arg9[%c0_56, %c0_57, %c0_58] : memref<6x32x96xf32, #tpu.memory_space<vmem>>, vector<1x32x96xf32>
    %137 = vector.shape_cast %136 : vector<1x32x96xf32> to vector<32x96xf32>
    %cst_59 = arith.constant dense<0.000000e+00> : vector<32x96xf32>
    %138 = tpu.matmul %135, %137, %cst_59 {dimension_numbers = #tpu.dot_dimension_numbers<[1], [0], [0], [1], [0, 0, 1, 1], [], []>} : vector<32x32xf32>, vector<32x96xf32>, vector<32x96xf32> -> vector<32x96xf32>
    %c0_60 = arith.constant 0 : index
    %c0_61 = arith.constant 0 : index
    %c0_62 = arith.constant 0 : index
    %139 = vector.load %arg10[%c0_60, %c0_61, %c0_62] : memref<6x1x96xf32, #tpu.memory_space<vmem>>, vector<1x1x96xf32>
    %140 = vector.shape_cast %139 : vector<1x1x96xf32> to vector<1x96xf32>
    %141 = vector.broadcast %140 : vector<1x96xf32> to vector<32x96xf32>
    %142 = arith.addf %138, %141 : vector<32x96xf32>
    %143 = vector.extract_strided_slice %142 {offsets = [0, 0], sizes = [32, 32], strides = [1, 1]} : vector<32x96xf32> to vector<32x32xf32>
    %144 = vector.extract_strided_slice %142 {offsets = [0, 32], sizes = [32, 32], strides = [1, 1]} : vector<32x96xf32> to vector<32x32xf32>
    %145 = vector.extract_strided_slice %142 {offsets = [0, 64], sizes = [32, 32], strides = [1, 1]} : vector<32x96xf32> to vector<32x32xf32>
    %146 = vector.extract_strided_slice %143 {offsets = [0, 0], sizes = [8, 32], strides = [1, 1]} : vector<32x32xf32> to vector<8x32xf32>
    %147 = vector.extract_strided_slice %144 {offsets = [0, 0], sizes = [8, 32], strides = [1, 1]} : vector<32x32xf32> to vector<8x32xf32>
    %148 = vector.extract_strided_slice %145 {offsets = [0, 0], sizes = [8, 32], strides = [1, 1]} : vector<32x32xf32> to vector<8x32xf32>
    %149 = tpu.transpose %147, [1, 0] : vector<8x32xf32> -> vector<32x8xf32>
    %cst_63 = arith.constant dense<0.000000e+00> : vector<8x8xf32>
    %150 = tpu.matmul %146, %149, %cst_63 {dimension_numbers = #tpu.dot_dimension_numbers<[1], [0], [0], [1], [0, 0, 1, 1], [], []>} : vector<8x32xf32>, vector<32x8xf32>, vector<8x8xf32> -> vector<8x8xf32>
    %cst_64 = arith.constant 0.176776692 : f32
    %151 = vector.broadcast %cst_64 : f32 to vector<8x8xf32>
    %152 = arith.mulf %150, %151 : vector<8x8xf32>
    %cst_65 = arith.constant dense<0xFF800000> : vector<8xf32>
    %153 = vector.multi_reduction <maximumf>, %152, %cst_65 [1] : vector<8x8xf32> to vector<8xf32>
    %154 = vector.shape_cast %153 : vector<8xf32> to vector<8x1xf32>
    %155 = vector.broadcast %154 : vector<8x1xf32> to vector<8x8xf32>
    %156 = arith.subf %152, %155 : vector<8x8xf32>
    %157 = math.exp %156 : vector<8x8xf32>
    %cst_66 = arith.constant dense<0.000000e+00> : vector<8xf32>
    %158 = vector.multi_reduction <add>, %157, %cst_66 [1] : vector<8x8xf32> to vector<8xf32>
    %159 = vector.shape_cast %158 : vector<8xf32> to vector<8x1xf32>
    %160 = tpu.reciprocal %159 {approx = true} : vector<8x1xf32> -> vector<8x1xf32>
    %161 = vector.broadcast %160 : vector<8x1xf32> to vector<8x8xf32>
    %162 = arith.mulf %157, %161 : vector<8x8xf32>
    %cst_67 = arith.constant dense<0.000000e+00> : vector<8x32xf32>
    %163 = tpu.matmul %162, %148, %cst_67 {dimension_numbers = #tpu.dot_dimension_numbers<[1], [0], [0], [1], [0, 0, 1, 1], [], []>} : vector<8x8xf32>, vector<8x32xf32>, vector<8x32xf32> -> vector<8x32xf32>
    %164 = vector.extract_strided_slice %143 {offsets = [8, 0], sizes = [8, 32], strides = [1, 1]} : vector<32x32xf32> to vector<8x32xf32>
    %165 = vector.extract_strided_slice %144 {offsets = [8, 0], sizes = [8, 32], strides = [1, 1]} : vector<32x32xf32> to vector<8x32xf32>
    %166 = vector.extract_strided_slice %145 {offsets = [8, 0], sizes = [8, 32], strides = [1, 1]} : vector<32x32xf32> to vector<8x32xf32>
    %167 = tpu.transpose %165, [1, 0] : vector<8x32xf32> -> vector<32x8xf32>
    %cst_68 = arith.constant dense<0.000000e+00> : vector<8x8xf32>
    %168 = tpu.matmul %164, %167, %cst_68 {dimension_numbers = #tpu.dot_dimension_numbers<[1], [0], [0], [1], [0, 0, 1, 1], [], []>} : vector<8x32xf32>, vector<32x8xf32>, vector<8x8xf32> -> vector<8x8xf32>
    %cst_69 = arith.constant 0.176776692 : f32
    %169 = vector.broadcast %cst_69 : f32 to vector<8x8xf32>
    %170 = arith.mulf %168, %169 : vector<8x8xf32>
    %cst_70 = arith.constant dense<0xFF800000> : vector<8xf32>
    %171 = vector.multi_reduction <maximumf>, %170, %cst_70 [1] : vector<8x8xf32> to vector<8xf32>
    %172 = vector.shape_cast %171 : vector<8xf32> to vector<8x1xf32>
    %173 = vector.broadcast %172 : vector<8x1xf32> to vector<8x8xf32>
    %174 = arith.subf %170, %173 : vector<8x8xf32>
    %175 = math.exp %174 : vector<8x8xf32>
    %cst_71 = arith.constant dense<0.000000e+00> : vector<8xf32>
    %176 = vector.multi_reduction <add>, %175, %cst_71 [1] : vector<8x8xf32> to vector<8xf32>
    %177 = vector.shape_cast %176 : vector<8xf32> to vector<8x1xf32>
    %178 = tpu.reciprocal %177 {approx = true} : vector<8x1xf32> -> vector<8x1xf32>
    %179 = vector.broadcast %178 : vector<8x1xf32> to vector<8x8xf32>
    %180 = arith.mulf %175, %179 : vector<8x8xf32>
    %cst_72 = arith.constant dense<0.000000e+00> : vector<8x32xf32>
    %181 = tpu.matmul %180, %166, %cst_72 {dimension_numbers = #tpu.dot_dimension_numbers<[1], [0], [0], [1], [0, 0, 1, 1], [], []>} : vector<8x8xf32>, vector<8x32xf32>, vector<8x32xf32> -> vector<8x32xf32>
    %182 = vector.extract_strided_slice %143 {offsets = [16, 0], sizes = [8, 32], strides = [1, 1]} : vector<32x32xf32> to vector<8x32xf32>
    %183 = vector.extract_strided_slice %144 {offsets = [16, 0], sizes = [8, 32], strides = [1, 1]} : vector<32x32xf32> to vector<8x32xf32>
    %184 = vector.extract_strided_slice %145 {offsets = [16, 0], sizes = [8, 32], strides = [1, 1]} : vector<32x32xf32> to vector<8x32xf32>
    %185 = tpu.transpose %183, [1, 0] : vector<8x32xf32> -> vector<32x8xf32>
    %cst_73 = arith.constant dense<0.000000e+00> : vector<8x8xf32>
    %186 = tpu.matmul %182, %185, %cst_73 {dimension_numbers = #tpu.dot_dimension_numbers<[1], [0], [0], [1], [0, 0, 1, 1], [], []>} : vector<8x32xf32>, vector<32x8xf32>, vector<8x8xf32> -> vector<8x8xf32>
    %cst_74 = arith.constant 0.176776692 : f32
    %187 = vector.broadcast %cst_74 : f32 to vector<8x8xf32>
    %188 = arith.mulf %186, %187 : vector<8x8xf32>
    %cst_75 = arith.constant dense<0xFF800000> : vector<8xf32>
    %189 = vector.multi_reduction <maximumf>, %188, %cst_75 [1] : vector<8x8xf32> to vector<8xf32>
    %190 = vector.shape_cast %189 : vector<8xf32> to vector<8x1xf32>
    %191 = vector.broadcast %190 : vector<8x1xf32> to vector<8x8xf32>
    %192 = arith.subf %188, %191 : vector<8x8xf32>
    %193 = math.exp %192 : vector<8x8xf32>
    %cst_76 = arith.constant dense<0.000000e+00> : vector<8xf32>
    %194 = vector.multi_reduction <add>, %193, %cst_76 [1] : vector<8x8xf32> to vector<8xf32>
    %195 = vector.shape_cast %194 : vector<8xf32> to vector<8x1xf32>
    %196 = tpu.reciprocal %195 {approx = true} : vector<8x1xf32> -> vector<8x1xf32>
    %197 = vector.broadcast %196 : vector<8x1xf32> to vector<8x8xf32>
    %198 = arith.mulf %193, %197 : vector<8x8xf32>
    %cst_77 = arith.constant dense<0.000000e+00> : vector<8x32xf32>
    %199 = tpu.matmul %198, %184, %cst_77 {dimension_numbers = #tpu.dot_dimension_numbers<[1], [0], [0], [1], [0, 0, 1, 1], [], []>} : vector<8x8xf32>, vector<8x32xf32>, vector<8x32xf32> -> vector<8x32xf32>
    %200 = vector.extract_strided_slice %143 {offsets = [24, 0], sizes = [8, 32], strides = [1, 1]} : vector<32x32xf32> to vector<8x32xf32>
    %201 = vector.extract_strided_slice %144 {offsets = [24, 0], sizes = [8, 32], strides = [1, 1]} : vector<32x32xf32> to vector<8x32xf32>
    %202 = vector.extract_strided_slice %145 {offsets = [24, 0], sizes = [8, 32], strides = [1, 1]} : vector<32x32xf32> to vector<8x32xf32>
    %203 = tpu.transpose %201, [1, 0] : vector<8x32xf32> -> vector<32x8xf32>
    %cst_78 = arith.constant dense<0.000000e+00> : vector<8x8xf32>
    %204 = tpu.matmul %200, %203, %cst_78 {dimension_numbers = #tpu.dot_dimension_numbers<[1], [0], [0], [1], [0, 0, 1, 1], [], []>} : vector<8x32xf32>, vector<32x8xf32>, vector<8x8xf32> -> vector<8x8xf32>
    %cst_79 = arith.constant 0.176776692 : f32
    %205 = vector.broadcast %cst_79 : f32 to vector<8x8xf32>
    %206 = arith.mulf %204, %205 : vector<8x8xf32>
    %cst_80 = arith.constant dense<0xFF800000> : vector<8xf32>
    %207 = vector.multi_reduction <maximumf>, %206, %cst_80 [1] : vector<8x8xf32> to vector<8xf32>
    %208 = vector.shape_cast %207 : vector<8xf32> to vector<8x1xf32>
    %209 = vector.broadcast %208 : vector<8x1xf32> to vector<8x8xf32>
    %210 = arith.subf %206, %209 : vector<8x8xf32>
    %211 = math.exp %210 : vector<8x8xf32>
    %cst_81 = arith.constant dense<0.000000e+00> : vector<8xf32>
    %212 = vector.multi_reduction <add>, %211, %cst_81 [1] : vector<8x8xf32> to vector<8xf32>
    %213 = vector.shape_cast %212 : vector<8xf32> to vector<8x1xf32>
    %214 = tpu.reciprocal %213 {approx = true} : vector<8x1xf32> -> vector<8x1xf32>
    %215 = vector.broadcast %214 : vector<8x1xf32> to vector<8x8xf32>
    %216 = arith.mulf %211, %215 : vector<8x8xf32>
    %cst_82 = arith.constant dense<0.000000e+00> : vector<8x32xf32>
    %217 = tpu.matmul %216, %202, %cst_82 {dimension_numbers = #tpu.dot_dimension_numbers<[1], [0], [0], [1], [0, 0, 1, 1], [], []>} : vector<8x8xf32>, vector<8x32xf32>, vector<8x32xf32> -> vector<8x32xf32>
    %218 = tpu.concatenate %163, %181, %199, %217 in 0 : vector<8x32xf32>, vector<8x32xf32>, vector<8x32xf32>, vector<8x32xf32> -> vector<32x32xf32>
    %c0_83 = arith.constant 0 : index
    %c0_84 = arith.constant 0 : index
    %c0_85 = arith.constant 0 : index
    %219 = vector.load %arg11[%c0_83, %c0_84, %c0_85] : memref<6x32x32xf32, #tpu.memory_space<vmem>>, vector<1x32x32xf32>
    %220 = vector.shape_cast %219 : vector<1x32x32xf32> to vector<32x32xf32>
    %cst_86 = arith.constant dense<0.000000e+00> : vector<32x32xf32>
    %221 = tpu.matmul %218, %220, %cst_86 {dimension_numbers = #tpu.dot_dimension_numbers<[1], [0], [0], [1], [0, 0, 1, 1], [], []>} : vector<32x32xf32>, vector<32x32xf32>, vector<32x32xf32> -> vector<32x32xf32>
    %222 = arith.addf %111, %221 : vector<32x32xf32>
    %c0_87 = arith.constant 0 : index
    %c0_88 = arith.constant 0 : index
    %c0_89 = arith.constant 0 : index
    %223 = vector.load %arg12[%c0_87, %c0_88, %c0_89] : memref<6x1x32xf32, #tpu.memory_space<vmem>>, vector<1x1x32xf32>
    %224 = vector.shape_cast %223 : vector<1x1x32xf32> to vector<1x32xf32>
    %225 = vector.broadcast %224 : vector<1x32xf32> to vector<32x32xf32>
    %226 = arith.addf %222, %225 : vector<32x32xf32>
    %c0_90 = arith.constant 0 : index
    %c0_91 = arith.constant 0 : index
    %c0_92 = arith.constant 0 : index
    %227 = vector.load %arg13[%c0_90, %c0_91, %c0_92] : memref<6x1x32xf32, #tpu.memory_space<vmem>>, vector<1x1x32xf32>
    %228 = vector.shape_cast %227 : vector<1x1x32xf32> to vector<1x32xf32>
    %c0_93 = arith.constant 0 : index
    %c0_94 = arith.constant 0 : index
    %c0_95 = arith.constant 0 : index
    %229 = vector.load %arg14[%c0_93, %c0_94, %c0_95] : memref<6x1x32xf32, #tpu.memory_space<vmem>>, vector<1x1x32xf32>
    %230 = vector.shape_cast %229 : vector<1x1x32xf32> to vector<1x32xf32>
    %cst_96 = arith.constant dense<0.000000e+00> : vector<32xf32>
    %231 = vector.multi_reduction <add>, %226, %cst_96 [1] : vector<32x32xf32> to vector<32xf32>
    %232 = vector.shape_cast %231 : vector<32xf32> to vector<32x1xf32>
    %cst_97 = arith.constant 3.200000e+01 : f32
    %233 = vector.broadcast %cst_97 : f32 to vector<32x1xf32>
    %234 = arith.divf %232, %233 : vector<32x1xf32>
    %235 = vector.broadcast %234 : vector<32x1xf32> to vector<32x32xf32>
    %236 = arith.subf %226, %235 : vector<32x32xf32>
    %237 = arith.mulf %236, %236 : vector<32x32xf32>
    %cst_98 = arith.constant dense<0.000000e+00> : vector<32xf32>
    %238 = vector.multi_reduction <add>, %237, %cst_98 [1] : vector<32x32xf32> to vector<32xf32>
    %239 = vector.shape_cast %238 : vector<32xf32> to vector<32x1xf32>
    %cst_99 = arith.constant 3.200000e+01 : f32
    %240 = vector.broadcast %cst_99 : f32 to vector<32x1xf32>
    %241 = arith.divf %239, %240 : vector<32x1xf32>
    %cst_100 = arith.constant 9.99999974E-6 : f32
    %242 = vector.broadcast %cst_100 : f32 to vector<32x1xf32>
    %243 = arith.addf %241, %242 : vector<32x1xf32>
    %244 = math.rsqrt %243 : vector<32x1xf32>
    %245 = vector.broadcast %244 : vector<32x1xf32> to vector<32x32xf32>
    %246 = arith.mulf %236, %245 : vector<32x32xf32>
    %247 = vector.broadcast %228 : vector<1x32xf32> to vector<32x32xf32>
    %248 = arith.mulf %246, %247 : vector<32x32xf32>
    %249 = vector.broadcast %230 : vector<1x32xf32> to vector<32x32xf32>
    %250 = arith.addf %248, %249 : vector<32x32xf32>
    %c0_101 = arith.constant 0 : index
    %c0_102 = arith.constant 0 : index
    %c0_103 = arith.constant 0 : index
    %251 = vector.load %arg15[%c0_101, %c0_102, %c0_103] : memref<6x32x64xf32, #tpu.memory_space<vmem>>, vector<1x32x64xf32>
    %252 = vector.shape_cast %251 : vector<1x32x64xf32> to vector<32x64xf32>
    %cst_104 = arith.constant dense<0.000000e+00> : vector<32x64xf32>
    %253 = tpu.matmul %250, %252, %cst_104 {dimension_numbers = #tpu.dot_dimension_numbers<[1], [0], [0], [1], [0, 0, 1, 1], [], []>} : vector<32x32xf32>, vector<32x64xf32>, vector<32x64xf32> -> vector<32x64xf32>
    %c0_105 = arith.constant 0 : index
    %c0_106 = arith.constant 0 : index
    %c0_107 = arith.constant 0 : index
    %254 = vector.load %arg16[%c0_105, %c0_106, %c0_107] : memref<6x1x64xf32, #tpu.memory_space<vmem>>, vector<1x1x64xf32>
    %255 = vector.shape_cast %254 : vector<1x1x64xf32> to vector<1x64xf32>
    %256 = vector.broadcast %255 : vector<1x64xf32> to vector<32x64xf32>
    %257 = arith.addf %253, %256 : vector<32x64xf32>
    %cst_108 = arith.constant 5.000000e-01 : f32
    %258 = vector.broadcast %cst_108 : f32 to vector<32x64xf32>
    %259 = arith.mulf %258, %257 : vector<32x64xf32>
    %cst_109 = arith.constant 0.707106769 : f32
    %260 = vector.broadcast %cst_109 : f32 to vector<32x64xf32>
    %261 = arith.mulf %257, %260 : vector<32x64xf32>
    %cst_110 = arith.constant 0.000000e+00 : f32
    %262 = vector.broadcast %cst_110 : f32 to vector<32x64xf32>
    %263 = arith.cmpf oge, %261, %262 : vector<32x64xf32>
    %cst_111 = arith.constant 1.000000e+00 : f32
    %cst_112 = arith.constant -1.000000e+00 : f32
    %264 = vector.broadcast %cst_111 : f32 to vector<32x64xf32>
    %265 = vector.broadcast %cst_112 : f32 to vector<32x64xf32>
    %266 = arith.select %263, %264, %265 : vector<32x64xi1>, vector<32x64xf32>
    %267 = math.absf %261 : vector<32x64xf32>
    %cst_113 = arith.constant 0.327591091 : f32
    %268 = vector.broadcast %cst_113 : f32 to vector<32x64xf32>
    %269 = arith.mulf %268, %267 : vector<32x64xf32>
    %cst_114 = arith.constant 1.000000e+00 : f32
    %270 = vector.broadcast %cst_114 : f32 to vector<32x64xf32>
    %271 = arith.addf %270, %269 : vector<32x64xf32>
    %cst_115 = arith.constant 1.000000e+00 : f32
    %272 = vector.broadcast %cst_115 : f32 to vector<32x64xf32>
    %273 = arith.divf %272, %271 : vector<32x64xf32>
    %cst_116 = arith.constant 1.06140542 : f32
    %274 = vector.broadcast %cst_116 : f32 to vector<32x64xf32>
    %275 = arith.mulf %274, %273 : vector<32x64xf32>
    %cst_117 = arith.constant -1.45315206 : f32
    %276 = vector.broadcast %cst_117 : f32 to vector<32x64xf32>
    %277 = arith.addf %275, %276 : vector<32x64xf32>
    %278 = arith.mulf %277, %273 : vector<32x64xf32>
    %cst_118 = arith.constant 1.42141378 : f32
    %279 = vector.broadcast %cst_118 : f32 to vector<32x64xf32>
    %280 = arith.addf %278, %279 : vector<32x64xf32>
    %281 = arith.mulf %280, %273 : vector<32x64xf32>
    %cst_119 = arith.constant -0.284496725 : f32
    %282 = vector.broadcast %cst_119 : f32 to vector<32x64xf32>
    %283 = arith.addf %281, %282 : vector<32x64xf32>
    %284 = arith.mulf %283, %273 : vector<32x64xf32>
    %cst_120 = arith.constant 0.254829586 : f32
    %285 = vector.broadcast %cst_120 : f32 to vector<32x64xf32>
    %286 = arith.addf %284, %285 : vector<32x64xf32>
    %287 = arith.mulf %286, %273 : vector<32x64xf32>
    %cst_121 = arith.constant 0.000000e+00 : f32
    %288 = vector.broadcast %cst_121 : f32 to vector<32x64xf32>
    %289 = arith.subf %288, %267 : vector<32x64xf32>
    %290 = arith.mulf %289, %267 : vector<32x64xf32>
    %291 = math.exp %290 : vector<32x64xf32>
    %292 = arith.mulf %287, %291 : vector<32x64xf32>
    %cst_122 = arith.constant 1.000000e+00 : f32
    %293 = vector.broadcast %cst_122 : f32 to vector<32x64xf32>
    %294 = arith.subf %293, %292 : vector<32x64xf32>
    %295 = arith.mulf %266, %294 : vector<32x64xf32>
    %cst_123 = arith.constant 1.000000e+00 : f32
    %296 = vector.broadcast %cst_123 : f32 to vector<32x64xf32>
    %297 = arith.addf %296, %295 : vector<32x64xf32>
    %298 = arith.mulf %259, %297 : vector<32x64xf32>
    %c0_124 = arith.constant 0 : index
    %c0_125 = arith.constant 0 : index
    %c0_126 = arith.constant 0 : index
    %299 = vector.load %arg17[%c0_124, %c0_125, %c0_126] : memref<6x64x32xf32, #tpu.memory_space<vmem>>, vector<1x64x32xf32>
    %300 = vector.shape_cast %299 : vector<1x64x32xf32> to vector<64x32xf32>
    %cst_127 = arith.constant dense<0.000000e+00> : vector<32x32xf32>
    %301 = tpu.matmul %298, %300, %cst_127 {dimension_numbers = #tpu.dot_dimension_numbers<[1], [0], [0], [1], [0, 0, 1, 1], [], []>} : vector<32x64xf32>, vector<64x32xf32>, vector<32x32xf32> -> vector<32x32xf32>
    %302 = arith.addf %226, %301 : vector<32x32xf32>
    %c0_128 = arith.constant 0 : index
    %c0_129 = arith.constant 0 : index
    %c0_130 = arith.constant 0 : index
    %303 = vector.load %arg18[%c0_128, %c0_129, %c0_130] : memref<6x1x32xf32, #tpu.memory_space<vmem>>, vector<1x1x32xf32>
    %304 = vector.shape_cast %303 : vector<1x1x32xf32> to vector<1x32xf32>
    %305 = vector.broadcast %304 : vector<1x32xf32> to vector<32x32xf32>
    %306 = arith.addf %302, %305 : vector<32x32xf32>
    %c1 = arith.constant 1 : index
    %c0_131 = arith.constant 0 : index
    %c0_132 = arith.constant 0 : index
    %307 = vector.load %arg7[%c1, %c0_131, %c0_132] : memref<6x1x32xf32, #tpu.memory_space<vmem>>, vector<1x1x32xf32>
    %308 = vector.shape_cast %307 : vector<1x1x32xf32> to vector<1x32xf32>
    %c1_133 = arith.constant 1 : index
    %c0_134 = arith.constant 0 : index
    %c0_135 = arith.constant 0 : index
    %309 = vector.load %arg8[%c1_133, %c0_134, %c0_135] : memref<6x1x32xf32, #tpu.memory_space<vmem>>, vector<1x1x32xf32>
    %310 = vector.shape_cast %309 : vector<1x1x32xf32> to vector<1x32xf32>
    %cst_136 = arith.constant dense<0.000000e+00> : vector<32xf32>
    %311 = vector.multi_reduction <add>, %306, %cst_136 [1] : vector<32x32xf32> to vector<32xf32>
    %312 = vector.shape_cast %311 : vector<32xf32> to vector<32x1xf32>
    %cst_137 = arith.constant 3.200000e+01 : f32
    %313 = vector.broadcast %cst_137 : f32 to vector<32x1xf32>
    %314 = arith.divf %312, %313 : vector<32x1xf32>
    %315 = vector.broadcast %314 : vector<32x1xf32> to vector<32x32xf32>
    %316 = arith.subf %306, %315 : vector<32x32xf32>
    %317 = arith.mulf %316, %316 : vector<32x32xf32>
    %cst_138 = arith.constant dense<0.000000e+00> : vector<32xf32>
    %318 = vector.multi_reduction <add>, %317, %cst_138 [1] : vector<32x32xf32> to vector<32xf32>
    %319 = vector.shape_cast %318 : vector<32xf32> to vector<32x1xf32>
    %cst_139 = arith.constant 3.200000e+01 : f32
    %320 = vector.broadcast %cst_139 : f32 to vector<32x1xf32>
    %321 = arith.divf %319, %320 : vector<32x1xf32>
    %cst_140 = arith.constant 9.99999974E-6 : f32
    %322 = vector.broadcast %cst_140 : f32 to vector<32x1xf32>
    %323 = arith.addf %321, %322 : vector<32x1xf32>
    %324 = math.rsqrt %323 : vector<32x1xf32>
    %325 = vector.broadcast %324 : vector<32x1xf32> to vector<32x32xf32>
    %326 = arith.mulf %316, %325 : vector<32x32xf32>
    %327 = vector.broadcast %308 : vector<1x32xf32> to vector<32x32xf32>
    %328 = arith.mulf %326, %327 : vector<32x32xf32>
    %329 = vector.broadcast %310 : vector<1x32xf32> to vector<32x32xf32>
    %330 = arith.addf %328, %329 : vector<32x32xf32>
    %c1_141 = arith.constant 1 : index
    %c0_142 = arith.constant 0 : index
    %c0_143 = arith.constant 0 : index
    %331 = vector.load %arg9[%c1_141, %c0_142, %c0_143] : memref<6x32x96xf32, #tpu.memory_space<vmem>>, vector<1x32x96xf32>
    %332 = vector.shape_cast %331 : vector<1x32x96xf32> to vector<32x96xf32>
    %cst_144 = arith.constant dense<0.000000e+00> : vector<32x96xf32>
    %333 = tpu.matmul %330, %332, %cst_144 {dimension_numbers = #tpu.dot_dimension_numbers<[1], [0], [0], [1], [0, 0, 1, 1], [], []>} : vector<32x32xf32>, vector<32x96xf32>, vector<32x96xf32> -> vector<32x96xf32>
    %c1_145 = arith.constant 1 : index
    %c0_146 = arith.constant 0 : index
    %c0_147 = arith.constant 0 : index
    %334 = vector.load %arg10[%c1_145, %c0_146, %c0_147] : memref<6x1x96xf32, #tpu.memory_space<vmem>>, vector<1x1x96xf32>
    %335 = vector.shape_cast %334 : vector<1x1x96xf32> to vector<1x96xf32>
    %336 = vector.broadcast %335 : vector<1x96xf32> to vector<32x96xf32>
    %337 = arith.addf %333, %336 : vector<32x96xf32>
    %338 = vector.extract_strided_slice %337 {offsets = [0, 0], sizes = [32, 32], strides = [1, 1]} : vector<32x96xf32> to vector<32x32xf32>
    %339 = vector.extract_strided_slice %337 {offsets = [0, 32], sizes = [32, 32], strides = [1, 1]} : vector<32x96xf32> to vector<32x32xf32>
    %340 = vector.extract_strided_slice %337 {offsets = [0, 64], sizes = [32, 32], strides = [1, 1]} : vector<32x96xf32> to vector<32x32xf32>
    %341 = vector.extract_strided_slice %338 {offsets = [0, 0], sizes = [8, 32], strides = [1, 1]} : vector<32x32xf32> to vector<8x32xf32>
    %342 = vector.extract_strided_slice %339 {offsets = [0, 0], sizes = [8, 32], strides = [1, 1]} : vector<32x32xf32> to vector<8x32xf32>
    %343 = vector.extract_strided_slice %340 {offsets = [0, 0], sizes = [8, 32], strides = [1, 1]} : vector<32x32xf32> to vector<8x32xf32>
    %344 = tpu.transpose %342, [1, 0] : vector<8x32xf32> -> vector<32x8xf32>
    %cst_148 = arith.constant dense<0.000000e+00> : vector<8x8xf32>
    %345 = tpu.matmul %341, %344, %cst_148 {dimension_numbers = #tpu.dot_dimension_numbers<[1], [0], [0], [1], [0, 0, 1, 1], [], []>} : vector<8x32xf32>, vector<32x8xf32>, vector<8x8xf32> -> vector<8x8xf32>
    %cst_149 = arith.constant 0.176776692 : f32
    %346 = vector.broadcast %cst_149 : f32 to vector<8x8xf32>
    %347 = arith.mulf %345, %346 : vector<8x8xf32>
    %cst_150 = arith.constant dense<0xFF800000> : vector<8xf32>
    %348 = vector.multi_reduction <maximumf>, %347, %cst_150 [1] : vector<8x8xf32> to vector<8xf32>
    %349 = vector.shape_cast %348 : vector<8xf32> to vector<8x1xf32>
    %350 = vector.broadcast %349 : vector<8x1xf32> to vector<8x8xf32>
    %351 = arith.subf %347, %350 : vector<8x8xf32>
    %352 = math.exp %351 : vector<8x8xf32>
    %cst_151 = arith.constant dense<0.000000e+00> : vector<8xf32>
    %353 = vector.multi_reduction <add>, %352, %cst_151 [1] : vector<8x8xf32> to vector<8xf32>
    %354 = vector.shape_cast %353 : vector<8xf32> to vector<8x1xf32>
    %355 = tpu.reciprocal %354 {approx = true} : vector<8x1xf32> -> vector<8x1xf32>
    %356 = vector.broadcast %355 : vector<8x1xf32> to vector<8x8xf32>
    %357 = arith.mulf %352, %356 : vector<8x8xf32>
    %cst_152 = arith.constant dense<0.000000e+00> : vector<8x32xf32>
    %358 = tpu.matmul %357, %343, %cst_152 {dimension_numbers = #tpu.dot_dimension_numbers<[1], [0], [0], [1], [0, 0, 1, 1], [], []>} : vector<8x8xf32>, vector<8x32xf32>, vector<8x32xf32> -> vector<8x32xf32>
    %359 = vector.extract_strided_slice %338 {offsets = [8, 0], sizes = [8, 32], strides = [1, 1]} : vector<32x32xf32> to vector<8x32xf32>
    %360 = vector.extract_strided_slice %339 {offsets = [8, 0], sizes = [8, 32], strides = [1, 1]} : vector<32x32xf32> to vector<8x32xf32>
    %361 = vector.extract_strided_slice %340 {offsets = [8, 0], sizes = [8, 32], strides = [1, 1]} : vector<32x32xf32> to vector<8x32xf32>
    %362 = tpu.transpose %360, [1, 0] : vector<8x32xf32> -> vector<32x8xf32>
    %cst_153 = arith.constant dense<0.000000e+00> : vector<8x8xf32>
    %363 = tpu.matmul %359, %362, %cst_153 {dimension_numbers = #tpu.dot_dimension_numbers<[1], [0], [0], [1], [0, 0, 1, 1], [], []>} : vector<8x32xf32>, vector<32x8xf32>, vector<8x8xf32> -> vector<8x8xf32>
    %cst_154 = arith.constant 0.176776692 : f32
    %364 = vector.broadcast %cst_154 : f32 to vector<8x8xf32>
    %365 = arith.mulf %363, %364 : vector<8x8xf32>
    %cst_155 = arith.constant dense<0xFF800000> : vector<8xf32>
    %366 = vector.multi_reduction <maximumf>, %365, %cst_155 [1] : vector<8x8xf32> to vector<8xf32>
    %367 = vector.shape_cast %366 : vector<8xf32> to vector<8x1xf32>
    %368 = vector.broadcast %367 : vector<8x1xf32> to vector<8x8xf32>
    %369 = arith.subf %365, %368 : vector<8x8xf32>
    %370 = math.exp %369 : vector<8x8xf32>
    %cst_156 = arith.constant dense<0.000000e+00> : vector<8xf32>
    %371 = vector.multi_reduction <add>, %370, %cst_156 [1] : vector<8x8xf32> to vector<8xf32>
    %372 = vector.shape_cast %371 : vector<8xf32> to vector<8x1xf32>
    %373 = tpu.reciprocal %372 {approx = true} : vector<8x1xf32> -> vector<8x1xf32>
    %374 = vector.broadcast %373 : vector<8x1xf32> to vector<8x8xf32>
    %375 = arith.mulf %370, %374 : vector<8x8xf32>
    %cst_157 = arith.constant dense<0.000000e+00> : vector<8x32xf32>
    %376 = tpu.matmul %375, %361, %cst_157 {dimension_numbers = #tpu.dot_dimension_numbers<[1], [0], [0], [1], [0, 0, 1, 1], [], []>} : vector<8x8xf32>, vector<8x32xf32>, vector<8x32xf32> -> vector<8x32xf32>
    %377 = vector.extract_strided_slice %338 {offsets = [16, 0], sizes = [8, 32], strides = [1, 1]} : vector<32x32xf32> to vector<8x32xf32>
    %378 = vector.extract_strided_slice %339 {offsets = [16, 0], sizes = [8, 32], strides = [1, 1]} : vector<32x32xf32> to vector<8x32xf32>
    %379 = vector.extract_strided_slice %340 {offsets = [16, 0], sizes = [8, 32], strides = [1, 1]} : vector<32x32xf32> to vector<8x32xf32>
    %380 = tpu.transpose %378, [1, 0] : vector<8x32xf32> -> vector<32x8xf32>
    %cst_158 = arith.constant dense<0.000000e+00> : vector<8x8xf32>
    %381 = tpu.matmul %377, %380, %cst_158 {dimension_numbers = #tpu.dot_dimension_numbers<[1], [0], [0], [1], [0, 0, 1, 1], [], []>} : vector<8x32xf32>, vector<32x8xf32>, vector<8x8xf32> -> vector<8x8xf32>
    %cst_159 = arith.constant 0.176776692 : f32
    %382 = vector.broadcast %cst_159 : f32 to vector<8x8xf32>
    %383 = arith.mulf %381, %382 : vector<8x8xf32>
    %cst_160 = arith.constant dense<0xFF800000> : vector<8xf32>
    %384 = vector.multi_reduction <maximumf>, %383, %cst_160 [1] : vector<8x8xf32> to vector<8xf32>
    %385 = vector.shape_cast %384 : vector<8xf32> to vector<8x1xf32>
    %386 = vector.broadcast %385 : vector<8x1xf32> to vector<8x8xf32>
    %387 = arith.subf %383, %386 : vector<8x8xf32>
    %388 = math.exp %387 : vector<8x8xf32>
    %cst_161 = arith.constant dense<0.000000e+00> : vector<8xf32>
    %389 = vector.multi_reduction <add>, %388, %cst_161 [1] : vector<8x8xf32> to vector<8xf32>
    %390 = vector.shape_cast %389 : vector<8xf32> to vector<8x1xf32>
    %391 = tpu.reciprocal %390 {approx = true} : vector<8x1xf32> -> vector<8x1xf32>
    %392 = vector.broadcast %391 : vector<8x1xf32> to vector<8x8xf32>
    %393 = arith.mulf %388, %392 : vector<8x8xf32>
    %cst_162 = arith.constant dense<0.000000e+00> : vector<8x32xf32>
    %394 = tpu.matmul %393, %379, %cst_162 {dimension_numbers = #tpu.dot_dimension_numbers<[1], [0], [0], [1], [0, 0, 1, 1], [], []>} : vector<8x8xf32>, vector<8x32xf32>, vector<8x32xf32> -> vector<8x32xf32>
    %395 = vector.extract_strided_slice %338 {offsets = [24, 0], sizes = [8, 32], strides = [1, 1]} : vector<32x32xf32> to vector<8x32xf32>
    %396 = vector.extract_strided_slice %339 {offsets = [24, 0], sizes = [8, 32], strides = [1, 1]} : vector<32x32xf32> to vector<8x32xf32>
    %397 = vector.extract_strided_slice %340 {offsets = [24, 0], sizes = [8, 32], strides = [1, 1]} : vector<32x32xf32> to vector<8x32xf32>
    %398 = tpu.transpose %396, [1, 0] : vector<8x32xf32> -> vector<32x8xf32>
    %cst_163 = arith.constant dense<0.000000e+00> : vector<8x8xf32>
    %399 = tpu.matmul %395, %398, %cst_163 {dimension_numbers = #tpu.dot_dimension_numbers<[1], [0], [0], [1], [0, 0, 1, 1], [], []>} : vector<8x32xf32>, vector<32x8xf32>, vector<8x8xf32> -> vector<8x8xf32>
    %cst_164 = arith.constant 0.176776692 : f32
    %400 = vector.broadcast %cst_164 : f32 to vector<8x8xf32>
    %401 = arith.mulf %399, %400 : vector<8x8xf32>
    %cst_165 = arith.constant dense<0xFF800000> : vector<8xf32>
    %402 = vector.multi_reduction <maximumf>, %401, %cst_165 [1] : vector<8x8xf32> to vector<8xf32>
    %403 = vector.shape_cast %402 : vector<8xf32> to vector<8x1xf32>
    %404 = vector.broadcast %403 : vector<8x1xf32> to vector<8x8xf32>
    %405 = arith.subf %401, %404 : vector<8x8xf32>
    %406 = math.exp %405 : vector<8x8xf32>
    %cst_166 = arith.constant dense<0.000000e+00> : vector<8xf32>
    %407 = vector.multi_reduction <add>, %406, %cst_166 [1] : vector<8x8xf32> to vector<8xf32>
    %408 = vector.shape_cast %407 : vector<8xf32> to vector<8x1xf32>
    %409 = tpu.reciprocal %408 {approx = true} : vector<8x1xf32> -> vector<8x1xf32>
    %410 = vector.broadcast %409 : vector<8x1xf32> to vector<8x8xf32>
    %411 = arith.mulf %406, %410 : vector<8x8xf32>
    %cst_167 = arith.constant dense<0.000000e+00> : vector<8x32xf32>
    %412 = tpu.matmul %411, %397, %cst_167 {dimension_numbers = #tpu.dot_dimension_numbers<[1], [0], [0], [1], [0, 0, 1, 1], [], []>} : vector<8x8xf32>, vector<8x32xf32>, vector<8x32xf32> -> vector<8x32xf32>
    %413 = tpu.concatenate %358, %376, %394, %412 in 0 : vector<8x32xf32>, vector<8x32xf32>, vector<8x32xf32>, vector<8x32xf32> -> vector<32x32xf32>
    %c1_168 = arith.constant 1 : index
    %c0_169 = arith.constant 0 : index
    %c0_170 = arith.constant 0 : index
    %414 = vector.load %arg11[%c1_168, %c0_169, %c0_170] : memref<6x32x32xf32, #tpu.memory_space<vmem>>, vector<1x32x32xf32>
    %415 = vector.shape_cast %414 : vector<1x32x32xf32> to vector<32x32xf32>
    %cst_171 = arith.constant dense<0.000000e+00> : vector<32x32xf32>
    %416 = tpu.matmul %413, %415, %cst_171 {dimension_numbers = #tpu.dot_dimension_numbers<[1], [0], [0], [1], [0, 0, 1, 1], [], []>} : vector<32x32xf32>, vector<32x32xf32>, vector<32x32xf32> -> vector<32x32xf32>
    %417 = arith.addf %306, %416 : vector<32x32xf32>
    %c1_172 = arith.constant 1 : index
    %c0_173 = arith.constant 0 : index
    %c0_174 = arith.constant 0 : index
    %418 = vector.load %arg12[%c1_172, %c0_173, %c0_174] : memref<6x1x32xf32, #tpu.memory_space<vmem>>, vector<1x1x32xf32>
    %419 = vector.shape_cast %418 : vector<1x1x32xf32> to vector<1x32xf32>
    %420 = vector.broadcast %419 : vector<1x32xf32> to vector<32x32xf32>
    %421 = arith.addf %417, %420 : vector<32x32xf32>
    %c1_175 = arith.constant 1 : index
    %c0_176 = arith.constant 0 : index
    %c0_177 = arith.constant 0 : index
    %422 = vector.load %arg13[%c1_175, %c0_176, %c0_177] : memref<6x1x32xf32, #tpu.memory_space<vmem>>, vector<1x1x32xf32>
    %423 = vector.shape_cast %422 : vector<1x1x32xf32> to vector<1x32xf32>
    %c1_178 = arith.constant 1 : index
    %c0_179 = arith.constant 0 : index
    %c0_180 = arith.constant 0 : index
    %424 = vector.load %arg14[%c1_178, %c0_179, %c0_180] : memref<6x1x32xf32, #tpu.memory_space<vmem>>, vector<1x1x32xf32>
    %425 = vector.shape_cast %424 : vector<1x1x32xf32> to vector<1x32xf32>
    %cst_181 = arith.constant dense<0.000000e+00> : vector<32xf32>
    %426 = vector.multi_reduction <add>, %421, %cst_181 [1] : vector<32x32xf32> to vector<32xf32>
    %427 = vector.shape_cast %426 : vector<32xf32> to vector<32x1xf32>
    %cst_182 = arith.constant 3.200000e+01 : f32
    %428 = vector.broadcast %cst_182 : f32 to vector<32x1xf32>
    %429 = arith.divf %427, %428 : vector<32x1xf32>
    %430 = vector.broadcast %429 : vector<32x1xf32> to vector<32x32xf32>
    %431 = arith.subf %421, %430 : vector<32x32xf32>
    %432 = arith.mulf %431, %431 : vector<32x32xf32>
    %cst_183 = arith.constant dense<0.000000e+00> : vector<32xf32>
    %433 = vector.multi_reduction <add>, %432, %cst_183 [1] : vector<32x32xf32> to vector<32xf32>
    %434 = vector.shape_cast %433 : vector<32xf32> to vector<32x1xf32>
    %cst_184 = arith.constant 3.200000e+01 : f32
    %435 = vector.broadcast %cst_184 : f32 to vector<32x1xf32>
    %436 = arith.divf %434, %435 : vector<32x1xf32>
    %cst_185 = arith.constant 9.99999974E-6 : f32
    %437 = vector.broadcast %cst_185 : f32 to vector<32x1xf32>
    %438 = arith.addf %436, %437 : vector<32x1xf32>
    %439 = math.rsqrt %438 : vector<32x1xf32>
    %440 = vector.broadcast %439 : vector<32x1xf32> to vector<32x32xf32>
    %441 = arith.mulf %431, %440 : vector<32x32xf32>
    %442 = vector.broadcast %423 : vector<1x32xf32> to vector<32x32xf32>
    %443 = arith.mulf %441, %442 : vector<32x32xf32>
    %444 = vector.broadcast %425 : vector<1x32xf32> to vector<32x32xf32>
    %445 = arith.addf %443, %444 : vector<32x32xf32>
    %c1_186 = arith.constant 1 : index
    %c0_187 = arith.constant 0 : index
    %c0_188 = arith.constant 0 : index
    %446 = vector.load %arg15[%c1_186, %c0_187, %c0_188] : memref<6x32x64xf32, #tpu.memory_space<vmem>>, vector<1x32x64xf32>
    %447 = vector.shape_cast %446 : vector<1x32x64xf32> to vector<32x64xf32>
    %cst_189 = arith.constant dense<0.000000e+00> : vector<32x64xf32>
    %448 = tpu.matmul %445, %447, %cst_189 {dimension_numbers = #tpu.dot_dimension_numbers<[1], [0], [0], [1], [0, 0, 1, 1], [], []>} : vector<32x32xf32>, vector<32x64xf32>, vector<32x64xf32> -> vector<32x64xf32>
    %c1_190 = arith.constant 1 : index
    %c0_191 = arith.constant 0 : index
    %c0_192 = arith.constant 0 : index
    %449 = vector.load %arg16[%c1_190, %c0_191, %c0_192] : memref<6x1x64xf32, #tpu.memory_space<vmem>>, vector<1x1x64xf32>
    %450 = vector.shape_cast %449 : vector<1x1x64xf32> to vector<1x64xf32>
    %451 = vector.broadcast %450 : vector<1x64xf32> to vector<32x64xf32>
    %452 = arith.addf %448, %451 : vector<32x64xf32>
    %cst_193 = arith.constant 5.000000e-01 : f32
    %453 = vector.broadcast %cst_193 : f32 to vector<32x64xf32>
    %454 = arith.mulf %453, %452 : vector<32x64xf32>
    %cst_194 = arith.constant 0.707106769 : f32
    %455 = vector.broadcast %cst_194 : f32 to vector<32x64xf32>
    %456 = arith.mulf %452, %455 : vector<32x64xf32>
    %cst_195 = arith.constant 0.000000e+00 : f32
    %457 = vector.broadcast %cst_195 : f32 to vector<32x64xf32>
    %458 = arith.cmpf oge, %456, %457 : vector<32x64xf32>
    %cst_196 = arith.constant 1.000000e+00 : f32
    %cst_197 = arith.constant -1.000000e+00 : f32
    %459 = vector.broadcast %cst_196 : f32 to vector<32x64xf32>
    %460 = vector.broadcast %cst_197 : f32 to vector<32x64xf32>
    %461 = arith.select %458, %459, %460 : vector<32x64xi1>, vector<32x64xf32>
    %462 = math.absf %456 : vector<32x64xf32>
    %cst_198 = arith.constant 0.327591091 : f32
    %463 = vector.broadcast %cst_198 : f32 to vector<32x64xf32>
    %464 = arith.mulf %463, %462 : vector<32x64xf32>
    %cst_199 = arith.constant 1.000000e+00 : f32
    %465 = vector.broadcast %cst_199 : f32 to vector<32x64xf32>
    %466 = arith.addf %465, %464 : vector<32x64xf32>
    %cst_200 = arith.constant 1.000000e+00 : f32
    %467 = vector.broadcast %cst_200 : f32 to vector<32x64xf32>
    %468 = arith.divf %467, %466 : vector<32x64xf32>
    %cst_201 = arith.constant 1.06140542 : f32
    %469 = vector.broadcast %cst_201 : f32 to vector<32x64xf32>
    %470 = arith.mulf %469, %468 : vector<32x64xf32>
    %cst_202 = arith.constant -1.45315206 : f32
    %471 = vector.broadcast %cst_202 : f32 to vector<32x64xf32>
    %472 = arith.addf %470, %471 : vector<32x64xf32>
    %473 = arith.mulf %472, %468 : vector<32x64xf32>
    %cst_203 = arith.constant 1.42141378 : f32
    %474 = vector.broadcast %cst_203 : f32 to vector<32x64xf32>
    %475 = arith.addf %473, %474 : vector<32x64xf32>
    %476 = arith.mulf %475, %468 : vector<32x64xf32>
    %cst_204 = arith.constant -0.284496725 : f32
    %477 = vector.broadcast %cst_204 : f32 to vector<32x64xf32>
    %478 = arith.addf %476, %477 : vector<32x64xf32>
    %479 = arith.mulf %478, %468 : vector<32x64xf32>
    %cst_205 = arith.constant 0.254829586 : f32
    %480 = vector.broadcast %cst_205 : f32 to vector<32x64xf32>
    %481 = arith.addf %479, %480 : vector<32x64xf32>
    %482 = arith.mulf %481, %468 : vector<32x64xf32>
    %cst_206 = arith.constant 0.000000e+00 : f32
    %483 = vector.broadcast %cst_206 : f32 to vector<32x64xf32>
    %484 = arith.subf %483, %462 : vector<32x64xf32>
    %485 = arith.mulf %484, %462 : vector<32x64xf32>
    %486 = math.exp %485 : vector<32x64xf32>
    %487 = arith.mulf %482, %486 : vector<32x64xf32>
    %cst_207 = arith.constant 1.000000e+00 : f32
    %488 = vector.broadcast %cst_207 : f32 to vector<32x64xf32>
    %489 = arith.subf %488, %487 : vector<32x64xf32>
    %490 = arith.mulf %461, %489 : vector<32x64xf32>
    %cst_208 = arith.constant 1.000000e+00 : f32
    %491 = vector.broadcast %cst_208 : f32 to vector<32x64xf32>
    %492 = arith.addf %491, %490 : vector<32x64xf32>
    %493 = arith.mulf %454, %492 : vector<32x64xf32>
    %c1_209 = arith.constant 1 : index
    %c0_210 = arith.constant 0 : index
    %c0_211 = arith.constant 0 : index
    %494 = vector.load %arg17[%c1_209, %c0_210, %c0_211] : memref<6x64x32xf32, #tpu.memory_space<vmem>>, vector<1x64x32xf32>
    %495 = vector.shape_cast %494 : vector<1x64x32xf32> to vector<64x32xf32>
    %cst_212 = arith.constant dense<0.000000e+00> : vector<32x32xf32>
    %496 = tpu.matmul %493, %495, %cst_212 {dimension_numbers = #tpu.dot_dimension_numbers<[1], [0], [0], [1], [0, 0, 1, 1], [], []>} : vector<32x64xf32>, vector<64x32xf32>, vector<32x32xf32> -> vector<32x32xf32>
    %497 = arith.addf %421, %496 : vector<32x32xf32>
    %c1_213 = arith.constant 1 : index
    %c0_214 = arith.constant 0 : index
    %c0_215 = arith.constant 0 : index
    %498 = vector.load %arg18[%c1_213, %c0_214, %c0_215] : memref<6x1x32xf32, #tpu.memory_space<vmem>>, vector<1x1x32xf32>
    %499 = vector.shape_cast %498 : vector<1x1x32xf32> to vector<1x32xf32>
    %500 = vector.broadcast %499 : vector<1x32xf32> to vector<32x32xf32>
    %501 = arith.addf %497, %500 : vector<32x32xf32>
    %c2 = arith.constant 2 : index
    %c0_216 = arith.constant 0 : index
    %c0_217 = arith.constant 0 : index
    %502 = vector.load %arg7[%c2, %c0_216, %c0_217] : memref<6x1x32xf32, #tpu.memory_space<vmem>>, vector<1x1x32xf32>
    %503 = vector.shape_cast %502 : vector<1x1x32xf32> to vector<1x32xf32>
    %c2_218 = arith.constant 2 : index
    %c0_219 = arith.constant 0 : index
    %c0_220 = arith.constant 0 : index
    %504 = vector.load %arg8[%c2_218, %c0_219, %c0_220] : memref<6x1x32xf32, #tpu.memory_space<vmem>>, vector<1x1x32xf32>
    %505 = vector.shape_cast %504 : vector<1x1x32xf32> to vector<1x32xf32>
    %cst_221 = arith.constant dense<0.000000e+00> : vector<32xf32>
    %506 = vector.multi_reduction <add>, %501, %cst_221 [1] : vector<32x32xf32> to vector<32xf32>
    %507 = vector.shape_cast %506 : vector<32xf32> to vector<32x1xf32>
    %cst_222 = arith.constant 3.200000e+01 : f32
    %508 = vector.broadcast %cst_222 : f32 to vector<32x1xf32>
    %509 = arith.divf %507, %508 : vector<32x1xf32>
    %510 = vector.broadcast %509 : vector<32x1xf32> to vector<32x32xf32>
    %511 = arith.subf %501, %510 : vector<32x32xf32>
    %512 = arith.mulf %511, %511 : vector<32x32xf32>
    %cst_223 = arith.constant dense<0.000000e+00> : vector<32xf32>
    %513 = vector.multi_reduction <add>, %512, %cst_223 [1] : vector<32x32xf32> to vector<32xf32>
    %514 = vector.shape_cast %513 : vector<32xf32> to vector<32x1xf32>
    %cst_224 = arith.constant 3.200000e+01 : f32
    %515 = vector.broadcast %cst_224 : f32 to vector<32x1xf32>
    %516 = arith.divf %514, %515 : vector<32x1xf32>
    %cst_225 = arith.constant 9.99999974E-6 : f32
    %517 = vector.broadcast %cst_225 : f32 to vector<32x1xf32>
    %518 = arith.addf %516, %517 : vector<32x1xf32>
    %519 = math.rsqrt %518 : vector<32x1xf32>
    %520 = vector.broadcast %519 : vector<32x1xf32> to vector<32x32xf32>
    %521 = arith.mulf %511, %520 : vector<32x32xf32>
    %522 = vector.broadcast %503 : vector<1x32xf32> to vector<32x32xf32>
    %523 = arith.mulf %521, %522 : vector<32x32xf32>
    %524 = vector.broadcast %505 : vector<1x32xf32> to vector<32x32xf32>
    %525 = arith.addf %523, %524 : vector<32x32xf32>
    %c2_226 = arith.constant 2 : index
    %c0_227 = arith.constant 0 : index
    %c0_228 = arith.constant 0 : index
    %526 = vector.load %arg9[%c2_226, %c0_227, %c0_228] : memref<6x32x96xf32, #tpu.memory_space<vmem>>, vector<1x32x96xf32>
    %527 = vector.shape_cast %526 : vector<1x32x96xf32> to vector<32x96xf32>
    %cst_229 = arith.constant dense<0.000000e+00> : vector<32x96xf32>
    %528 = tpu.matmul %525, %527, %cst_229 {dimension_numbers = #tpu.dot_dimension_numbers<[1], [0], [0], [1], [0, 0, 1, 1], [], []>} : vector<32x32xf32>, vector<32x96xf32>, vector<32x96xf32> -> vector<32x96xf32>
    %c2_230 = arith.constant 2 : index
    %c0_231 = arith.constant 0 : index
    %c0_232 = arith.constant 0 : index
    %529 = vector.load %arg10[%c2_230, %c0_231, %c0_232] : memref<6x1x96xf32, #tpu.memory_space<vmem>>, vector<1x1x96xf32>
    %530 = vector.shape_cast %529 : vector<1x1x96xf32> to vector<1x96xf32>
    %531 = vector.broadcast %530 : vector<1x96xf32> to vector<32x96xf32>
    %532 = arith.addf %528, %531 : vector<32x96xf32>
    %533 = vector.extract_strided_slice %532 {offsets = [0, 0], sizes = [32, 32], strides = [1, 1]} : vector<32x96xf32> to vector<32x32xf32>
    %534 = vector.extract_strided_slice %532 {offsets = [0, 32], sizes = [32, 32], strides = [1, 1]} : vector<32x96xf32> to vector<32x32xf32>
    %535 = vector.extract_strided_slice %532 {offsets = [0, 64], sizes = [32, 32], strides = [1, 1]} : vector<32x96xf32> to vector<32x32xf32>
    %536 = vector.extract_strided_slice %533 {offsets = [0, 0], sizes = [8, 32], strides = [1, 1]} : vector<32x32xf32> to vector<8x32xf32>
    %537 = vector.extract_strided_slice %534 {offsets = [0, 0], sizes = [8, 32], strides = [1, 1]} : vector<32x32xf32> to vector<8x32xf32>
    %538 = vector.extract_strided_slice %535 {offsets = [0, 0], sizes = [8, 32], strides = [1, 1]} : vector<32x32xf32> to vector<8x32xf32>
    %539 = tpu.transpose %537, [1, 0] : vector<8x32xf32> -> vector<32x8xf32>
    %cst_233 = arith.constant dense<0.000000e+00> : vector<8x8xf32>
    %540 = tpu.matmul %536, %539, %cst_233 {dimension_numbers = #tpu.dot_dimension_numbers<[1], [0], [0], [1], [0, 0, 1, 1], [], []>} : vector<8x32xf32>, vector<32x8xf32>, vector<8x8xf32> -> vector<8x8xf32>
    %cst_234 = arith.constant 0.176776692 : f32
    %541 = vector.broadcast %cst_234 : f32 to vector<8x8xf32>
    %542 = arith.mulf %540, %541 : vector<8x8xf32>
    %cst_235 = arith.constant dense<0xFF800000> : vector<8xf32>
    %543 = vector.multi_reduction <maximumf>, %542, %cst_235 [1] : vector<8x8xf32> to vector<8xf32>
    %544 = vector.shape_cast %543 : vector<8xf32> to vector<8x1xf32>
    %545 = vector.broadcast %544 : vector<8x1xf32> to vector<8x8xf32>
    %546 = arith.subf %542, %545 : vector<8x8xf32>
    %547 = math.exp %546 : vector<8x8xf32>
    %cst_236 = arith.constant dense<0.000000e+00> : vector<8xf32>
    %548 = vector.multi_reduction <add>, %547, %cst_236 [1] : vector<8x8xf32> to vector<8xf32>
    %549 = vector.shape_cast %548 : vector<8xf32> to vector<8x1xf32>
    %550 = tpu.reciprocal %549 {approx = true} : vector<8x1xf32> -> vector<8x1xf32>
    %551 = vector.broadcast %550 : vector<8x1xf32> to vector<8x8xf32>
    %552 = arith.mulf %547, %551 : vector<8x8xf32>
    %cst_237 = arith.constant dense<0.000000e+00> : vector<8x32xf32>
    %553 = tpu.matmul %552, %538, %cst_237 {dimension_numbers = #tpu.dot_dimension_numbers<[1], [0], [0], [1], [0, 0, 1, 1], [], []>} : vector<8x8xf32>, vector<8x32xf32>, vector<8x32xf32> -> vector<8x32xf32>
    %554 = vector.extract_strided_slice %533 {offsets = [8, 0], sizes = [8, 32], strides = [1, 1]} : vector<32x32xf32> to vector<8x32xf32>
    %555 = vector.extract_strided_slice %534 {offsets = [8, 0], sizes = [8, 32], strides = [1, 1]} : vector<32x32xf32> to vector<8x32xf32>
    %556 = vector.extract_strided_slice %535 {offsets = [8, 0], sizes = [8, 32], strides = [1, 1]} : vector<32x32xf32> to vector<8x32xf32>
    %557 = tpu.transpose %555, [1, 0] : vector<8x32xf32> -> vector<32x8xf32>
    %cst_238 = arith.constant dense<0.000000e+00> : vector<8x8xf32>
    %558 = tpu.matmul %554, %557, %cst_238 {dimension_numbers = #tpu.dot_dimension_numbers<[1], [0], [0], [1], [0, 0, 1, 1], [], []>} : vector<8x32xf32>, vector<32x8xf32>, vector<8x8xf32> -> vector<8x8xf32>
    %cst_239 = arith.constant 0.176776692 : f32
    %559 = vector.broadcast %cst_239 : f32 to vector<8x8xf32>
    %560 = arith.mulf %558, %559 : vector<8x8xf32>
    %cst_240 = arith.constant dense<0xFF800000> : vector<8xf32>
    %561 = vector.multi_reduction <maximumf>, %560, %cst_240 [1] : vector<8x8xf32> to vector<8xf32>
    %562 = vector.shape_cast %561 : vector<8xf32> to vector<8x1xf32>
    %563 = vector.broadcast %562 : vector<8x1xf32> to vector<8x8xf32>
    %564 = arith.subf %560, %563 : vector<8x8xf32>
    %565 = math.exp %564 : vector<8x8xf32>
    %cst_241 = arith.constant dense<0.000000e+00> : vector<8xf32>
    %566 = vector.multi_reduction <add>, %565, %cst_241 [1] : vector<8x8xf32> to vector<8xf32>
    %567 = vector.shape_cast %566 : vector<8xf32> to vector<8x1xf32>
    %568 = tpu.reciprocal %567 {approx = true} : vector<8x1xf32> -> vector<8x1xf32>
    %569 = vector.broadcast %568 : vector<8x1xf32> to vector<8x8xf32>
    %570 = arith.mulf %565, %569 : vector<8x8xf32>
    %cst_242 = arith.constant dense<0.000000e+00> : vector<8x32xf32>
    %571 = tpu.matmul %570, %556, %cst_242 {dimension_numbers = #tpu.dot_dimension_numbers<[1], [0], [0], [1], [0, 0, 1, 1], [], []>} : vector<8x8xf32>, vector<8x32xf32>, vector<8x32xf32> -> vector<8x32xf32>
    %572 = vector.extract_strided_slice %533 {offsets = [16, 0], sizes = [8, 32], strides = [1, 1]} : vector<32x32xf32> to vector<8x32xf32>
    %573 = vector.extract_strided_slice %534 {offsets = [16, 0], sizes = [8, 32], strides = [1, 1]} : vector<32x32xf32> to vector<8x32xf32>
    %574 = vector.extract_strided_slice %535 {offsets = [16, 0], sizes = [8, 32], strides = [1, 1]} : vector<32x32xf32> to vector<8x32xf32>
    %575 = tpu.transpose %573, [1, 0] : vector<8x32xf32> -> vector<32x8xf32>
    %cst_243 = arith.constant dense<0.000000e+00> : vector<8x8xf32>
    %576 = tpu.matmul %572, %575, %cst_243 {dimension_numbers = #tpu.dot_dimension_numbers<[1], [0], [0], [1], [0, 0, 1, 1], [], []>} : vector<8x32xf32>, vector<32x8xf32>, vector<8x8xf32> -> vector<8x8xf32>
    %cst_244 = arith.constant 0.176776692 : f32
    %577 = vector.broadcast %cst_244 : f32 to vector<8x8xf32>
    %578 = arith.mulf %576, %577 : vector<8x8xf32>
    %cst_245 = arith.constant dense<0xFF800000> : vector<8xf32>
    %579 = vector.multi_reduction <maximumf>, %578, %cst_245 [1] : vector<8x8xf32> to vector<8xf32>
    %580 = vector.shape_cast %579 : vector<8xf32> to vector<8x1xf32>
    %581 = vector.broadcast %580 : vector<8x1xf32> to vector<8x8xf32>
    %582 = arith.subf %578, %581 : vector<8x8xf32>
    %583 = math.exp %582 : vector<8x8xf32>
    %cst_246 = arith.constant dense<0.000000e+00> : vector<8xf32>
    %584 = vector.multi_reduction <add>, %583, %cst_246 [1] : vector<8x8xf32> to vector<8xf32>
    %585 = vector.shape_cast %584 : vector<8xf32> to vector<8x1xf32>
    %586 = tpu.reciprocal %585 {approx = true} : vector<8x1xf32> -> vector<8x1xf32>
    %587 = vector.broadcast %586 : vector<8x1xf32> to vector<8x8xf32>
    %588 = arith.mulf %583, %587 : vector<8x8xf32>
    %cst_247 = arith.constant dense<0.000000e+00> : vector<8x32xf32>
    %589 = tpu.matmul %588, %574, %cst_247 {dimension_numbers = #tpu.dot_dimension_numbers<[1], [0], [0], [1], [0, 0, 1, 1], [], []>} : vector<8x8xf32>, vector<8x32xf32>, vector<8x32xf32> -> vector<8x32xf32>
    %590 = vector.extract_strided_slice %533 {offsets = [24, 0], sizes = [8, 32], strides = [1, 1]} : vector<32x32xf32> to vector<8x32xf32>
    %591 = vector.extract_strided_slice %534 {offsets = [24, 0], sizes = [8, 32], strides = [1, 1]} : vector<32x32xf32> to vector<8x32xf32>
    %592 = vector.extract_strided_slice %535 {offsets = [24, 0], sizes = [8, 32], strides = [1, 1]} : vector<32x32xf32> to vector<8x32xf32>
    %593 = tpu.transpose %591, [1, 0] : vector<8x32xf32> -> vector<32x8xf32>
    %cst_248 = arith.constant dense<0.000000e+00> : vector<8x8xf32>
    %594 = tpu.matmul %590, %593, %cst_248 {dimension_numbers = #tpu.dot_dimension_numbers<[1], [0], [0], [1], [0, 0, 1, 1], [], []>} : vector<8x32xf32>, vector<32x8xf32>, vector<8x8xf32> -> vector<8x8xf32>
    %cst_249 = arith.constant 0.176776692 : f32
    %595 = vector.broadcast %cst_249 : f32 to vector<8x8xf32>
    %596 = arith.mulf %594, %595 : vector<8x8xf32>
    %cst_250 = arith.constant dense<0xFF800000> : vector<8xf32>
    %597 = vector.multi_reduction <maximumf>, %596, %cst_250 [1] : vector<8x8xf32> to vector<8xf32>
    %598 = vector.shape_cast %597 : vector<8xf32> to vector<8x1xf32>
    %599 = vector.broadcast %598 : vector<8x1xf32> to vector<8x8xf32>
    %600 = arith.subf %596, %599 : vector<8x8xf32>
    %601 = math.exp %600 : vector<8x8xf32>
    %cst_251 = arith.constant dense<0.000000e+00> : vector<8xf32>
    %602 = vector.multi_reduction <add>, %601, %cst_251 [1] : vector<8x8xf32> to vector<8xf32>
    %603 = vector.shape_cast %602 : vector<8xf32> to vector<8x1xf32>
    %604 = tpu.reciprocal %603 {approx = true} : vector<8x1xf32> -> vector<8x1xf32>
    %605 = vector.broadcast %604 : vector<8x1xf32> to vector<8x8xf32>
    %606 = arith.mulf %601, %605 : vector<8x8xf32>
    %cst_252 = arith.constant dense<0.000000e+00> : vector<8x32xf32>
    %607 = tpu.matmul %606, %592, %cst_252 {dimension_numbers = #tpu.dot_dimension_numbers<[1], [0], [0], [1], [0, 0, 1, 1], [], []>} : vector<8x8xf32>, vector<8x32xf32>, vector<8x32xf32> -> vector<8x32xf32>
    %608 = tpu.concatenate %553, %571, %589, %607 in 0 : vector<8x32xf32>, vector<8x32xf32>, vector<8x32xf32>, vector<8x32xf32> -> vector<32x32xf32>
    %c2_253 = arith.constant 2 : index
    %c0_254 = arith.constant 0 : index
    %c0_255 = arith.constant 0 : index
    %609 = vector.load %arg11[%c2_253, %c0_254, %c0_255] : memref<6x32x32xf32, #tpu.memory_space<vmem>>, vector<1x32x32xf32>
    %610 = vector.shape_cast %609 : vector<1x32x32xf32> to vector<32x32xf32>
    %cst_256 = arith.constant dense<0.000000e+00> : vector<32x32xf32>
    %611 = tpu.matmul %608, %610, %cst_256 {dimension_numbers = #tpu.dot_dimension_numbers<[1], [0], [0], [1], [0, 0, 1, 1], [], []>} : vector<32x32xf32>, vector<32x32xf32>, vector<32x32xf32> -> vector<32x32xf32>
    %612 = arith.addf %501, %611 : vector<32x32xf32>
    %c2_257 = arith.constant 2 : index
    %c0_258 = arith.constant 0 : index
    %c0_259 = arith.constant 0 : index
    %613 = vector.load %arg12[%c2_257, %c0_258, %c0_259] : memref<6x1x32xf32, #tpu.memory_space<vmem>>, vector<1x1x32xf32>
    %614 = vector.shape_cast %613 : vector<1x1x32xf32> to vector<1x32xf32>
    %615 = vector.broadcast %614 : vector<1x32xf32> to vector<32x32xf32>
    %616 = arith.addf %612, %615 : vector<32x32xf32>
    %c2_260 = arith.constant 2 : index
    %c0_261 = arith.constant 0 : index
    %c0_262 = arith.constant 0 : index
    %617 = vector.load %arg13[%c2_260, %c0_261, %c0_262] : memref<6x1x32xf32, #tpu.memory_space<vmem>>, vector<1x1x32xf32>
    %618 = vector.shape_cast %617 : vector<1x1x32xf32> to vector<1x32xf32>
    %c2_263 = arith.constant 2 : index
    %c0_264 = arith.constant 0 : index
    %c0_265 = arith.constant 0 : index
    %619 = vector.load %arg14[%c2_263, %c0_264, %c0_265] : memref<6x1x32xf32, #tpu.memory_space<vmem>>, vector<1x1x32xf32>
    %620 = vector.shape_cast %619 : vector<1x1x32xf32> to vector<1x32xf32>
    %cst_266 = arith.constant dense<0.000000e+00> : vector<32xf32>
    %621 = vector.multi_reduction <add>, %616, %cst_266 [1] : vector<32x32xf32> to vector<32xf32>
    %622 = vector.shape_cast %621 : vector<32xf32> to vector<32x1xf32>
    %cst_267 = arith.constant 3.200000e+01 : f32
    %623 = vector.broadcast %cst_267 : f32 to vector<32x1xf32>
    %624 = arith.divf %622, %623 : vector<32x1xf32>
    %625 = vector.broadcast %624 : vector<32x1xf32> to vector<32x32xf32>
    %626 = arith.subf %616, %625 : vector<32x32xf32>
    %627 = arith.mulf %626, %626 : vector<32x32xf32>
    %cst_268 = arith.constant dense<0.000000e+00> : vector<32xf32>
    %628 = vector.multi_reduction <add>, %627, %cst_268 [1] : vector<32x32xf32> to vector<32xf32>
    %629 = vector.shape_cast %628 : vector<32xf32> to vector<32x1xf32>
    %cst_269 = arith.constant 3.200000e+01 : f32
    %630 = vector.broadcast %cst_269 : f32 to vector<32x1xf32>
    %631 = arith.divf %629, %630 : vector<32x1xf32>
    %cst_270 = arith.constant 9.99999974E-6 : f32
    %632 = vector.broadcast %cst_270 : f32 to vector<32x1xf32>
    %633 = arith.addf %631, %632 : vector<32x1xf32>
    %634 = math.rsqrt %633 : vector<32x1xf32>
    %635 = vector.broadcast %634 : vector<32x1xf32> to vector<32x32xf32>
    %636 = arith.mulf %626, %635 : vector<32x32xf32>
    %637 = vector.broadcast %618 : vector<1x32xf32> to vector<32x32xf32>
    %638 = arith.mulf %636, %637 : vector<32x32xf32>
    %639 = vector.broadcast %620 : vector<1x32xf32> to vector<32x32xf32>
    %640 = arith.addf %638, %639 : vector<32x32xf32>
    %c2_271 = arith.constant 2 : index
    %c0_272 = arith.constant 0 : index
    %c0_273 = arith.constant 0 : index
    %641 = vector.load %arg15[%c2_271, %c0_272, %c0_273] : memref<6x32x64xf32, #tpu.memory_space<vmem>>, vector<1x32x64xf32>
    %642 = vector.shape_cast %641 : vector<1x32x64xf32> to vector<32x64xf32>
    %cst_274 = arith.constant dense<0.000000e+00> : vector<32x64xf32>
    %643 = tpu.matmul %640, %642, %cst_274 {dimension_numbers = #tpu.dot_dimension_numbers<[1], [0], [0], [1], [0, 0, 1, 1], [], []>} : vector<32x32xf32>, vector<32x64xf32>, vector<32x64xf32> -> vector<32x64xf32>
    %c2_275 = arith.constant 2 : index
    %c0_276 = arith.constant 0 : index
    %c0_277 = arith.constant 0 : index
    %644 = vector.load %arg16[%c2_275, %c0_276, %c0_277] : memref<6x1x64xf32, #tpu.memory_space<vmem>>, vector<1x1x64xf32>
    %645 = vector.shape_cast %644 : vector<1x1x64xf32> to vector<1x64xf32>
    %646 = vector.broadcast %645 : vector<1x64xf32> to vector<32x64xf32>
    %647 = arith.addf %643, %646 : vector<32x64xf32>
    %cst_278 = arith.constant 5.000000e-01 : f32
    %648 = vector.broadcast %cst_278 : f32 to vector<32x64xf32>
    %649 = arith.mulf %648, %647 : vector<32x64xf32>
    %cst_279 = arith.constant 0.707106769 : f32
    %650 = vector.broadcast %cst_279 : f32 to vector<32x64xf32>
    %651 = arith.mulf %647, %650 : vector<32x64xf32>
    %cst_280 = arith.constant 0.000000e+00 : f32
    %652 = vector.broadcast %cst_280 : f32 to vector<32x64xf32>
    %653 = arith.cmpf oge, %651, %652 : vector<32x64xf32>
    %cst_281 = arith.constant 1.000000e+00 : f32
    %cst_282 = arith.constant -1.000000e+00 : f32
    %654 = vector.broadcast %cst_281 : f32 to vector<32x64xf32>
    %655 = vector.broadcast %cst_282 : f32 to vector<32x64xf32>
    %656 = arith.select %653, %654, %655 : vector<32x64xi1>, vector<32x64xf32>
    %657 = math.absf %651 : vector<32x64xf32>
    %cst_283 = arith.constant 0.327591091 : f32
    %658 = vector.broadcast %cst_283 : f32 to vector<32x64xf32>
    %659 = arith.mulf %658, %657 : vector<32x64xf32>
    %cst_284 = arith.constant 1.000000e+00 : f32
    %660 = vector.broadcast %cst_284 : f32 to vector<32x64xf32>
    %661 = arith.addf %660, %659 : vector<32x64xf32>
    %cst_285 = arith.constant 1.000000e+00 : f32
    %662 = vector.broadcast %cst_285 : f32 to vector<32x64xf32>
    %663 = arith.divf %662, %661 : vector<32x64xf32>
    %cst_286 = arith.constant 1.06140542 : f32
    %664 = vector.broadcast %cst_286 : f32 to vector<32x64xf32>
    %665 = arith.mulf %664, %663 : vector<32x64xf32>
    %cst_287 = arith.constant -1.45315206 : f32
    %666 = vector.broadcast %cst_287 : f32 to vector<32x64xf32>
    %667 = arith.addf %665, %666 : vector<32x64xf32>
    %668 = arith.mulf %667, %663 : vector<32x64xf32>
    %cst_288 = arith.constant 1.42141378 : f32
    %669 = vector.broadcast %cst_288 : f32 to vector<32x64xf32>
    %670 = arith.addf %668, %669 : vector<32x64xf32>
    %671 = arith.mulf %670, %663 : vector<32x64xf32>
    %cst_289 = arith.constant -0.284496725 : f32
    %672 = vector.broadcast %cst_289 : f32 to vector<32x64xf32>
    %673 = arith.addf %671, %672 : vector<32x64xf32>
    %674 = arith.mulf %673, %663 : vector<32x64xf32>
    %cst_290 = arith.constant 0.254829586 : f32
    %675 = vector.broadcast %cst_290 : f32 to vector<32x64xf32>
    %676 = arith.addf %674, %675 : vector<32x64xf32>
    %677 = arith.mulf %676, %663 : vector<32x64xf32>
    %cst_291 = arith.constant 0.000000e+00 : f32
    %678 = vector.broadcast %cst_291 : f32 to vector<32x64xf32>
    %679 = arith.subf %678, %657 : vector<32x64xf32>
    %680 = arith.mulf %679, %657 : vector<32x64xf32>
    %681 = math.exp %680 : vector<32x64xf32>
    %682 = arith.mulf %677, %681 : vector<32x64xf32>
    %cst_292 = arith.constant 1.000000e+00 : f32
    %683 = vector.broadcast %cst_292 : f32 to vector<32x64xf32>
    %684 = arith.subf %683, %682 : vector<32x64xf32>
    %685 = arith.mulf %656, %684 : vector<32x64xf32>
    %cst_293 = arith.constant 1.000000e+00 : f32
    %686 = vector.broadcast %cst_293 : f32 to vector<32x64xf32>
    %687 = arith.addf %686, %685 : vector<32x64xf32>
    %688 = arith.mulf %649, %687 : vector<32x64xf32>
    %c2_294 = arith.constant 2 : index
    %c0_295 = arith.constant 0 : index
    %c0_296 = arith.constant 0 : index
    %689 = vector.load %arg17[%c2_294, %c0_295, %c0_296] : memref<6x64x32xf32, #tpu.memory_space<vmem>>, vector<1x64x32xf32>
    %690 = vector.shape_cast %689 : vector<1x64x32xf32> to vector<64x32xf32>
    %cst_297 = arith.constant dense<0.000000e+00> : vector<32x32xf32>
    %691 = tpu.matmul %688, %690, %cst_297 {dimension_numbers = #tpu.dot_dimension_numbers<[1], [0], [0], [1], [0, 0, 1, 1], [], []>} : vector<32x64xf32>, vector<64x32xf32>, vector<32x32xf32> -> vector<32x32xf32>
    %692 = arith.addf %616, %691 : vector<32x32xf32>
    %c2_298 = arith.constant 2 : index
    %c0_299 = arith.constant 0 : index
    %c0_300 = arith.constant 0 : index
    %693 = vector.load %arg18[%c2_298, %c0_299, %c0_300] : memref<6x1x32xf32, #tpu.memory_space<vmem>>, vector<1x1x32xf32>
    %694 = vector.shape_cast %693 : vector<1x1x32xf32> to vector<1x32xf32>
    %695 = vector.broadcast %694 : vector<1x32xf32> to vector<32x32xf32>
    %696 = arith.addf %692, %695 : vector<32x32xf32>
    %c3 = arith.constant 3 : index
    %c0_301 = arith.constant 0 : index
    %c0_302 = arith.constant 0 : index
    %697 = vector.load %arg7[%c3, %c0_301, %c0_302] : memref<6x1x32xf32, #tpu.memory_space<vmem>>, vector<1x1x32xf32>
    %698 = vector.shape_cast %697 : vector<1x1x32xf32> to vector<1x32xf32>
    %c3_303 = arith.constant 3 : index
    %c0_304 = arith.constant 0 : index
    %c0_305 = arith.constant 0 : index
    %699 = vector.load %arg8[%c3_303, %c0_304, %c0_305] : memref<6x1x32xf32, #tpu.memory_space<vmem>>, vector<1x1x32xf32>
    %700 = vector.shape_cast %699 : vector<1x1x32xf32> to vector<1x32xf32>
    %cst_306 = arith.constant dense<0.000000e+00> : vector<32xf32>
    %701 = vector.multi_reduction <add>, %696, %cst_306 [1] : vector<32x32xf32> to vector<32xf32>
    %702 = vector.shape_cast %701 : vector<32xf32> to vector<32x1xf32>
    %cst_307 = arith.constant 3.200000e+01 : f32
    %703 = vector.broadcast %cst_307 : f32 to vector<32x1xf32>
    %704 = arith.divf %702, %703 : vector<32x1xf32>
    %705 = vector.broadcast %704 : vector<32x1xf32> to vector<32x32xf32>
    %706 = arith.subf %696, %705 : vector<32x32xf32>
    %707 = arith.mulf %706, %706 : vector<32x32xf32>
    %cst_308 = arith.constant dense<0.000000e+00> : vector<32xf32>
    %708 = vector.multi_reduction <add>, %707, %cst_308 [1] : vector<32x32xf32> to vector<32xf32>
    %709 = vector.shape_cast %708 : vector<32xf32> to vector<32x1xf32>
    %cst_309 = arith.constant 3.200000e+01 : f32
    %710 = vector.broadcast %cst_309 : f32 to vector<32x1xf32>
    %711 = arith.divf %709, %710 : vector<32x1xf32>
    %cst_310 = arith.constant 9.99999974E-6 : f32
    %712 = vector.broadcast %cst_310 : f32 to vector<32x1xf32>
    %713 = arith.addf %711, %712 : vector<32x1xf32>
    %714 = math.rsqrt %713 : vector<32x1xf32>
    %715 = vector.broadcast %714 : vector<32x1xf32> to vector<32x32xf32>
    %716 = arith.mulf %706, %715 : vector<32x32xf32>
    %717 = vector.broadcast %698 : vector<1x32xf32> to vector<32x32xf32>
    %718 = arith.mulf %716, %717 : vector<32x32xf32>
    %719 = vector.broadcast %700 : vector<1x32xf32> to vector<32x32xf32>
    %720 = arith.addf %718, %719 : vector<32x32xf32>
    %c3_311 = arith.constant 3 : index
    %c0_312 = arith.constant 0 : index
    %c0_313 = arith.constant 0 : index
    %721 = vector.load %arg9[%c3_311, %c0_312, %c0_313] : memref<6x32x96xf32, #tpu.memory_space<vmem>>, vector<1x32x96xf32>
    %722 = vector.shape_cast %721 : vector<1x32x96xf32> to vector<32x96xf32>
    %cst_314 = arith.constant dense<0.000000e+00> : vector<32x96xf32>
    %723 = tpu.matmul %720, %722, %cst_314 {dimension_numbers = #tpu.dot_dimension_numbers<[1], [0], [0], [1], [0, 0, 1, 1], [], []>} : vector<32x32xf32>, vector<32x96xf32>, vector<32x96xf32> -> vector<32x96xf32>
    %c3_315 = arith.constant 3 : index
    %c0_316 = arith.constant 0 : index
    %c0_317 = arith.constant 0 : index
    %724 = vector.load %arg10[%c3_315, %c0_316, %c0_317] : memref<6x1x96xf32, #tpu.memory_space<vmem>>, vector<1x1x96xf32>
    %725 = vector.shape_cast %724 : vector<1x1x96xf32> to vector<1x96xf32>
    %726 = vector.broadcast %725 : vector<1x96xf32> to vector<32x96xf32>
    %727 = arith.addf %723, %726 : vector<32x96xf32>
    %728 = vector.extract_strided_slice %727 {offsets = [0, 0], sizes = [32, 32], strides = [1, 1]} : vector<32x96xf32> to vector<32x32xf32>
    %729 = vector.extract_strided_slice %727 {offsets = [0, 32], sizes = [32, 32], strides = [1, 1]} : vector<32x96xf32> to vector<32x32xf32>
    %730 = vector.extract_strided_slice %727 {offsets = [0, 64], sizes = [32, 32], strides = [1, 1]} : vector<32x96xf32> to vector<32x32xf32>
    %731 = vector.extract_strided_slice %728 {offsets = [0, 0], sizes = [8, 32], strides = [1, 1]} : vector<32x32xf32> to vector<8x32xf32>
    %732 = vector.extract_strided_slice %729 {offsets = [0, 0], sizes = [8, 32], strides = [1, 1]} : vector<32x32xf32> to vector<8x32xf32>
    %733 = vector.extract_strided_slice %730 {offsets = [0, 0], sizes = [8, 32], strides = [1, 1]} : vector<32x32xf32> to vector<8x32xf32>
    %734 = tpu.transpose %732, [1, 0] : vector<8x32xf32> -> vector<32x8xf32>
    %cst_318 = arith.constant dense<0.000000e+00> : vector<8x8xf32>
    %735 = tpu.matmul %731, %734, %cst_318 {dimension_numbers = #tpu.dot_dimension_numbers<[1], [0], [0], [1], [0, 0, 1, 1], [], []>} : vector<8x32xf32>, vector<32x8xf32>, vector<8x8xf32> -> vector<8x8xf32>
    %cst_319 = arith.constant 0.176776692 : f32
    %736 = vector.broadcast %cst_319 : f32 to vector<8x8xf32>
    %737 = arith.mulf %735, %736 : vector<8x8xf32>
    %cst_320 = arith.constant dense<0xFF800000> : vector<8xf32>
    %738 = vector.multi_reduction <maximumf>, %737, %cst_320 [1] : vector<8x8xf32> to vector<8xf32>
    %739 = vector.shape_cast %738 : vector<8xf32> to vector<8x1xf32>
    %740 = vector.broadcast %739 : vector<8x1xf32> to vector<8x8xf32>
    %741 = arith.subf %737, %740 : vector<8x8xf32>
    %742 = math.exp %741 : vector<8x8xf32>
    %cst_321 = arith.constant dense<0.000000e+00> : vector<8xf32>
    %743 = vector.multi_reduction <add>, %742, %cst_321 [1] : vector<8x8xf32> to vector<8xf32>
    %744 = vector.shape_cast %743 : vector<8xf32> to vector<8x1xf32>
    %745 = tpu.reciprocal %744 {approx = true} : vector<8x1xf32> -> vector<8x1xf32>
    %746 = vector.broadcast %745 : vector<8x1xf32> to vector<8x8xf32>
    %747 = arith.mulf %742, %746 : vector<8x8xf32>
    %cst_322 = arith.constant dense<0.000000e+00> : vector<8x32xf32>
    %748 = tpu.matmul %747, %733, %cst_322 {dimension_numbers = #tpu.dot_dimension_numbers<[1], [0], [0], [1], [0, 0, 1, 1], [], []>} : vector<8x8xf32>, vector<8x32xf32>, vector<8x32xf32> -> vector<8x32xf32>
    %749 = vector.extract_strided_slice %728 {offsets = [8, 0], sizes = [8, 32], strides = [1, 1]} : vector<32x32xf32> to vector<8x32xf32>
    %750 = vector.extract_strided_slice %729 {offsets = [8, 0], sizes = [8, 32], strides = [1, 1]} : vector<32x32xf32> to vector<8x32xf32>
    %751 = vector.extract_strided_slice %730 {offsets = [8, 0], sizes = [8, 32], strides = [1, 1]} : vector<32x32xf32> to vector<8x32xf32>
    %752 = tpu.transpose %750, [1, 0] : vector<8x32xf32> -> vector<32x8xf32>
    %cst_323 = arith.constant dense<0.000000e+00> : vector<8x8xf32>
    %753 = tpu.matmul %749, %752, %cst_323 {dimension_numbers = #tpu.dot_dimension_numbers<[1], [0], [0], [1], [0, 0, 1, 1], [], []>} : vector<8x32xf32>, vector<32x8xf32>, vector<8x8xf32> -> vector<8x8xf32>
    %cst_324 = arith.constant 0.176776692 : f32
    %754 = vector.broadcast %cst_324 : f32 to vector<8x8xf32>
    %755 = arith.mulf %753, %754 : vector<8x8xf32>
    %cst_325 = arith.constant dense<0xFF800000> : vector<8xf32>
    %756 = vector.multi_reduction <maximumf>, %755, %cst_325 [1] : vector<8x8xf32> to vector<8xf32>
    %757 = vector.shape_cast %756 : vector<8xf32> to vector<8x1xf32>
    %758 = vector.broadcast %757 : vector<8x1xf32> to vector<8x8xf32>
    %759 = arith.subf %755, %758 : vector<8x8xf32>
    %760 = math.exp %759 : vector<8x8xf32>
    %cst_326 = arith.constant dense<0.000000e+00> : vector<8xf32>
    %761 = vector.multi_reduction <add>, %760, %cst_326 [1] : vector<8x8xf32> to vector<8xf32>
    %762 = vector.shape_cast %761 : vector<8xf32> to vector<8x1xf32>
    %763 = tpu.reciprocal %762 {approx = true} : vector<8x1xf32> -> vector<8x1xf32>
    %764 = vector.broadcast %763 : vector<8x1xf32> to vector<8x8xf32>
    %765 = arith.mulf %760, %764 : vector<8x8xf32>
    %cst_327 = arith.constant dense<0.000000e+00> : vector<8x32xf32>
    %766 = tpu.matmul %765, %751, %cst_327 {dimension_numbers = #tpu.dot_dimension_numbers<[1], [0], [0], [1], [0, 0, 1, 1], [], []>} : vector<8x8xf32>, vector<8x32xf32>, vector<8x32xf32> -> vector<8x32xf32>
    %767 = vector.extract_strided_slice %728 {offsets = [16, 0], sizes = [8, 32], strides = [1, 1]} : vector<32x32xf32> to vector<8x32xf32>
    %768 = vector.extract_strided_slice %729 {offsets = [16, 0], sizes = [8, 32], strides = [1, 1]} : vector<32x32xf32> to vector<8x32xf32>
    %769 = vector.extract_strided_slice %730 {offsets = [16, 0], sizes = [8, 32], strides = [1, 1]} : vector<32x32xf32> to vector<8x32xf32>
    %770 = tpu.transpose %768, [1, 0] : vector<8x32xf32> -> vector<32x8xf32>
    %cst_328 = arith.constant dense<0.000000e+00> : vector<8x8xf32>
    %771 = tpu.matmul %767, %770, %cst_328 {dimension_numbers = #tpu.dot_dimension_numbers<[1], [0], [0], [1], [0, 0, 1, 1], [], []>} : vector<8x32xf32>, vector<32x8xf32>, vector<8x8xf32> -> vector<8x8xf32>
    %cst_329 = arith.constant 0.176776692 : f32
    %772 = vector.broadcast %cst_329 : f32 to vector<8x8xf32>
    %773 = arith.mulf %771, %772 : vector<8x8xf32>
    %cst_330 = arith.constant dense<0xFF800000> : vector<8xf32>
    %774 = vector.multi_reduction <maximumf>, %773, %cst_330 [1] : vector<8x8xf32> to vector<8xf32>
    %775 = vector.shape_cast %774 : vector<8xf32> to vector<8x1xf32>
    %776 = vector.broadcast %775 : vector<8x1xf32> to vector<8x8xf32>
    %777 = arith.subf %773, %776 : vector<8x8xf32>
    %778 = math.exp %777 : vector<8x8xf32>
    %cst_331 = arith.constant dense<0.000000e+00> : vector<8xf32>
    %779 = vector.multi_reduction <add>, %778, %cst_331 [1] : vector<8x8xf32> to vector<8xf32>
    %780 = vector.shape_cast %779 : vector<8xf32> to vector<8x1xf32>
    %781 = tpu.reciprocal %780 {approx = true} : vector<8x1xf32> -> vector<8x1xf32>
    %782 = vector.broadcast %781 : vector<8x1xf32> to vector<8x8xf32>
    %783 = arith.mulf %778, %782 : vector<8x8xf32>
    %cst_332 = arith.constant dense<0.000000e+00> : vector<8x32xf32>
    %784 = tpu.matmul %783, %769, %cst_332 {dimension_numbers = #tpu.dot_dimension_numbers<[1], [0], [0], [1], [0, 0, 1, 1], [], []>} : vector<8x8xf32>, vector<8x32xf32>, vector<8x32xf32> -> vector<8x32xf32>
    %785 = vector.extract_strided_slice %728 {offsets = [24, 0], sizes = [8, 32], strides = [1, 1]} : vector<32x32xf32> to vector<8x32xf32>
    %786 = vector.extract_strided_slice %729 {offsets = [24, 0], sizes = [8, 32], strides = [1, 1]} : vector<32x32xf32> to vector<8x32xf32>
    %787 = vector.extract_strided_slice %730 {offsets = [24, 0], sizes = [8, 32], strides = [1, 1]} : vector<32x32xf32> to vector<8x32xf32>
    %788 = tpu.transpose %786, [1, 0] : vector<8x32xf32> -> vector<32x8xf32>
    %cst_333 = arith.constant dense<0.000000e+00> : vector<8x8xf32>
    %789 = tpu.matmul %785, %788, %cst_333 {dimension_numbers = #tpu.dot_dimension_numbers<[1], [0], [0], [1], [0, 0, 1, 1], [], []>} : vector<8x32xf32>, vector<32x8xf32>, vector<8x8xf32> -> vector<8x8xf32>
    %cst_334 = arith.constant 0.176776692 : f32
    %790 = vector.broadcast %cst_334 : f32 to vector<8x8xf32>
    %791 = arith.mulf %789, %790 : vector<8x8xf32>
    %cst_335 = arith.constant dense<0xFF800000> : vector<8xf32>
    %792 = vector.multi_reduction <maximumf>, %791, %cst_335 [1] : vector<8x8xf32> to vector<8xf32>
    %793 = vector.shape_cast %792 : vector<8xf32> to vector<8x1xf32>
    %794 = vector.broadcast %793 : vector<8x1xf32> to vector<8x8xf32>
    %795 = arith.subf %791, %794 : vector<8x8xf32>
    %796 = math.exp %795 : vector<8x8xf32>
    %cst_336 = arith.constant dense<0.000000e+00> : vector<8xf32>
    %797 = vector.multi_reduction <add>, %796, %cst_336 [1] : vector<8x8xf32> to vector<8xf32>
    %798 = vector.shape_cast %797 : vector<8xf32> to vector<8x1xf32>
    %799 = tpu.reciprocal %798 {approx = true} : vector<8x1xf32> -> vector<8x1xf32>
    %800 = vector.broadcast %799 : vector<8x1xf32> to vector<8x8xf32>
    %801 = arith.mulf %796, %800 : vector<8x8xf32>
    %cst_337 = arith.constant dense<0.000000e+00> : vector<8x32xf32>
    %802 = tpu.matmul %801, %787, %cst_337 {dimension_numbers = #tpu.dot_dimension_numbers<[1], [0], [0], [1], [0, 0, 1, 1], [], []>} : vector<8x8xf32>, vector<8x32xf32>, vector<8x32xf32> -> vector<8x32xf32>
    %803 = tpu.concatenate %748, %766, %784, %802 in 0 : vector<8x32xf32>, vector<8x32xf32>, vector<8x32xf32>, vector<8x32xf32> -> vector<32x32xf32>
    %c3_338 = arith.constant 3 : index
    %c0_339 = arith.constant 0 : index
    %c0_340 = arith.constant 0 : index
    %804 = vector.load %arg11[%c3_338, %c0_339, %c0_340] : memref<6x32x32xf32, #tpu.memory_space<vmem>>, vector<1x32x32xf32>
    %805 = vector.shape_cast %804 : vector<1x32x32xf32> to vector<32x32xf32>
    %cst_341 = arith.constant dense<0.000000e+00> : vector<32x32xf32>
    %806 = tpu.matmul %803, %805, %cst_341 {dimension_numbers = #tpu.dot_dimension_numbers<[1], [0], [0], [1], [0, 0, 1, 1], [], []>} : vector<32x32xf32>, vector<32x32xf32>, vector<32x32xf32> -> vector<32x32xf32>
    %807 = arith.addf %696, %806 : vector<32x32xf32>
    %c3_342 = arith.constant 3 : index
    %c0_343 = arith.constant 0 : index
    %c0_344 = arith.constant 0 : index
    %808 = vector.load %arg12[%c3_342, %c0_343, %c0_344] : memref<6x1x32xf32, #tpu.memory_space<vmem>>, vector<1x1x32xf32>
    %809 = vector.shape_cast %808 : vector<1x1x32xf32> to vector<1x32xf32>
    %810 = vector.broadcast %809 : vector<1x32xf32> to vector<32x32xf32>
    %811 = arith.addf %807, %810 : vector<32x32xf32>
    %c3_345 = arith.constant 3 : index
    %c0_346 = arith.constant 0 : index
    %c0_347 = arith.constant 0 : index
    %812 = vector.load %arg13[%c3_345, %c0_346, %c0_347] : memref<6x1x32xf32, #tpu.memory_space<vmem>>, vector<1x1x32xf32>
    %813 = vector.shape_cast %812 : vector<1x1x32xf32> to vector<1x32xf32>
    %c3_348 = arith.constant 3 : index
    %c0_349 = arith.constant 0 : index
    %c0_350 = arith.constant 0 : index
    %814 = vector.load %arg14[%c3_348, %c0_349, %c0_350] : memref<6x1x32xf32, #tpu.memory_space<vmem>>, vector<1x1x32xf32>
    %815 = vector.shape_cast %814 : vector<1x1x32xf32> to vector<1x32xf32>
    %cst_351 = arith.constant dense<0.000000e+00> : vector<32xf32>
    %816 = vector.multi_reduction <add>, %811, %cst_351 [1] : vector<32x32xf32> to vector<32xf32>
    %817 = vector.shape_cast %816 : vector<32xf32> to vector<32x1xf32>
    %cst_352 = arith.constant 3.200000e+01 : f32
    %818 = vector.broadcast %cst_352 : f32 to vector<32x1xf32>
    %819 = arith.divf %817, %818 : vector<32x1xf32>
    %820 = vector.broadcast %819 : vector<32x1xf32> to vector<32x32xf32>
    %821 = arith.subf %811, %820 : vector<32x32xf32>
    %822 = arith.mulf %821, %821 : vector<32x32xf32>
    %cst_353 = arith.constant dense<0.000000e+00> : vector<32xf32>
    %823 = vector.multi_reduction <add>, %822, %cst_353 [1] : vector<32x32xf32> to vector<32xf32>
    %824 = vector.shape_cast %823 : vector<32xf32> to vector<32x1xf32>
    %cst_354 = arith.constant 3.200000e+01 : f32
    %825 = vector.broadcast %cst_354 : f32 to vector<32x1xf32>
    %826 = arith.divf %824, %825 : vector<32x1xf32>
    %cst_355 = arith.constant 9.99999974E-6 : f32
    %827 = vector.broadcast %cst_355 : f32 to vector<32x1xf32>
    %828 = arith.addf %826, %827 : vector<32x1xf32>
    %829 = math.rsqrt %828 : vector<32x1xf32>
    %830 = vector.broadcast %829 : vector<32x1xf32> to vector<32x32xf32>
    %831 = arith.mulf %821, %830 : vector<32x32xf32>
    %832 = vector.broadcast %813 : vector<1x32xf32> to vector<32x32xf32>
    %833 = arith.mulf %831, %832 : vector<32x32xf32>
    %834 = vector.broadcast %815 : vector<1x32xf32> to vector<32x32xf32>
    %835 = arith.addf %833, %834 : vector<32x32xf32>
    %c3_356 = arith.constant 3 : index
    %c0_357 = arith.constant 0 : index
    %c0_358 = arith.constant 0 : index
    %836 = vector.load %arg15[%c3_356, %c0_357, %c0_358] : memref<6x32x64xf32, #tpu.memory_space<vmem>>, vector<1x32x64xf32>
    %837 = vector.shape_cast %836 : vector<1x32x64xf32> to vector<32x64xf32>
    %cst_359 = arith.constant dense<0.000000e+00> : vector<32x64xf32>
    %838 = tpu.matmul %835, %837, %cst_359 {dimension_numbers = #tpu.dot_dimension_numbers<[1], [0], [0], [1], [0, 0, 1, 1], [], []>} : vector<32x32xf32>, vector<32x64xf32>, vector<32x64xf32> -> vector<32x64xf32>
    %c3_360 = arith.constant 3 : index
    %c0_361 = arith.constant 0 : index
    %c0_362 = arith.constant 0 : index
    %839 = vector.load %arg16[%c3_360, %c0_361, %c0_362] : memref<6x1x64xf32, #tpu.memory_space<vmem>>, vector<1x1x64xf32>
    %840 = vector.shape_cast %839 : vector<1x1x64xf32> to vector<1x64xf32>
    %841 = vector.broadcast %840 : vector<1x64xf32> to vector<32x64xf32>
    %842 = arith.addf %838, %841 : vector<32x64xf32>
    %cst_363 = arith.constant 5.000000e-01 : f32
    %843 = vector.broadcast %cst_363 : f32 to vector<32x64xf32>
    %844 = arith.mulf %843, %842 : vector<32x64xf32>
    %cst_364 = arith.constant 0.707106769 : f32
    %845 = vector.broadcast %cst_364 : f32 to vector<32x64xf32>
    %846 = arith.mulf %842, %845 : vector<32x64xf32>
    %cst_365 = arith.constant 0.000000e+00 : f32
    %847 = vector.broadcast %cst_365 : f32 to vector<32x64xf32>
    %848 = arith.cmpf oge, %846, %847 : vector<32x64xf32>
    %cst_366 = arith.constant 1.000000e+00 : f32
    %cst_367 = arith.constant -1.000000e+00 : f32
    %849 = vector.broadcast %cst_366 : f32 to vector<32x64xf32>
    %850 = vector.broadcast %cst_367 : f32 to vector<32x64xf32>
    %851 = arith.select %848, %849, %850 : vector<32x64xi1>, vector<32x64xf32>
    %852 = math.absf %846 : vector<32x64xf32>
    %cst_368 = arith.constant 0.327591091 : f32
    %853 = vector.broadcast %cst_368 : f32 to vector<32x64xf32>
    %854 = arith.mulf %853, %852 : vector<32x64xf32>
    %cst_369 = arith.constant 1.000000e+00 : f32
    %855 = vector.broadcast %cst_369 : f32 to vector<32x64xf32>
    %856 = arith.addf %855, %854 : vector<32x64xf32>
    %cst_370 = arith.constant 1.000000e+00 : f32
    %857 = vector.broadcast %cst_370 : f32 to vector<32x64xf32>
    %858 = arith.divf %857, %856 : vector<32x64xf32>
    %cst_371 = arith.constant 1.06140542 : f32
    %859 = vector.broadcast %cst_371 : f32 to vector<32x64xf32>
    %860 = arith.mulf %859, %858 : vector<32x64xf32>
    %cst_372 = arith.constant -1.45315206 : f32
    %861 = vector.broadcast %cst_372 : f32 to vector<32x64xf32>
    %862 = arith.addf %860, %861 : vector<32x64xf32>
    %863 = arith.mulf %862, %858 : vector<32x64xf32>
    %cst_373 = arith.constant 1.42141378 : f32
    %864 = vector.broadcast %cst_373 : f32 to vector<32x64xf32>
    %865 = arith.addf %863, %864 : vector<32x64xf32>
    %866 = arith.mulf %865, %858 : vector<32x64xf32>
    %cst_374 = arith.constant -0.284496725 : f32
    %867 = vector.broadcast %cst_374 : f32 to vector<32x64xf32>
    %868 = arith.addf %866, %867 : vector<32x64xf32>
    %869 = arith.mulf %868, %858 : vector<32x64xf32>
    %cst_375 = arith.constant 0.254829586 : f32
    %870 = vector.broadcast %cst_375 : f32 to vector<32x64xf32>
    %871 = arith.addf %869, %870 : vector<32x64xf32>
    %872 = arith.mulf %871, %858 : vector<32x64xf32>
    %cst_376 = arith.constant 0.000000e+00 : f32
    %873 = vector.broadcast %cst_376 : f32 to vector<32x64xf32>
    %874 = arith.subf %873, %852 : vector<32x64xf32>
    %875 = arith.mulf %874, %852 : vector<32x64xf32>
    %876 = math.exp %875 : vector<32x64xf32>
    %877 = arith.mulf %872, %876 : vector<32x64xf32>
    %cst_377 = arith.constant 1.000000e+00 : f32
    %878 = vector.broadcast %cst_377 : f32 to vector<32x64xf32>
    %879 = arith.subf %878, %877 : vector<32x64xf32>
    %880 = arith.mulf %851, %879 : vector<32x64xf32>
    %cst_378 = arith.constant 1.000000e+00 : f32
    %881 = vector.broadcast %cst_378 : f32 to vector<32x64xf32>
    %882 = arith.addf %881, %880 : vector<32x64xf32>
    %883 = arith.mulf %844, %882 : vector<32x64xf32>
    %c3_379 = arith.constant 3 : index
    %c0_380 = arith.constant 0 : index
    %c0_381 = arith.constant 0 : index
    %884 = vector.load %arg17[%c3_379, %c0_380, %c0_381] : memref<6x64x32xf32, #tpu.memory_space<vmem>>, vector<1x64x32xf32>
    %885 = vector.shape_cast %884 : vector<1x64x32xf32> to vector<64x32xf32>
    %cst_382 = arith.constant dense<0.000000e+00> : vector<32x32xf32>
    %886 = tpu.matmul %883, %885, %cst_382 {dimension_numbers = #tpu.dot_dimension_numbers<[1], [0], [0], [1], [0, 0, 1, 1], [], []>} : vector<32x64xf32>, vector<64x32xf32>, vector<32x32xf32> -> vector<32x32xf32>
    %887 = arith.addf %811, %886 : vector<32x32xf32>
    %c3_383 = arith.constant 3 : index
    %c0_384 = arith.constant 0 : index
    %c0_385 = arith.constant 0 : index
    %888 = vector.load %arg18[%c3_383, %c0_384, %c0_385] : memref<6x1x32xf32, #tpu.memory_space<vmem>>, vector<1x1x32xf32>
    %889 = vector.shape_cast %888 : vector<1x1x32xf32> to vector<1x32xf32>
    %890 = vector.broadcast %889 : vector<1x32xf32> to vector<32x32xf32>
    %891 = arith.addf %887, %890 : vector<32x32xf32>
    %c4 = arith.constant 4 : index
    %c0_386 = arith.constant 0 : index
    %c0_387 = arith.constant 0 : index
    %892 = vector.load %arg7[%c4, %c0_386, %c0_387] : memref<6x1x32xf32, #tpu.memory_space<vmem>>, vector<1x1x32xf32>
    %893 = vector.shape_cast %892 : vector<1x1x32xf32> to vector<1x32xf32>
    %c4_388 = arith.constant 4 : index
    %c0_389 = arith.constant 0 : index
    %c0_390 = arith.constant 0 : index
    %894 = vector.load %arg8[%c4_388, %c0_389, %c0_390] : memref<6x1x32xf32, #tpu.memory_space<vmem>>, vector<1x1x32xf32>
    %895 = vector.shape_cast %894 : vector<1x1x32xf32> to vector<1x32xf32>
    %cst_391 = arith.constant dense<0.000000e+00> : vector<32xf32>
    %896 = vector.multi_reduction <add>, %891, %cst_391 [1] : vector<32x32xf32> to vector<32xf32>
    %897 = vector.shape_cast %896 : vector<32xf32> to vector<32x1xf32>
    %cst_392 = arith.constant 3.200000e+01 : f32
    %898 = vector.broadcast %cst_392 : f32 to vector<32x1xf32>
    %899 = arith.divf %897, %898 : vector<32x1xf32>
    %900 = vector.broadcast %899 : vector<32x1xf32> to vector<32x32xf32>
    %901 = arith.subf %891, %900 : vector<32x32xf32>
    %902 = arith.mulf %901, %901 : vector<32x32xf32>
    %cst_393 = arith.constant dense<0.000000e+00> : vector<32xf32>
    %903 = vector.multi_reduction <add>, %902, %cst_393 [1] : vector<32x32xf32> to vector<32xf32>
    %904 = vector.shape_cast %903 : vector<32xf32> to vector<32x1xf32>
    %cst_394 = arith.constant 3.200000e+01 : f32
    %905 = vector.broadcast %cst_394 : f32 to vector<32x1xf32>
    %906 = arith.divf %904, %905 : vector<32x1xf32>
    %cst_395 = arith.constant 9.99999974E-6 : f32
    %907 = vector.broadcast %cst_395 : f32 to vector<32x1xf32>
    %908 = arith.addf %906, %907 : vector<32x1xf32>
    %909 = math.rsqrt %908 : vector<32x1xf32>
    %910 = vector.broadcast %909 : vector<32x1xf32> to vector<32x32xf32>
    %911 = arith.mulf %901, %910 : vector<32x32xf32>
    %912 = vector.broadcast %893 : vector<1x32xf32> to vector<32x32xf32>
    %913 = arith.mulf %911, %912 : vector<32x32xf32>
    %914 = vector.broadcast %895 : vector<1x32xf32> to vector<32x32xf32>
    %915 = arith.addf %913, %914 : vector<32x32xf32>
    %c4_396 = arith.constant 4 : index
    %c0_397 = arith.constant 0 : index
    %c0_398 = arith.constant 0 : index
    %916 = vector.load %arg9[%c4_396, %c0_397, %c0_398] : memref<6x32x96xf32, #tpu.memory_space<vmem>>, vector<1x32x96xf32>
    %917 = vector.shape_cast %916 : vector<1x32x96xf32> to vector<32x96xf32>
    %cst_399 = arith.constant dense<0.000000e+00> : vector<32x96xf32>
    %918 = tpu.matmul %915, %917, %cst_399 {dimension_numbers = #tpu.dot_dimension_numbers<[1], [0], [0], [1], [0, 0, 1, 1], [], []>} : vector<32x32xf32>, vector<32x96xf32>, vector<32x96xf32> -> vector<32x96xf32>
    %c4_400 = arith.constant 4 : index
    %c0_401 = arith.constant 0 : index
    %c0_402 = arith.constant 0 : index
    %919 = vector.load %arg10[%c4_400, %c0_401, %c0_402] : memref<6x1x96xf32, #tpu.memory_space<vmem>>, vector<1x1x96xf32>
    %920 = vector.shape_cast %919 : vector<1x1x96xf32> to vector<1x96xf32>
    %921 = vector.broadcast %920 : vector<1x96xf32> to vector<32x96xf32>
    %922 = arith.addf %918, %921 : vector<32x96xf32>
    %923 = vector.extract_strided_slice %922 {offsets = [0, 0], sizes = [32, 32], strides = [1, 1]} : vector<32x96xf32> to vector<32x32xf32>
    %924 = vector.extract_strided_slice %922 {offsets = [0, 32], sizes = [32, 32], strides = [1, 1]} : vector<32x96xf32> to vector<32x32xf32>
    %925 = vector.extract_strided_slice %922 {offsets = [0, 64], sizes = [32, 32], strides = [1, 1]} : vector<32x96xf32> to vector<32x32xf32>
    %926 = vector.extract_strided_slice %923 {offsets = [0, 0], sizes = [8, 32], strides = [1, 1]} : vector<32x32xf32> to vector<8x32xf32>
    %927 = vector.extract_strided_slice %924 {offsets = [0, 0], sizes = [8, 32], strides = [1, 1]} : vector<32x32xf32> to vector<8x32xf32>
    %928 = vector.extract_strided_slice %925 {offsets = [0, 0], sizes = [8, 32], strides = [1, 1]} : vector<32x32xf32> to vector<8x32xf32>
    %929 = tpu.transpose %927, [1, 0] : vector<8x32xf32> -> vector<32x8xf32>
    %cst_403 = arith.constant dense<0.000000e+00> : vector<8x8xf32>
    %930 = tpu.matmul %926, %929, %cst_403 {dimension_numbers = #tpu.dot_dimension_numbers<[1], [0], [0], [1], [0, 0, 1, 1], [], []>} : vector<8x32xf32>, vector<32x8xf32>, vector<8x8xf32> -> vector<8x8xf32>
    %cst_404 = arith.constant 0.176776692 : f32
    %931 = vector.broadcast %cst_404 : f32 to vector<8x8xf32>
    %932 = arith.mulf %930, %931 : vector<8x8xf32>
    %cst_405 = arith.constant dense<0xFF800000> : vector<8xf32>
    %933 = vector.multi_reduction <maximumf>, %932, %cst_405 [1] : vector<8x8xf32> to vector<8xf32>
    %934 = vector.shape_cast %933 : vector<8xf32> to vector<8x1xf32>
    %935 = vector.broadcast %934 : vector<8x1xf32> to vector<8x8xf32>
    %936 = arith.subf %932, %935 : vector<8x8xf32>
    %937 = math.exp %936 : vector<8x8xf32>
    %cst_406 = arith.constant dense<0.000000e+00> : vector<8xf32>
    %938 = vector.multi_reduction <add>, %937, %cst_406 [1] : vector<8x8xf32> to vector<8xf32>
    %939 = vector.shape_cast %938 : vector<8xf32> to vector<8x1xf32>
    %940 = tpu.reciprocal %939 {approx = true} : vector<8x1xf32> -> vector<8x1xf32>
    %941 = vector.broadcast %940 : vector<8x1xf32> to vector<8x8xf32>
    %942 = arith.mulf %937, %941 : vector<8x8xf32>
    %cst_407 = arith.constant dense<0.000000e+00> : vector<8x32xf32>
    %943 = tpu.matmul %942, %928, %cst_407 {dimension_numbers = #tpu.dot_dimension_numbers<[1], [0], [0], [1], [0, 0, 1, 1], [], []>} : vector<8x8xf32>, vector<8x32xf32>, vector<8x32xf32> -> vector<8x32xf32>
    %944 = vector.extract_strided_slice %923 {offsets = [8, 0], sizes = [8, 32], strides = [1, 1]} : vector<32x32xf32> to vector<8x32xf32>
    %945 = vector.extract_strided_slice %924 {offsets = [8, 0], sizes = [8, 32], strides = [1, 1]} : vector<32x32xf32> to vector<8x32xf32>
    %946 = vector.extract_strided_slice %925 {offsets = [8, 0], sizes = [8, 32], strides = [1, 1]} : vector<32x32xf32> to vector<8x32xf32>
    %947 = tpu.transpose %945, [1, 0] : vector<8x32xf32> -> vector<32x8xf32>
    %cst_408 = arith.constant dense<0.000000e+00> : vector<8x8xf32>
    %948 = tpu.matmul %944, %947, %cst_408 {dimension_numbers = #tpu.dot_dimension_numbers<[1], [0], [0], [1], [0, 0, 1, 1], [], []>} : vector<8x32xf32>, vector<32x8xf32>, vector<8x8xf32> -> vector<8x8xf32>
    %cst_409 = arith.constant 0.176776692 : f32
    %949 = vector.broadcast %cst_409 : f32 to vector<8x8xf32>
    %950 = arith.mulf %948, %949 : vector<8x8xf32>
    %cst_410 = arith.constant dense<0xFF800000> : vector<8xf32>
    %951 = vector.multi_reduction <maximumf>, %950, %cst_410 [1] : vector<8x8xf32> to vector<8xf32>
    %952 = vector.shape_cast %951 : vector<8xf32> to vector<8x1xf32>
    %953 = vector.broadcast %952 : vector<8x1xf32> to vector<8x8xf32>
    %954 = arith.subf %950, %953 : vector<8x8xf32>
    %955 = math.exp %954 : vector<8x8xf32>
    %cst_411 = arith.constant dense<0.000000e+00> : vector<8xf32>
    %956 = vector.multi_reduction <add>, %955, %cst_411 [1] : vector<8x8xf32> to vector<8xf32>
    %957 = vector.shape_cast %956 : vector<8xf32> to vector<8x1xf32>
    %958 = tpu.reciprocal %957 {approx = true} : vector<8x1xf32> -> vector<8x1xf32>
    %959 = vector.broadcast %958 : vector<8x1xf32> to vector<8x8xf32>
    %960 = arith.mulf %955, %959 : vector<8x8xf32>
    %cst_412 = arith.constant dense<0.000000e+00> : vector<8x32xf32>
    %961 = tpu.matmul %960, %946, %cst_412 {dimension_numbers = #tpu.dot_dimension_numbers<[1], [0], [0], [1], [0, 0, 1, 1], [], []>} : vector<8x8xf32>, vector<8x32xf32>, vector<8x32xf32> -> vector<8x32xf32>
    %962 = vector.extract_strided_slice %923 {offsets = [16, 0], sizes = [8, 32], strides = [1, 1]} : vector<32x32xf32> to vector<8x32xf32>
    %963 = vector.extract_strided_slice %924 {offsets = [16, 0], sizes = [8, 32], strides = [1, 1]} : vector<32x32xf32> to vector<8x32xf32>
    %964 = vector.extract_strided_slice %925 {offsets = [16, 0], sizes = [8, 32], strides = [1, 1]} : vector<32x32xf32> to vector<8x32xf32>
    %965 = tpu.transpose %963, [1, 0] : vector<8x32xf32> -> vector<32x8xf32>
    %cst_413 = arith.constant dense<0.000000e+00> : vector<8x8xf32>
    %966 = tpu.matmul %962, %965, %cst_413 {dimension_numbers = #tpu.dot_dimension_numbers<[1], [0], [0], [1], [0, 0, 1, 1], [], []>} : vector<8x32xf32>, vector<32x8xf32>, vector<8x8xf32> -> vector<8x8xf32>
    %cst_414 = arith.constant 0.176776692 : f32
    %967 = vector.broadcast %cst_414 : f32 to vector<8x8xf32>
    %968 = arith.mulf %966, %967 : vector<8x8xf32>
    %cst_415 = arith.constant dense<0xFF800000> : vector<8xf32>
    %969 = vector.multi_reduction <maximumf>, %968, %cst_415 [1] : vector<8x8xf32> to vector<8xf32>
    %970 = vector.shape_cast %969 : vector<8xf32> to vector<8x1xf32>
    %971 = vector.broadcast %970 : vector<8x1xf32> to vector<8x8xf32>
    %972 = arith.subf %968, %971 : vector<8x8xf32>
    %973 = math.exp %972 : vector<8x8xf32>
    %cst_416 = arith.constant dense<0.000000e+00> : vector<8xf32>
    %974 = vector.multi_reduction <add>, %973, %cst_416 [1] : vector<8x8xf32> to vector<8xf32>
    %975 = vector.shape_cast %974 : vector<8xf32> to vector<8x1xf32>
    %976 = tpu.reciprocal %975 {approx = true} : vector<8x1xf32> -> vector<8x1xf32>
    %977 = vector.broadcast %976 : vector<8x1xf32> to vector<8x8xf32>
    %978 = arith.mulf %973, %977 : vector<8x8xf32>
    %cst_417 = arith.constant dense<0.000000e+00> : vector<8x32xf32>
    %979 = tpu.matmul %978, %964, %cst_417 {dimension_numbers = #tpu.dot_dimension_numbers<[1], [0], [0], [1], [0, 0, 1, 1], [], []>} : vector<8x8xf32>, vector<8x32xf32>, vector<8x32xf32> -> vector<8x32xf32>
    %980 = vector.extract_strided_slice %923 {offsets = [24, 0], sizes = [8, 32], strides = [1, 1]} : vector<32x32xf32> to vector<8x32xf32>
    %981 = vector.extract_strided_slice %924 {offsets = [24, 0], sizes = [8, 32], strides = [1, 1]} : vector<32x32xf32> to vector<8x32xf32>
    %982 = vector.extract_strided_slice %925 {offsets = [24, 0], sizes = [8, 32], strides = [1, 1]} : vector<32x32xf32> to vector<8x32xf32>
    %983 = tpu.transpose %981, [1, 0] : vector<8x32xf32> -> vector<32x8xf32>
    %cst_418 = arith.constant dense<0.000000e+00> : vector<8x8xf32>
    %984 = tpu.matmul %980, %983, %cst_418 {dimension_numbers = #tpu.dot_dimension_numbers<[1], [0], [0], [1], [0, 0, 1, 1], [], []>} : vector<8x32xf32>, vector<32x8xf32>, vector<8x8xf32> -> vector<8x8xf32>
    %cst_419 = arith.constant 0.176776692 : f32
    %985 = vector.broadcast %cst_419 : f32 to vector<8x8xf32>
    %986 = arith.mulf %984, %985 : vector<8x8xf32>
    %cst_420 = arith.constant dense<0xFF800000> : vector<8xf32>
    %987 = vector.multi_reduction <maximumf>, %986, %cst_420 [1] : vector<8x8xf32> to vector<8xf32>
    %988 = vector.shape_cast %987 : vector<8xf32> to vector<8x1xf32>
    %989 = vector.broadcast %988 : vector<8x1xf32> to vector<8x8xf32>
    %990 = arith.subf %986, %989 : vector<8x8xf32>
    %991 = math.exp %990 : vector<8x8xf32>
    %cst_421 = arith.constant dense<0.000000e+00> : vector<8xf32>
    %992 = vector.multi_reduction <add>, %991, %cst_421 [1] : vector<8x8xf32> to vector<8xf32>
    %993 = vector.shape_cast %992 : vector<8xf32> to vector<8x1xf32>
    %994 = tpu.reciprocal %993 {approx = true} : vector<8x1xf32> -> vector<8x1xf32>
    %995 = vector.broadcast %994 : vector<8x1xf32> to vector<8x8xf32>
    %996 = arith.mulf %991, %995 : vector<8x8xf32>
    %cst_422 = arith.constant dense<0.000000e+00> : vector<8x32xf32>
    %997 = tpu.matmul %996, %982, %cst_422 {dimension_numbers = #tpu.dot_dimension_numbers<[1], [0], [0], [1], [0, 0, 1, 1], [], []>} : vector<8x8xf32>, vector<8x32xf32>, vector<8x32xf32> -> vector<8x32xf32>
    %998 = tpu.concatenate %943, %961, %979, %997 in 0 : vector<8x32xf32>, vector<8x32xf32>, vector<8x32xf32>, vector<8x32xf32> -> vector<32x32xf32>
    %c4_423 = arith.constant 4 : index
    %c0_424 = arith.constant 0 : index
    %c0_425 = arith.constant 0 : index
    %999 = vector.load %arg11[%c4_423, %c0_424, %c0_425] : memref<6x32x32xf32, #tpu.memory_space<vmem>>, vector<1x32x32xf32>
    %1000 = vector.shape_cast %999 : vector<1x32x32xf32> to vector<32x32xf32>
    %cst_426 = arith.constant dense<0.000000e+00> : vector<32x32xf32>
    %1001 = tpu.matmul %998, %1000, %cst_426 {dimension_numbers = #tpu.dot_dimension_numbers<[1], [0], [0], [1], [0, 0, 1, 1], [], []>} : vector<32x32xf32>, vector<32x32xf32>, vector<32x32xf32> -> vector<32x32xf32>
    %1002 = arith.addf %891, %1001 : vector<32x32xf32>
    %c4_427 = arith.constant 4 : index
    %c0_428 = arith.constant 0 : index
    %c0_429 = arith.constant 0 : index
    %1003 = vector.load %arg12[%c4_427, %c0_428, %c0_429] : memref<6x1x32xf32, #tpu.memory_space<vmem>>, vector<1x1x32xf32>
    %1004 = vector.shape_cast %1003 : vector<1x1x32xf32> to vector<1x32xf32>
    %1005 = vector.broadcast %1004 : vector<1x32xf32> to vector<32x32xf32>
    %1006 = arith.addf %1002, %1005 : vector<32x32xf32>
    %c4_430 = arith.constant 4 : index
    %c0_431 = arith.constant 0 : index
    %c0_432 = arith.constant 0 : index
    %1007 = vector.load %arg13[%c4_430, %c0_431, %c0_432] : memref<6x1x32xf32, #tpu.memory_space<vmem>>, vector<1x1x32xf32>
    %1008 = vector.shape_cast %1007 : vector<1x1x32xf32> to vector<1x32xf32>
    %c4_433 = arith.constant 4 : index
    %c0_434 = arith.constant 0 : index
    %c0_435 = arith.constant 0 : index
    %1009 = vector.load %arg14[%c4_433, %c0_434, %c0_435] : memref<6x1x32xf32, #tpu.memory_space<vmem>>, vector<1x1x32xf32>
    %1010 = vector.shape_cast %1009 : vector<1x1x32xf32> to vector<1x32xf32>
    %cst_436 = arith.constant dense<0.000000e+00> : vector<32xf32>
    %1011 = vector.multi_reduction <add>, %1006, %cst_436 [1] : vector<32x32xf32> to vector<32xf32>
    %1012 = vector.shape_cast %1011 : vector<32xf32> to vector<32x1xf32>
    %cst_437 = arith.constant 3.200000e+01 : f32
    %1013 = vector.broadcast %cst_437 : f32 to vector<32x1xf32>
    %1014 = arith.divf %1012, %1013 : vector<32x1xf32>
    %1015 = vector.broadcast %1014 : vector<32x1xf32> to vector<32x32xf32>
    %1016 = arith.subf %1006, %1015 : vector<32x32xf32>
    %1017 = arith.mulf %1016, %1016 : vector<32x32xf32>
    %cst_438 = arith.constant dense<0.000000e+00> : vector<32xf32>
    %1018 = vector.multi_reduction <add>, %1017, %cst_438 [1] : vector<32x32xf32> to vector<32xf32>
    %1019 = vector.shape_cast %1018 : vector<32xf32> to vector<32x1xf32>
    %cst_439 = arith.constant 3.200000e+01 : f32
    %1020 = vector.broadcast %cst_439 : f32 to vector<32x1xf32>
    %1021 = arith.divf %1019, %1020 : vector<32x1xf32>
    %cst_440 = arith.constant 9.99999974E-6 : f32
    %1022 = vector.broadcast %cst_440 : f32 to vector<32x1xf32>
    %1023 = arith.addf %1021, %1022 : vector<32x1xf32>
    %1024 = math.rsqrt %1023 : vector<32x1xf32>
    %1025 = vector.broadcast %1024 : vector<32x1xf32> to vector<32x32xf32>
    %1026 = arith.mulf %1016, %1025 : vector<32x32xf32>
    %1027 = vector.broadcast %1008 : vector<1x32xf32> to vector<32x32xf32>
    %1028 = arith.mulf %1026, %1027 : vector<32x32xf32>
    %1029 = vector.broadcast %1010 : vector<1x32xf32> to vector<32x32xf32>
    %1030 = arith.addf %1028, %1029 : vector<32x32xf32>
    %c4_441 = arith.constant 4 : index
    %c0_442 = arith.constant 0 : index
    %c0_443 = arith.constant 0 : index
    %1031 = vector.load %arg15[%c4_441, %c0_442, %c0_443] : memref<6x32x64xf32, #tpu.memory_space<vmem>>, vector<1x32x64xf32>
    %1032 = vector.shape_cast %1031 : vector<1x32x64xf32> to vector<32x64xf32>
    %cst_444 = arith.constant dense<0.000000e+00> : vector<32x64xf32>
    %1033 = tpu.matmul %1030, %1032, %cst_444 {dimension_numbers = #tpu.dot_dimension_numbers<[1], [0], [0], [1], [0, 0, 1, 1], [], []>} : vector<32x32xf32>, vector<32x64xf32>, vector<32x64xf32> -> vector<32x64xf32>
    %c4_445 = arith.constant 4 : index
    %c0_446 = arith.constant 0 : index
    %c0_447 = arith.constant 0 : index
    %1034 = vector.load %arg16[%c4_445, %c0_446, %c0_447] : memref<6x1x64xf32, #tpu.memory_space<vmem>>, vector<1x1x64xf32>
    %1035 = vector.shape_cast %1034 : vector<1x1x64xf32> to vector<1x64xf32>
    %1036 = vector.broadcast %1035 : vector<1x64xf32> to vector<32x64xf32>
    %1037 = arith.addf %1033, %1036 : vector<32x64xf32>
    %cst_448 = arith.constant 5.000000e-01 : f32
    %1038 = vector.broadcast %cst_448 : f32 to vector<32x64xf32>
    %1039 = arith.mulf %1038, %1037 : vector<32x64xf32>
    %cst_449 = arith.constant 0.707106769 : f32
    %1040 = vector.broadcast %cst_449 : f32 to vector<32x64xf32>
    %1041 = arith.mulf %1037, %1040 : vector<32x64xf32>
    %cst_450 = arith.constant 0.000000e+00 : f32
    %1042 = vector.broadcast %cst_450 : f32 to vector<32x64xf32>
    %1043 = arith.cmpf oge, %1041, %1042 : vector<32x64xf32>
    %cst_451 = arith.constant 1.000000e+00 : f32
    %cst_452 = arith.constant -1.000000e+00 : f32
    %1044 = vector.broadcast %cst_451 : f32 to vector<32x64xf32>
    %1045 = vector.broadcast %cst_452 : f32 to vector<32x64xf32>
    %1046 = arith.select %1043, %1044, %1045 : vector<32x64xi1>, vector<32x64xf32>
    %1047 = math.absf %1041 : vector<32x64xf32>
    %cst_453 = arith.constant 0.327591091 : f32
    %1048 = vector.broadcast %cst_453 : f32 to vector<32x64xf32>
    %1049 = arith.mulf %1048, %1047 : vector<32x64xf32>
    %cst_454 = arith.constant 1.000000e+00 : f32
    %1050 = vector.broadcast %cst_454 : f32 to vector<32x64xf32>
    %1051 = arith.addf %1050, %1049 : vector<32x64xf32>
    %cst_455 = arith.constant 1.000000e+00 : f32
    %1052 = vector.broadcast %cst_455 : f32 to vector<32x64xf32>
    %1053 = arith.divf %1052, %1051 : vector<32x64xf32>
    %cst_456 = arith.constant 1.06140542 : f32
    %1054 = vector.broadcast %cst_456 : f32 to vector<32x64xf32>
    %1055 = arith.mulf %1054, %1053 : vector<32x64xf32>
    %cst_457 = arith.constant -1.45315206 : f32
    %1056 = vector.broadcast %cst_457 : f32 to vector<32x64xf32>
    %1057 = arith.addf %1055, %1056 : vector<32x64xf32>
    %1058 = arith.mulf %1057, %1053 : vector<32x64xf32>
    %cst_458 = arith.constant 1.42141378 : f32
    %1059 = vector.broadcast %cst_458 : f32 to vector<32x64xf32>
    %1060 = arith.addf %1058, %1059 : vector<32x64xf32>
    %1061 = arith.mulf %1060, %1053 : vector<32x64xf32>
    %cst_459 = arith.constant -0.284496725 : f32
    %1062 = vector.broadcast %cst_459 : f32 to vector<32x64xf32>
    %1063 = arith.addf %1061, %1062 : vector<32x64xf32>
    %1064 = arith.mulf %1063, %1053 : vector<32x64xf32>
    %cst_460 = arith.constant 0.254829586 : f32
    %1065 = vector.broadcast %cst_460 : f32 to vector<32x64xf32>
    %1066 = arith.addf %1064, %1065 : vector<32x64xf32>
    %1067 = arith.mulf %1066, %1053 : vector<32x64xf32>
    %cst_461 = arith.constant 0.000000e+00 : f32
    %1068 = vector.broadcast %cst_461 : f32 to vector<32x64xf32>
    %1069 = arith.subf %1068, %1047 : vector<32x64xf32>
    %1070 = arith.mulf %1069, %1047 : vector<32x64xf32>
    %1071 = math.exp %1070 : vector<32x64xf32>
    %1072 = arith.mulf %1067, %1071 : vector<32x64xf32>
    %cst_462 = arith.constant 1.000000e+00 : f32
    %1073 = vector.broadcast %cst_462 : f32 to vector<32x64xf32>
    %1074 = arith.subf %1073, %1072 : vector<32x64xf32>
    %1075 = arith.mulf %1046, %1074 : vector<32x64xf32>
    %cst_463 = arith.constant 1.000000e+00 : f32
    %1076 = vector.broadcast %cst_463 : f32 to vector<32x64xf32>
    %1077 = arith.addf %1076, %1075 : vector<32x64xf32>
    %1078 = arith.mulf %1039, %1077 : vector<32x64xf32>
    %c4_464 = arith.constant 4 : index
    %c0_465 = arith.constant 0 : index
    %c0_466 = arith.constant 0 : index
    %1079 = vector.load %arg17[%c4_464, %c0_465, %c0_466] : memref<6x64x32xf32, #tpu.memory_space<vmem>>, vector<1x64x32xf32>
    %1080 = vector.shape_cast %1079 : vector<1x64x32xf32> to vector<64x32xf32>
    %cst_467 = arith.constant dense<0.000000e+00> : vector<32x32xf32>
    %1081 = tpu.matmul %1078, %1080, %cst_467 {dimension_numbers = #tpu.dot_dimension_numbers<[1], [0], [0], [1], [0, 0, 1, 1], [], []>} : vector<32x64xf32>, vector<64x32xf32>, vector<32x32xf32> -> vector<32x32xf32>
    %1082 = arith.addf %1006, %1081 : vector<32x32xf32>
    %c4_468 = arith.constant 4 : index
    %c0_469 = arith.constant 0 : index
    %c0_470 = arith.constant 0 : index
    %1083 = vector.load %arg18[%c4_468, %c0_469, %c0_470] : memref<6x1x32xf32, #tpu.memory_space<vmem>>, vector<1x1x32xf32>
    %1084 = vector.shape_cast %1083 : vector<1x1x32xf32> to vector<1x32xf32>
    %1085 = vector.broadcast %1084 : vector<1x32xf32> to vector<32x32xf32>
    %1086 = arith.addf %1082, %1085 : vector<32x32xf32>
    %c5 = arith.constant 5 : index
    %c0_471 = arith.constant 0 : index
    %c0_472 = arith.constant 0 : index
    %1087 = vector.load %arg7[%c5, %c0_471, %c0_472] : memref<6x1x32xf32, #tpu.memory_space<vmem>>, vector<1x1x32xf32>
    %1088 = vector.shape_cast %1087 : vector<1x1x32xf32> to vector<1x32xf32>
    %c5_473 = arith.constant 5 : index
    %c0_474 = arith.constant 0 : index
    %c0_475 = arith.constant 0 : index
    %1089 = vector.load %arg8[%c5_473, %c0_474, %c0_475] : memref<6x1x32xf32, #tpu.memory_space<vmem>>, vector<1x1x32xf32>
    %1090 = vector.shape_cast %1089 : vector<1x1x32xf32> to vector<1x32xf32>
    %cst_476 = arith.constant dense<0.000000e+00> : vector<32xf32>
    %1091 = vector.multi_reduction <add>, %1086, %cst_476 [1] : vector<32x32xf32> to vector<32xf32>
    %1092 = vector.shape_cast %1091 : vector<32xf32> to vector<32x1xf32>
    %cst_477 = arith.constant 3.200000e+01 : f32
    %1093 = vector.broadcast %cst_477 : f32 to vector<32x1xf32>
    %1094 = arith.divf %1092, %1093 : vector<32x1xf32>
    %1095 = vector.broadcast %1094 : vector<32x1xf32> to vector<32x32xf32>
    %1096 = arith.subf %1086, %1095 : vector<32x32xf32>
    %1097 = arith.mulf %1096, %1096 : vector<32x32xf32>
    %cst_478 = arith.constant dense<0.000000e+00> : vector<32xf32>
    %1098 = vector.multi_reduction <add>, %1097, %cst_478 [1] : vector<32x32xf32> to vector<32xf32>
    %1099 = vector.shape_cast %1098 : vector<32xf32> to vector<32x1xf32>
    %cst_479 = arith.constant 3.200000e+01 : f32
    %1100 = vector.broadcast %cst_479 : f32 to vector<32x1xf32>
    %1101 = arith.divf %1099, %1100 : vector<32x1xf32>
    %cst_480 = arith.constant 9.99999974E-6 : f32
    %1102 = vector.broadcast %cst_480 : f32 to vector<32x1xf32>
    %1103 = arith.addf %1101, %1102 : vector<32x1xf32>
    %1104 = math.rsqrt %1103 : vector<32x1xf32>
    %1105 = vector.broadcast %1104 : vector<32x1xf32> to vector<32x32xf32>
    %1106 = arith.mulf %1096, %1105 : vector<32x32xf32>
    %1107 = vector.broadcast %1088 : vector<1x32xf32> to vector<32x32xf32>
    %1108 = arith.mulf %1106, %1107 : vector<32x32xf32>
    %1109 = vector.broadcast %1090 : vector<1x32xf32> to vector<32x32xf32>
    %1110 = arith.addf %1108, %1109 : vector<32x32xf32>
    %c5_481 = arith.constant 5 : index
    %c0_482 = arith.constant 0 : index
    %c0_483 = arith.constant 0 : index
    %1111 = vector.load %arg9[%c5_481, %c0_482, %c0_483] : memref<6x32x96xf32, #tpu.memory_space<vmem>>, vector<1x32x96xf32>
    %1112 = vector.shape_cast %1111 : vector<1x32x96xf32> to vector<32x96xf32>
    %cst_484 = arith.constant dense<0.000000e+00> : vector<32x96xf32>
    %1113 = tpu.matmul %1110, %1112, %cst_484 {dimension_numbers = #tpu.dot_dimension_numbers<[1], [0], [0], [1], [0, 0, 1, 1], [], []>} : vector<32x32xf32>, vector<32x96xf32>, vector<32x96xf32> -> vector<32x96xf32>
    %c5_485 = arith.constant 5 : index
    %c0_486 = arith.constant 0 : index
    %c0_487 = arith.constant 0 : index
    %1114 = vector.load %arg10[%c5_485, %c0_486, %c0_487] : memref<6x1x96xf32, #tpu.memory_space<vmem>>, vector<1x1x96xf32>
    %1115 = vector.shape_cast %1114 : vector<1x1x96xf32> to vector<1x96xf32>
    %1116 = vector.broadcast %1115 : vector<1x96xf32> to vector<32x96xf32>
    %1117 = arith.addf %1113, %1116 : vector<32x96xf32>
    %1118 = vector.extract_strided_slice %1117 {offsets = [0, 0], sizes = [32, 32], strides = [1, 1]} : vector<32x96xf32> to vector<32x32xf32>
    %1119 = vector.extract_strided_slice %1117 {offsets = [0, 32], sizes = [32, 32], strides = [1, 1]} : vector<32x96xf32> to vector<32x32xf32>
    %1120 = vector.extract_strided_slice %1117 {offsets = [0, 64], sizes = [32, 32], strides = [1, 1]} : vector<32x96xf32> to vector<32x32xf32>
    %1121 = vector.extract_strided_slice %1118 {offsets = [0, 0], sizes = [8, 32], strides = [1, 1]} : vector<32x32xf32> to vector<8x32xf32>
    %1122 = vector.extract_strided_slice %1119 {offsets = [0, 0], sizes = [8, 32], strides = [1, 1]} : vector<32x32xf32> to vector<8x32xf32>
    %1123 = vector.extract_strided_slice %1120 {offsets = [0, 0], sizes = [8, 32], strides = [1, 1]} : vector<32x32xf32> to vector<8x32xf32>
    %1124 = tpu.transpose %1122, [1, 0] : vector<8x32xf32> -> vector<32x8xf32>
    %cst_488 = arith.constant dense<0.000000e+00> : vector<8x8xf32>
    %1125 = tpu.matmul %1121, %1124, %cst_488 {dimension_numbers = #tpu.dot_dimension_numbers<[1], [0], [0], [1], [0, 0, 1, 1], [], []>} : vector<8x32xf32>, vector<32x8xf32>, vector<8x8xf32> -> vector<8x8xf32>
    %cst_489 = arith.constant 0.176776692 : f32
    %1126 = vector.broadcast %cst_489 : f32 to vector<8x8xf32>
    %1127 = arith.mulf %1125, %1126 : vector<8x8xf32>
    %cst_490 = arith.constant dense<0xFF800000> : vector<8xf32>
    %1128 = vector.multi_reduction <maximumf>, %1127, %cst_490 [1] : vector<8x8xf32> to vector<8xf32>
    %1129 = vector.shape_cast %1128 : vector<8xf32> to vector<8x1xf32>
    %1130 = vector.broadcast %1129 : vector<8x1xf32> to vector<8x8xf32>
    %1131 = arith.subf %1127, %1130 : vector<8x8xf32>
    %1132 = math.exp %1131 : vector<8x8xf32>
    %cst_491 = arith.constant dense<0.000000e+00> : vector<8xf32>
    %1133 = vector.multi_reduction <add>, %1132, %cst_491 [1] : vector<8x8xf32> to vector<8xf32>
    %1134 = vector.shape_cast %1133 : vector<8xf32> to vector<8x1xf32>
    %1135 = tpu.reciprocal %1134 {approx = true} : vector<8x1xf32> -> vector<8x1xf32>
    %1136 = vector.broadcast %1135 : vector<8x1xf32> to vector<8x8xf32>
    %1137 = arith.mulf %1132, %1136 : vector<8x8xf32>
    %cst_492 = arith.constant dense<0.000000e+00> : vector<8x32xf32>
    %1138 = tpu.matmul %1137, %1123, %cst_492 {dimension_numbers = #tpu.dot_dimension_numbers<[1], [0], [0], [1], [0, 0, 1, 1], [], []>} : vector<8x8xf32>, vector<8x32xf32>, vector<8x32xf32> -> vector<8x32xf32>
    %1139 = vector.extract_strided_slice %1118 {offsets = [8, 0], sizes = [8, 32], strides = [1, 1]} : vector<32x32xf32> to vector<8x32xf32>
    %1140 = vector.extract_strided_slice %1119 {offsets = [8, 0], sizes = [8, 32], strides = [1, 1]} : vector<32x32xf32> to vector<8x32xf32>
    %1141 = vector.extract_strided_slice %1120 {offsets = [8, 0], sizes = [8, 32], strides = [1, 1]} : vector<32x32xf32> to vector<8x32xf32>
    %1142 = tpu.transpose %1140, [1, 0] : vector<8x32xf32> -> vector<32x8xf32>
    %cst_493 = arith.constant dense<0.000000e+00> : vector<8x8xf32>
    %1143 = tpu.matmul %1139, %1142, %cst_493 {dimension_numbers = #tpu.dot_dimension_numbers<[1], [0], [0], [1], [0, 0, 1, 1], [], []>} : vector<8x32xf32>, vector<32x8xf32>, vector<8x8xf32> -> vector<8x8xf32>
    %cst_494 = arith.constant 0.176776692 : f32
    %1144 = vector.broadcast %cst_494 : f32 to vector<8x8xf32>
    %1145 = arith.mulf %1143, %1144 : vector<8x8xf32>
    %cst_495 = arith.constant dense<0xFF800000> : vector<8xf32>
    %1146 = vector.multi_reduction <maximumf>, %1145, %cst_495 [1] : vector<8x8xf32> to vector<8xf32>
    %1147 = vector.shape_cast %1146 : vector<8xf32> to vector<8x1xf32>
    %1148 = vector.broadcast %1147 : vector<8x1xf32> to vector<8x8xf32>
    %1149 = arith.subf %1145, %1148 : vector<8x8xf32>
    %1150 = math.exp %1149 : vector<8x8xf32>
    %cst_496 = arith.constant dense<0.000000e+00> : vector<8xf32>
    %1151 = vector.multi_reduction <add>, %1150, %cst_496 [1] : vector<8x8xf32> to vector<8xf32>
    %1152 = vector.shape_cast %1151 : vector<8xf32> to vector<8x1xf32>
    %1153 = tpu.reciprocal %1152 {approx = true} : vector<8x1xf32> -> vector<8x1xf32>
    %1154 = vector.broadcast %1153 : vector<8x1xf32> to vector<8x8xf32>
    %1155 = arith.mulf %1150, %1154 : vector<8x8xf32>
    %cst_497 = arith.constant dense<0.000000e+00> : vector<8x32xf32>
    %1156 = tpu.matmul %1155, %1141, %cst_497 {dimension_numbers = #tpu.dot_dimension_numbers<[1], [0], [0], [1], [0, 0, 1, 1], [], []>} : vector<8x8xf32>, vector<8x32xf32>, vector<8x32xf32> -> vector<8x32xf32>
    %1157 = vector.extract_strided_slice %1118 {offsets = [16, 0], sizes = [8, 32], strides = [1, 1]} : vector<32x32xf32> to vector<8x32xf32>
    %1158 = vector.extract_strided_slice %1119 {offsets = [16, 0], sizes = [8, 32], strides = [1, 1]} : vector<32x32xf32> to vector<8x32xf32>
    %1159 = vector.extract_strided_slice %1120 {offsets = [16, 0], sizes = [8, 32], strides = [1, 1]} : vector<32x32xf32> to vector<8x32xf32>
    %1160 = tpu.transpose %1158, [1, 0] : vector<8x32xf32> -> vector<32x8xf32>
    %cst_498 = arith.constant dense<0.000000e+00> : vector<8x8xf32>
    %1161 = tpu.matmul %1157, %1160, %cst_498 {dimension_numbers = #tpu.dot_dimension_numbers<[1], [0], [0], [1], [0, 0, 1, 1], [], []>} : vector<8x32xf32>, vector<32x8xf32>, vector<8x8xf32> -> vector<8x8xf32>
    %cst_499 = arith.constant 0.176776692 : f32
    %1162 = vector.broadcast %cst_499 : f32 to vector<8x8xf32>
    %1163 = arith.mulf %1161, %1162 : vector<8x8xf32>
    %cst_500 = arith.constant dense<0xFF800000> : vector<8xf32>
    %1164 = vector.multi_reduction <maximumf>, %1163, %cst_500 [1] : vector<8x8xf32> to vector<8xf32>
    %1165 = vector.shape_cast %1164 : vector<8xf32> to vector<8x1xf32>
    %1166 = vector.broadcast %1165 : vector<8x1xf32> to vector<8x8xf32>
    %1167 = arith.subf %1163, %1166 : vector<8x8xf32>
    %1168 = math.exp %1167 : vector<8x8xf32>
    %cst_501 = arith.constant dense<0.000000e+00> : vector<8xf32>
    %1169 = vector.multi_reduction <add>, %1168, %cst_501 [1] : vector<8x8xf32> to vector<8xf32>
    %1170 = vector.shape_cast %1169 : vector<8xf32> to vector<8x1xf32>
    %1171 = tpu.reciprocal %1170 {approx = true} : vector<8x1xf32> -> vector<8x1xf32>
    %1172 = vector.broadcast %1171 : vector<8x1xf32> to vector<8x8xf32>
    %1173 = arith.mulf %1168, %1172 : vector<8x8xf32>
    %cst_502 = arith.constant dense<0.000000e+00> : vector<8x32xf32>
    %1174 = tpu.matmul %1173, %1159, %cst_502 {dimension_numbers = #tpu.dot_dimension_numbers<[1], [0], [0], [1], [0, 0, 1, 1], [], []>} : vector<8x8xf32>, vector<8x32xf32>, vector<8x32xf32> -> vector<8x32xf32>
    %1175 = vector.extract_strided_slice %1118 {offsets = [24, 0], sizes = [8, 32], strides = [1, 1]} : vector<32x32xf32> to vector<8x32xf32>
    %1176 = vector.extract_strided_slice %1119 {offsets = [24, 0], sizes = [8, 32], strides = [1, 1]} : vector<32x32xf32> to vector<8x32xf32>
    %1177 = vector.extract_strided_slice %1120 {offsets = [24, 0], sizes = [8, 32], strides = [1, 1]} : vector<32x32xf32> to vector<8x32xf32>
    %1178 = tpu.transpose %1176, [1, 0] : vector<8x32xf32> -> vector<32x8xf32>
    %cst_503 = arith.constant dense<0.000000e+00> : vector<8x8xf32>
    %1179 = tpu.matmul %1175, %1178, %cst_503 {dimension_numbers = #tpu.dot_dimension_numbers<[1], [0], [0], [1], [0, 0, 1, 1], [], []>} : vector<8x32xf32>, vector<32x8xf32>, vector<8x8xf32> -> vector<8x8xf32>
    %cst_504 = arith.constant 0.176776692 : f32
    %1180 = vector.broadcast %cst_504 : f32 to vector<8x8xf32>
    %1181 = arith.mulf %1179, %1180 : vector<8x8xf32>
    %cst_505 = arith.constant dense<0xFF800000> : vector<8xf32>
    %1182 = vector.multi_reduction <maximumf>, %1181, %cst_505 [1] : vector<8x8xf32> to vector<8xf32>
    %1183 = vector.shape_cast %1182 : vector<8xf32> to vector<8x1xf32>
    %1184 = vector.broadcast %1183 : vector<8x1xf32> to vector<8x8xf32>
    %1185 = arith.subf %1181, %1184 : vector<8x8xf32>
    %1186 = math.exp %1185 : vector<8x8xf32>
    %cst_506 = arith.constant dense<0.000000e+00> : vector<8xf32>
    %1187 = vector.multi_reduction <add>, %1186, %cst_506 [1] : vector<8x8xf32> to vector<8xf32>
    %1188 = vector.shape_cast %1187 : vector<8xf32> to vector<8x1xf32>
    %1189 = tpu.reciprocal %1188 {approx = true} : vector<8x1xf32> -> vector<8x1xf32>
    %1190 = vector.broadcast %1189 : vector<8x1xf32> to vector<8x8xf32>
    %1191 = arith.mulf %1186, %1190 : vector<8x8xf32>
    %cst_507 = arith.constant dense<0.000000e+00> : vector<8x32xf32>
    %1192 = tpu.matmul %1191, %1177, %cst_507 {dimension_numbers = #tpu.dot_dimension_numbers<[1], [0], [0], [1], [0, 0, 1, 1], [], []>} : vector<8x8xf32>, vector<8x32xf32>, vector<8x32xf32> -> vector<8x32xf32>
    %1193 = tpu.concatenate %1138, %1156, %1174, %1192 in 0 : vector<8x32xf32>, vector<8x32xf32>, vector<8x32xf32>, vector<8x32xf32> -> vector<32x32xf32>
    %c5_508 = arith.constant 5 : index
    %c0_509 = arith.constant 0 : index
    %c0_510 = arith.constant 0 : index
    %1194 = vector.load %arg11[%c5_508, %c0_509, %c0_510] : memref<6x32x32xf32, #tpu.memory_space<vmem>>, vector<1x32x32xf32>
    %1195 = vector.shape_cast %1194 : vector<1x32x32xf32> to vector<32x32xf32>
    %cst_511 = arith.constant dense<0.000000e+00> : vector<32x32xf32>
    %1196 = tpu.matmul %1193, %1195, %cst_511 {dimension_numbers = #tpu.dot_dimension_numbers<[1], [0], [0], [1], [0, 0, 1, 1], [], []>} : vector<32x32xf32>, vector<32x32xf32>, vector<32x32xf32> -> vector<32x32xf32>
    %1197 = arith.addf %1086, %1196 : vector<32x32xf32>
    %c5_512 = arith.constant 5 : index
    %c0_513 = arith.constant 0 : index
    %c0_514 = arith.constant 0 : index
    %1198 = vector.load %arg12[%c5_512, %c0_513, %c0_514] : memref<6x1x32xf32, #tpu.memory_space<vmem>>, vector<1x1x32xf32>
    %1199 = vector.shape_cast %1198 : vector<1x1x32xf32> to vector<1x32xf32>
    %1200 = vector.broadcast %1199 : vector<1x32xf32> to vector<32x32xf32>
    %1201 = arith.addf %1197, %1200 : vector<32x32xf32>
    %c5_515 = arith.constant 5 : index
    %c0_516 = arith.constant 0 : index
    %c0_517 = arith.constant 0 : index
    %1202 = vector.load %arg13[%c5_515, %c0_516, %c0_517] : memref<6x1x32xf32, #tpu.memory_space<vmem>>, vector<1x1x32xf32>
    %1203 = vector.shape_cast %1202 : vector<1x1x32xf32> to vector<1x32xf32>
    %c5_518 = arith.constant 5 : index
    %c0_519 = arith.constant 0 : index
    %c0_520 = arith.constant 0 : index
    %1204 = vector.load %arg14[%c5_518, %c0_519, %c0_520] : memref<6x1x32xf32, #tpu.memory_space<vmem>>, vector<1x1x32xf32>
    %1205 = vector.shape_cast %1204 : vector<1x1x32xf32> to vector<1x32xf32>
    %cst_521 = arith.constant dense<0.000000e+00> : vector<32xf32>
    %1206 = vector.multi_reduction <add>, %1201, %cst_521 [1] : vector<32x32xf32> to vector<32xf32>
    %1207 = vector.shape_cast %1206 : vector<32xf32> to vector<32x1xf32>
    %cst_522 = arith.constant 3.200000e+01 : f32
    %1208 = vector.broadcast %cst_522 : f32 to vector<32x1xf32>
    %1209 = arith.divf %1207, %1208 : vector<32x1xf32>
    %1210 = vector.broadcast %1209 : vector<32x1xf32> to vector<32x32xf32>
    %1211 = arith.subf %1201, %1210 : vector<32x32xf32>
    %1212 = arith.mulf %1211, %1211 : vector<32x32xf32>
    %cst_523 = arith.constant dense<0.000000e+00> : vector<32xf32>
    %1213 = vector.multi_reduction <add>, %1212, %cst_523 [1] : vector<32x32xf32> to vector<32xf32>
    %1214 = vector.shape_cast %1213 : vector<32xf32> to vector<32x1xf32>
    %cst_524 = arith.constant 3.200000e+01 : f32
    %1215 = vector.broadcast %cst_524 : f32 to vector<32x1xf32>
    %1216 = arith.divf %1214, %1215 : vector<32x1xf32>
    %cst_525 = arith.constant 9.99999974E-6 : f32
    %1217 = vector.broadcast %cst_525 : f32 to vector<32x1xf32>
    %1218 = arith.addf %1216, %1217 : vector<32x1xf32>
    %1219 = math.rsqrt %1218 : vector<32x1xf32>
    %1220 = vector.broadcast %1219 : vector<32x1xf32> to vector<32x32xf32>
    %1221 = arith.mulf %1211, %1220 : vector<32x32xf32>
    %1222 = vector.broadcast %1203 : vector<1x32xf32> to vector<32x32xf32>
    %1223 = arith.mulf %1221, %1222 : vector<32x32xf32>
    %1224 = vector.broadcast %1205 : vector<1x32xf32> to vector<32x32xf32>
    %1225 = arith.addf %1223, %1224 : vector<32x32xf32>
    %c5_526 = arith.constant 5 : index
    %c0_527 = arith.constant 0 : index
    %c0_528 = arith.constant 0 : index
    %1226 = vector.load %arg15[%c5_526, %c0_527, %c0_528] : memref<6x32x64xf32, #tpu.memory_space<vmem>>, vector<1x32x64xf32>
    %1227 = vector.shape_cast %1226 : vector<1x32x64xf32> to vector<32x64xf32>
    %cst_529 = arith.constant dense<0.000000e+00> : vector<32x64xf32>
    %1228 = tpu.matmul %1225, %1227, %cst_529 {dimension_numbers = #tpu.dot_dimension_numbers<[1], [0], [0], [1], [0, 0, 1, 1], [], []>} : vector<32x32xf32>, vector<32x64xf32>, vector<32x64xf32> -> vector<32x64xf32>
    %c5_530 = arith.constant 5 : index
    %c0_531 = arith.constant 0 : index
    %c0_532 = arith.constant 0 : index
    %1229 = vector.load %arg16[%c5_530, %c0_531, %c0_532] : memref<6x1x64xf32, #tpu.memory_space<vmem>>, vector<1x1x64xf32>
    %1230 = vector.shape_cast %1229 : vector<1x1x64xf32> to vector<1x64xf32>
    %1231 = vector.broadcast %1230 : vector<1x64xf32> to vector<32x64xf32>
    %1232 = arith.addf %1228, %1231 : vector<32x64xf32>
    %cst_533 = arith.constant 5.000000e-01 : f32
    %1233 = vector.broadcast %cst_533 : f32 to vector<32x64xf32>
    %1234 = arith.mulf %1233, %1232 : vector<32x64xf32>
    %cst_534 = arith.constant 0.707106769 : f32
    %1235 = vector.broadcast %cst_534 : f32 to vector<32x64xf32>
    %1236 = arith.mulf %1232, %1235 : vector<32x64xf32>
    %cst_535 = arith.constant 0.000000e+00 : f32
    %1237 = vector.broadcast %cst_535 : f32 to vector<32x64xf32>
    %1238 = arith.cmpf oge, %1236, %1237 : vector<32x64xf32>
    %cst_536 = arith.constant 1.000000e+00 : f32
    %cst_537 = arith.constant -1.000000e+00 : f32
    %1239 = vector.broadcast %cst_536 : f32 to vector<32x64xf32>
    %1240 = vector.broadcast %cst_537 : f32 to vector<32x64xf32>
    %1241 = arith.select %1238, %1239, %1240 : vector<32x64xi1>, vector<32x64xf32>
    %1242 = math.absf %1236 : vector<32x64xf32>
    %cst_538 = arith.constant 0.327591091 : f32
    %1243 = vector.broadcast %cst_538 : f32 to vector<32x64xf32>
    %1244 = arith.mulf %1243, %1242 : vector<32x64xf32>
    %cst_539 = arith.constant 1.000000e+00 : f32
    %1245 = vector.broadcast %cst_539 : f32 to vector<32x64xf32>
    %1246 = arith.addf %1245, %1244 : vector<32x64xf32>
    %cst_540 = arith.constant 1.000000e+00 : f32
    %1247 = vector.broadcast %cst_540 : f32 to vector<32x64xf32>
    %1248 = arith.divf %1247, %1246 : vector<32x64xf32>
    %cst_541 = arith.constant 1.06140542 : f32
    %1249 = vector.broadcast %cst_541 : f32 to vector<32x64xf32>
    %1250 = arith.mulf %1249, %1248 : vector<32x64xf32>
    %cst_542 = arith.constant -1.45315206 : f32
    %1251 = vector.broadcast %cst_542 : f32 to vector<32x64xf32>
    %1252 = arith.addf %1250, %1251 : vector<32x64xf32>
    %1253 = arith.mulf %1252, %1248 : vector<32x64xf32>
    %cst_543 = arith.constant 1.42141378 : f32
    %1254 = vector.broadcast %cst_543 : f32 to vector<32x64xf32>
    %1255 = arith.addf %1253, %1254 : vector<32x64xf32>
    %1256 = arith.mulf %1255, %1248 : vector<32x64xf32>
    %cst_544 = arith.constant -0.284496725 : f32
    %1257 = vector.broadcast %cst_544 : f32 to vector<32x64xf32>
    %1258 = arith.addf %1256, %1257 : vector<32x64xf32>
    %1259 = arith.mulf %1258, %1248 : vector<32x64xf32>
    %cst_545 = arith.constant 0.254829586 : f32
    %1260 = vector.broadcast %cst_545 : f32 to vector<32x64xf32>
    %1261 = arith.addf %1259, %1260 : vector<32x64xf32>
    %1262 = arith.mulf %1261, %1248 : vector<32x64xf32>
    %cst_546 = arith.constant 0.000000e+00 : f32
    %1263 = vector.broadcast %cst_546 : f32 to vector<32x64xf32>
    %1264 = arith.subf %1263, %1242 : vector<32x64xf32>
    %1265 = arith.mulf %1264, %1242 : vector<32x64xf32>
    %1266 = math.exp %1265 : vector<32x64xf32>
    %1267 = arith.mulf %1262, %1266 : vector<32x64xf32>
    %cst_547 = arith.constant 1.000000e+00 : f32
    %1268 = vector.broadcast %cst_547 : f32 to vector<32x64xf32>
    %1269 = arith.subf %1268, %1267 : vector<32x64xf32>
    %1270 = arith.mulf %1241, %1269 : vector<32x64xf32>
    %cst_548 = arith.constant 1.000000e+00 : f32
    %1271 = vector.broadcast %cst_548 : f32 to vector<32x64xf32>
    %1272 = arith.addf %1271, %1270 : vector<32x64xf32>
    %1273 = arith.mulf %1234, %1272 : vector<32x64xf32>
    %c5_549 = arith.constant 5 : index
    %c0_550 = arith.constant 0 : index
    %c0_551 = arith.constant 0 : index
    %1274 = vector.load %arg17[%c5_549, %c0_550, %c0_551] : memref<6x64x32xf32, #tpu.memory_space<vmem>>, vector<1x64x32xf32>
    %1275 = vector.shape_cast %1274 : vector<1x64x32xf32> to vector<64x32xf32>
    %cst_552 = arith.constant dense<0.000000e+00> : vector<32x32xf32>
    %1276 = tpu.matmul %1273, %1275, %cst_552 {dimension_numbers = #tpu.dot_dimension_numbers<[1], [0], [0], [1], [0, 0, 1, 1], [], []>} : vector<32x64xf32>, vector<64x32xf32>, vector<32x32xf32> -> vector<32x32xf32>
    %1277 = arith.addf %1201, %1276 : vector<32x32xf32>
    %c5_553 = arith.constant 5 : index
    %c0_554 = arith.constant 0 : index
    %c0_555 = arith.constant 0 : index
    %1278 = vector.load %arg18[%c5_553, %c0_554, %c0_555] : memref<6x1x32xf32, #tpu.memory_space<vmem>>, vector<1x1x32xf32>
    %1279 = vector.shape_cast %1278 : vector<1x1x32xf32> to vector<1x32xf32>
    %1280 = vector.broadcast %1279 : vector<1x32xf32> to vector<32x32xf32>
    %1281 = arith.addf %1277, %1280 : vector<32x32xf32>
    %1282 = vector.extract_strided_slice %1281 {offsets = [0, 0], sizes = [16, 32], strides = [1, 1]} : vector<32x32xf32> to vector<16x32xf32>
    %1283 = vector.extract_strided_slice %1281 {offsets = [16, 0], sizes = [16, 32], strides = [1, 1]} : vector<32x32xf32> to vector<16x32xf32>
    %1284 = arith.subf %1282, %1283 : vector<16x32xf32>
    %1285 = arith.mulf %1284, %1284 : vector<16x32xf32>
    %1286 = vector.shape_cast %1285 : vector<16x32xf32> to vector<1x16x32xf32>
    %cst_556 = arith.constant dense<0.000000e+00> : vector<1xf32>
    %1287 = vector.multi_reduction <add>, %1286, %cst_556 [1, 2] : vector<1x16x32xf32> to vector<1xf32>
    %1288 = vector.shape_cast %1287 : vector<1xf32> to vector<1x1x1xf32>
    %1289 = vector.extract %1288[0, 0, 0] : f32 from vector<1x1x1xf32>
    %cst_557 = arith.constant 5.120000e+02 : f32
    %1290 = arith.divf %1289, %cst_557 : f32
    %1291 = vector.broadcast %1290 : f32 to vector<1x1xf32>
    %c0_558 = arith.constant 0 : index
    %c0_559 = arith.constant 0 : index
    %1292 = vector.load %arg19[%c0_558, %c0_559] : memref<1x1xf32, #tpu.memory_space<vmem>>, vector<1x1xf32>
    tpu.vector_store %arg19[%c0_558, %c0_559], %1291 {strides = array<i32>} : memref<1x1xf32, #tpu.memory_space<vmem>>, vector<1x1xf32>,
    return
  }
}

</mosaic_0001>

<bundles_post_ra>
// kernel: wavlm_loss.1
= control target key start
LH: loop header
LB: loop body
LE: loop exit
PB: predicated region body
PF: predicated region fallthrough
CT: control target
= control target key end

     0   :  { %s8626_s0 = inlined_call_operand.vmem [shape: f32[32,16], index: 0, kind: input, shape index: {}]   ;;  %s8627_s1 = inlined_call_operand.vmem [shape: f32[16,16], index: 1, kind: input, shape index: {}]   ;;  %s8628_s2 = inlined_call_operand.vmem [shape: f32[1,16], index: 2, kind: input, shape index: {}]   ;;  %s8629_s3 = inlined_call_operand.vmem [shape: f32[16,32], index: 3, kind: input, shape index: {}]   ;;  %s8630_s4 = inlined_call_operand.vmem [shape: f32[1,32], index: 4, kind: input, shape index: {}]   ;;  %s8631_s5 = inlined_call_operand.hbm [shape: f32[1,32], index: 5, kind: input, shape index: {}]   ;;  %s8632_s6 = inlined_call_operand.hbm [shape: f32[1,32], index: 6, kind: input, shape index: {}]   ;;  %s8633_s7 = inlined_call_operand.vmem [shape: f32[6,1,32], index: 7, kind: input, shape index: {}]   ;;  %s8634_s8 = inlined_call_operand.vmem [shape: f32[6,1,32], index: 8, kind: input, shape index: {}]   ;;  %s8635_s9 = inlined_call_operand.vmem [shape: f32[6,32,96], index: 9, kind: input, shape index: {}]   ;;  %s8636_s10 = inlined_call_operand.vmem [shape: f32[6,1,96], index: 10, kind: input, shape index: {}]   ;;  %s8637_s11 = inlined_call_operand.vmem [shape: f32[6,32,32], index: 11, kind: input, shape index: {}]   ;;  %s8638_s12 = inlined_call_operand.vmem [shape: f32[6,1,32], index: 12, kind: input, shape index: {}]   ;;  %s8639_s13 = inlined_call_operand.vmem [shape: f32[6,1,32], index: 13, kind: input, shape index: {}]   ;;  %s8640_s14 = inlined_call_operand.vmem [shape: f32[6,1,32], index: 14, kind: input, shape index: {}]   ;;  %s8641_s15 = inlined_call_operand.vmem [shape: f32[6,32,64], index: 15, kind: input, shape index: {}]   ;;  %s8642_s16 = inlined_call_operand.hbm [shape: f32[6,1,64], index: 16, kind: input, shape index: {}]   ;;  %s8643_s17 = inlined_call_operand.vmem [shape: f32[6,64,32], index: 17, kind: input, shape index: {}]   ;;  %s8644_s18 = inlined_call_operand.hbm [shape: f32[6,1,32], index: 18, kind: input, shape index: {}]   ;;  %s8645_s19 = inlined_call_operand.hbm [shape: f32[1,1], index: 19, kind: output, shape index: {}]  }
   0x1   :  { %8649 = sst [smem:[#allocation15_spill]] %s8626_s0 }
   0x2   :  { %8650 = sst [smem:[#allocation16_spill]] %s8627_s1 }
   0x3   :  { %8651 = sst [smem:[#allocation17_spill]] %s8628_s2 }
   0x4   :  { %8652 = sst [smem:[#allocation18_spill]] %s8629_s3 }
   0x5   :  { %24 = vsyncpa [#allocation3], 0 }
   0x6   :  { %25 = vsyncpa [#allocation6], 0 }
   0x7   :  { %26 = vsyncpa [#allocation9], 0  ;;  %s54_s20 = sshll.u32 %s8632_s6, 4  ;;  %s55_s20 = int_to_ptr.hbm [resolvable:$true] %s54_s20 }
   0x8   :  { %27 = vsyncpa [#allocation4], 0  ;;  %s6672_s21 = smov [#allocation5]   ;;  %s43_s23 = sshll.u32 %s8631_s5, 4  ;;  %s44_s23 = int_to_ptr.hbm [resolvable:$true] %s43_s23 }
   0x9   :  { %s56_s1 = sshll.u32 %s6672_s21, 4  ;;  %s6673_s24 = smov [#allocation2]   ;;  %s57_s1 = int_to_ptr.vmem [resolvable:$true] %s56_s1 }
   0xa   :  { %59 = dma.hbm_to_vmem [thread:$0]  %s55_s20, 16, %s57_s1, [#allocation6]  }
   0xb   :  { %s45_s25 = sshll.u32 %s6673_s24, 4  ;;  %s82_s27 = sshll.u32 %s8642_s16, 4  ;;  %s46_s25 = int_to_ptr.vmem [resolvable:$true] %s45_s25  ;;  %s83_s27 = int_to_ptr.hbm [resolvable:$true] %s82_s27 }
   0xc   :  { %48 = dma.hbm_to_vmem [thread:$0]  %s44_s23, 16, %s46_s25, [#allocation3]  }
   0xd   :  { %s6674_s6 = smov [#allocation7]   ;;  %s97_s30 = sshll.u32 %s8644_s18, 4  ;;  %s98_s30 = int_to_ptr.hbm [resolvable:$true] %s97_s30 }
   0xe   :  { %s84_s28 = sshll.u32 %s6674_s6, 4  ;;  %s6675_s21 = smov 16   ;;  %s85_s28 = int_to_ptr.vmem [resolvable:$true] %s84_s28 }
   0xf   :  { %s6676_s5 = smov 1   ;;  %s6677_s20 = smov [#allocation8]  }
  0x10   :  { %90 = dma.hbm_to_vmem [thread:$0]  %s83_s27, 96, %s85_s28, [#allocation6], %s6675_s21, %s6675_s21, %s6676_s5  }
  0x11   :  { %s99_s1 = sshll.u32 %s6677_s20, 4  ;;  %s100_s1 = int_to_ptr.vmem [resolvable:$true] %s99_s1 }
  0x12   :  { %105 = dma.hbm_to_vmem [thread:$0]  %s98_s30, 96, %s100_s1, [#allocation9], %s6675_s21, %s6675_s21, %s6676_s5  }
  0x13   :  { %6664 = dma.done.wait [#allocation3], 16  }
  0x14   :  { %6665 = vsyncadd [#allocation3], 4294967280 }
  0x15   :  { %6666 = dma.done.wait [#allocation6], 112  }
  0x16   :  { %6667 = vsyncadd [#allocation6], 4294967184 }
  0x17   :  { %6668 = dma.done.wait [#allocation9], 96  }
  0x18   :  { %6669 = vsyncadd [#allocation9], 4294967200  ;;  %s8653_s2 = sld [smem:[#allocation16_spill]]  ;;  %vm132_vm0 = vcmask 130048   ;;  %v6678_v16 = vmov 256.0   ;;  %vm513_vm10 = vcmask 261120  }
  0x19   :  { %s8654_s3 = sld [smem:[#allocation15_spill]] }
  0x1a   :  { %s8655_s30 = sld [smem:[#allocation17_spill]] }
  0x1b   :  { %s8656_s25 = sld [smem:[#allocation18_spill]] }
  0x1e   :  { %v127_v0 = vld [vmem:[%s8653_s2 + $0x8] sm:$0xff]  ;;  %v126_v1 = vld [vmem:[%s8653_s2] sm:$0xff] }
  0x1f   :  { %159 = vmatpush.msra.mxu0 %v127_v0  ;;  %v122_v2 = vld [vmem:[%s8654_s3] sm:$0xff]  ;;  %v123_v3 = vld [vmem:[%s8654_s3 + $0x8] sm:$0xff]  ;;  %v124_v4 = vld [vmem:[%s8654_s3 + $0x10] sm:$0xff] }
  0x20   :  { %v6162_v6 = vld [vmem:[%s8655_s30] ss:$0 sm:$0xff]  ;;  %v125_v15 = vld [vmem:[%s8654_s3 + $0x18] sm:$0xff]  ;;  %s5784_s3 = sshll.u32 %s8645_s19, 4  ;;  %s5785_s3 = int_to_ptr.hbm [resolvable:$true] %s5784_s3 }
  0x21   :  { %160 = vmatpush.msra.mxu0 %v126_v1 }
  0x22   :  { %5796 = vmatmul.msk.f32.vlgmr.msra.gmra.mxu0 %vm132_vm0, %v122_v2 }
  0x2a   :  { %5797 = vmatmul.msk.f32.gmra.mxu0 %vm132_vm0, %v123_v3 }
  0x32   :  { %5798 = vmatmul.msk.f32.gmra.mxu0 %vm132_vm0, %v124_v4 }
  0x3a   :  { %5799 = vmatmul.msk.f32.gmra.mxu0 %vm132_vm0, %v125_v15 }
  0x9f   :  { %v162_v5 = vpop.f32.mrf.mxu0 }
  0xa0   :  { %v163_v7 = vadd.f32 %v6162_v6, %v162_v5  ;;  %v305_v5 = vld [vmem:[%s8656_s25 + $0x8] sm:$0xff] }
  0xa1   :  { %336 = vmatpush.msra.mxu1 %v305_v5  ;;  %v6680_v5 = vmov 32.0  }
  0xa2   :  { %6214 = vtanh.f32 %v163_v7 }
  0xa7   :  { %v165_v8 = vpop.f32.mrf.mxu0 }
  0xa8   :  { %v166_v9 = vadd.f32 %v6162_v6, %v165_v8  ;;  %v6215_v10 = vpop.eup %6214 }
  0xa9   :  { %v178_v12 = vsel %vm132_vm0, %v6215_v10, 0.0 }
  0xaa   :  { %6216 = vtanh.f32 %v166_v9 }
  0xab   :  { %6218 = vrcp.f32 %v6678_v16 }
  0xaf   :  { %v168_v38 = vpop.f32.mrf.mxu0 }
  0xb0   :  { %v6217_v11 = vpop.eup %6216  ;;  %v169_v39 = vadd.f32 %v6162_v6, %v168_v38 }
  0xb1   :  { %v179_v13 = vsel %vm132_vm0, %v6217_v11, 0.0  ;;  %v6219_v17 = vpop.eup %6218 }
  0xb2   :  { %v180_v14 = vadd.f32 %v179_v13, %v178_v12  ;;  %v191_v18 = vmul.f32 256.0, %v6219_v17  ;;  %vm195_vm1 = vweird.f32 %v6219_v17  ;;  %6220 = vtanh.f32 %v169_v39 }
  0xb4   :  { %181 = vadd.xlane.f32.xlu0 %v180_v14  ;;  %v192_v19 = vsub.f32 1.0, %v191_v18 }
  0xb6   :  { %v193_v23 = vmul.f32 %v6219_v17, %v192_v19 }
  0xb7   :  { %v171_v40 = vpop.f32.mrf.mxu0 }
  0xb8   :  { %v194_v26 = vadd.f32 %v6219_v17, %v193_v23  ;;  %v172_v41 = vadd.f32 %v6162_v6, %v171_v40  ;;  %v6829_v42 = vpop.eup %6220  ;;  %v304_v6 = vld [vmem:[%s8656_s25] sm:$0xff] }
  0xb9   :  { %v241_v43 = vsel %vm132_vm0, %v6829_v42, 0.0  ;;  %337 = vmatpush.msra.mxu1 %v304_v6 }
  0xba   :  { %v196_v29 = vsel %vm195_vm1, %v6219_v17, %v194_v26  ;;  %6222 = vtanh.f32 %v172_v41 }
  0xc0   :  { %v6833_v44 = vpop.eup %6222 }
  0xc1   :  { %v242_v45 = vsel %vm132_vm0, %v6833_v44, 0.0 }
  0xc2   :  { %v243_v46 = vadd.f32 %v242_v45, %v241_v43  ;;  %v6679_v43 = vmov -1.0  }
  0xc4   :  { %244 = vadd.xlane.f32.xlu1 %v243_v46 }
 0x127   :  { %v182_v20 = vpop.xlane.xlu0 %181 }
 0x128   :  { %v183_v21 = vrot.slane %v182_v20, 4 }
 0x12a   :  { %v184_v22 = vadd.f32 %v183_v21, %v182_v20 }
 0x12c   :  { %v185_v24 = vrot.slane %v184_v22, 2 }
 0x12e   :  { %v186_v25 = vadd.f32 %v185_v24, %v184_v22 }
 0x130   :  { %v187_v27 = vrot.slane %v186_v25, 1 }
 0x132   :  { %v188_v28 = vadd.f32 %v187_v27, %v186_v25 }
 0x134   :  { %6106 = vpush %v188_v28 }
 0x135   :  { %6108 = vpush %v196_v29 }
 0x137   :  { %v245_v54 = vpop.xlane.xlu1 %244 }
 0x138   :  { %v246_v55 = vrot.slane %v245_v54, 4 }
 0x13a   :  { %v247_v57 = vadd.f32 %v246_v55, %v245_v54 }
 0x13c   :  { %v248_v58 = vrot.slane %v247_v57, 2 }
 0x13e   :  { %v249_v61 = vadd.f32 %v248_v58, %v247_v57 }
 0x140   :  { %v250_v0 = vrot.slane %v249_v61, 1 }
 0x142   :  { %v251_v3 = vadd.f32 %v250_v0, %v249_v61 }
 0x165   :  { %s6107_s20 = spop %6106 }
 0x166   :  { %s6824_s1 = spop %6108 }
 0x167   :  { %s198_s16 = smul.f32 %s6824_s1, %s6107_s20 }
 0x169   :  { %v199_v30 = vstv %s198_s16 }
 0x16a   :  { %v200_v31 = vsub.f32 %v6215_v10, %v199_v30  ;;  %v201_v32 = vsub.f32 %v6217_v11, %v199_v30  ;;  %v6849_v10 = vld [vmem:[%s8630_s4] ss:$0 sm:$0xff] }
 0x16c   :  { %v202_v33 = vmul.f32 %v200_v31, %v200_v31  ;;  %v203_v34 = vmul.f32 %v201_v32, %v201_v32 }
 0x16e   :  { %v204_v35 = vsel %vm132_vm0, %v202_v33, 0.0  ;;  %v205_v36 = vsel %vm132_vm0, %v203_v34, 0.0 }
 0x16f   :  { %v206_v37 = vadd.f32 %v205_v36, %v204_v35 }
 0x171   :  { %207 = vadd.xlane.f32.xlu0 %v206_v37 }
 0x1e4   :  { %v208_v47 = vpop.xlane.xlu0 %207 }
 0x1e5   :  { %v209_v48 = vrot.slane %v208_v47, 4 }
 0x1e7   :  { %v210_v49 = vadd.f32 %v209_v48, %v208_v47 }
 0x1e9   :  { %v211_v50 = vrot.slane %v210_v49, 2 }
 0x1eb   :  { %v212_v51 = vadd.f32 %v211_v50, %v210_v49 }
 0x1ed   :  { %v213_v52 = vrot.slane %v212_v51, 1 }
 0x1ef   :  { %v214_v53 = vadd.f32 %v213_v52, %v212_v51 }
 0x1f1   :  { %6110 = vpush %v214_v53 }
 0x222   :  { %s6111_s22 = spop %6110 }
 0x223   :  { %s224_s2 = smul.f32 %s6111_s22, %s6824_s1 }
 0x225   :  { %s225_s23 = sadd.f32 1e-05, %s224_s2 }
 0x227   :  { %v226_v56 = vstv %s225_s23 }
 0x228   :  { %6224 = vrsqrt.f32 %v226_v56  ;;  %vm233_vm3 = vweird.f32 %v226_v56 }
 0x22e   :  { %v6225_v59 = vpop.eup %6224 }
 0x22f   :  { %v228_v60 = vmul.f32 %v6225_v59, %v226_v56  ;;  %vm234_vm2 = vweird.f32 %v6225_v59 }
 0x230   :  { %vm235_vm4 = vmor %vm233_vm3, %vm234_vm2 }
 0x231   :  { %v229_v62 = vmul.f32 %v6225_v59, %v228_v60 }
 0x233   :  { %v230_v63 = vmul.f32 0.5, %v229_v62 }
 0x235   :  { %v231_v1 = vsub.f32 1.5, %v230_v63 }
 0x237   :  { %v232_v2 = vmul.f32 %v6225_v59, %v231_v1 }
 0x239   :  { %v236_v4 = vsel %vm235_vm4, %v6225_v59, %v232_v2 }
 0x23a   :  { %6112 = vpush %v236_v4 }
 0x23b   :  { %6114 = vpush %v251_v3 }
 0x26b   :  { %s6113_s27 = spop %6112 }
 0x26c   :  { %v238_v7 = vstv %s6113_s27  ;;  %s6115_s4 = spop %6114 }
 0x26d   :  { %v239_v8 = vmul.f32 %v238_v7, %v200_v31  ;;  %v240_v9 = vmul.f32 %v238_v7, %v201_v32  ;;  %s261_s29 = smul.f32 %s6115_s4, %s6824_s1  ;;  %s6681_s4 = smov 96  }
 0x26f   :  { %5800 = vmatmul.msk.f32.vlgmr.msra.gmra.mxu1 %vm132_vm0, %v239_v8 }
 0x277   :  { %5801 = vmatmul.msk.f32.gmra.mxu1 %vm132_vm0, %v240_v9 }
 0x2ec   :  { %v339_v11 = vpop.f32.mrf.mxu1 }
 0x2ed   :  { %v340_v12 = vadd.f32 %v6849_v10, %v339_v11 }
 0x2ef   :  { %v355_v13 = vmul.f32 0.70710677, %v340_v12  ;;  %v351_v47 = vmul.f32 0.5, %v340_v12 }
 0x2f1   :  { %v367_v14 = vand.u32 2147483647, %v355_v13  ;;  %vm359_vm9 = vcmp.ge.f32.partialorder %v355_v13, 0.0 }
 0x2f2   :  { %v363_v45 = vsel %vm359_vm9, 1.0, %v6679_v43 }
 0x2f3   :  { %v371_v15 = vmul.f32 0.3275911, %v367_v14  ;;  %v475_v26 = vsub.f32 0.0, %v367_v14 }
 0x2f4   :  { %v342_v51 = vpop.f32.mrf.mxu1 }
 0x2f5   :  { %v375_v16 = vadd.f32 1.0, %v371_v15  ;;  %v479_v30 = vmul.f32 %v475_v26, %v367_v14  ;;  %v6855_v52 = vadd.f32 %v6849_v10, %v342_v51 }
 0x2f7   :  { %6226 = vrcp.f32 %v375_v16  ;;  %v390_v20 = vand.u32 2147483648, %v375_v16  ;;  %v388_v22 = vand.u32 2147483647, %v375_v16  ;;  %vm384_vm6 = vweird.f32 %v375_v16 }
 0x2f8   :  { %v483_v33 = vmul.f32 1.442695, %v479_v30  ;;  %v356_v53 = vmul.f32 0.70710677, %v6855_v52 }
 0x2f9   :  { %v391_v24 = vor.u32 1.1754944e-38, %v390_v20  ;;  %vm389_vm8 = vcmp.eq.f32.partialorder %v388_v22, 8.507059e+37  ;;  %v262_v22 = vstv %s261_s29  ;;  %s6682_s29 = smov 64  }
 0x2fa   :  { %6228 = vpow2.f32 %v483_v33  ;;  %v368_v54 = vand.u32 2147483647, %v356_v53  ;;  %vm360_vm1 = vcmp.ge.f32.partialorder %v356_v53, 0.0 }
 0x2fc   :  { %v372_v55 = vmul.f32 0.3275911, %v368_v54  ;;  %v476_v12 = vsub.f32 0.0, %v368_v54 }
 0x2fd   :  { %v6227_v17 = vpop.eup %6226 }
 0x2fe   :  { %v380_v18 = vmul.f32 %v6227_v17, %v375_v16  ;;  %vm385_vm5 = vweird.f32 %v6227_v17  ;;  %v376_v56 = vadd.f32 1.0, %v372_v55  ;;  %v480_v15 = vmul.f32 %v476_v12, %v368_v54 }
 0x2ff   :  { %vm386_vm7 = vmor %vm384_vm6, %vm385_vm5 }
 0x300   :  { %v381_v19 = vsub.f32 1.0, %v380_v18  ;;  %v6229_v39 = vpop.eup %6228  ;;  %6230 = vrcp.f32 %v376_v56  ;;  %v405_v62 = vand.u32 2147483648, %v376_v56  ;;  %vm399_vm12 = vweird.f32 %v376_v56 }
 0x301   :  { %v403_v63 = vand.u32 2147483647, %v376_v56  ;;  %6232 = vrcp.f32 %v6680_v5  ;;  %v485_v18 = vmul.f32 1.442695, %v480_v15 }
 0x302   :  { %v382_v21 = vmul.f32 %v6227_v17, %v381_v19  ;;  %v406_v1 = vor.u32 1.1754944e-38, %v405_v62  ;;  %v6879_v62 = vld [vmem:[#allocation2] ss:$0 sm:$0xff] }
 0x303   :  { %vm404_vm14 = vcmp.eq.f32.partialorder %v403_v63, 8.507059e+37  ;;  %6234 = vpow2.f32 %v485_v18 }
 0x304   :  { %v383_v23 = vadd.f32 %v6227_v17, %v382_v21 }
 0x306   :  { %v387_v25 = vsel %vm386_vm7, %v6227_v17, %v383_v23  ;;  %v6231_v57 = vpop.eup %6230 }
 0x307   :  { %v392_v27 = vsel %vm389_vm8, %v391_v24, %v387_v25  ;;  %v395_v58 = vmul.f32 %v6231_v57, %v376_v56  ;;  %vm400_vm11 = vweird.f32 %v6231_v57  ;;  %v6233_v7 = vpop.eup %6232 }
 0x308   :  { %v439_v28 = vmul.f32 1.0614054, %v392_v27  ;;  %vm401_vm13 = vmor %vm399_vm12, %vm400_vm11  ;;  %v527_v9 = vmul.f32 32.0, %v6233_v7  ;;  %vm531_vm15 = vweird.f32 %v6233_v7 }
 0x309   :  { %v396_v59 = vsub.f32 1.0, %v395_v58  ;;  %v6235_v26 = vpop.eup %6234 }
 0x30a   :  { %v443_v29 = vadd.f32 -1.4531521, %v439_v28  ;;  %v528_v13 = vsub.f32 1.0, %v527_v9  ;;  %v6866_v28 = vsub.f32 %v6833_v44, %v262_v22 }
 0x30b   :  { %v397_v60 = vmul.f32 %v6231_v57, %v396_v59 }
 0x30c   :  { %v447_v31 = vmul.f32 %v443_v29, %v392_v27  ;;  %v529_v16 = vmul.f32 %v6233_v7, %v528_v13  ;;  %v266_v33 = vmul.f32 %v6866_v28, %v6866_v28 }
 0x30d   :  { %v398_v61 = vadd.f32 %v6231_v57, %v397_v60 }
 0x30e   :  { %v451_v32 = vadd.f32 1.4214138, %v447_v31  ;;  %v530_v19 = vadd.f32 %v6233_v7, %v529_v16  ;;  %v268_v44 = vsel %vm132_vm0, %v266_v33, 0.0 }
 0x30f   :  { %v402_v0 = vsel %vm401_vm13, %v6231_v57, %v398_v61 }
 0x310   :  { %v455_v34 = vmul.f32 %v451_v32, %v392_v27  ;;  %v407_v2 = vsel %vm404_vm14, %v406_v1, %v402_v0  ;;  %v6859_v21 = vsel %vm531_vm15, %v6233_v7, %v530_v19 }
 0x311   :  { %v440_v3 = vmul.f32 1.0614054, %v407_v2 }
 0x312   :  { %v459_v35 = vadd.f32 -0.28449672, %v455_v34 }
 0x313   :  { %v444_v4 = vadd.f32 -1.4531521, %v440_v3 }
 0x314   :  { %v463_v36 = vmul.f32 %v459_v35, %v392_v27 }
 0x315   :  { %v448_v6 = vmul.f32 %v444_v4, %v407_v2 }
 0x316   :  { %v467_v37 = vadd.f32 0.2548296, %v463_v36 }
 0x317   :  { %v452_v8 = vadd.f32 1.4214138, %v448_v6 }
 0x318   :  { %v471_v38 = vmul.f32 %v467_v37, %v392_v27  ;;  %v6863_v27 = vsub.f32 %v6829_v42, %v262_v22  ;;  %v364_v42 = vsel %vm360_vm1, 1.0, %v6679_v43 }
 0x319   :  { %v456_v11 = vmul.f32 %v452_v8, %v407_v2 }
 0x31a   :  { %v491_v40 = vmul.f32 %v6229_v39, %v471_v38  ;;  %v265_v32 = vmul.f32 %v6863_v27, %v6863_v27 }
 0x31b   :  { %v460_v14 = vadd.f32 -0.28449672, %v456_v11 }
 0x31c   :  { %v495_v41 = vsub.f32 1.0, %v491_v40  ;;  %v267_v36 = vsel %vm132_vm0, %v265_v32, 0.0  ;;  %v352_v40 = vmul.f32 0.5, %v6855_v52 }
 0x31d   :  { %v464_v17 = vmul.f32 %v460_v14, %v407_v2  ;;  %v269_v38 = vadd.f32 %v268_v44, %v267_v36 }
 0x31e   :  { %v499_v46 = vmul.f32 %v495_v41, %v363_v45 }
 0x31f   :  { %v468_v20 = vadd.f32 0.2548296, %v464_v17 }
 0x320   :  { %v503_v48 = vadd.f32 1.0, %v499_v46 }
 0x321   :  { %v472_v23 = vmul.f32 %v468_v20, %v407_v2  ;;  %v6881_v2 = vld [vmem:[#allocation5] ss:$0 sm:$0xff] }
 0x322   :  { %v507_v49 = vmul.f32 %v503_v48, %v351_v47 }
 0x323   :  { %v492_v30 = vmul.f32 %v6235_v26, %v472_v23 }
 0x324   :  { %v514_v50 = vsel %vm513_vm10, %v507_v49, 0.0 }
 0x325   :  { %515 = vadd.xlane.f32.xlu1 %v514_v50  ;;  %v496_v35 = vsub.f32 1.0, %v492_v30 }
 0x327   :  { %v500_v37 = vmul.f32 %v496_v35, %v364_v42 }
 0x329   :  { %v504_v39 = vadd.f32 1.0, %v500_v37 }
 0x32b   :  { %v508_v41 = vmul.f32 %v504_v39, %v352_v40  ;;  %v730_v40 = vld [vmem:[%s8635_s9 + $0x18] sm:$0xff] }
 0x32c   :  { %759 = vmatpush.msra.mxu2 %v730_v40 }
 0x32d   :  { %v517_v45 = vsel %vm513_vm10, %v508_v41, 0.0 }
 0x398   :  { %v516_v24 = vpop.xlane.xlu1 %515 }
 0x399   :  { %v533_v25 = vmul.f32 %v6859_v21, %v516_v24 }
 0x39b   :  { %v537_v29 = vsub.f32 %v507_v49, %v533_v25 }
 0x39d   :  { %v541_v31 = vmul.f32 %v537_v29, %v537_v29 }
 0x39f   :  { %v545_v34 = vsel %vm513_vm10, %v541_v31, 0.0 }
 0x3a0   :  { %546 = vadd.xlane.f32.xlu2 %v545_v34 }
 0x3a8   :  { %270 = vadd.xlane.f32.xlu2 %v269_v38 }
 0x3b0   :  { %518 = vadd.xlane.f32.xlu2 %v517_v45  ;;  %v728_v45 = vld [vmem:[%s8635_s9 + $0x8] sm:$0xff] }
 0x413   :  { %v547_v46 = vpop.xlane.xlu2 %546 }
 0x414   :  { %v557_v47 = vmul.f32 %v547_v46, %v6859_v21  ;;  %v727_v46 = vld [vmem:[%s8635_s9] sm:$0xff] }
 0x416   :  { %v561_v48 = vadd.f32 1e-05, %v557_v47 }
 0x418   :  { %6236 = vrsqrt.f32 %v561_v48  ;;  %vm571_vm3 = vweird.f32 %v561_v48 }
 0x41b   :  { %v271_v49 = vpop.xlane.xlu2 %270 }
 0x41c   :  { %v272_v50 = vrot.slane %v271_v49, 4 }
 0x41e   :  { %v6237_v51 = vpop.eup %6236  ;;  %v273_v53 = vadd.f32 %v272_v50, %v271_v49 }
 0x41f   :  { %v566_v54 = vmul.f32 %v6237_v51, %v561_v48  ;;  %vm572_vm2 = vweird.f32 %v6237_v51 }
 0x420   :  { %v274_v55 = vrot.slane %v273_v53, 2  ;;  %vm573_vm4 = vmor %vm571_vm3, %vm572_vm2 }
 0x421   :  { %v567_v56 = vmul.f32 %v6237_v51, %v566_v54 }
 0x422   :  { %v275_v57 = vadd.f32 %v274_v55, %v273_v53 }
 0x423   :  { %v568_v58 = vmul.f32 0.5, %v567_v56  ;;  %v519_v63 = vpop.xlane.xlu2 %518 }
 0x424   :  { %v276_v59 = vrot.slane %v275_v57, 1  ;;  %v534_v3 = vmul.f32 %v6859_v21, %v519_v63 }
 0x425   :  { %v569_v52 = vsub.f32 1.5, %v568_v58 }
 0x426   :  { %v277_v60 = vadd.f32 %v276_v59, %v275_v57  ;;  %v538_v6 = vsub.f32 %v508_v41, %v534_v3  ;;  %v729_v41 = vld [vmem:[%s8635_s9 + $0x10] sm:$0xff] }
 0x427   :  { %v570_v61 = vmul.f32 %v6237_v51, %v569_v52  ;;  %760 = vmatpush.msra.mxu2 %v729_v41 }
 0x428   :  { %6116 = vpush %v277_v60  ;;  %v542_v8 = vmul.f32 %v538_v6, %v538_v6 }
 0x429   :  { %v574_v0 = vsel %vm573_vm4, %v6237_v51, %v570_v61  ;;  %761 = vmatpush.msra.mxu2 %v728_v45 }
 0x42a   :  { %v605_v1 = vmul.f32 %v574_v0, %v537_v29  ;;  %v548_v9 = vsel %vm513_vm10, %v542_v8, 0.0 }
 0x42b   :  { %762 = vmatpush.msra.mxu2 %v727_v46 }
 0x42c   :  { %v612_v4 = vmul.f32 %v6879_v62, %v605_v1 }
 0x42e   :  { %v6886_v5 = vadd.f32 %v6881_v2, %v612_v4 }
 0x430   :  { %v625_v7 = vsel %vm513_vm10, %v6886_v5, 0.0 }
 0x431   :  { %626 = vadd.xlane.f32.xlu0 %v625_v7 }
 0x439   :  { %549 = vadd.xlane.f32.xlu0 %v548_v9 }
 0x459   :  { %s6117_s0 = spop %6116 }
 0x45a   :  { %s287_s30 = smul.f32 %s6117_s0, %s6824_s1 }
 0x45c   :  { %s288_s21 = sadd.f32 1e-05, %s287_s30 }
 0x45e   :  { %v289_v11 = vstv %s288_s21 }
 0x45f   :  { %6238 = vrsqrt.f32 %v289_v11  ;;  %vm296_vm6 = vweird.f32 %v289_v11 }
 0x465   :  { %v6239_v12 = vpop.eup %6238 }
 0x466   :  { %v291_v13 = vmul.f32 %v6239_v12, %v289_v11  ;;  %vm297_vm5 = vweird.f32 %v6239_v12 }
 0x467   :  { %vm298_vm7 = vmor %vm296_vm6, %vm297_vm5 }
 0x468   :  { %v292_v14 = vmul.f32 %v6239_v12, %v291_v13 }
 0x46a   :  { %v293_v15 = vmul.f32 0.5, %v292_v14 }
 0x46c   :  { %v294_v16 = vsub.f32 1.5, %v293_v15 }
 0x46e   :  { %v295_v17 = vmul.f32 %v6239_v12, %v294_v16 }
 0x470   :  { %v299_v18 = vsel %vm298_vm7, %v6239_v12, %v295_v17  ;;  %v6949_v12 = vld [vmem:[%s8634_s8] ss:$0 sm:$0xff] }
 0x471   :  { %6118 = vpush %v299_v18 }
 0x4a2   :  { %s6119_s5 = spop %6118 }
 0x4a3   :  { %v301_v19 = vstv %s6119_s5 }
 0x4a4   :  { %v302_v20 = vmul.f32 %v301_v19, %v6863_v27  ;;  %v627_v22 = vpop.xlane.xlu0 %626  ;;  %v303_v29 = vmul.f32 %v301_v19, %v6866_v28 }
 0x4a5   :  { %v637_v23 = vmul.f32 %v627_v22, %v6859_v21 }
 0x4a6   :  { %5802 = vmatmul.msk.f32.gmra.mxu1 %vm132_vm0, %v302_v20 }
 0x4a7   :  { %v6896_v24 = vsub.f32 %v6886_v5, %v637_v23 }
 0x4a9   :  { %v645_v25 = vmul.f32 %v6896_v24, %v6896_v24 }
 0x4ab   :  { %v649_v26 = vsel %vm513_vm10, %v645_v25, 0.0 }
 0x4ac   :  { %650 = vadd.xlane.f32.xlu1 %v649_v26  ;;  %v550_v30 = vpop.xlane.xlu0 %549 }
 0x4ad   :  { %v558_v31 = vmul.f32 %v550_v30, %v6859_v21 }
 0x4ae   :  { %5803 = vmatmul.msk.f32.gmra.mxu1 %vm132_vm0, %v303_v29 }
 0x4af   :  { %v562_v27 = vadd.f32 1e-05, %v558_v31 }
 0x4b1   :  { %6240 = vrsqrt.f32 %v562_v27  ;;  %vm581_vm9 = vweird.f32 %v562_v27 }
 0x4b7   :  { %v6241_v32 = vpop.eup %6240 }
 0x4b8   :  { %v576_v33 = vmul.f32 %v6241_v32, %v562_v27  ;;  %vm582_vm8 = vweird.f32 %v6241_v32 }
 0x4b9   :  { %vm583_vm11 = vmor %vm581_vm9, %vm582_vm8 }
 0x4ba   :  { %v577_v34 = vmul.f32 %v6241_v32, %v576_v33 }
 0x4bc   :  { %v578_v35 = vmul.f32 0.5, %v577_v34 }
 0x4be   :  { %v579_v42 = vsub.f32 1.5, %v578_v35 }
 0x4c0   :  { %v580_v36 = vmul.f32 %v6241_v32, %v579_v42 }
 0x4c2   :  { %v584_v44 = vsel %vm583_vm11, %v6241_v32, %v580_v36 }
 0x4c3   :  { %v606_v37 = vmul.f32 %v584_v44, %v538_v6 }
 0x4c5   :  { %v613_v28 = vmul.f32 %v6879_v62, %v606_v37 }
 0x4c7   :  { %v6906_v38 = vadd.f32 %v6881_v2, %v613_v28 }
 0x4c9   :  { %v628_v39 = vsel %vm513_vm10, %v6906_v38, 0.0 }
 0x4ca   :  { %629 = vadd.xlane.f32.xlu1 %v628_v39 }
 0x51f   :  { %v651_v47 = vpop.xlane.xlu1 %650 }
 0x520   :  { %v661_v48 = vmul.f32 %v651_v47, %v6859_v21 }
 0x522   :  { %v665_v49 = vadd.f32 1e-05, %v661_v48 }
 0x523   :  { %v345_v50 = vpop.f32.mrf.mxu1 }
 0x524   :  { %6242 = vrsqrt.f32 %v665_v49  ;;  %v6924_v51 = vadd.f32 %v6849_v10, %v345_v50  ;;  %vm675_vm12 = vweird.f32 %v665_v49 }
 0x526   :  { %v6927_v53 = vmul.f32 0.70710677, %v6924_v51 }
 0x528   :  { %v369_v54 = vand.u32 2147483647, %v6927_v53  ;;  %vm361_vm7 = vcmp.ge.f32.partialorder %v6927_v53, 0.0 }
 0x52a   :  { %v6243_v55 = vpop.eup %6242  ;;  %v373_v56 = vmul.f32 0.3275911, %v369_v54  ;;  %v477_v26 = vsub.f32 0.0, %v369_v54 }
 0x52b   :  { %v670_v57 = vmul.f32 %v6243_v55, %v665_v49  ;;  %v348_v58 = vpop.f32.mrf.mxu1  ;;  %vm676_vm0 = vweird.f32 %v6243_v55 }
 0x52c   :  { %v377_v59 = vadd.f32 1.0, %v373_v56  ;;  %v6931_v52 = vadd.f32 %v6849_v10, %v348_v58  ;;  %vm677_vm13 = vmor %vm675_vm12, %vm676_vm0  ;;  %v6943_v10 = vld [vmem:[%s8633_s7] ss:$0 sm:$0xff]  ;;  %v481_v36 = vmul.f32 %v477_v26, %v369_v54 }
 0x52d   :  { %v671_v60 = vmul.f32 %v6243_v55, %v670_v57 }
 0x52e   :  { %6244 = vrcp.f32 %v377_v59  ;;  %v6934_v61 = vmul.f32 0.70710677, %v6931_v52  ;;  %v420_v15 = vand.u32 2147483648, %v377_v59  ;;  %v418_v17 = vand.u32 2147483647, %v377_v59 }
 0x52f   :  { %v672_v63 = vmul.f32 0.5, %v671_v60  ;;  %vm414_vm15 = vweird.f32 %v377_v59  ;;  %v487_v46 = vmul.f32 1.442695, %v481_v36 }
 0x530   :  { %v6937_v0 = vand.u32 2147483647, %v6934_v61  ;;  %v421_v22 = vor.u32 1.1754944e-38, %v420_v15  ;;  %vm419_vm2 = vcmp.eq.f32.partialorder %v418_v17, 8.507059e+37  ;;  %vm362_vm8 = vcmp.ge.f32.partialorder %v6934_v61, 0.0 }
 0x531   :  { %v673_v1 = vsub.f32 1.5, %v672_v63 }
 0x532   :  { %v374_v3 = vmul.f32 0.3275911, %v6937_v0  ;;  %v478_v47 = vsub.f32 0.0, %v6937_v0 }
 0x533   :  { %v674_v4 = vmul.f32 %v6243_v55, %v673_v1 }
 0x534   :  { %v6245_v6 = vpop.eup %6244  ;;  %v378_v7 = vadd.f32 1.0, %v374_v3  ;;  %v482_v56 = vmul.f32 %v478_v47, %v6937_v0  ;;  %v353_v0 = vmul.f32 0.5, %v6924_v51 }
 0x535   :  { %v410_v8 = vmul.f32 %v6245_v6, %v377_v59  ;;  %v678_v9 = vsel %vm677_vm13, %v6243_v55, %v674_v4  ;;  %vm415_vm14 = vweird.f32 %v6245_v6 }
 0x536   :  { %6246 = vrcp.f32 %v378_v7  ;;  %v709_v11 = vmul.f32 %v678_v9, %v6896_v24  ;;  %vm416_vm1 = vmor %vm414_vm15, %vm415_vm14  ;;  %v435_v33 = vand.u32 2147483648, %v378_v7  ;;  %v433_v42 = vand.u32 2147483647, %v378_v7 }
 0x537   :  { %v411_v13 = vsub.f32 1.0, %v410_v8  ;;  %vm429_vm4 = vweird.f32 %v378_v7  ;;  %6248 = vpow2.f32 %v487_v46  ;;  %v489_v63 = vmul.f32 1.442695, %v482_v56 }
 0x538   :  { %v716_v14 = vmul.f32 %v6943_v10, %v709_v11  ;;  %v436_v40 = vor.u32 1.1754944e-38, %v435_v33  ;;  %vm434_vm6 = vcmp.eq.f32.partialorder %v433_v42, 8.507059e+37  ;;  %v365_v11 = vsel %vm361_vm7, 1.0, %v6679_v43 }
 0x539   :  { %v412_v16 = vmul.f32 %v6245_v6, %v411_v13  ;;  %6250 = vpow2.f32 %v489_v63 }
 0x53a   :  { %v723_v18 = vadd.f32 %v6949_v12, %v716_v14 }
 0x53b   :  { %v413_v19 = vadd.f32 %v6245_v6, %v412_v16 }
 0x53c   :  { %v6247_v20 = vpop.eup %6246  ;;  %5804 = vmatmul.msk.f32.vlgmr.msra.gmra.mxu2 %vm513_vm10, %v723_v18 }
 0x53d   :  { %v425_v23 = vmul.f32 %v6247_v20, %v378_v7  ;;  %v630_v24 = vpop.xlane.xlu1 %629  ;;  %v417_v25 = vsel %vm416_vm1, %v6245_v6, %v413_v19  ;;  %vm430_vm3 = vweird.f32 %v6247_v20  ;;  %v6249_v4 = vpop.eup %6248 }
 0x53e   :  { %v638_v29 = vmul.f32 %v630_v24, %v6859_v21  ;;  %v422_v30 = vsel %vm419_vm2, %v421_v22, %v417_v25  ;;  %vm431_vm5 = vmor %vm429_vm4, %vm430_vm3  ;;  %v366_v22 = vsel %vm362_vm8, 1.0, %v6679_v43  ;;  %v354_v24 = vmul.f32 0.5, %v6931_v52 }
 0x53f   :  { %v426_v31 = vsub.f32 1.0, %v425_v23  ;;  %v441_v27 = vmul.f32 1.0614054, %v422_v30  ;;  %v6251_v17 = vpop.eup %6250  ;;  %vm804_vm3 = vcmask 64512  }
 0x540   :  { %v6956_v32 = vsub.f32 %v6906_v38, %v638_v29 }
 0x541   :  { %v445_v34 = vadd.f32 -1.4531521, %v441_v27  ;;  %v427_v35 = vmul.f32 %v6247_v20, %v426_v31  ;;  %v6975_v31 = vld [vmem:[%s8636_s10] ss:$0 sm:$0xff] }
 0x542   :  { %v646_v44 = vmul.f32 %v6956_v32, %v6956_v32 }
 0x543   :  { %v449_v37 = vmul.f32 %v445_v34, %v422_v30  ;;  %v428_v28 = vadd.f32 %v6247_v20, %v427_v35 }
 0x544   :  { %v652_v39 = vsel %vm513_vm10, %v646_v44, 0.0 }
 0x545   :  { %653 = vadd.xlane.f32.xlu0 %v652_v39  ;;  %v453_v41 = vadd.f32 1.4214138, %v449_v37  ;;  %v432_v45 = vsel %vm431_vm5, %v6247_v20, %v428_v28 }
 0x546   :  { %v437_v48 = vsel %vm434_vm6, %v436_v40, %v432_v45 }
 0x547   :  { %v457_v49 = vmul.f32 %v453_v41, %v422_v30  ;;  %v442_v50 = vmul.f32 1.0614054, %v437_v48 }
 0x549   :  { %v461_v54 = vadd.f32 -0.28449672, %v457_v49  ;;  %v446_v55 = vadd.f32 -1.4531521, %v442_v50 }
 0x54b   :  { %v465_v57 = vmul.f32 %v461_v54, %v422_v30  ;;  %v450_v58 = vmul.f32 %v446_v55, %v437_v48 }
 0x54d   :  { %v469_v59 = vadd.f32 0.2548296, %v465_v57  ;;  %v454_v60 = vadd.f32 1.4214138, %v450_v58 }
 0x54f   :  { %v473_v1 = vmul.f32 %v469_v59, %v422_v30  ;;  %v458_v3 = vmul.f32 %v454_v60, %v437_v48 }
 0x551   :  { %v493_v6 = vmul.f32 %v6249_v4, %v473_v1  ;;  %v462_v7 = vadd.f32 -0.28449672, %v458_v3 }
 0x553   :  { %v497_v8 = vsub.f32 1.0, %v493_v6  ;;  %v466_v9 = vmul.f32 %v462_v7, %v437_v48 }
 0x555   :  { %v501_v13 = vmul.f32 %v497_v8, %v365_v11  ;;  %v470_v14 = vadd.f32 0.2548296, %v466_v9 }
 0x557   :  { %v505_v15 = vadd.f32 1.0, %v501_v13  ;;  %v474_v16 = vmul.f32 %v470_v14, %v437_v48 }
 0x559   :  { %v509_v18 = vmul.f32 %v505_v15, %v353_v0  ;;  %v494_v19 = vmul.f32 %v6251_v17, %v474_v16 }
 0x55b   :  { %v520_v53 = vsel %vm513_vm10, %v509_v18, 0.0  ;;  %v498_v20 = vsub.f32 1.0, %v494_v19 }
 0x55c   :  { %521 = vadd.xlane.f32.xlu1 %v520_v53 }
 0x55d   :  { %v502_v23 = vmul.f32 %v498_v20, %v366_v22 }
 0x55f   :  { %v506_v25 = vadd.f32 1.0, %v502_v23 }
 0x561   :  { %v510_v26 = vmul.f32 %v506_v25, %v354_v24 }
 0x563   :  { %v523_v51 = vsel %vm513_vm10, %v510_v26, 0.0 }
 0x564   :  { %524 = vadd.xlane.f32.xlu1 %v523_v51 }
 0x5b8   :  { %v654_v29 = vpop.xlane.xlu0 %653 }
 0x5b9   :  { %v662_v30 = vmul.f32 %v654_v29, %v6859_v21 }
 0x5bb   :  { %v666_v61 = vadd.f32 1e-05, %v662_v30 }
 0x5bd   :  { %6252 = vrsqrt.f32 %v666_v61  ;;  %vm685_vm11 = vweird.f32 %v666_v61 }
 0x5bf   :  { %v764_v27 = vpop.f32.mrf.mxu2 }
 0x5c0   :  { %v6978_v33 = vadd.f32 %v6975_v31, %v764_v27 }
 0x5c2   :  { %777 = vrot.lane.b32.xlu2 %v6978_v33, %s6681_s4 }
 0x5c3   :  { %v6253_v52 = vpop.eup %6252 }
 0x5c4   :  { %v680_v34 = vmul.f32 %v6253_v52, %v666_v61  ;;  %vm686_vm9 = vweird.f32 %v6253_v52 }
 0x5c5   :  { %vm687_vm0 = vmor %vm685_vm11, %vm686_vm9 }
 0x5c6   :  { %v681_v35 = vmul.f32 %v6253_v52, %v680_v34 }
 0x5c8   :  { %v682_v42 = vmul.f32 0.5, %v681_v35 }
 0x5ca   :  { %v683_v36 = vsub.f32 1.5, %v682_v42 }
 0x5cc   :  { %v684_v44 = vmul.f32 %v6253_v52, %v683_v36 }
 0x5ce   :  { %v688_v37 = vsel %vm687_vm0, %v6253_v52, %v684_v44 }
 0x5cf   :  { %v522_v28 = vpop.xlane.xlu1 %521  ;;  %v710_v39 = vmul.f32 %v688_v37, %v6956_v32 }
 0x5d0   :  { %v535_v40 = vmul.f32 %v6859_v21, %v522_v28 }
 0x5d1   :  { %v717_v41 = vmul.f32 %v6943_v10, %v710_v39 }
 0x5d2   :  { %v539_v45 = vsub.f32 %v509_v18, %v535_v40 }
 0x5d3   :  { %v724_v46 = vadd.f32 %v6949_v12, %v717_v41 }
 0x5d4   :  { %v543_v47 = vmul.f32 %v539_v45, %v539_v45 }
 0x5d5   :  { %5805 = vmatmul.msk.f32.gmra.mxu2 %vm513_vm10, %v724_v46 }
 0x5d6   :  { %v551_v48 = vsel %vm513_vm10, %v543_v47, 0.0 }
 0x5d7   :  { %552 = vadd.xlane.f32.xlu0 %v551_v48  ;;  %v525_v49 = vpop.xlane.xlu1 %524 }
 0x5d8   :  { %v536_v50 = vmul.f32 %v6859_v21, %v525_v49 }
 0x5da   :  { %v540_v54 = vsub.f32 %v510_v26, %v536_v50 }
 0x5dc   :  { %v544_v55 = vmul.f32 %v540_v54, %v540_v54 }
 0x5de   :  { %v554_v32 = vsel %vm513_vm10, %v544_v55, 0.0 }
 0x5df   :  { %555 = vadd.xlane.f32.xlu1 %v554_v32 }
 0x61c   :  { %v778_v56 = vpop.permute.xlu2 %777 }
 0x61d   :  { %5808 = vmatpush.xpose.msk.msra.mxu3 %vm513_vm10, %v778_v56 }
 0x620   :  { %5809 = vmatmul.msk.f32.vlgmr.msra.gmra.mxu3 %vm513_vm10, %v6978_v33 }
 0x64a   :  { %v553_v57 = vpop.xlane.xlu0 %552 }
 0x64b   :  { %v559_v58 = vmul.f32 %v553_v57, %v6859_v21 }
 0x64d   :  { %v563_v59 = vadd.f32 1e-05, %v559_v58 }
 0x64f   :  { %6254 = vrsqrt.f32 %v563_v59  ;;  %vm591_vm13 = vweird.f32 %v563_v59 }
 0x652   :  { %v556_v60 = vpop.xlane.xlu1 %555 }
 0x653   :  { %v560_v63 = vmul.f32 %v556_v60, %v6859_v21 }
 0x655   :  { %v6255_v1 = vpop.eup %6254  ;;  %v564_v3 = vadd.f32 1e-05, %v560_v63 }
 0x656   :  { %v586_v4 = vmul.f32 %v6255_v1, %v563_v59  ;;  %vm592_vm12 = vweird.f32 %v6255_v1 }
 0x657   :  { %6256 = vrsqrt.f32 %v564_v3  ;;  %vm593_vm14 = vmor %vm591_vm13, %vm592_vm12  ;;  %vm601_vm1 = vweird.f32 %v564_v3 }
 0x658   :  { %v587_v6 = vmul.f32 %v6255_v1, %v586_v4 }
 0x65a   :  { %v588_v7 = vmul.f32 0.5, %v587_v6 }
 0x65c   :  { %v589_v8 = vsub.f32 1.5, %v588_v7 }
 0x65d   :  { %v6257_v9 = vpop.eup %6256 }
 0x65e   :  { %v590_v11 = vmul.f32 %v6255_v1, %v589_v8  ;;  %v596_v13 = vmul.f32 %v6257_v9, %v564_v3  ;;  %vm602_vm15 = vweird.f32 %v6257_v9 }
 0x65f   :  { %vm603_vm2 = vmor %vm601_vm1, %vm602_vm15 }
 0x660   :  { %v597_v14 = vmul.f32 %v6257_v9, %v596_v13  ;;  %v594_v0 = vsel %vm593_vm14, %v6255_v1, %v590_v11 }
 0x661   :  { %v607_v15 = vmul.f32 %v594_v0, %v539_v45  ;;  %v767_v45 = vpop.f32.mrf.mxu2 }
 0x662   :  { %v598_v16 = vmul.f32 0.5, %v597_v14 }
 0x663   :  { %v614_v17 = vmul.f32 %v6879_v62, %v607_v15 }
 0x664   :  { %v599_v18 = vsub.f32 1.5, %v598_v16 }
 0x665   :  { %v6997_v19 = vadd.f32 %v6881_v2, %v614_v17 }
 0x666   :  { %v600_v53 = vmul.f32 %v6257_v9, %v599_v18 }
 0x667   :  { %v631_v20 = vsel %vm513_vm10, %v6997_v19, 0.0 }
 0x668   :  { %632 = vadd.xlane.f32.xlu0 %v631_v20  ;;  %v604_v22 = vsel %vm603_vm2, %v6257_v9, %v600_v53 }
 0x669   :  { %v608_v23 = vmul.f32 %v604_v22, %v540_v54 }
 0x66b   :  { %v615_v24 = vmul.f32 %v6879_v62, %v608_v23 }
 0x66d   :  { %v7003_v25 = vadd.f32 %v6881_v2, %v615_v24 }
 0x66f   :  { %v634_v26 = vsel %vm513_vm10, %v7003_v25, 0.0 }
 0x670   :  { %635 = vadd.xlane.f32.xlu1 %v634_v26 }
 0x6a3   :  { %v800_v51 = vpop.f32.mrf.mxu3 }
 0x6a4   :  { %v803_v29 = vmul.f32 0.17677669, %v800_v51 }
 0x6a6   :  { %v805_v30 = vsel %vm804_vm3, %v803_v29, -inf }
 0x6a7   :  { %806 = vmax.xlane.f32.xlu2 %v805_v30  ;;  %v1040_v30 = vld [vmem:[%s8637_s11 + $0x18] sm:$0xff] }
 0x6db   :  { %v633_v61 = vpop.xlane.xlu0 %632 }
 0x6dc   :  { %v639_v27 = vmul.f32 %v633_v61, %v6859_v21 }
 0x6de   :  { %v643_v52 = vsub.f32 %v6997_v19, %v639_v27 }
 0x6e0   :  { %v647_v34 = vmul.f32 %v643_v52, %v643_v52 }
 0x6e2   :  { %v655_v62 = vsel %vm513_vm10, %v647_v34, 0.0  ;;  %v1038_v34 = vld [vmem:[%s8637_s11 + $0x8] sm:$0xff] }
 0x6e3   :  { %656 = vadd.xlane.f32.xlu0 %v655_v62  ;;  %v636_v2 = vpop.xlane.xlu1 %635 }
 0x6e4   :  { %v640_v35 = vmul.f32 %v636_v2, %v6859_v21 }
 0x6e6   :  { %v644_v42 = vsub.f32 %v7003_v25, %v640_v35 }
 0x6e8   :  { %v648_v37 = vmul.f32 %v644_v42, %v644_v42 }
 0x6ea   :  { %v658_v39 = vsel %vm513_vm10, %v648_v37, 0.0 }
 0x6f7   :  { %816 = vrot.lane.b32.xlu0 %v6978_v33, %s6682_s29  ;;  %v768_v33 = vadd.f32 %v6975_v31, %v767_v45 }
 0x71a   :  { %v807_v36 = vpop.xlane.xlu2 %806 }
 0x71b   :  { %v808_v44 = vsub.f32 %v803_v29, %v807_v36 }
 0x71d   :  { %v809_v28 = vmul.f32 1.442695, %v808_v44 }
 0x71f   :  { %6258 = vpow2.f32 %v809_v28 }
 0x721   :  { %659 = vadd.xlane.f32.xlu0 %v658_v39 }
 0x725   :  { %v6259_v40 = vpop.eup %6258 }
 0x726   :  { %v811_v41 = vsel %vm804_vm3, %v6259_v40, 0.0 }
 0x727   :  { %812 = vadd.xlane.f32.xlu1 %v811_v41 }
 0x735   :  { %881 = vrot.lane.b32.xlu0 %v768_v33, %s6682_s29 }
 0x740   :  { %843 = vrot.lane.b32.xlu1 %v768_v33, %s6681_s4 }
 0x756   :  { %v657_v46 = vpop.xlane.xlu0 %656 }
 0x757   :  { %v663_v47 = vmul.f32 %v657_v46, %v6859_v21 }
 0x759   :  { %v667_v48 = vadd.f32 1e-05, %v663_v47 }
 0x75b   :  { %6260 = vrsqrt.f32 %v667_v48  ;;  %vm695_vm5 = vweird.f32 %v667_v48 }
 0x761   :  { %v6261_v49 = vpop.eup %6260 }
 0x762   :  { %v690_v50 = vmul.f32 %v6261_v49, %v667_v48  ;;  %vm696_vm4 = vweird.f32 %v6261_v49 }
 0x763   :  { %vm697_vm6 = vmor %vm695_vm5, %vm696_vm4 }
 0x764   :  { %v691_v54 = vmul.f32 %v6261_v49, %v690_v50 }
 0x766   :  { %v692_v55 = vmul.f32 0.5, %v691_v54 }
 0x768   :  { %v693_v32 = vsub.f32 1.5, %v692_v55  ;;  %v7066_v55 = vld [vmem:[%s8638_s12] ss:$0 sm:$0xff] }
 0x769   :  { %v817_v56 = vpop.permute.xlu0 %816 }
 0x76a   :  { %v694_v57 = vmul.f32 %v6261_v49, %v693_v32  ;;  %837 = vmatpush.msrb.mxu3 %v817_v56 }
 0x76c   :  { %v698_v58 = vsel %vm697_vm6, %v6261_v49, %v694_v57 }
 0x76d   :  { %v711_v59 = vmul.f32 %v698_v58, %v643_v52  ;;  %v1039_v52 = vld [vmem:[%s8637_s11 + $0x10] sm:$0xff] }
 0x76f   :  { %v718_v60 = vmul.f32 %v6943_v10, %v711_v59 }
 0x771   :  { %v725_v63 = vadd.f32 %v6949_v12, %v718_v60 }
 0x773   :  { %5806 = vmatmul.msk.f32.gmra.mxu2 %vm513_vm10, %v725_v63 }
 0x794   :  { %v660_v1 = vpop.xlane.xlu0 %659 }
 0x795   :  { %v664_v3 = vmul.f32 %v660_v1, %v6859_v21 }
 0x797   :  { %v668_v4 = vadd.f32 1e-05, %v664_v3 }
 0x799   :  { %6262 = vrsqrt.f32 %v668_v4  ;;  %vm705_vm8 = vweird.f32 %v668_v4 }
 0x79a   :  { %v813_v6 = vpop.xlane.xlu1 %812 }
 0x79b   :  { %6264 = vrcp.f32 %v813_v6 }
 0x79f   :  { %v6263_v7 = vpop.eup %6262 }
 0x7a0   :  { %v700_v8 = vmul.f32 %v6263_v7, %v668_v4  ;;  %vm706_vm7 = vweird.f32 %v6263_v7 }
 0x7a1   :  { %v6265_v9 = vpop.eup %6264  ;;  %vm707_vm9 = vmor %vm705_vm8, %vm706_vm7  ;;  %vm1415_vm7 = vcmask 523264  }
 0x7a2   :  { %v701_v11 = vmul.f32 %v6263_v7, %v700_v8  ;;  %v815_v13 = vmul.f32 %v6265_v9, %v6259_v40 }
 0x7a4   :  { %v702_v14 = vmul.f32 0.5, %v701_v11  ;;  %5810 = vmatmul.msk.f32.vlgmr.msrb.gmra.mxu3 %vm804_vm3, %v815_v13 }
 0x7a6   :  { %v703_v0 = vsub.f32 1.5, %v702_v14 }
 0x7a7   :  { %v882_v22 = vpop.permute.xlu0 %881 }
 0x7a8   :  { %v704_v15 = vmul.f32 %v6263_v7, %v703_v0 }
 0x7aa   :  { %v708_v16 = vsel %vm707_vm9, %v6263_v7, %v704_v15 }
 0x7ab   :  { %v712_v17 = vmul.f32 %v708_v16, %v644_v42 }
 0x7ad   :  { %v719_v18 = vmul.f32 %v6943_v10, %v712_v17 }
 0x7af   :  { %v726_v53 = vadd.f32 %v6949_v12, %v719_v18 }
 0x7b1   :  { %5807 = vmatmul.msk.f32.gmra.mxu2 %vm513_vm10, %v726_v53 }
 0x7b2   :  { %v844_v20 = vpop.permute.xlu1 %843 }
 0x7b3   :  { %5811 = vmatpush.xpose.msk.msra.mxu3 %vm513_vm10, %v844_v20 }
 0x7b6   :  { %5812 = vmatmul.msk.f32.vlgmr.msra.gmra.mxu3 %vm513_vm10, %v768_v33 }
 0x7b7   :  { %902 = vmatpush.msrb.mxu3 %v882_v22  ;;  %v1200_v22 = vld [vmem:[%s8641_s15 + $0x10] sm:$0xff] }
 0x7f6   :  { %v770_v23 = vpop.f32.mrf.mxu2 }
 0x7f7   :  { %v771_v24 = vadd.f32 %v6975_v31, %v770_v23  ;;  %v1199_v23 = vld [vmem:[%s8641_s15 + $0x8] sm:$0xff] }
 0x7f9   :  { %908 = vrot.lane.b32.xlu2 %v771_v24, %s6681_s4 }
 0x827   :  { %v839_v26 = vpop.f32.mrf.mxu3 }
 0x834   :  { %v773_v12 = vpop.f32.mrf.mxu2 }
 0x835   :  { %v7038_v27 = vadd.f32 %v6975_v31, %v773_v12  ;;  %v1037_v31 = vld [vmem:[%s8637_s11] sm:$0xff] }
 0x839   :  { %v866_v51 = vpop.f32.mrf.mxu3 }
 0x83a   :  { %v869_v29 = vmul.f32 0.17677669, %v866_v51 }
 0x83c   :  { %v870_v10 = vsel %vm804_vm3, %v869_v29, -inf }
 0x83d   :  { %871 = vmax.xlane.f32.xlu1 %v870_v10 }
 0x853   :  { %v909_v61 = vpop.permute.xlu2 %908 }
 0x854   :  { %5814 = vmatpush.xpose.msk.msrb.mxu0 %vm513_vm10, %v909_v61 }
 0x856   :  { %973 = vrot.lane.b32.xlu1 %v7038_v27, %s6681_s4 }
 0x857   :  { %5815 = vmatmul.msk.f32.vlgmr.msrb.gmra.mxu0 %vm513_vm10, %v771_v24 }
 0x858   :  { %1065 = vmatpush.msra.mxu0 %v1040_v30 }
 0x85a   :  { %1066 = vmatpush.msra.mxu0 %v1039_v52 }
 0x85c   :  { %1067 = vmatpush.msra.mxu0 %v1038_v34  ;;  %v7105_v34 = vld [vmem:[%s8639_s13] ss:$0 sm:$0xff] }
 0x85e   :  { %1068 = vmatpush.msra.mxu0 %v1037_v31 }
 0x85f   :  { %5820 = vmatmul.msk.f32.vlgmr.msra.gmra.mxu0 %vm513_vm10, %v839_v26 }
 0x8b0   :  { %v872_v62 = vpop.xlane.xlu1 %871 }
 0x8b1   :  { %v873_v2 = vsub.f32 %v869_v29, %v872_v62 }
 0x8b3   :  { %v874_v35 = vmul.f32 1.442695, %v873_v2  ;;  %v7110_v2 = vld [vmem:[%s8640_s14] ss:$0 sm:$0xff] }
 0x8b5   :  { %6266 = vpow2.f32 %v874_v35 }
 0x8bb   :  { %v6267_v42 = vpop.eup %6266 }
 0x8bc   :  { %v876_v36 = vsel %vm804_vm3, %v6267_v42, 0.0 }
 0x8bd   :  { %877 = vadd.xlane.f32.xlu2 %v876_v36 }
 0x8c8   :  { %v974_v44 = vpop.permute.xlu1 %973 }
 0x8c9   :  { %5817 = vmatpush.xpose.msk.msra.mxu3 %vm513_vm10, %v974_v44 }
 0x8d4   :  { %v931_v37 = vpop.f32.mrf.mxu0 }
 0x8d5   :  { %v934_v28 = vmul.f32 0.17677669, %v931_v37 }
 0x8d7   :  { %v935_v39 = vsel %vm804_vm3, %v934_v28, -inf }
 0x8d8   :  { %936 = vmax.xlane.f32.xlu0 %v935_v39 }
 0x8dc   :  { %v1070_v50 = vpop.f32.mrf.mxu0 }
 0x8dd   :  { %v1082_v54 = vadd.f32 %v1070_v50, %v6886_v5  ;;  %v7129_v50 = vld [vmem:[#allocation7] ss:$0 sm:$0xff] }
 0x8df   :  { %v7069_v32 = vadd.f32 %v7066_v55, %v1082_v54 }
 0x8e1   :  { %v1096_v56 = vsel %vm513_vm10, %v7069_v32, 0.0 }
 0x930   :  { %v878_v40 = vpop.xlane.xlu2 %877 }
 0x931   :  { %6268 = vrcp.f32 %v878_v40 }
 0x937   :  { %v6269_v41 = vpop.eup %6268 }
 0x938   :  { %v880_v45 = vmul.f32 %v6269_v41, %v6267_v42 }
 0x93a   :  { %5813 = vmatmul.msk.f32.vlgmr.msrb.gmra.mxu3 %vm804_vm3, %v880_v45 }
 0x942   :  { %5818 = vmatmul.msk.f32.vlgmr.msra.gmra.mxu3 %vm513_vm10, %v7038_v27 }
 0x94b   :  { %v937_v33 = vpop.xlane.xlu0 %936 }
 0x94c   :  { %v938_v46 = vsub.f32 %v934_v28, %v937_v33 }
 0x94e   :  { %v939_v47 = vmul.f32 1.442695, %v938_v46 }
 0x950   :  { %6270 = vpow2.f32 %v939_v47 }
 0x956   :  { %v6271_v48 = vpop.eup %6270 }
 0x957   :  { %v941_v49 = vsel %vm804_vm3, %v6271_v48, 0.0 }
 0x958   :  { %942 = vadd.xlane.f32.xlu2 %v941_v49 }
 0x970   :  { %946 = vrot.lane.b32.xlu2 %v771_v24, %s6682_s29  ;;  %v1198_v24 = vld [vmem:[%s8641_s15] sm:$0xff] }
 0x999   :  { %1097 = vadd.xlane.f32.xlu2 %v1096_v56 }
 0x9bd   :  { %v904_v57 = vpop.f32.mrf.mxu3 }
 0x9be   :  { %5821 = vmatmul.msk.f32.gmra.mxu0 %vm513_vm10, %v904_v57 }
 0x9c5   :  { %v996_v58 = vpop.f32.mrf.mxu3 }
 0x9c6   :  { %v999_v59 = vmul.f32 0.17677669, %v996_v58 }
 0x9c8   :  { %v1000_v60 = vsel %vm804_vm3, %v999_v59, -inf }
 0x9c9   :  { %1001 = vmax.xlane.f32.xlu1 %v1000_v60  ;;  %v1414_v60 = vld [vmem:[%s8643_s17 + $0x38] sm:$0xff] }
 0x9ca   :  { %1436 = vmatpush.msrb.mxu3 %v1414_v60 }
 0x9cb   :  { %v943_v5 = vpop.xlane.xlu2 %942 }
 0x9cc   :  { %6272 = vrcp.f32 %v943_v5  ;;  %v1413_v5 = vld [vmem:[%s8643_s17 + $0x30] sm:$0xff] }
 0x9cd   :  { %1437 = vmatpush.msrb.mxu3 %v1413_v5 }
 0x9d2   :  { %v6273_v63 = vpop.eup %6272 }
 0x9d3   :  { %v947_v1 = vpop.permute.xlu2 %946  ;;  %v945_v3 = vmul.f32 %v6273_v63, %v6271_v48  ;;  %v1412_v63 = vld [vmem:[%s8643_s17 + $0x28] sm:$0xff] }
 0x9d4   :  { %967 = vmatpush.msrb.mxu2 %v947_v1  ;;  %1438 = vmatpush.msrb.mxu3 %v1412_v63 }
 0x9d5   :  { %5816 = vmatmul.msk.f32.vlgmr.msrb.gmra.mxu2 %vm804_vm3, %v945_v3 }
 0xa0c   :  { %v1098_v4 = vpop.xlane.xlu2 %1097 }
 0xa0d   :  { %v1108_v6 = vmul.f32 %v1098_v4, %v6859_v21  ;;  %v1411_v4 = vld [vmem:[%s8643_s17 + $0x20] sm:$0xff] }
 0xa0e   :  { %1439 = vmatpush.msrb.mxu3 %v1411_v4 }
 0xa0f   :  { %v1112_v7 = vsub.f32 %v7069_v32, %v1108_v6 }
 0xa11   :  { %v1116_v8 = vmul.f32 %v1112_v7, %v1112_v7 }
 0xa13   :  { %v1120_v9 = vsel %vm513_vm10, %v1116_v8, 0.0  ;;  %v1410_v8 = vld [vmem:[%s8643_s17 + $0x18] sm:$0xff] }
 0xa14   :  { %1121 = vadd.xlane.f32.xlu1 %v1120_v9  ;;  %1440 = vmatpush.msrb.mxu3 %v1410_v8 }
 0xa3b   :  { %v1073_v11 = vpop.f32.mrf.mxu0 }
 0xa3c   :  { %v1083_v13 = vadd.f32 %v1073_v11, %v6906_v38  ;;  %v1002_v14 = vpop.xlane.xlu1 %1001  ;;  %v1201_v38 = vld [vmem:[%s8641_s15 + $0x18] sm:$0xff]  ;;  %v1409_v11 = vld [vmem:[%s8643_s17 + $0x10] sm:$0xff] }
 0xa3d   :  { %v1003_v0 = vsub.f32 %v999_v59, %v1002_v14  ;;  %1230 = vmatpush.msrb.mxu1 %v1201_v38  ;;  %1441 = vmatpush.msrb.mxu3 %v1409_v11 }
 0xa3e   :  { %v7081_v15 = vadd.f32 %v7066_v55, %v1083_v13 }
 0xa3f   :  { %v1004_v16 = vmul.f32 1.442695, %v1003_v0  ;;  %1231 = vmatpush.msrb.mxu1 %v1200_v22  ;;  %v1408_v0 = vld [vmem:[%s8643_s17 + $0x8] sm:$0xff] }
 0xa40   :  { %v1099_v17 = vsel %vm513_vm10, %v7081_v15, 0.0  ;;  %1442 = vmatpush.msrb.mxu3 %v1408_v0 }
 0xa41   :  { %6274 = vpow2.f32 %v1004_v16  ;;  %1100 = vadd.xlane.f32.xlu1 %v1099_v17  ;;  %1232 = vmatpush.msrb.mxu1 %v1199_v23 }
 0xa43   :  { %1233 = vmatpush.msrb.mxu1 %v1198_v24 }
 0xa47   :  { %v6275_v18 = vpop.eup %6274 }
 0xa48   :  { %v1006_v53 = vsel %vm804_vm3, %v6275_v18, 0.0 }
 0xa49   :  { %1007 = vadd.xlane.f32.xlu0 %v1006_v53 }
 0xa58   :  { %v969_v20 = vpop.f32.mrf.mxu2 }
 0xa59   :  { %5822 = vmatmul.msk.f32.gmra.mxu0 %vm513_vm10, %v969_v20 }
 0xa5d   :  { %1011 = vrot.lane.b32.xlu0 %v7038_v27, %s6682_s29 }
 0xa87   :  { %v1122_v26 = vpop.xlane.xlu1 %1121 }
 0xa88   :  { %v1132_v51 = vmul.f32 %v1122_v26, %v6859_v21 }
 0xa8a   :  { %v1136_v29 = vadd.f32 1e-05, %v1132_v51 }
 0xa8c   :  { %6276 = vrsqrt.f32 %v1136_v29  ;;  %vm1146_vm0 = vweird.f32 %v1136_v29 }
 0xa92   :  { %v6277_v10 = vpop.eup %6276 }
 0xa93   :  { %v1141_v12 = vmul.f32 %v6277_v10, %v1136_v29  ;;  %vm1147_vm11 = vweird.f32 %v6277_v10 }
 0xa94   :  { %vm1148_vm12 = vmor %vm1146_vm0, %vm1147_vm11 }
 0xa95   :  { %v1142_v30 = vmul.f32 %v6277_v10, %v1141_v12 }
 0xa97   :  { %v1143_v61 = vmul.f32 0.5, %v1142_v30 }
 0xa99   :  { %v1144_v27 = vsub.f32 1.5, %v1143_v61 }
 0xa9b   :  { %v1145_v52 = vmul.f32 %v6277_v10, %v1144_v27 }
 0xa9d   :  { %v1149_v31 = vsel %vm1148_vm12, %v6277_v10, %v1145_v52 }
 0xa9e   :  { %v1180_v62 = vmul.f32 %v1149_v31, %v1112_v7 }
 0xaa0   :  { %v1187_v35 = vmul.f32 %v7105_v34, %v1180_v62 }
 0xaa2   :  { %v1194_v42 = vadd.f32 %v7110_v2, %v1187_v35 }
 0xaa4   :  { %5824 = vmatmul.msk.f32.vlgmr.msrb.gmra.mxu1 %vm513_vm10, %v1194_v42 }
 0xab4   :  { %v1101_v36 = vpop.xlane.xlu1 %1100 }
 0xab5   :  { %v1109_v44 = vmul.f32 %v1101_v36, %v6859_v21 }
 0xab7   :  { %v7117_v37 = vsub.f32 %v7081_v15, %v1109_v44 }
 0xab9   :  { %v1117_v28 = vmul.f32 %v7117_v37, %v7117_v37 }
 0xabb   :  { %v1123_v39 = vsel %vm513_vm10, %v1117_v28, 0.0 }
 0xabc   :  { %1124 = vadd.xlane.f32.xlu1 %v1123_v39  ;;  %v1008_v40 = vpop.xlane.xlu0 %1007 }
 0xabd   :  { %6278 = vrcp.f32 %v1008_v40 }
 0xac3   :  { %v6279_v41 = vpop.eup %6278 }
 0xac4   :  { %v1010_v45 = vmul.f32 %v6279_v41, %v6275_v18  ;;  %v1407_v18 = vld [vmem:[%s8643_s17] sm:$0xff] }
 0xac5   :  { %1443 = vmatpush.msrb.mxu3 %v1407_v18 }
 0xacf   :  { %v1012_v33 = vpop.permute.xlu0 %1011 }
 0xad0   :  { %1032 = vmatpush.msra.mxu2 %v1012_v33 }
 0xad1   :  { %5819 = vmatmul.msk.f32.vlgmr.msra.gmra.mxu2 %vm804_vm3, %v1010_v45 }
 0xad6   :  { %v1076_v46 = vpop.f32.mrf.mxu0 }
 0xad7   :  { %v1084_v47 = vadd.f32 %v1076_v46, %v6997_v19 }
 0xad9   :  { %v7125_v48 = vadd.f32 %v7066_v55, %v1084_v47 }
 0xadb   :  { %v1102_v49 = vsel %vm513_vm10, %v7125_v48, 0.0 }
 0xadc   :  { %1103 = vadd.xlane.f32.xlu0 %v1102_v49 }
 0xb21   :  { %v1235_v54 = vpop.f32.mrf.mxu1 }
 0xb22   :  { %v7132_v56 = vadd.f32 %v7129_v50, %v1235_v54 }
 0xb24   :  { %v7135_v57 = vmul.f32 0.70710677, %v7132_v56  ;;  %v1247_v5 = vmul.f32 0.5, %v7132_v56 }
 0xb26   :  { %v1263_v58 = vand.u32 2147483647, %v7135_v57  ;;  %vm1255_vm6 = vcmp.ge.f32.partialorder %v7135_v57, 0.0 }
 0xb28   :  { %v1267_v59 = vmul.f32 0.3275911, %v1263_v58  ;;  %v1371_v26 = vsub.f32 0.0, %v1263_v58 }
 0xb2a   :  { %v1271_v19 = vadd.f32 1.0, %v1267_v59  ;;  %v1375_v30 = vmul.f32 %v1371_v26, %v1263_v58 }
 0xb2c   :  { %6280 = vrcp.f32 %v1271_v19  ;;  %v1286_v14 = vand.u32 2147483648, %v1271_v19  ;;  %v1284_v17 = vand.u32 2147483647, %v1271_v19  ;;  %vm1280_vm14 = vweird.f32 %v1271_v19 }
 0xb2d   :  { %v1379_v62 = vmul.f32 1.442695, %v1375_v30 }
 0xb2e   :  { %v1287_v38 = vor.u32 1.1754944e-38, %v1286_v14  ;;  %vm1285_vm1 = vcmp.eq.f32.partialorder %v1284_v17, 8.507059e+37 }
 0xb2f   :  { %v1125_v1 = vpop.xlane.xlu1 %1124 }
 0xb30   :  { %v1133_v3 = vmul.f32 %v1125_v1, %v6859_v21 }
 0xb32   :  { %v6281_v6 = vpop.eup %6280  ;;  %v1137_v7 = vadd.f32 1e-05, %v1133_v3 }
 0xb33   :  { %v1276_v9 = vmul.f32 %v6281_v6, %v1271_v19  ;;  %vm1281_vm13 = vweird.f32 %v6281_v6 }
 0xb34   :  { %6282 = vrsqrt.f32 %v1137_v7  ;;  %vm1282_vm15 = vmor %vm1280_vm14, %vm1281_vm13  ;;  %vm1156_vm4 = vweird.f32 %v1137_v7 }
 0xb35   :  { %v1277_v13 = vsub.f32 1.0, %v1276_v9  ;;  %6284 = vpow2.f32 %v1379_v62 }
 0xb37   :  { %v1278_v16 = vmul.f32 %v6281_v6, %v1277_v13 }
 0xb39   :  { %v1279_v53 = vadd.f32 %v6281_v6, %v1278_v16 }
 0xb3a   :  { %v6283_v20 = vpop.eup %6282 }
 0xb3b   :  { %v1283_v22 = vsel %vm1282_vm15, %v6281_v6, %v1279_v53  ;;  %v1151_v23 = vmul.f32 %v6283_v20, %v1137_v7  ;;  %vm1157_vm2 = vweird.f32 %v6283_v20  ;;  %v6285_v33 = vpop.eup %6284 }
 0xb3c   :  { %v1288_v24 = vsel %vm1285_vm1, %v1287_v38, %v1283_v22  ;;  %vm1158_vm5 = vmor %vm1156_vm4, %vm1157_vm2 }
 0xb3d   :  { %v1335_v51 = vmul.f32 1.0614054, %v1288_v24  ;;  %v1152_v29 = vmul.f32 %v6283_v20, %v1151_v23 }
 0xb3f   :  { %v1339_v10 = vadd.f32 -1.4531521, %v1335_v51  ;;  %v1153_v12 = vmul.f32 0.5, %v1152_v29 }
 0xb41   :  { %v1343_v61 = vmul.f32 %v1339_v10, %v1288_v24  ;;  %v1154_v27 = vsub.f32 1.5, %v1153_v12 }
 0xb43   :  { %v1347_v52 = vadd.f32 1.4214138, %v1343_v61  ;;  %v1155_v31 = vmul.f32 %v6283_v20, %v1154_v27 }
 0xb45   :  { %v1351_v35 = vmul.f32 %v1347_v52, %v1288_v24  ;;  %v1159_v42 = vsel %vm1158_vm5, %v6283_v20, %v1155_v31 }
 0xb46   :  { %v1181_v36 = vmul.f32 %v1159_v42, %v7117_v37  ;;  %v1259_v37 = vsel %vm1255_vm6, 1.0, %v6679_v43 }
 0xb47   :  { %v1355_v44 = vadd.f32 -0.28449672, %v1351_v35 }
 0xb48   :  { %v1188_v28 = vmul.f32 %v7105_v34, %v1181_v36 }
 0xb49   :  { %v1359_v39 = vmul.f32 %v1355_v44, %v1288_v24 }
 0xb4a   :  { %v1195_v40 = vadd.f32 %v7110_v2, %v1188_v28 }
 0xb4b   :  { %v1363_v41 = vadd.f32 0.2548296, %v1359_v39 }
 0xb4c   :  { %5825 = vmatmul.msk.f32.gmra.mxu1 %vm513_vm10, %v1195_v40 }
 0xb4d   :  { %v1367_v45 = vmul.f32 %v1363_v41, %v1288_v24  ;;  %v7189_v24 = vld [vmem:[#allocation8] ss:$0 sm:$0xff] }
 0xb4f   :  { %v1387_v46 = vmul.f32 %v6285_v33, %v1367_v45  ;;  %v1104_v47 = vpop.xlane.xlu0 %1103 }
 0xb50   :  { %v1110_v49 = vmul.f32 %v1104_v47, %v6859_v21 }
 0xb51   :  { %v1391_v54 = vsub.f32 1.0, %v1387_v46 }
 0xb52   :  { %v1114_v58 = vsub.f32 %v7125_v48, %v1110_v49 }
 0xb53   :  { %v1395_v59 = vmul.f32 %v1391_v54, %v1259_v37 }
 0xb54   :  { %v1034_v19 = vpop.f32.mrf.mxu2  ;;  %v1118_v60 = vmul.f32 %v1114_v58, %v1114_v58 }
 0xb55   :  { %v1399_v63 = vadd.f32 1.0, %v1395_v59  ;;  %5823 = vmatmul.msk.f32.gmra.mxu0 %vm513_vm10, %v1034_v19 }
 0xb56   :  { %v1126_v1 = vsel %vm513_vm10, %v1118_v60, 0.0 }
 0xb57   :  { %v1403_v57 = vmul.f32 %v1399_v63, %v1247_v5  ;;  %1127 = vadd.xlane.f32.xlu2 %v1126_v1 }
 0xb59   :  { %5828 = vmatmul.msk.f32.vlgmr.msrb.gmra.mxu3 %vm1415_vm7, %v1403_v57 }
 0xbc9   :  { %v1238_v3 = vpop.f32.mrf.mxu1 }
 0xbca   :  { %v7176_v4 = vadd.f32 %v7129_v50, %v1238_v3  ;;  %v1128_v6 = vpop.xlane.xlu2 %1127 }
 0xbcb   :  { %v1134_v7 = vmul.f32 %v1128_v6, %v6859_v21 }
 0xbcc   :  { %v7180_v8 = vmul.f32 0.70710677, %v7176_v4  ;;  %v1248_v1 = vmul.f32 0.5, %v7176_v4 }
 0xbcd   :  { %v1138_v56 = vadd.f32 1e-05, %v1134_v7 }
 0xbce   :  { %v1264_v9 = vand.u32 2147483647, %v7180_v8  ;;  %vm1256_vm15 = vcmp.ge.f32.partialorder %v7180_v8, 0.0 }
 0xbcf   :  { %6286 = vrsqrt.f32 %v1138_v56  ;;  %vm1166_vm9 = vweird.f32 %v1138_v56  ;;  %v1260_v5 = vsel %vm1256_vm15, 1.0, %v6679_v43 }
 0xbd0   :  { %v1268_v11 = vmul.f32 0.3275911, %v1264_v9  ;;  %v1372_v36 = vsub.f32 0.0, %v1264_v9 }
 0xbd2   :  { %v1272_v13 = vadd.f32 1.0, %v1268_v11  ;;  %v1079_v14 = vpop.f32.mrf.mxu0  ;;  %v1376_v41 = vmul.f32 %v1372_v36, %v1264_v9 }
 0xbd3   :  { %v1085_v0 = vadd.f32 %v1079_v14, %v7003_v25 }
 0xbd4   :  { %6288 = vrcp.f32 %v1272_v13  ;;  %v1299_v61 = vand.u32 2147483647, %v1272_v13  ;;  %vm1295_vm12 = vweird.f32 %v1272_v13  ;;  %v1381_v46 = vmul.f32 1.442695, %v1376_v41 }
 0xbd5   :  { %v6287_v16 = vpop.eup %6286  ;;  %v7185_v17 = vadd.f32 %v7066_v55, %v1085_v0  ;;  %v1301_v55 = vand.u32 2147483648, %v1272_v13 }
 0xbd6   :  { %v1161_v18 = vmul.f32 %v6287_v16, %v1138_v56  ;;  %vm1167_vm8 = vweird.f32 %v6287_v16  ;;  %vm1300_vm14 = vcmp.eq.f32.partialorder %v1299_v61, 8.507059e+37  ;;  %6290 = vpow2.f32 %v1381_v46 }
 0xbd7   :  { %v1105_v53 = vsel %vm513_vm10, %v7185_v17, 0.0  ;;  %vm1168_vm11 = vmor %vm1166_vm9, %vm1167_vm8 }
 0xbd8   :  { %v1162_v20 = vmul.f32 %v6287_v16, %v1161_v18  ;;  %1106 = vadd.xlane.f32.xlu1 %v1105_v53 }
 0xbda   :  { %v6289_v38 = vpop.eup %6288  ;;  %v1163_v22 = vmul.f32 0.5, %v1162_v20 }
 0xbdb   :  { %v1291_v23 = vmul.f32 %v6289_v38, %v1272_v13  ;;  %vm1296_vm0 = vweird.f32 %v6289_v38 }
 0xbdc   :  { %v1164_v26 = vsub.f32 1.5, %v1163_v22  ;;  %v1445_v51 = vpop.f32.mrf.mxu3  ;;  %vm1297_vm13 = vmor %vm1295_vm12, %vm1296_vm0  ;;  %v6291_v59 = vpop.eup %6290 }
 0xbdd   :  { %v1292_v25 = vsub.f32 1.0, %v1291_v23  ;;  %v1457_v29 = vadd.f32 %v1445_v51, %v7069_v32  ;;  %v1302_v32 = vor.u32 1.1754944e-38, %v1301_v55 }
 0xbde   :  { %v1165_v10 = vmul.f32 %v6287_v16, %v1164_v26 }
 0xbdf   :  { %v1293_v12 = vmul.f32 %v6289_v38, %v1292_v25  ;;  %v7193_v30 = vadd.f32 %v7189_v24, %v1457_v29 }
 0xbe0   :  { %v1169_v27 = vsel %vm1168_vm11, %v6287_v16, %v1165_v10 }
 0xbe1   :  { %v1473_v52 = vsel %vm513_vm10, %v7193_v30, 0.0  ;;  %v1182_v31 = vmul.f32 %v1169_v27, %v1114_v58  ;;  %v1294_v62 = vadd.f32 %v6289_v38, %v1293_v12 }
 0xbe2   :  { %1474 = vadd.xlane.f32.xlu1 %v1473_v52 }
 0xbe3   :  { %v1189_v35 = vmul.f32 %v7105_v34, %v1182_v31  ;;  %v1298_v42 = vsel %vm1297_vm13, %v6289_v38, %v1294_v62 }
 0xbe4   :  { %v1303_v44 = vsel %vm1300_vm14, %v1302_v32, %v1298_v42 }
 0xbe5   :  { %v1196_v28 = vadd.f32 %v7110_v2, %v1189_v35  ;;  %v1336_v39 = vmul.f32 1.0614054, %v1303_v44 }
 0xbe7   :  { %5826 = vmatmul.msk.f32.gmra.mxu1 %vm513_vm10, %v1196_v28  ;;  %v1340_v40 = vadd.f32 -1.4531521, %v1336_v39 }
 0xbe9   :  { %v1344_v45 = vmul.f32 %v1340_v40, %v1303_v44 }
 0xbeb   :  { %v1348_v33 = vadd.f32 1.4214138, %v1344_v45 }
 0xbed   :  { %v1352_v47 = vmul.f32 %v1348_v33, %v1303_v44 }
 0xbef   :  { %v1356_v49 = vadd.f32 -0.28449672, %v1352_v47 }
 0xbf1   :  { %v1360_v54 = vmul.f32 %v1356_v49, %v1303_v44 }
 0xbf3   :  { %v1364_v37 = vadd.f32 0.2548296, %v1360_v54 }
 0xbf5   :  { %v1368_v58 = vmul.f32 %v1364_v37, %v1303_v44 }
 0xbf7   :  { %v1388_v19 = vmul.f32 %v6291_v59, %v1368_v58 }
 0xbf9   :  { %v1392_v60 = vsub.f32 1.0, %v1388_v19 }
 0xbfb   :  { %v1396_v63 = vmul.f32 %v1392_v60, %v1260_v5 }
 0xbfd   :  { %v1400_v57 = vadd.f32 1.0, %v1396_v63  ;;  %v5837_v63 = vld [vmem:[%s8635_s9 + $0x38] sm:$0xff] }
 0xbfe   :  { %1609 = vmatpush.msrb.mxu2 %v5837_v63 }
 0xbff   :  { %v1404_v3 = vmul.f32 %v1400_v57, %v1248_v1  ;;  %v5836_v57 = vld [vmem:[%s8635_s9 + $0x30] sm:$0xff] }
 0xc00   :  { %1610 = vmatpush.msrb.mxu2 %v5836_v57 }
 0xc01   :  { %5829 = vmatmul.msk.f32.gmra.mxu3 %vm1415_vm7, %v1404_v3 }
 0xc4b   :  { %v1107_v6 = vpop.xlane.xlu1 %1106 }
 0xc4c   :  { %v1111_v7 = vmul.f32 %v1107_v6, %v6859_v21  ;;  %v5835_v6 = vld [vmem:[%s8635_s9 + $0x28] sm:$0xff] }
 0xc4d   :  { %1611 = vmatpush.msrb.mxu2 %v5835_v6 }
 0xc4e   :  { %v7206_v56 = vsub.f32 %v7185_v17, %v1111_v7  ;;  %v5834_v7 = vld [vmem:[%s8635_s9 + $0x20] sm:$0xff] }
 0xc4f   :  { %1612 = vmatpush.msrb.mxu2 %v5834_v7 }
 0xc50   :  { %v1119_v8 = vmul.f32 %v7206_v56, %v7206_v56 }
 0xc52   :  { %v1129_v9 = vsel %vm513_vm10, %v1119_v8, 0.0 }
 0xc53   :  { %1130 = vadd.xlane.f32.xlu2 %v1129_v9 }
 0xc55   :  { %v1475_v11 = vpop.xlane.xlu1 %1474 }
 0xc56   :  { %v1485_v13 = vmul.f32 %v1475_v11, %v6859_v21 }
 0xc58   :  { %v7213_v4 = vsub.f32 %v7193_v30, %v1485_v13 }
 0xc5a   :  { %v1493_v14 = vmul.f32 %v7213_v4, %v7213_v4 }
 0xc5c   :  { %v1497_v0 = vsel %vm513_vm10, %v1493_v14, 0.0 }
 0xc5d   :  { %1498 = vadd.xlane.f32.xlu2 %v1497_v0 }
 0xc64   :  { %v1241_v16 = vpop.f32.mrf.mxu1 }
 0xc65   :  { %v1242_v18 = vadd.f32 %v7129_v50, %v1241_v16 }
 0xc67   :  { %v1253_v53 = vmul.f32 0.70710677, %v1242_v18  ;;  %v1249_v59 = vmul.f32 0.5, %v1242_v18 }
 0xc69   :  { %v1265_v20 = vand.u32 2147483647, %v1253_v53  ;;  %vm1257_vm6 = vcmp.ge.f32.partialorder %v1253_v53, 0.0 }
 0xc6b   :  { %v1269_v38 = vmul.f32 0.3275911, %v1265_v20  ;;  %v1373_v27 = vsub.f32 0.0, %v1265_v20 }
 0xc6d   :  { %v1273_v22 = vadd.f32 1.0, %v1269_v38  ;;  %v1377_v32 = vmul.f32 %v1373_v27, %v1265_v20 }
 0xc6f   :  { %6292 = vrcp.f32 %v1273_v22  ;;  %v1316_v25 = vand.u32 2147483648, %v1273_v22  ;;  %v1314_v10 = vand.u32 2147483647, %v1273_v22  ;;  %vm1310_vm2 = vweird.f32 %v1273_v22 }
 0xc70   :  { %v1383_v28 = vmul.f32 1.442695, %v1377_v32 }
 0xc71   :  { %v1317_v12 = vor.u32 1.1754944e-38, %v1316_v25  ;;  %vm1315_vm5 = vcmp.eq.f32.partialorder %v1314_v10, 8.507059e+37 }
 0xc72   :  { %6294 = vpow2.f32 %v1383_v28 }
 0xc75   :  { %v6293_v23 = vpop.eup %6292 }
 0xc76   :  { %v1306_v26 = vmul.f32 %v6293_v23, %v1273_v22  ;;  %vm1311_vm1 = vweird.f32 %v6293_v23 }
 0xc77   :  { %vm1312_vm4 = vmor %vm1310_vm2, %vm1311_vm1 }
 0xc78   :  { %v1307_v51 = vsub.f32 1.0, %v1306_v26  ;;  %v6295_v49 = vpop.eup %6294 }
 0xc7a   :  { %v1308_v29 = vmul.f32 %v6293_v23, %v1307_v51 }
 0xc7c   :  { %v1309_v55 = vadd.f32 %v6293_v23, %v1308_v29 }
 0xc7e   :  { %v1313_v61 = vsel %vm1312_vm4, %v6293_v23, %v1309_v55 }
 0xc7f   :  { %v1318_v52 = vsel %vm1315_vm5, %v1317_v12, %v1313_v61  ;;  %v7248_v12 = vld [vmem:[%s8633_s7 + $0x1] ss:$0 sm:$0xff] }
 0xc80   :  { %v1337_v31 = vmul.f32 1.0614054, %v1318_v52 }
 0xc82   :  { %v1341_v62 = vadd.f32 -1.4531521, %v1337_v31 }
 0xc84   :  { %v1448_v35 = vpop.f32.mrf.mxu3  ;;  %v1345_v42 = vmul.f32 %v1341_v62, %v1318_v52 }
 0xc85   :  { %v1458_v36 = vadd.f32 %v1448_v35, %v7081_v15  ;;  %v1261_v15 = vsel %vm1257_vm6, 1.0, %v6679_v43 }
 0xc86   :  { %v1349_v44 = vadd.f32 1.4214138, %v1345_v42 }
 0xc87   :  { %v7221_v39 = vadd.f32 %v7189_v24, %v1458_v36 }
 0xc88   :  { %v1353_v40 = vmul.f32 %v1349_v44, %v1318_v52 }
 0xc89   :  { %v1476_v41 = vsel %vm513_vm10, %v7221_v39, 0.0 }
 0xc8a   :  { %1477 = vadd.xlane.f32.xlu1 %v1476_v41  ;;  %v1357_v45 = vadd.f32 -0.28449672, %v1353_v40 }
 0xc8c   :  { %v1361_v33 = vmul.f32 %v1357_v45, %v1318_v52 }
 0xc8e   :  { %v1365_v46 = vadd.f32 0.2548296, %v1361_v33 }
 0xc90   :  { %v1369_v47 = vmul.f32 %v1365_v46, %v1318_v52 }
 0xc92   :  { %v1389_v54 = vmul.f32 %v6295_v49, %v1369_v47  ;;  %v7276_v47 = vld [vmem:[%s8636_s10 + $0x1] ss:$0 sm:$0xff] }
 0xc94   :  { %v1393_v37 = vsub.f32 1.0, %v1389_v54 }
 0xc96   :  { %v1397_v58 = vmul.f32 %v1393_v37, %v1261_v15 }
 0xc98   :  { %v1401_v19 = vadd.f32 1.0, %v1397_v58 }
 0xc9a   :  { %v1405_v60 = vmul.f32 %v1401_v19, %v1249_v59 }
 0xc9c   :  { %5830 = vmatmul.msk.f32.gmra.mxu3 %vm1415_vm7, %v1405_v60 }
 0xcc6   :  { %v1131_v5 = vpop.xlane.xlu2 %1130 }
 0xcc7   :  { %v1135_v1 = vmul.f32 %v1131_v5, %v6859_v21 }
 0xcc9   :  { %v1139_v3 = vadd.f32 1e-05, %v1135_v1 }
 0xccb   :  { %6296 = vrsqrt.f32 %v1139_v3  ;;  %vm1176_vm9 = vweird.f32 %v1139_v3 }
 0xcd0   :  { %v1499_v8 = vpop.xlane.xlu2 %1498 }
 0xcd1   :  { %v6297_v9 = vpop.eup %6296  ;;  %v1509_v11 = vmul.f32 %v1499_v8, %v6859_v21 }
 0xcd2   :  { %v1171_v13 = vmul.f32 %v6297_v9, %v1139_v3  ;;  %vm1177_vm8 = vweird.f32 %v6297_v9 }
 0xcd3   :  { %v1513_v14 = vadd.f32 1e-05, %v1509_v11  ;;  %vm1178_vm11 = vmor %vm1176_vm9, %vm1177_vm8 }
 0xcd4   :  { %v1172_v0 = vmul.f32 %v6297_v9, %v1171_v13 }
 0xcd5   :  { %6298 = vrsqrt.f32 %v1513_v14  ;;  %vm1523_vm12 = vweird.f32 %v1513_v14 }
 0xcd6   :  { %v1173_v16 = vmul.f32 0.5, %v1172_v0 }
 0xcd8   :  { %v1174_v18 = vsub.f32 1.5, %v1173_v16 }
 0xcda   :  { %v1175_v53 = vmul.f32 %v6297_v9, %v1174_v18 }
 0xcdb   :  { %v6299_v20 = vpop.eup %6298 }
 0xcdc   :  { %v1518_v38 = vmul.f32 %v6299_v20, %v1513_v14  ;;  %v1179_v22 = vsel %vm1178_vm11, %v6297_v9, %v1175_v53  ;;  %vm1524_vm0 = vweird.f32 %v6299_v20 }
 0xcdd   :  { %v1183_v23 = vmul.f32 %v1179_v22, %v7206_v56  ;;  %vm1525_vm13 = vmor %vm1523_vm12, %vm1524_vm0 }
 0xcde   :  { %v1519_v26 = vmul.f32 %v6299_v20, %v1518_v38 }
 0xcdf   :  { %v1190_v51 = vmul.f32 %v7105_v34, %v1183_v23  ;;  %v7254_v34 = vld [vmem:[%s8634_s8 + $0x1] ss:$0 sm:$0xff] }
 0xce0   :  { %v1520_v25 = vmul.f32 0.5, %v1519_v26 }
 0xce1   :  { %v1197_v29 = vadd.f32 %v7110_v2, %v1190_v51 }
 0xce2   :  { %v1521_v10 = vsub.f32 1.5, %v1520_v25 }
 0xce3   :  { %5827 = vmatmul.msk.f32.gmra.mxu1 %vm513_vm10, %v1197_v29 }
 0xce4   :  { %v1522_v55 = vmul.f32 %v6299_v20, %v1521_v10 }
 0xce6   :  { %v1526_v61 = vsel %vm1525_vm13, %v6299_v20, %v1522_v55 }
 0xce7   :  { %v1557_v56 = vmul.f32 %v1526_v61, %v7213_v4 }
 0xce9   :  { %v1564_v2 = vmul.f32 %v7248_v12, %v1557_v56 }
 0xceb   :  { %v1571_v27 = vadd.f32 %v7254_v34, %v1564_v2 }
 0xced   :  { %5839 = vmatmul.msk.f32.vlgmr.msrb.gmra.mxu2 %vm513_vm10, %v1571_v27 }
 0xcfd   :  { %v1478_v52 = vpop.xlane.xlu1 %1477 }
 0xcfe   :  { %v1486_v31 = vmul.f32 %v1478_v52, %v6859_v21 }
 0xd00   :  { %v7261_v62 = vsub.f32 %v7221_v39, %v1486_v31 }
 0xd02   :  { %v1494_v4 = vmul.f32 %v7261_v62, %v7261_v62 }
 0xd04   :  { %v1500_v32 = vsel %vm513_vm10, %v1494_v4, 0.0 }
 0xd05   :  { %1501 = vadd.xlane.f32.xlu0 %v1500_v32 }
 0xd1f   :  { %v1451_v35 = vpop.f32.mrf.mxu3 }
 0xd20   :  { %v1459_v42 = vadd.f32 %v1451_v35, %v7125_v48 }
 0xd22   :  { %v7268_v36 = vadd.f32 %v7189_v24, %v1459_v42 }
 0xd24   :  { %v1479_v44 = vsel %vm513_vm10, %v7268_v36, 0.0 }
 0xd25   :  { %1480 = vadd.xlane.f32.xlu2 %v1479_v44 }
 0xd60   :  { %v1244_v28 = vpop.f32.mrf.mxu1 }
 0xd61   :  { %v1245_v40 = vadd.f32 %v7129_v50, %v1244_v28 }
 0xd63   :  { %v1254_v41 = vmul.f32 0.70710677, %v1245_v40  ;;  %v1250_v4 = vmul.f32 0.5, %v1245_v40 }
 0xd65   :  { %v1266_v45 = vand.u32 2147483647, %v1254_v41  ;;  %vm1258_vm8 = vcmp.ge.f32.partialorder %v1254_v41, 0.0 }
 0xd66   :  { %v1262_v2 = vsel %vm1258_vm8, 1.0, %v6679_v43 }
 0xd67   :  { %v1270_v33 = vmul.f32 0.3275911, %v1266_v45  ;;  %v1374_v57 = vsub.f32 0.0, %v1266_v45 }
 0xd69   :  { %v1274_v46 = vadd.f32 1.0, %v1270_v33  ;;  %v1378_v9 = vmul.f32 %v1374_v57, %v1266_v45 }
 0xd6b   :  { %6300 = vrcp.f32 %v1274_v46  ;;  %v1331_v15 = vand.u32 2147483648, %v1274_v46  ;;  %v1329_v59 = vand.u32 2147483647, %v1274_v46  ;;  %vm1325_vm15 = vweird.f32 %v1274_v46 }
 0xd6c   :  { %v1385_v0 = vmul.f32 1.442695, %v1378_v9 }
 0xd6d   :  { %v1332_v63 = vor.u32 1.1754944e-38, %v1331_v15  ;;  %vm1330_vm2 = vcmp.eq.f32.partialorder %v1329_v59, 8.507059e+37 }
 0xd70   :  { %v1614_v48 = vpop.f32.mrf.mxu2 }
 0xd71   :  { %v6301_v49 = vpop.eup %6300  ;;  %v7279_v54 = vadd.f32 %v7276_v47, %v1614_v48 }
 0xd72   :  { %v1321_v37 = vmul.f32 %v6301_v49, %v1274_v46  ;;  %vm1326_vm14 = vweird.f32 %v6301_v49 }
 0xd73   :  { %1627 = vrot.lane.b32.xlu1 %v7279_v54, %s6681_s4  ;;  %vm1327_vm1 = vmor %vm1325_vm15, %vm1326_vm14 }
 0xd74   :  { %v1322_v50 = vsub.f32 1.0, %v1321_v37 }
 0xd76   :  { %v1323_v58 = vmul.f32 %v6301_v49, %v1322_v50 }
 0xd78   :  { %v1502_v19 = vpop.xlane.xlu0 %1501  ;;  %v1324_v60 = vadd.f32 %v6301_v49, %v1323_v58 }
 0xd79   :  { %v1510_v5 = vmul.f32 %v1502_v19, %v6859_v21 }
 0xd7a   :  { %v1328_v1 = vsel %vm1327_vm1, %v6301_v49, %v1324_v60 }
 0xd7b   :  { %v1514_v3 = vadd.f32 1e-05, %v1510_v5  ;;  %v1333_v6 = vsel %vm1330_vm2, %v1332_v63, %v1328_v1 }
 0xd7c   :  { %v1338_v7 = vmul.f32 1.0614054, %v1333_v6 }
 0xd7d   :  { %6302 = vrsqrt.f32 %v1514_v3  ;;  %vm1533_vm5 = vweird.f32 %v1514_v3 }
 0xd7e   :  { %v1342_v8 = vadd.f32 -1.4531521, %v1338_v7  ;;  %6304 = vpow2.f32 %v1385_v0 }
 0xd80   :  { %v1346_v11 = vmul.f32 %v1342_v8, %v1333_v6 }
 0xd82   :  { %v1350_v13 = vadd.f32 1.4214138, %v1346_v11 }
 0xd83   :  { %v6303_v14 = vpop.eup %6302 }
 0xd84   :  { %v1528_v16 = vmul.f32 %v6303_v14, %v1514_v3  ;;  %v1354_v18 = vmul.f32 %v1350_v13, %v1333_v6  ;;  %vm1534_vm4 = vweird.f32 %v6303_v14  ;;  %v6305_v29 = vpop.eup %6304 }
 0xd85   :  { %vm1535_vm6 = vmor %vm1533_vm5, %vm1534_vm4 }
 0xd86   :  { %v1529_v53 = vmul.f32 %v6303_v14, %v1528_v16  ;;  %v1358_v20 = vadd.f32 -0.28449672, %v1354_v18 }
 0xd88   :  { %v1530_v38 = vmul.f32 0.5, %v1529_v53  ;;  %v1362_v22 = vmul.f32 %v1358_v20, %v1333_v6 }
 0xd8a   :  { %v1531_v23 = vsub.f32 1.5, %v1530_v38  ;;  %v1366_v26 = vadd.f32 0.2548296, %v1362_v22 }
 0xd8c   :  { %v1532_v51 = vmul.f32 %v6303_v14, %v1531_v23  ;;  %v1370_v25 = vmul.f32 %v1366_v26, %v1333_v6 }
 0xd8e   :  { %v1536_v10 = vsel %vm1535_vm6, %v6303_v14, %v1532_v51  ;;  %v1390_v55 = vmul.f32 %v6305_v29, %v1370_v25 }
 0xd8f   :  { %v1558_v61 = vmul.f32 %v1536_v10, %v7261_v62 }
 0xd90   :  { %v1394_v56 = vsub.f32 1.0, %v1390_v55 }
 0xd91   :  { %v1565_v27 = vmul.f32 %v7248_v12, %v1558_v61 }
 0xd92   :  { %v1398_v52 = vmul.f32 %v1394_v56, %v1262_v2 }
 0xd93   :  { %v1572_v31 = vadd.f32 %v7254_v34, %v1565_v27 }
 0xd94   :  { %v1402_v32 = vadd.f32 1.0, %v1398_v52 }
 0xd95   :  { %5840 = vmatmul.msk.f32.gmra.mxu2 %vm513_vm10, %v1572_v31 }
 0xd96   :  { %v1406_v35 = vmul.f32 %v1402_v32, %v1250_v4 }
 0xd98   :  { %5831 = vmatmul.msk.f32.gmra.mxu3 %vm1415_vm7, %v1406_v35  ;;  %v1481_v42 = vpop.xlane.xlu2 %1480 }
 0xd99   :  { %v1487_v44 = vmul.f32 %v1481_v42, %v6859_v21 }
 0xd9b   :  { %v1491_v62 = vsub.f32 %v7268_v36, %v1487_v44 }
 0xd9d   :  { %v1495_v28 = vmul.f32 %v1491_v62, %v1491_v62 }
 0xd9f   :  { %v1503_v41 = vsel %vm513_vm10, %v1495_v28, 0.0 }
 0xda0   :  { %1504 = vadd.xlane.f32.xlu2 %v1503_v41  ;;  %v5857_v41 = vld [vmem:[%s8637_s11 + $0x30] sm:$0xff] }
 0xde5   :  { %v1628_v45 = vpop.permute.xlu1 %1627 }
 0xde6   :  { %5843 = vmatpush.xpose.msk.msrb.mxu0 %vm513_vm10, %v1628_v45  ;;  %v5856_v45 = vld [vmem:[%s8637_s11 + $0x28] sm:$0xff] }
 0xde9   :  { %5844 = vmatmul.msk.f32.vlgmr.msrb.gmra.mxu0 %vm513_vm10, %v7279_v54 }
 0xe13   :  { %v1505_v40 = vpop.xlane.xlu2 %1504 }
 0xe14   :  { %v1511_v33 = vmul.f32 %v1505_v40, %v6859_v21 }
 0xe16   :  { %v1515_v46 = vadd.f32 1e-05, %v1511_v33 }
 0xe18   :  { %6306 = vrsqrt.f32 %v1515_v46  ;;  %v1617_v48 = vpop.f32.mrf.mxu2  ;;  %vm1543_vm11 = vweird.f32 %v1515_v46 }
 0xe19   :  { %v7298_v49 = vadd.f32 %v7276_v47, %v1617_v48 }
 0xe1b   :  { %v1454_v37 = vpop.f32.mrf.mxu3  ;;  %1692 = vrot.lane.b32.xlu1 %v7298_v49, %s6681_s4 }
 0xe1c   :  { %v1460_v50 = vadd.f32 %v1454_v37, %v7185_v17 }
 0xe1e   :  { %v6307_v15 = vpop.eup %6306  ;;  %v7304_v58 = vadd.f32 %v7189_v24, %v1460_v50 }
 0xe1f   :  { %v1538_v59 = vmul.f32 %v6307_v15, %v1515_v46  ;;  %vm1544_vm9 = vweird.f32 %v6307_v15 }
 0xe20   :  { %v1482_v19 = vsel %vm513_vm10, %v7304_v58, 0.0  ;;  %vm1545_vm0 = vmor %vm1543_vm11, %vm1544_vm9 }
 0xe21   :  { %v1539_v60 = vmul.f32 %v6307_v15, %v1538_v59  ;;  %1483 = vadd.xlane.f32.xlu0 %v1482_v19 }
 0xe23   :  { %v1540_v5 = vmul.f32 0.5, %v1539_v60 }
 0xe25   :  { %v1541_v63 = vsub.f32 1.5, %v1540_v5 }
 0xe27   :  { %v1542_v1 = vmul.f32 %v6307_v15, %v1541_v63 }
 0xe29   :  { %v1546_v57 = vsel %vm1545_vm0, %v6307_v15, %v1542_v1 }
 0xe2a   :  { %v1559_v3 = vmul.f32 %v1546_v57, %v1491_v62 }
 0xe2c   :  { %v1566_v17 = vmul.f32 %v7248_v12, %v1559_v3  ;;  %v7355_v3 = vld [vmem:[%s8638_s12 + $0x1] ss:$0 sm:$0xff] }
 0xe2e   :  { %v1573_v6 = vadd.f32 %v7254_v34, %v1566_v17 }
 0xe30   :  { %5841 = vmatmul.msk.f32.gmra.mxu2 %vm513_vm10, %v1573_v6 }
 0xe66   :  { %v1650_v24 = vpop.f32.mrf.mxu0 }
 0xe67   :  { %v1653_v7 = vmul.f32 0.17677669, %v1650_v24 }
 0xe69   :  { %v1654_v8 = vsel %vm804_vm3, %v1653_v7, -inf }
 0xe6a   :  { %1655 = vmax.xlane.f32.xlu0 %v1654_v8 }
 0xe7e   :  { %1665 = vrot.lane.b32.xlu0 %v7279_v54, %s6682_s29 }
 0xe8d   :  { %v1693_v9 = vpop.permute.xlu1 %1692 }
 0xe8e   :  { %5846 = vmatpush.xpose.msk.msra.mxu2 %vm513_vm10, %v1693_v9 }
 0xe94   :  { %v1484_v11 = vpop.xlane.xlu0 %1483 }
 0xe95   :  { %v1488_v13 = vmul.f32 %v1484_v11, %v6859_v21 }
 0xe97   :  { %v1492_v14 = vsub.f32 %v7304_v58, %v1488_v13 }
 0xe99   :  { %v1496_v0 = vmul.f32 %v1492_v14, %v1492_v14 }
 0xe9b   :  { %v1506_v16 = vsel %vm513_vm10, %v1496_v0, 0.0 }
 0xe9c   :  { %1507 = vadd.xlane.f32.xlu2 %v1506_v16 }
 0xeb3   :  { %v1620_v23 = vpop.f32.mrf.mxu2 }
 0xeb4   :  { %v1621_v26 = vadd.f32 %v7276_v47, %v1620_v23 }
 0xeb6   :  { %v6137_v59 = vpack.i.bf16 %v1621_v26, %v7298_v49 }
 0xedd   :  { %v1656_v18 = vpop.xlane.xlu0 %1655 }
 0xede   :  { %v1657_v53 = vsub.f32 %v1653_v7, %v1656_v18 }
 0xee0   :  { %v1658_v20 = vmul.f32 1.442695, %v1657_v53 }
 0xee2   :  { %6308 = vpow2.f32 %v1658_v20 }
 0xee8   :  { %v6309_v38 = vpop.eup %6308 }
 0xee9   :  { %v1660_v22 = vsel %vm804_vm3, %v6309_v38, 0.0 }
 0xeea   :  { %1661 = vadd.xlane.f32.xlu2 %v1660_v22 }
 0xef0   :  { %v1666_v54 = vpop.permute.xlu0 %1665 }
 0xef1   :  { %1686 = vmatpush.msra.mxu1 %v1666_v54 }
 0xf02   :  { %1757 = vrot.lane.b32.xlu2 %v1621_v26, %s6681_s4 }
 0xf0f   :  { %v1508_v51 = vpop.xlane.xlu2 %1507 }
 0xf10   :  { %v1512_v25 = vmul.f32 %v1508_v51, %v6859_v21 }
 0xf12   :  { %v1516_v29 = vadd.f32 1e-05, %v1512_v25 }
 0xf14   :  { %6310 = vrsqrt.f32 %v1516_v29  ;;  %vm1553_vm13 = vweird.f32 %v1516_v29 }
 0xf1a   :  { %v6311_v10 = vpop.eup %6310 }
 0xf1b   :  { %v1548_v55 = vmul.f32 %v6311_v10, %v1516_v29  ;;  %vm1554_vm12 = vweird.f32 %v6311_v10 }
 0xf1c   :  { %vm1555_vm14 = vmor %vm1553_vm13, %vm1554_vm12 }
 0xf1d   :  { %v1549_v61 = vmul.f32 %v6311_v10, %v1548_v55 }
 0xf1f   :  { %v1550_v56 = vmul.f32 0.5, %v1549_v61 }
 0xf21   :  { %v1551_v2 = vsub.f32 1.5, %v1550_v56 }
 0xf23   :  { %v1552_v27 = vmul.f32 %v6311_v10, %v1551_v2 }
 0xf25   :  { %v1556_v52 = vsel %vm1555_vm14, %v6311_v10, %v1552_v27 }
 0xf26   :  { %v1560_v31 = vmul.f32 %v1556_v52, %v1492_v14 }
 0xf28   :  { %v1567_v4 = vmul.f32 %v7248_v12, %v1560_v31 }
 0xf2a   :  { %v1574_v32 = vadd.f32 %v7254_v34, %v1567_v4  ;;  %v5858_v34 = vld [vmem:[%s8637_s11 + $0x38] sm:$0xff] }
 0xf2c   :  { %5842 = vmatmul.msk.f32.gmra.mxu2 %vm513_vm10, %v1574_v32 }
 0xf34   :  { %5847 = vmatmul.msk.f32.vlgmr.msra.gmra.mxu2 %vm513_vm10, %v7298_v49 }
 0xf5d   :  { %v1662_v35 = vpop.xlane.xlu2 %1661 }
 0xf5e   :  { %6312 = vrcp.f32 %v1662_v35  ;;  %v5869_v35 = vld [vmem:[%s8641_s15 + $0x38] sm:$0xff] }
 0xf64   :  { %v6313_v42 = vpop.eup %6312 }
 0xf65   :  { %v1664_v44 = vmul.f32 %v6313_v42, %v6309_v38  ;;  %v1758_v62 = vpop.permute.xlu2 %1757 }
 0xf66   :  { %5849 = vmatpush.xpose.msk.msrb.mxu1 %vm513_vm10, %v1758_v62  ;;  %v5867_v62 = vld [vmem:[%s8641_s15 + $0x28] sm:$0xff] }
 0xf67   :  { %5845 = vmatmul.msk.f32.vlgmr.msra.gmra.mxu1 %vm804_vm3, %v1664_v44  ;;  %v5868_v44 = vld [vmem:[%s8641_s15 + $0x30] sm:$0xff] }
 0xf6a   :  { %1915 = vmatpush.msra.mxu1 %v5858_v34 }
 0xf6c   :  { %1916 = vmatpush.msra.mxu1 %v5857_v41 }
 0xf6e   :  { %1917 = vmatpush.msra.mxu1 %v5856_v45 }
 0xf6f   :  { %5850 = vmatmul.msk.f32.vlgmr.msrb.gmra.mxu1 %vm513_vm10, %v1621_v26 }
 0xfaf   :  { %v1623_v28 = vpop.f32.mrf.mxu2 }
 0xfb0   :  { %v1624_v12 = vadd.f32 %v7276_v47, %v1623_v28  ;;  %v5855_v47 = vld [vmem:[%s8637_s11 + $0x20] sm:$0xff] }
 0xfb1   :  { %1918 = vmatpush.msra.mxu1 %v5855_v47  ;;  %v5866_v28 = vld [vmem:[%s8641_s15 + $0x20] sm:$0xff] }
 0xfb2   :  { %1822 = vrot.lane.b32.xlu1 %v1624_v12, %s6681_s4 }
 0xfb7   :  { %v1715_v40 = vpop.f32.mrf.mxu2 }
 0xfb8   :  { %v1718_v33 = vmul.f32 0.17677669, %v1715_v40 }
 0xfba   :  { %v1719_v46 = vsel %vm804_vm3, %v1718_v33, -inf }
 0xfdc   :  { %1720 = vmax.xlane.f32.xlu1 %v1719_v46 }
 0xfe4   :  { %v1688_v48 = vpop.f32.mrf.mxu1 }
 0xfe5   :  { %5859 = vmatmul.msk.f32.vlgmr.msra.gmra.mxu1 %vm513_vm10, %v1688_v48 }
 0xfec   :  { %v1780_v37 = vpop.f32.mrf.mxu1 }
 0xfed   :  { %v1783_v50 = vmul.f32 0.17677669, %v1780_v37 }
 0xfef   :  { %v1784_v15 = vsel %vm804_vm3, %v1783_v50, -inf }
 0xff0   :  { %1785 = vmax.xlane.f32.xlu0 %v1784_v15  ;;  %v7391_v15 = vld [vmem:[%s8639_s13 + $0x1] ss:$0 sm:$0xff] }
0x1004   :  { %6138 = vrot.lane.b32.xlu0 %v6137_v59, %s6682_s29 }
0x1024   :  { %v1823_v19 = vpop.permute.xlu1 %1822 }
0x1025   :  { %5852 = vmatpush.xpose.msk.msrb.mxu2 %vm513_vm10, %v1823_v19 }
0x1028   :  { %5853 = vmatmul.msk.f32.vlgmr.msrb.gmra.mxu2 %vm513_vm10, %v1624_v12 }
0x104f   :  { %v1721_v60 = vpop.xlane.xlu1 %1720 }
0x1050   :  { %v1722_v5 = vsub.f32 %v1718_v33, %v1721_v60  ;;  %v7396_v60 = vld [vmem:[%s8640_s14 + $0x1] ss:$0 sm:$0xff] }
0x1052   :  { %v1723_v63 = vmul.f32 1.442695, %v1722_v5 }
0x1054   :  { %6314 = vpow2.f32 %v1723_v63 }
0x105a   :  { %v6315_v1 = vpop.eup %6314 }
0x105b   :  { %v1725_v57 = vsel %vm804_vm3, %v6315_v1, 0.0 }
0x105c   :  { %1726 = vadd.xlane.f32.xlu2 %v1725_v57 }
0x1062   :  { %v1920_v49 = vpop.f32.mrf.mxu1 }
0x1063   :  { %v1932_v17 = vadd.f32 %v1920_v49, %v7193_v30  ;;  %v1786_v6 = vpop.xlane.xlu0 %1785 }
0x1064   :  { %v1787_v24 = vsub.f32 %v1783_v50, %v1786_v6 }
0x1065   :  { %v7359_v7 = vadd.f32 %v7355_v3, %v1932_v17 }
0x1066   :  { %v1788_v8 = vmul.f32 1.442695, %v1787_v24 }
0x1067   :  { %v1949_v9 = vsel %vm513_vm10, %v7359_v7, 0.0 }
0x1068   :  { %6316 = vpow2.f32 %v1788_v8  ;;  %1950 = vadd.xlane.f32.xlu2 %v1949_v9 }
0x106e   :  { %v6317_v11 = vpop.eup %6316 }
0x106f   :  { %v1790_v13 = vsel %vm804_vm3, %v6317_v11, 0.0 }
0x1070   :  { %1791 = vadd.xlane.f32.xlu1 %v1790_v13 }
0x1076   :  { %v6139_v14 = vpop.permute.xlu0 %6138 }
0x1077   :  { %v6141_v0 = vunpack.i.h.bf16 %v6139_v14  ;;  %v6140_v16 = vunpack.i.l.bf16 %v6139_v14 }
0x1079   :  { %1751 = vmatpush.msra.mxu0 %v6140_v16  ;;  %1816 = vmatpush.msra.mxu3 %v6141_v0 }
0x107b   :  { %2085 = vmatpush.msrb.mxu3 %v5869_v35 }
0x107d   :  { %2086 = vmatpush.msrb.mxu3 %v5868_v44 }
0x107f   :  { %2087 = vmatpush.msrb.mxu3 %v5867_v62 }
0x1080   :  { %1860 = vrot.lane.b32.xlu2 %v1624_v12, %s6682_s29 }
0x1081   :  { %2088 = vmatpush.msrb.mxu3 %v5866_v28 }
0x10ab   :  { %v1845_v30 = vpop.f32.mrf.mxu2 }
0x10ac   :  { %v1848_v18 = vmul.f32 0.17677669, %v1845_v30 }
0x10ae   :  { %v1849_v53 = vsel %vm804_vm3, %v1848_v18, -inf }
0x10af   :  { %1850 = vmax.xlane.f32.xlu1 %v1849_v53 }
0x10cf   :  { %v1727_v20 = vpop.xlane.xlu2 %1726 }
0x10d0   :  { %6318 = vrcp.f32 %v1727_v20 }
0x10d6   :  { %v6319_v38 = vpop.eup %6318 }
0x10d7   :  { %v1729_v22 = vmul.f32 %v6319_v38, %v6315_v1 }
0x10d9   :  { %5848 = vmatmul.msk.f32.vlgmr.msra.gmra.mxu0 %vm804_vm3, %v1729_v22  ;;  %v5881_v22 = vld [vmem:[%s8643_s17 + $0x78] sm:$0xff] }
0x10da   :  { %2291 = vmatpush.msra.mxu2 %v5881_v22 }
0x10db   :  { %v1951_v54 = vpop.xlane.xlu2 %1950 }
0x10dc   :  { %v1961_v61 = vmul.f32 %v1951_v54, %v6859_v21 }
0x10de   :  { %v1965_v2 = vsub.f32 %v7359_v7, %v1961_v61 }
0x10e0   :  { %v1969_v52 = vmul.f32 %v1965_v2, %v1965_v2 }
0x10e2   :  { %v1973_v31 = vsel %vm513_vm10, %v1969_v52, 0.0 }
0x10e3   :  { %v1792_v23 = vpop.xlane.xlu1 %1791  ;;  %v1861_v26 = vpop.permute.xlu2 %1860 }
0x10e4   :  { %6320 = vrcp.f32 %v1792_v23  ;;  %1881 = vmatpush.msrb.mxu0 %v1861_v26  ;;  %v5880_v23 = vld [vmem:[%s8643_s17 + $0x70] sm:$0xff]  ;;  %v5879_v26 = vld [vmem:[%s8643_s17 + $0x68] sm:$0xff] }
0x10e5   :  { %2292 = vmatpush.msra.mxu2 %v5880_v23 }
0x10e7   :  { %2293 = vmatpush.msra.mxu2 %v5879_v26 }
0x10ea   :  { %v6321_v51 = vpop.eup %6320 }
0x10eb   :  { %v1794_v25 = vmul.f32 %v6321_v51, %v6317_v11  ;;  %v5878_v51 = vld [vmem:[%s8643_s17 + $0x60] sm:$0xff] }
0x10ec   :  { %2294 = vmatpush.msra.mxu2 %v5878_v51 }
0x10ed   :  { %5851 = vmatmul.msk.f32.vlgmr.msra.gmra.mxu3 %vm804_vm3, %v1794_v25 }
0x1122   :  { %v1851_v29 = vpop.xlane.xlu1 %1850 }
0x1123   :  { %v1852_v10 = vsub.f32 %v1848_v18, %v1851_v29  ;;  %v5877_v29 = vld [vmem:[%s8643_s17 + $0x58] sm:$0xff] }
0x1124   :  { %2295 = vmatpush.msra.mxu2 %v5877_v29 }
0x1125   :  { %v1853_v55 = vmul.f32 1.442695, %v1852_v10 }
0x1127   :  { %6322 = vpow2.f32 %v1853_v55  ;;  %v5876_v55 = vld [vmem:[%s8643_s17 + $0x50] sm:$0xff] }
0x1128   :  { %2296 = vmatpush.msra.mxu2 %v5876_v55 }
0x112d   :  { %v6323_v56 = vpop.eup %6322 }
0x112e   :  { %v1855_v27 = vsel %vm804_vm3, %v6323_v56, 0.0 }
0x112f   :  { %1856 = vadd.xlane.f32.xlu1 %v1855_v27 }
0x1137   :  { %1974 = vadd.xlane.f32.xlu1 %v1973_v31  ;;  %v5874_v31 = vld [vmem:[%s8643_s17 + $0x40] sm:$0xff] }
0x1156   :  { %v1753_v4 = vpop.f32.mrf.mxu0 }
0x1157   :  { %5860 = vmatmul.msk.f32.gmra.mxu1 %vm513_vm10, %v1753_v4 }
0x1170   :  { %v1818_v32 = vpop.f32.mrf.mxu3 }
0x1171   :  { %5861 = vmatmul.msk.f32.gmra.mxu1 %vm513_vm10, %v1818_v32 }
0x11a2   :  { %v1857_v42 = vpop.xlane.xlu1 %1856 }
0x11a3   :  { %6324 = vrcp.f32 %v1857_v42 }
0x11a9   :  { %v6325_v12 = vpop.eup %6324 }
0x11aa   :  { %v1859_v34 = vmul.f32 %v6325_v12, %v6323_v56  ;;  %v1975_v41 = vpop.xlane.xlu1 %1974 }
0x11ab   :  { %v1985_v45 = vmul.f32 %v1975_v41, %v6859_v21 }
0x11ac   :  { %5854 = vmatmul.msk.f32.vlgmr.msrb.gmra.mxu0 %vm804_vm3, %v1859_v34 }
0x11ad   :  { %v1989_v47 = vadd.f32 1e-05, %v1985_v45 }
0x11af   :  { %6326 = vrsqrt.f32 %v1989_v47  ;;  %vm1999_vm1 = vweird.f32 %v1989_v47 }
0x11b5   :  { %v6327_v40 = vpop.eup %6326 }
0x11b6   :  { %v1994_v33 = vmul.f32 %v6327_v40, %v1989_v47  ;;  %vm2000_vm15 = vweird.f32 %v6327_v40 }
0x11b7   :  { %vm2001_vm2 = vmor %vm1999_vm1, %vm2000_vm15 }
0x11b8   :  { %v1995_v46 = vmul.f32 %v6327_v40, %v1994_v33 }
0x11ba   :  { %v1996_v48 = vmul.f32 0.5, %v1995_v46 }
0x11bc   :  { %v1997_v37 = vsub.f32 1.5, %v1996_v48 }
0x11be   :  { %v1998_v50 = vmul.f32 %v6327_v40, %v1997_v37 }
0x11c0   :  { %v2002_v59 = vsel %vm2001_vm2, %v6327_v40, %v1998_v50 }
0x11c1   :  { %v2033_v19 = vmul.f32 %v2002_v59, %v1965_v2  ;;  %v5875_v2 = vld [vmem:[%s8643_s17 + $0x48] sm:$0xff] }
0x11c2   :  { %2297 = vmatpush.msra.mxu2 %v5875_v2 }
0x11c3   :  { %v2040_v5 = vmul.f32 %v7391_v15, %v2033_v19 }
0x11c4   :  { %2298 = vmatpush.msra.mxu2 %v5874_v31 }
0x11c5   :  { %v2047_v63 = vadd.f32 %v7396_v60, %v2040_v5 }
0x11c7   :  { %5870 = vmatmul.msk.f32.vlgmr.msrb.gmra.mxu3 %vm513_vm10, %v2047_v63 }
0x11d4   :  { %v1923_v1 = vpop.f32.mrf.mxu1 }
0x11d5   :  { %v1933_v57 = vadd.f32 %v1923_v1, %v7221_v39  ;;  %v7414_v39 = vld [vmem:[#allocation7 + $0x1] ss:$0 sm:$0xff] }
0x11d7   :  { %v7403_v49 = vadd.f32 %v7355_v3, %v1933_v57 }
0x11d9   :  { %v1952_v17 = vsel %vm513_vm10, %v7403_v49, 0.0 }
0x11da   :  { %1953 = vadd.xlane.f32.xlu0 %v1952_v17 }
0x11ee   :  { %v1926_v6 = vpop.f32.mrf.mxu1 }
0x11ef   :  { %v1934_v24 = vadd.f32 %v1926_v6, %v7268_v36 }
0x11f1   :  { %v7409_v8 = vadd.f32 %v7355_v3, %v1934_v24 }
0x11f3   :  { %v1955_v9 = vsel %vm513_vm10, %v7409_v8, 0.0 }
0x11f4   :  { %1956 = vadd.xlane.f32.xlu1 %v1955_v9 }
0x1229   :  { %v1883_v11 = vpop.f32.mrf.mxu0 }
0x122a   :  { %5862 = vmatmul.msk.f32.gmra.mxu1 %vm513_vm10, %v1883_v11 }
0x124a   :  { %v2090_v13 = vpop.f32.mrf.mxu3 }
0x124b   :  { %v7417_v14 = vadd.f32 %v7414_v39, %v2090_v13 }
0x124d   :  { %v7420_v0 = vmul.f32 0.70710677, %v7417_v14  ;;  %v1954_v36 = vpop.xlane.xlu0 %1953  ;;  %v2102_v24 = vmul.f32 0.5, %v7417_v14 }
0x124e   :  { %v1962_v16 = vmul.f32 %v1954_v36, %v6859_v21 }
0x124f   :  { %v2118_v30 = vand.u32 2147483647, %v7420_v0  ;;  %vm2110_vm9 = vcmp.ge.f32.partialorder %v7420_v0, 0.0 }
0x1250   :  { %v7425_v18 = vsub.f32 %v7403_v49, %v1962_v16  ;;  %v2114_v17 = vsel %vm2110_vm9, 1.0, %v6679_v43 }
0x1251   :  { %v2122_v53 = vmul.f32 0.3275911, %v2118_v30  ;;  %v2226_v44 = vsub.f32 0.0, %v2118_v30 }
0x1252   :  { %v1970_v20 = vmul.f32 %v7425_v18, %v7425_v18 }
0x1253   :  { %v2126_v38 = vadd.f32 1.0, %v2122_v53  ;;  %v2230_v41 = vmul.f32 %v2226_v44, %v2118_v30 }
0x1254   :  { %v1976_v54 = vsel %vm513_vm10, %v1970_v20, 0.0 }
0x1255   :  { %6328 = vrcp.f32 %v2126_v38  ;;  %1977 = vadd.xlane.f32.xlu1 %v1976_v54  ;;  %v2141_v56 = vand.u32 2147483648, %v2126_v38  ;;  %v2139_v52 = vand.u32 2147483647, %v2126_v38  ;;  %vm2135_vm5 = vweird.f32 %v2126_v38 }
0x1256   :  { %v2234_v46 = vmul.f32 1.442695, %v2230_v41  ;;  %v7483_v41 = vld [vmem:[#allocation8 + $0x1] ss:$0 sm:$0xff] }
0x1257   :  { %v2142_v32 = vor.u32 1.1754944e-38, %v2141_v56  ;;  %vm2140_vm8 = vcmp.eq.f32.partialorder %v2139_v52, 8.507059e+37 }
0x1258   :  { %6330 = vpow2.f32 %v2234_v46 }
0x125b   :  { %v6329_v25 = vpop.eup %6328 }
0x125c   :  { %v2131_v10 = vmul.f32 %v6329_v25, %v2126_v38  ;;  %vm2136_vm4 = vweird.f32 %v6329_v25 }
0x125d   :  { %vm2137_vm6 = vmor %vm2135_vm5, %vm2136_vm4 }
0x125e   :  { %v2132_v61 = vsub.f32 1.0, %v2131_v10  ;;  %v6331_v63 = vpop.eup %6330 }
0x1260   :  { %v2133_v27 = vmul.f32 %v6329_v25, %v2132_v61 }
0x1262   :  { %v2134_v4 = vadd.f32 %v6329_v25, %v2133_v27 }
0x1264   :  { %v2138_v35 = vsel %vm2137_vm6, %v6329_v25, %v2134_v4 }
0x1265   :  { %v2143_v42 = vsel %vm2140_vm8, %v2142_v32, %v2138_v35 }
0x1266   :  { %v2190_v62 = vmul.f32 1.0614054, %v2143_v42 }
0x1267   :  { %v1957_v28 = vpop.xlane.xlu1 %1956 }
0x1268   :  { %v2194_v12 = vadd.f32 -1.4531521, %v2190_v62  ;;  %v1963_v34 = vmul.f32 %v1957_v28, %v6859_v21 }
0x126a   :  { %v2198_v45 = vmul.f32 %v2194_v12, %v2143_v42  ;;  %v1967_v47 = vsub.f32 %v7409_v8, %v1963_v34 }
0x126c   :  { %v2202_v40 = vadd.f32 1.4214138, %v2198_v45  ;;  %v1971_v33 = vmul.f32 %v1967_v47, %v1967_v47 }
0x126e   :  { %v2206_v48 = vmul.f32 %v2202_v40, %v2143_v42  ;;  %v1979_v37 = vsel %vm513_vm10, %v1971_v33, 0.0 }
0x126f   :  { %1980 = vadd.xlane.f32.xlu2 %v1979_v37 }
0x1270   :  { %v2210_v50 = vadd.f32 -0.28449672, %v2206_v48 }
0x1272   :  { %v2214_v59 = vmul.f32 %v2210_v50, %v2143_v42 }
0x1274   :  { %v2218_v19 = vadd.f32 0.2548296, %v2214_v59 }
0x1276   :  { %v2222_v5 = vmul.f32 %v2218_v19, %v2143_v42 }
0x1278   :  { %v2242_v1 = vmul.f32 %v6331_v63, %v2222_v5 }
0x127a   :  { %v2246_v57 = vsub.f32 1.0, %v2242_v1 }
0x127c   :  { %v2250_v6 = vmul.f32 %v2246_v57, %v2114_v17 }
0x127e   :  { %v2254_v9 = vadd.f32 1.0, %v2250_v6 }
0x1280   :  { %v2258_v11 = vmul.f32 %v2254_v9, %v2102_v24 }
0x1282   :  { %5882 = vmatmul.msk.f32.vlgmr.msra.gmra.mxu2 %vm1415_vm7, %v2258_v11 }
0x12a7   :  { %v1929_v13 = vpop.f32.mrf.mxu1 }
0x12a8   :  { %v1935_v36 = vadd.f32 %v1929_v13, %v7304_v58 }
0x12aa   :  { %v7463_v16 = vadd.f32 %v7355_v3, %v1935_v36 }
0x12ac   :  { %v1958_v0 = vsel %vm513_vm10, %v7463_v16, 0.0 }
0x12ad   :  { %1959 = vadd.xlane.f32.xlu1 %v1958_v0 }
0x12c8   :  { %v1978_v30 = vpop.xlane.xlu1 %1977 }
0x12c9   :  { %v1986_v53 = vmul.f32 %v1978_v30, %v6859_v21 }
0x12cb   :  { %v1990_v20 = vadd.f32 1e-05, %v1986_v53 }
0x12cd   :  { %6332 = vrsqrt.f32 %v1990_v20  ;;  %vm2009_vm0 = vweird.f32 %v1990_v20 }
0x12d3   :  { %v6333_v14 = vpop.eup %6332 }
0x12d4   :  { %v2004_v38 = vmul.f32 %v6333_v14, %v1990_v20  ;;  %vm2010_vm11 = vweird.f32 %v6333_v14 }
0x12d5   :  { %vm2011_vm12 = vmor %vm2009_vm0, %vm2010_vm11 }
0x12d6   :  { %v2005_v22 = vmul.f32 %v6333_v14, %v2004_v38 }
0x12d8   :  { %v2006_v54 = vmul.f32 0.5, %v2005_v22 }
0x12da   :  { %v2007_v23 = vsub.f32 1.5, %v2006_v54 }
0x12dc   :  { %v2008_v26 = vmul.f32 %v6333_v14, %v2007_v23 }
0x12de   :  { %v2012_v58 = vsel %vm2011_vm12, %v6333_v14, %v2008_v26 }
0x12df   :  { %v2034_v3 = vmul.f32 %v2012_v58, %v7425_v18 }
0x12e1   :  { %v2041_v51 = vmul.f32 %v7391_v15, %v2034_v3 }
0x12e2   :  { %v1981_v25 = vpop.xlane.xlu2 %1980 }
0x12e3   :  { %v1987_v29 = vmul.f32 %v1981_v25, %v6859_v21  ;;  %v2048_v10 = vadd.f32 %v7396_v60, %v2041_v51 }
0x12e5   :  { %v1991_v55 = vadd.f32 1e-05, %v1987_v29  ;;  %5871 = vmatmul.msk.f32.gmra.mxu3 %vm513_vm10, %v2048_v10 }
0x12e7   :  { %6334 = vrsqrt.f32 %v1991_v55  ;;  %vm2019_vm14 = vweird.f32 %v1991_v55 }
0x12ed   :  { %v6335_v61 = vpop.eup %6334 }
0x12ee   :  { %v2014_v56 = vmul.f32 %v6335_v61, %v1991_v55  ;;  %vm2020_vm13 = vweird.f32 %v6335_v61 }
0x12ef   :  { %vm2021_vm15 = vmor %vm2019_vm14, %vm2020_vm13 }
0x12f0   :  { %v2015_v2 = vmul.f32 %v6335_v61, %v2014_v56 }
0x12f2   :  { %v2016_v27 = vmul.f32 0.5, %v2015_v2 }
0x12f4   :  { %v2017_v52 = vsub.f32 1.5, %v2016_v27 }
0x12f6   :  { %v2018_v31 = vmul.f32 %v6335_v61, %v2017_v52 }
0x12f8   :  { %v2022_v18 = vsel %vm2021_vm15, %v6335_v61, %v2018_v31 }
0x12f9   :  { %v2035_v4 = vmul.f32 %v2022_v18, %v1967_v47 }
0x12fb   :  { %v2042_v32 = vmul.f32 %v7391_v15, %v2035_v4 }
0x12fd   :  { %v2049_v35 = vadd.f32 %v7396_v60, %v2042_v32 }
0x12ff   :  { %5872 = vmatmul.msk.f32.gmra.mxu3 %vm513_vm10, %v2049_v35 }
0x1305   :  { %v2300_v28 = vpop.f32.mrf.mxu2 }
0x1306   :  { %v2312_v34 = vadd.f32 %v2300_v28, %v7359_v7 }
0x1308   :  { %v7487_v47 = vadd.f32 %v7483_v41, %v2312_v34 }
0x130a   :  { %v2329_v40 = vsel %vm513_vm10, %v7487_v47, 0.0 }
0x1320   :  { %v1960_v42 = vpop.xlane.xlu1 %1959 }
0x1321   :  { %v1964_v44 = vmul.f32 %v1960_v42, %v6859_v21 }
0x1323   :  { %v7478_v62 = vsub.f32 %v7463_v16, %v1964_v44 }
0x1325   :  { %v1972_v12 = vmul.f32 %v7478_v62, %v7478_v62 }
0x1327   :  { %v1982_v45 = vsel %vm513_vm10, %v1972_v12, 0.0 }
0x1328   :  { %1983 = vadd.xlane.f32.xlu1 %v1982_v45 }
0x1330   :  { %2330 = vadd.xlane.f32.xlu1 %v2329_v40 }
0x1368   :  { %v2093_v33 = vpop.f32.mrf.mxu3 }
0x1369   :  { %v2094_v46 = vadd.f32 %v7414_v39, %v2093_v33 }
0x136b   :  { %v2107_v48 = vmul.f32 0.70710677, %v2094_v46  ;;  %v2103_v42 = vmul.f32 0.5, %v2094_v46 }
0x136d   :  { %v2119_v37 = vand.u32 2147483647, %v2107_v48  ;;  %vm2111_vm6 = vcmp.ge.f32.partialorder %v2107_v48, 0.0 }
0x136e   :  { %v2115_v4 = vsel %vm2111_vm6, 1.0, %v6679_v43 }
0x136f   :  { %v2123_v50 = vmul.f32 0.3275911, %v2119_v37  ;;  %v2227_v11 = vsub.f32 0.0, %v2119_v37 }
0x1371   :  { %v2127_v59 = vadd.f32 1.0, %v2123_v50  ;;  %v2231_v20 = vmul.f32 %v2227_v11, %v2119_v37 }
0x1373   :  { %6336 = vrcp.f32 %v2127_v59  ;;  %v2156_v63 = vand.u32 2147483648, %v2127_v59  ;;  %v2154_v57 = vand.u32 2147483647, %v2127_v59  ;;  %vm2150_vm2 = vweird.f32 %v2127_v59 }
0x1374   :  { %v2236_v23 = vmul.f32 1.442695, %v2231_v20 }
0x1375   :  { %v2157_v6 = vor.u32 1.1754944e-38, %v2156_v63  ;;  %vm2155_vm5 = vcmp.eq.f32.partialorder %v2154_v57, 8.507059e+37 }
0x1379   :  { %v6337_v7 = vpop.eup %6336 }
0x137a   :  { %v2146_v19 = vmul.f32 %v6337_v7, %v2127_v59  ;;  %vm2151_vm1 = vweird.f32 %v6337_v7 }
0x137b   :  { %vm2152_vm4 = vmor %vm2150_vm2, %vm2151_vm1 }
0x137c   :  { %v2147_v5 = vsub.f32 1.0, %v2146_v19 }
0x137e   :  { %v2148_v1 = vmul.f32 %v6337_v7, %v2147_v5 }
0x1380   :  { %v2149_v17 = vadd.f32 %v6337_v7, %v2148_v1 }
0x1382   :  { %v2096_v24 = vpop.f32.mrf.mxu3  ;;  %v2153_v9 = vsel %vm2152_vm4, %v6337_v7, %v2149_v17 }
0x1383   :  { %v7493_v13 = vadd.f32 %v7414_v39, %v2096_v24  ;;  %v2158_v36 = vsel %vm2155_vm5, %v2157_v6, %v2153_v9 }
0x1384   :  { %v2191_v0 = vmul.f32 1.0614054, %v2158_v36 }
0x1385   :  { %v7496_v30 = vmul.f32 0.70710677, %v7493_v13 }
0x1386   :  { %v2195_v53 = vadd.f32 -1.4531521, %v2191_v0 }
0x1387   :  { %v2120_v14 = vand.u32 2147483647, %v7496_v30  ;;  %vm2112_vm14 = vcmp.ge.f32.partialorder %v7496_v30, 0.0 }
0x1388   :  { %v2199_v38 = vmul.f32 %v2195_v53, %v2158_v36 }
0x1389   :  { %v2124_v22 = vmul.f32 0.3275911, %v2120_v14  ;;  %v2228_v40 = vsub.f32 0.0, %v2120_v14 }
0x138a   :  { %v2203_v54 = vadd.f32 1.4214138, %v2199_v38 }
0x138b   :  { %v2128_v26 = vadd.f32 1.0, %v2124_v22  ;;  %v2232_v7 = vmul.f32 %v2228_v40, %v2120_v14 }
0x138c   :  { %v2207_v58 = vmul.f32 %v2203_v54, %v2158_v36 }
0x138d   :  { %6338 = vrcp.f32 %v2128_v26  ;;  %v2171_v27 = vand.u32 2147483648, %v2128_v26  ;;  %v2169_v18 = vand.u32 2147483647, %v2128_v26  ;;  %vm2165_vm9 = vweird.f32 %v2128_v26 }
0x138e   :  { %v2211_v3 = vadd.f32 -0.28449672, %v2207_v58  ;;  %6340 = vpow2.f32 %v2236_v23  ;;  %v2238_v1 = vmul.f32 1.442695, %v2232_v7 }
0x138f   :  { %v2172_v28 = vor.u32 1.1754944e-38, %v2171_v27  ;;  %vm2170_vm0 = vcmp.eq.f32.partialorder %v2169_v18, 8.507059e+37 }
0x1390   :  { %v2215_v51 = vmul.f32 %v2211_v3, %v2158_v36 }
0x1392   :  { %v2219_v25 = vadd.f32 0.2548296, %v2215_v51 }
0x1393   :  { %v6339_v29 = vpop.eup %6338 }
0x1394   :  { %v2161_v10 = vmul.f32 %v6339_v29, %v2128_v26  ;;  %v2223_v55 = vmul.f32 %v2219_v25, %v2158_v36  ;;  %v6341_v61 = vpop.eup %6340  ;;  %vm2166_vm8 = vweird.f32 %v6339_v29  ;;  %v2116_v25 = vsel %vm2112_vm14, 1.0, %v6679_v43 }
0x1395   :  { %vm2167_vm11 = vmor %vm2165_vm9, %vm2166_vm8 }
0x1396   :  { %v2162_v56 = vsub.f32 1.0, %v2161_v10  ;;  %v2243_v2 = vmul.f32 %v6341_v61, %v2223_v55  ;;  %v2104_v55 = vmul.f32 0.5, %v7493_v13  ;;  %v5888_v13 = vld [vmem:[%s8635_s9 + $0x40] sm:$0xff] }
0x1398   :  { %v2163_v52 = vmul.f32 %v6339_v29, %v2162_v56  ;;  %v2247_v31 = vsub.f32 1.0, %v2243_v2 }
0x139a   :  { %v2251_v32 = vmul.f32 %v2247_v31, %v2115_v4  ;;  %v2164_v35 = vadd.f32 %v6339_v29, %v2163_v52 }
0x139b   :  { %v1984_v44 = vpop.xlane.xlu1 %1983 }
0x139c   :  { %v1988_v12 = vmul.f32 %v1984_v44, %v6859_v21  ;;  %v2255_v34 = vadd.f32 1.0, %v2251_v32  ;;  %v2168_v45 = vsel %vm2167_vm11, %v6339_v29, %v2164_v35 }
0x139d   :  { %v2173_v33 = vsel %vm2170_vm0, %v2172_v28, %v2168_v45  ;;  %v7535_v45 = vld [vmem:[%s8633_s7 + $0x2] ss:$0 sm:$0xff] }
0x139e   :  { %v1992_v48 = vadd.f32 1e-05, %v1988_v12  ;;  %v2259_v37 = vmul.f32 %v2255_v34, %v2103_v42  ;;  %v2192_v50 = vmul.f32 1.0614054, %v2173_v33 }
0x13a0   :  { %6342 = vrsqrt.f32 %v1992_v48  ;;  %5883 = vmatmul.msk.f32.gmra.mxu2 %vm1415_vm7, %v2259_v37  ;;  %v2196_v59 = vadd.f32 -1.4531521, %v2192_v50  ;;  %vm2029_vm13 = vweird.f32 %v1992_v48 }
0x13a1   :  { %6344 = vpow2.f32 %v2238_v1 }
0x13a2   :  { %v2200_v19 = vmul.f32 %v2196_v59, %v2173_v33 }
0x13a3   :  { %v2331_v46 = vpop.xlane.xlu1 %2330 }
0x13a4   :  { %v2341_v5 = vmul.f32 %v2331_v46, %v6859_v21  ;;  %v2204_v63 = vadd.f32 1.4214138, %v2200_v19 }
0x13a6   :  { %v6343_v57 = vpop.eup %6342  ;;  %v2345_v17 = vsub.f32 %v7487_v47, %v2341_v5  ;;  %v2208_v6 = vmul.f32 %v2204_v63, %v2173_v33 }
0x13a7   :  { %v2024_v24 = vmul.f32 %v6343_v57, %v1992_v48  ;;  %vm2030_vm12 = vweird.f32 %v6343_v57  ;;  %v6345_v54 = vpop.eup %6344 }
0x13a8   :  { %v2349_v9 = vmul.f32 %v2345_v17, %v2345_v17  ;;  %v2212_v11 = vadd.f32 -0.28449672, %v2208_v6  ;;  %vm2031_vm15 = vmor %vm2029_vm13, %vm2030_vm12 }
0x13a9   :  { %v2025_v36 = vmul.f32 %v6343_v57, %v2024_v24 }
0x13aa   :  { %v2353_v0 = vsel %vm513_vm10, %v2349_v9, 0.0  ;;  %v2216_v53 = vmul.f32 %v2212_v11, %v2173_v33 }
0x13ab   :  { %v2026_v20 = vmul.f32 0.5, %v2025_v36  ;;  %2354 = vadd.xlane.f32.xlu0 %v2353_v0 }
0x13ac   :  { %v2220_v14 = vadd.f32 0.2548296, %v2216_v53 }
0x13ad   :  { %v2027_v38 = vsub.f32 1.5, %v2026_v20 }
0x13ae   :  { %v2224_v22 = vmul.f32 %v2220_v14, %v2173_v33  ;;  %v7540_v33 = vld [vmem:[%s8634_s8 + $0x2] ss:$0 sm:$0xff] }
0x13af   :  { %v2028_v23 = vmul.f32 %v6343_v57, %v2027_v38 }
0x13b0   :  { %v2244_v26 = vmul.f32 %v6345_v54, %v2224_v22 }
0x13b1   :  { %v2032_v58 = vsel %vm2031_vm15, %v6343_v57, %v2028_v23 }
0x13b2   :  { %v2036_v3 = vmul.f32 %v2032_v58, %v7478_v62  ;;  %v2248_v51 = vsub.f32 1.0, %v2244_v26  ;;  %v5891_v62 = vld [vmem:[%s8635_s9 + $0x58] sm:$0xff] }
0x13b3   :  { %2465 = vmatpush.msra.mxu0 %v5891_v62 }
0x13b4   :  { %v2043_v29 = vmul.f32 %v7391_v15, %v2036_v3  ;;  %v2252_v10 = vmul.f32 %v2248_v51, %v2116_v25  ;;  %v5890_v15 = vld [vmem:[%s8635_s9 + $0x50] sm:$0xff] }
0x13b5   :  { %2466 = vmatpush.msra.mxu0 %v5890_v15 }
0x13b6   :  { %v2050_v61 = vadd.f32 %v7396_v60, %v2043_v29  ;;  %v2256_v56 = vadd.f32 1.0, %v2252_v10  ;;  %v5889_v60 = vld [vmem:[%s8635_s9 + $0x48] sm:$0xff] }
0x13b7   :  { %2467 = vmatpush.msra.mxu0 %v5889_v60 }
0x13b8   :  { %5873 = vmatmul.msk.f32.gmra.mxu3 %vm513_vm10, %v2050_v61  ;;  %v2260_v2 = vmul.f32 %v2256_v56, %v2104_v55 }
0x13b9   :  { %2468 = vmatpush.msra.mxu0 %v5888_v13 }
0x13ba   :  { %5884 = vmatmul.msk.f32.gmra.mxu2 %vm1415_vm7, %v2260_v2 }
0x141e   :  { %v2355_v30 = vpop.xlane.xlu0 %2354 }
0x141f   :  { %v2365_v27 = vmul.f32 %v2355_v30, %v6859_v21 }
0x1421   :  { %v2369_v52 = vadd.f32 1e-05, %v2365_v27 }
0x1423   :  { %6346 = vrsqrt.f32 %v2369_v52  ;;  %v2303_v31 = vpop.f32.mrf.mxu2  ;;  %vm2379_vm2 = vweird.f32 %v2369_v52 }
0x1424   :  { %v2313_v18 = vadd.f32 %v2303_v31, %v7403_v49 }
0x1426   :  { %v7528_v4 = vadd.f32 %v7483_v41, %v2313_v18 }
0x1428   :  { %v2332_v32 = vsel %vm513_vm10, %v7528_v4, 0.0 }
0x1429   :  { %v6347_v35 = vpop.eup %6346  ;;  %2333 = vadd.xlane.f32.xlu1 %v2332_v32  ;;  %v7560_v32 = vld [vmem:[%s8636_s10 + $0x2] ss:$0 sm:$0xff] }
0x142a   :  { %v2374_v42 = vmul.f32 %v6347_v35, %v2369_v52  ;;  %vm2380_vm1 = vweird.f32 %v6347_v35 }
0x142b   :  { %vm2381_vm4 = vmor %vm2379_vm2, %vm2380_vm1 }
0x142c   :  { %v2375_v44 = vmul.f32 %v6347_v35, %v2374_v42 }
0x142e   :  { %v2376_v28 = vmul.f32 0.5, %v2375_v44 }
0x1430   :  { %v2377_v12 = vsub.f32 1.5, %v2376_v28 }
0x1432   :  { %v2378_v34 = vmul.f32 %v6347_v35, %v2377_v12 }
0x1434   :  { %v2382_v49 = vsel %vm2381_vm4, %v6347_v35, %v2378_v34 }
0x1435   :  { %v2413_v40 = vmul.f32 %v2382_v49, %v2345_v17 }
0x1437   :  { %v2420_v48 = vmul.f32 %v7535_v45, %v2413_v40 }
0x1439   :  { %v2427_v37 = vadd.f32 %v7540_v33, %v2420_v48 }
0x143b   :  { %v2099_v50 = vpop.f32.mrf.mxu3  ;;  %5893 = vmatmul.msk.f32.vlgmr.msra.gmra.mxu0 %vm513_vm10, %v2427_v37 }
0x143c   :  { %v2100_v59 = vadd.f32 %v7414_v39, %v2099_v50 }
0x143d   :  { %v2306_v7 = vpop.f32.mrf.mxu2 }
0x143e   :  { %v2109_v19 = vmul.f32 0.70710677, %v2100_v59  ;;  %v2314_v46 = vadd.f32 %v2306_v7, %v7409_v8  ;;  %v2105_v15 = vmul.f32 0.5, %v2100_v59 }
0x1440   :  { %v2121_v5 = vand.u32 2147483647, %v2109_v19  ;;  %v7548_v63 = vadd.f32 %v7483_v41, %v2314_v46  ;;  %vm2113_vm11 = vcmp.ge.f32.partialorder %v2109_v19, 0.0 }
0x1441   :  { %v2117_v2 = vsel %vm2113_vm11, 1.0, %v6679_v43 }
0x1442   :  { %v2125_v1 = vmul.f32 0.3275911, %v2121_v5  ;;  %v2335_v57 = vsel %vm513_vm10, %v7548_v63, 0.0  ;;  %v2229_v20 = vsub.f32 0.0, %v2121_v5 }
0x1443   :  { %2336 = vadd.xlane.f32.xlu0 %v2335_v57 }
0x1444   :  { %v2129_v17 = vadd.f32 1.0, %v2125_v1  ;;  %v2233_v54 = vmul.f32 %v2229_v20, %v2121_v5 }
0x1446   :  { %6348 = vrcp.f32 %v2129_v17  ;;  %v2186_v11 = vand.u32 2147483648, %v2129_v17  ;;  %v2184_v36 = vand.u32 2147483647, %v2129_v17  ;;  %vm2180_vm6 = vweird.f32 %v2129_v17 }
0x1447   :  { %v2240_v58 = vmul.f32 1.442695, %v2233_v54 }
0x1448   :  { %v2187_v8 = vor.u32 1.1754944e-38, %v2186_v11  ;;  %vm2185_vm9 = vcmp.eq.f32.partialorder %v2184_v36, 8.507059e+37 }
0x1449   :  { %6350 = vpow2.f32 %v2240_v58 }
0x144c   :  { %v6349_v6 = vpop.eup %6348 }
0x144d   :  { %v2176_v24 = vmul.f32 %v6349_v6, %v2129_v17  ;;  %vm2181_vm5 = vweird.f32 %v6349_v6 }
0x144e   :  { %vm2182_vm8 = vmor %vm2180_vm6, %vm2181_vm5 }
0x144f   :  { %v2177_v9 = vsub.f32 1.0, %v2176_v24  ;;  %v6351_v55 = vpop.eup %6350 }
0x1451   :  { %v2178_v39 = vmul.f32 %v6349_v6, %v2177_v9 }
0x1453   :  { %v2179_v0 = vadd.f32 %v6349_v6, %v2178_v39 }
0x1455   :  { %v2183_v53 = vsel %vm2182_vm8, %v6349_v6, %v2179_v0 }
0x1456   :  { %v2188_v14 = vsel %vm2185_vm9, %v2187_v8, %v2183_v53 }
0x1457   :  { %v2193_v38 = vmul.f32 1.0614054, %v2188_v14 }
0x1459   :  { %v2197_v22 = vadd.f32 -1.4531521, %v2193_v38 }
0x145b   :  { %v2201_v23 = vmul.f32 %v2197_v22, %v2188_v14 }
0x145d   :  { %v2205_v26 = vadd.f32 1.4214138, %v2201_v23 }
0x145f   :  { %v2209_v3 = vmul.f32 %v2205_v26, %v2188_v14 }
0x1461   :  { %v2213_v51 = vadd.f32 -0.28449672, %v2209_v3 }
0x1463   :  { %v2217_v25 = vmul.f32 %v2213_v51, %v2188_v14 }
0x1465   :  { %v2221_v29 = vadd.f32 0.2548296, %v2217_v25 }
0x1467   :  { %v2225_v10 = vmul.f32 %v2221_v29, %v2188_v14 }
0x1469   :  { %v2245_v61 = vmul.f32 %v6351_v55, %v2225_v10 }
0x146b   :  { %v2249_v56 = vsub.f32 1.0, %v2245_v61 }
0x146d   :  { %v2253_v62 = vmul.f32 %v2249_v56, %v2117_v2 }
0x146f   :  { %v2257_v60 = vadd.f32 1.0, %v2253_v62 }
0x1471   :  { %v2261_v13 = vmul.f32 %v2257_v60, %v2105_v15 }
0x1473   :  { %5885 = vmatmul.msk.f32.gmra.mxu2 %vm1415_vm7, %v2261_v13 }
0x149c   :  { %v2334_v30 = vpop.xlane.xlu1 %2333 }
0x149d   :  { %v2342_v27 = vmul.f32 %v2334_v30, %v6859_v21 }
0x149f   :  { %v2346_v52 = vsub.f32 %v7528_v4, %v2342_v27 }
0x14a1   :  { %v2350_v31 = vmul.f32 %v2346_v52, %v2346_v52 }
0x14a3   :  { %v2356_v18 = vsel %vm513_vm10, %v2350_v31, 0.0 }
0x14a4   :  { %2357 = vadd.xlane.f32.xlu2 %v2356_v18 }
0x14b6   :  { %v2337_v35 = vpop.xlane.xlu0 %2336 }
0x14b7   :  { %v2343_v42 = vmul.f32 %v2337_v35, %v6859_v21 }
0x14b8   :  { %v2470_v44 = vpop.f32.mrf.mxu0 }
0x14b9   :  { %v2347_v28 = vsub.f32 %v7548_v63, %v2343_v42  ;;  %v2471_v12 = vadd.f32 %v7560_v32, %v2470_v44 }
0x14bb   :  { %2483 = vrot.lane.b32.xlu1 %v2471_v12, %s6681_s4  ;;  %v2351_v34 = vmul.f32 %v2347_v28, %v2347_v28 }
0x14bd   :  { %v2359_v49 = vsel %vm513_vm10, %v2351_v34, 0.0 }
0x14be   :  { %2360 = vadd.xlane.f32.xlu0 %v2359_v49 }
0x14c3   :  { %2521 = vrot.lane.b32.xlu1 %v2471_v12, %s6682_s29 }
0x14f6   :  { %v2309_v40 = vpop.f32.mrf.mxu2 }
0x14f7   :  { %v2315_v48 = vadd.f32 %v2309_v40, %v7463_v16 }
0x14f9   :  { %v7570_v37 = vadd.f32 %v7483_v41, %v2315_v48 }
0x14fb   :  { %v2338_v50 = vsel %vm513_vm10, %v7570_v37, 0.0 }
0x14fc   :  { %2339 = vadd.xlane.f32.xlu2 %v2338_v50 }
0x1517   :  { %v2358_v59 = vpop.xlane.xlu2 %2357 }
0x1518   :  { %v2366_v7 = vmul.f32 %v2358_v59, %v6859_v21 }
0x151a   :  { %v2370_v19 = vadd.f32 1e-05, %v2366_v7 }
0x151c   :  { %6352 = vrsqrt.f32 %v2370_v19  ;;  %vm2389_vm12 = vweird.f32 %v2370_v19 }
0x1522   :  { %v6353_v46 = vpop.eup %6352 }
0x1523   :  { %v2384_v5 = vmul.f32 %v6353_v46, %v2370_v19  ;;  %vm2390_vm0 = vweird.f32 %v6353_v46 }
0x1524   :  { %vm2391_vm13 = vmor %vm2389_vm12, %vm2390_vm0 }
0x1525   :  { %v2385_v1 = vmul.f32 %v6353_v46, %v2384_v5 }
0x1527   :  { %v2386_v57 = vmul.f32 0.5, %v2385_v1 }
0x1529   :  { %v2387_v17 = vsub.f32 1.5, %v2386_v57 }
0x152b   :  { %v2388_v6 = vmul.f32 %v6353_v46, %v2387_v17 }
0x152d   :  { %v2484_v16 = vpop.permute.xlu1 %2483  ;;  %v2392_v41 = vsel %vm2391_vm13, %v6353_v46, %v2388_v6  ;;  %v5911_v6 = vld [vmem:[%s8637_s11 + $0x50] sm:$0xff] }
0x152e   :  { %5897 = vmatpush.xpose.msk.msrb.mxu1 %vm513_vm10, %v2484_v16  ;;  %v2414_v24 = vmul.f32 %v2392_v41, %v2346_v52  ;;  %v5910_v16 = vld [vmem:[%s8637_s11 + $0x48] sm:$0xff] }
0x1530   :  { %v2421_v9 = vmul.f32 %v7535_v45, %v2414_v24  ;;  %v5909_v24 = vld [vmem:[%s8637_s11 + $0x40] sm:$0xff] }
0x1531   :  { %5898 = vmatmul.msk.f32.vlgmr.msrb.gmra.mxu1 %vm513_vm10, %v2471_v12  ;;  %v2361_v11 = vpop.xlane.xlu0 %2360 }
0x1532   :  { %v2367_v39 = vmul.f32 %v2361_v11, %v6859_v21  ;;  %v2428_v36 = vadd.f32 %v7540_v33, %v2421_v9 }
0x1534   :  { %v2371_v0 = vadd.f32 1e-05, %v2367_v39  ;;  %5894 = vmatmul.msk.f32.gmra.mxu0 %vm513_vm10, %v2428_v36 }
0x1535   :  { %v2522_v8 = vpop.permute.xlu1 %2521 }
0x1536   :  { %6354 = vrsqrt.f32 %v2371_v0  ;;  %2542 = vmatpush.msra.mxu3 %v2522_v8  ;;  %vm2399_vm15 = vweird.f32 %v2371_v0 }
0x153c   :  { %v6355_v53 = vpop.eup %6354 }
0x153d   :  { %v2394_v20 = vmul.f32 %v6355_v53, %v2371_v0  ;;  %vm2400_vm14 = vweird.f32 %v6355_v53 }
0x153e   :  { %vm2401_vm1 = vmor %vm2399_vm15, %vm2400_vm14 }
0x153f   :  { %v2395_v14 = vmul.f32 %v6355_v53, %v2394_v20 }
0x1541   :  { %v2396_v38 = vmul.f32 0.5, %v2395_v14 }
0x1543   :  { %v2397_v22 = vsub.f32 1.5, %v2396_v38 }
0x1545   :  { %v2398_v54 = vmul.f32 %v6355_v53, %v2397_v22 }
0x1547   :  { %v2402_v23 = vsel %vm2401_vm1, %v6355_v53, %v2398_v54 }
0x1548   :  { %v2415_v26 = vmul.f32 %v2402_v23, %v2347_v28 }
0x154a   :  { %v2422_v58 = vmul.f32 %v7535_v45, %v2415_v26 }
0x154c   :  { %v2429_v3 = vadd.f32 %v7540_v33, %v2422_v58 }
0x154e   :  { %5895 = vmatmul.msk.f32.gmra.mxu0 %vm513_vm10, %v2429_v3 }
0x156f   :  { %v2340_v51 = vpop.xlane.xlu2 %2339 }
0x1570   :  { %v2344_v25 = vmul.f32 %v2340_v51, %v6859_v21 }
0x1572   :  { %v2348_v29 = vsub.f32 %v7570_v37, %v2344_v25 }
0x1574   :  { %v2352_v10 = vmul.f32 %v2348_v29, %v2348_v29 }
0x1576   :  { %v2362_v55 = vsel %vm513_vm10, %v2352_v10, 0.0 }
0x1577   :  { %2363 = vadd.xlane.f32.xlu0 %v2362_v55 }
0x15ae   :  { %v2506_v61 = vpop.f32.mrf.mxu1 }
0x15af   :  { %v2509_v56 = vmul.f32 0.17677669, %v2506_v61 }
0x15b1   :  { %v2510_v2 = vsel %vm804_vm3, %v2509_v56, -inf  ;;  %v2473_v62 = vpop.f32.mrf.mxu0 }
0x15b2   :  { %2511 = vmax.xlane.f32.xlu2 %v2510_v2  ;;  %v2474_v46 = vadd.f32 %v7560_v32, %v2473_v62 }
0x15cb   :  { %v2476_v15 = vpop.f32.mrf.mxu0 }
0x15cc   :  { %v7589_v60 = vadd.f32 %v7560_v32, %v2476_v15 }
0x15ce   :  { %2613 = vrot.lane.b32.xlu2 %v7589_v60, %s6681_s4  ;;  %v6142_v20 = vpack.i.bf16 %v7589_v60, %v2474_v46 }
0x15ea   :  { %v2364_v13 = vpop.xlane.xlu0 %2363 }
0x15eb   :  { %v2368_v30 = vmul.f32 %v2364_v13, %v6859_v21 }
0x15ed   :  { %v2372_v27 = vadd.f32 1e-05, %v2368_v30 }
0x15ef   :  { %6356 = vrsqrt.f32 %v2372_v27  ;;  %vm2409_vm4 = vweird.f32 %v2372_v27 }
0x15f5   :  { %v6357_v52 = vpop.eup %6356 }
0x15f6   :  { %v2404_v31 = vmul.f32 %v6357_v52, %v2372_v27  ;;  %vm2410_vm2 = vweird.f32 %v6357_v52 }
0x15f7   :  { %vm2411_vm5 = vmor %vm2409_vm4, %vm2410_vm2 }
0x15f8   :  { %v2405_v18 = vmul.f32 %v6357_v52, %v2404_v31 }
0x15fa   :  { %v2406_v35 = vmul.f32 0.5, %v2405_v18 }
0x15fc   :  { %v2407_v42 = vsub.f32 1.5, %v2406_v35 }
0x15fe   :  { %v2408_v44 = vmul.f32 %v6357_v52, %v2407_v42 }
0x1600   :  { %v2412_v28 = vsel %vm2411_vm5, %v6357_v52, %v2408_v44 }
0x1601   :  { %v2416_v12 = vmul.f32 %v2412_v28, %v2348_v29  ;;  %v7637_v28 = vld [vmem:[%s8638_s12 + $0x2] ss:$0 sm:$0xff] }
0x1603   :  { %v2423_v34 = vmul.f32 %v7535_v45, %v2416_v12 }
0x1605   :  { %v2430_v49 = vadd.f32 %v7540_v33, %v2423_v34 }
0x1607   :  { %5896 = vmatmul.msk.f32.gmra.mxu0 %vm513_vm10, %v2430_v49 }
0x1625   :  { %v2512_v40 = vpop.xlane.xlu2 %2511 }
0x1626   :  { %v2513_v48 = vsub.f32 %v2509_v56, %v2512_v40 }
0x1628   :  { %v2514_v50 = vmul.f32 1.442695, %v2513_v48 }
0x162a   :  { %6358 = vpow2.f32 %v2514_v50 }
0x162d   :  { %v2614_v59 = vpop.permute.xlu2 %2613 }
0x162e   :  { %5903 = vmatpush.xpose.msk.msrb.mxu3 %vm513_vm10, %v2614_v59 }
0x1630   :  { %v6359_v7 = vpop.eup %6358 }
0x1631   :  { %v2516_v19 = vsel %vm804_vm3, %v6359_v7, 0.0 }
0x1632   :  { %2517 = vadd.xlane.f32.xlu0 %v2516_v19 }
0x1646   :  { %2548 = vrot.lane.b32.xlu0 %v2474_v46, %s6681_s4 }
0x1684   :  { %v2479_v45 = vpop.f32.mrf.mxu0 }
0x1685   :  { %v2480_v33 = vadd.f32 %v7560_v32, %v2479_v45  ;;  %v5912_v32 = vld [vmem:[%s8637_s11 + $0x58] sm:$0xff] }
0x1687   :  { %2678 = vrot.lane.b32.xlu1 %v2480_v33, %s6681_s4 }
0x16a5   :  { %v2518_v5 = vpop.xlane.xlu0 %2517 }
0x16a6   :  { %6360 = vrcp.f32 %v2518_v5 }
0x16ac   :  { %v6361_v1 = vpop.eup %6360 }
0x16ad   :  { %v2520_v57 = vmul.f32 %v6361_v1, %v6359_v7  ;;  %v5923_v1 = vld [vmem:[%s8641_s15 + $0x58] sm:$0xff] }
0x16af   :  { %5899 = vmatmul.msk.f32.vlgmr.msra.gmra.mxu3 %vm804_vm3, %v2520_v57  ;;  %v5922_v57 = vld [vmem:[%s8641_s15 + $0x50] sm:$0xff] }
0x16b0   :  { %2771 = vmatpush.msra.mxu3 %v5912_v32  ;;  %v5920_v32 = vld [vmem:[%s8641_s15 + $0x40] sm:$0xff] }
0x16b2   :  { %2772 = vmatpush.msra.mxu3 %v5911_v6 }
0x16b4   :  { %2773 = vmatpush.msra.mxu3 %v5910_v16 }
0x16b6   :  { %2774 = vmatpush.msra.mxu3 %v5909_v24 }
0x16b7   :  { %5904 = vmatmul.msk.f32.vlgmr.msrb.gmra.mxu3 %vm513_vm10, %v7589_v60 }
0x16b8   :  { %v2549_v17 = vpop.permute.xlu0 %2548 }
0x16b9   :  { %5900 = vmatpush.xpose.msk.msrb.mxu0 %vm513_vm10, %v2549_v17  ;;  %v5921_v17 = vld [vmem:[%s8641_s15 + $0x48] sm:$0xff] }
0x16bc   :  { %5901 = vmatmul.msk.f32.vlgmr.msrb.gmra.mxu0 %vm513_vm10, %v2474_v46 }
0x16f9   :  { %v2679_v41 = vpop.permute.xlu1 %2678 }
0x16fa   :  { %5906 = vmatpush.xpose.msk.msra.mxu0 %vm513_vm10, %v2679_v41 }
0x16fd   :  { %5907 = vmatmul.msk.f32.vlgmr.msra.gmra.mxu0 %vm513_vm10, %v2480_v33 }
0x16fe   :  { %2941 = vmatpush.msrb.mxu0 %v5923_v1 }
0x1700   :  { %2942 = vmatpush.msrb.mxu0 %v5922_v57 }
0x1702   :  { %2943 = vmatpush.msrb.mxu0 %v5921_v17 }
0x1704   :  { %2944 = vmatpush.msrb.mxu0 %v5920_v32 }
0x1732   :  { %v2544_v9 = vpop.f32.mrf.mxu3 }
0x1733   :  { %5913 = vmatmul.msk.f32.vlgmr.msra.gmra.mxu3 %vm513_vm10, %v2544_v9 }
0x1739   :  { %v2571_v11 = vpop.f32.mrf.mxu0 }
0x173a   :  { %v2574_v39 = vmul.f32 0.17677669, %v2571_v11  ;;  %v2636_v36 = vpop.f32.mrf.mxu3 }
0x173b   :  { %v2639_v0 = vmul.f32 0.17677669, %v2636_v36 }
0x173c   :  { %v2575_v8 = vsel %vm804_vm3, %v2574_v39, -inf }
0x173d   :  { %2576 = vmax.xlane.f32.xlu1 %v2575_v8  ;;  %v2640_v53 = vsel %vm804_vm3, %v2639_v0, -inf }
0x173e   :  { %2641 = vmax.xlane.f32.xlu0 %v2640_v53 }
0x1752   :  { %6143 = vrot.lane.b32.xlu0 %v6142_v20, %s6682_s29 }
0x177a   :  { %v2701_v29 = vpop.f32.mrf.mxu0 }
0x177b   :  { %v2704_v10 = vmul.f32 0.17677669, %v2701_v29 }
0x177d   :  { %v2705_v2 = vsel %vm804_vm3, %v2704_v10, -inf }
0x17b0   :  { %v2577_v14 = vpop.xlane.xlu1 %2576 }
0x17b1   :  { %v2578_v38 = vsub.f32 %v2574_v39, %v2577_v14  ;;  %v2642_v22 = vpop.xlane.xlu0 %2641 }
0x17b2   :  { %v2643_v54 = vsub.f32 %v2639_v0, %v2642_v22 }
0x17b3   :  { %v2579_v23 = vmul.f32 1.442695, %v2578_v38 }
0x17b4   :  { %v2644_v26 = vmul.f32 1.442695, %v2643_v54 }
0x17b5   :  { %6362 = vpow2.f32 %v2579_v23 }
0x17b6   :  { %6364 = vpow2.f32 %v2644_v26  ;;  %v2776_v35 = vpop.f32.mrf.mxu3  ;;  %v7680_v26 = vld [vmem:[%s8639_s13 + $0x2] ss:$0 sm:$0xff] }
0x17b7   :  { %v2788_v44 = vadd.f32 %v2776_v35, %v7487_v47 }
0x17b9   :  { %v7641_v34 = vadd.f32 %v7637_v28, %v2788_v44 }
0x17bb   :  { %v6363_v58 = vpop.eup %6362  ;;  %v2805_v49 = vsel %vm513_vm10, %v7641_v34, 0.0 }
0x17bc   :  { %v6365_v3 = vpop.eup %6364  ;;  %v2581_v51 = vsel %vm804_vm3, %v6363_v58, 0.0 }
0x17bd   :  { %2582 = vadd.xlane.f32.xlu2 %v2581_v51  ;;  %v2646_v25 = vsel %vm804_vm3, %v6365_v3, 0.0 }
0x17be   :  { %2647 = vadd.xlane.f32.xlu1 %v2646_v25 }
0x17c4   :  { %v6144_v55 = vpop.permute.xlu0 %6143 }
0x17c5   :  { %v6146_v61 = vunpack.i.h.bf16 %v6144_v55  ;;  %v6145_v56 = vunpack.i.l.bf16 %v6144_v55 }
0x17c6   :  { %2706 = vmax.xlane.f32.xlu1 %v2705_v2 }
0x17c7   :  { %2607 = vmatpush.msra.mxu1 %v6145_v56  ;;  %2672 = vmatpush.msrb.mxu2 %v6146_v61 }
0x17c9   :  { %6102 = vmatpush.msra.mxu2 %v5923_v1  ;;  %v5935_v1 = vld [vmem:[%s8643_s17 + $0xb8] sm:$0xff] }
0x17ca   :  { %3147 = vmatpush.msra.mxu0 %v5935_v1 }
0x17cb   :  { %6103 = vmatpush.msra.mxu2 %v5922_v57  ;;  %v5934_v57 = vld [vmem:[%s8643_s17 + $0xb0] sm:$0xff] }
0x17cc   :  { %3148 = vmatpush.msra.mxu0 %v5934_v57 }
0x17cd   :  { %6104 = vmatpush.msra.mxu2 %v5921_v17 }
0x17cf   :  { %6105 = vmatpush.msra.mxu2 %v5920_v32 }
0x17df   :  { %2716 = vrot.lane.b32.xlu1 %v2480_v33, %s6682_s29 }
0x1830   :  { %v2583_v62 = vpop.xlane.xlu2 %2582 }
0x1831   :  { %6366 = vrcp.f32 %v2583_v62  ;;  %v2648_v15 = vpop.xlane.xlu1 %2647 }
0x1832   :  { %6368 = vrcp.f32 %v2648_v15 }
0x1837   :  { %v6367_v60 = vpop.eup %6366 }
0x1838   :  { %v6369_v13 = vpop.eup %6368  ;;  %v2585_v30 = vmul.f32 %v6367_v60, %v6363_v58 }
0x1839   :  { %v2650_v27 = vmul.f32 %v6369_v13, %v6365_v3  ;;  %v2707_v52 = vpop.xlane.xlu1 %2706  ;;  %v7685_v3 = vld [vmem:[%s8640_s14 + $0x2] ss:$0 sm:$0xff] }
0x183a   :  { %v2708_v31 = vsub.f32 %v2704_v10, %v2707_v52  ;;  %5902 = vmatmul.msk.f32.vlgmr.msra.gmra.mxu1 %vm804_vm3, %v2585_v30 }
0x183b   :  { %5905 = vmatmul.msk.f32.vlgmr.msrb.gmra.mxu2 %vm804_vm3, %v2650_v27 }
0x183c   :  { %v2709_v18 = vmul.f32 1.442695, %v2708_v31 }
0x183e   :  { %6370 = vpow2.f32 %v2709_v18  ;;  %v7710_v18 = vld [vmem:[#allocation7 + $0x2] ss:$0 sm:$0xff] }
0x1844   :  { %v6371_v42 = vpop.eup %6370 }
0x1845   :  { %v2711_v12 = vsel %vm804_vm3, %v6371_v42, 0.0 }
0x1846   :  { %2712 = vadd.xlane.f32.xlu2 %v2711_v12 }
0x184e   :  { %2806 = vadd.xlane.f32.xlu2 %v2805_v49 }
0x1851   :  { %v2717_v40 = vpop.permute.xlu1 %2716 }
0x1852   :  { %2737 = vmatpush.msrb.mxu1 %v2717_v40 }
0x18b7   :  { %v2609_v48 = vpop.f32.mrf.mxu1 }
0x18b8   :  { %5914 = vmatmul.msk.f32.gmra.mxu3 %vm513_vm10, %v2609_v48 }
0x18b9   :  { %v2713_v47 = vpop.xlane.xlu2 %2712 }
0x18ba   :  { %6372 = vrcp.f32 %v2713_v47 }
0x18be   :  { %v2674_v50 = vpop.f32.mrf.mxu2 }
0x18c0   :  { %v6373_v59 = vpop.eup %6372  ;;  %5915 = vmatmul.msk.f32.gmra.mxu3 %vm513_vm10, %v2674_v50 }
0x18c1   :  { %v2715_v7 = vmul.f32 %v6373_v59, %v6371_v42  ;;  %v2807_v19 = vpop.xlane.xlu2 %2806 }
0x18c2   :  { %v2817_v46 = vmul.f32 %v2807_v19, %v6859_v21 }
0x18c3   :  { %5908 = vmatmul.msk.f32.vlgmr.msrb.gmra.mxu1 %vm804_vm3, %v2715_v7 }
0x18c4   :  { %v2821_v45 = vsub.f32 %v7641_v34, %v2817_v46 }
0x18c6   :  { %v2825_v33 = vmul.f32 %v2821_v45, %v2821_v45 }
0x18c8   :  { %v2829_v5 = vsel %vm513_vm10, %v2825_v33, 0.0 }
0x18c9   :  { %2830 = vadd.xlane.f32.xlu2 %v2829_v5 }
0x193b   :  { %v2779_v6 = vpop.f32.mrf.mxu3 }
0x193c   :  { %v2789_v16 = vadd.f32 %v2779_v6, %v7528_v4  ;;  %v2831_v41 = vpop.xlane.xlu2 %2830  ;;  %v5933_v6 = vld [vmem:[%s8643_s17 + $0xa8] sm:$0xff] }
0x193d   :  { %v2841_v24 = vmul.f32 %v2831_v41, %v6859_v21  ;;  %v5932_v41 = vld [vmem:[%s8643_s17 + $0xa0] sm:$0xff]  ;;  %3149 = vmatpush.msra.mxu0 %v5933_v6 }
0x193e   :  { %v7666_v9 = vadd.f32 %v7637_v28, %v2789_v16 }
0x193f   :  { %v2845_v11 = vadd.f32 1e-05, %v2841_v24  ;;  %3150 = vmatpush.msra.mxu0 %v5932_v41 }
0x1940   :  { %v2739_v39 = vpop.f32.mrf.mxu1  ;;  %v2808_v36 = vsel %vm513_vm10, %v7666_v9, 0.0 }
0x1941   :  { %6374 = vrsqrt.f32 %v2845_v11  ;;  %2809 = vadd.xlane.f32.xlu0 %v2808_v36  ;;  %5916 = vmatmul.msk.f32.gmra.mxu3 %vm513_vm10, %v2739_v39  ;;  %vm2855_vm8 = vweird.f32 %v2845_v11  ;;  %v5931_v39 = vld [vmem:[%s8643_s17 + $0x98] sm:$0xff]  ;;  %v5930_v36 = vld [vmem:[%s8643_s17 + $0x90] sm:$0xff] }
0x1942   :  { %3151 = vmatpush.msra.mxu0 %v5931_v39 }
0x1943   :  { %v2782_v0 = vpop.f32.mrf.mxu3 }
0x1944   :  { %v2790_v8 = vadd.f32 %v2782_v0, %v7548_v63  ;;  %3152 = vmatpush.msra.mxu0 %v5930_v36 }
0x1946   :  { %v7673_v4 = vadd.f32 %v7637_v28, %v2790_v8 }
0x1947   :  { %v6375_v53 = vpop.eup %6374 }
0x1948   :  { %v2850_v20 = vmul.f32 %v6375_v53, %v2845_v11  ;;  %v2811_v14 = vsel %vm513_vm10, %v7673_v4, 0.0  ;;  %vm2856_vm6 = vweird.f32 %v6375_v53 }
0x1949   :  { %2812 = vadd.xlane.f32.xlu2 %v2811_v14  ;;  %vm2857_vm9 = vmor %vm2855_vm8, %vm2856_vm6 }
0x194a   :  { %v2851_v38 = vmul.f32 %v6375_v53, %v2850_v20  ;;  %v5929_v20 = vld [vmem:[%s8643_s17 + $0x88] sm:$0xff] }
0x194b   :  { %3153 = vmatpush.msra.mxu0 %v5929_v20 }
0x194c   :  { %v2852_v22 = vmul.f32 0.5, %v2851_v38  ;;  %v5928_v38 = vld [vmem:[%s8643_s17 + $0x80] sm:$0xff] }
0x194d   :  { %3154 = vmatpush.msra.mxu0 %v5928_v38 }
0x194e   :  { %v2853_v54 = vsub.f32 1.5, %v2852_v22 }
0x1950   :  { %v2854_v23 = vmul.f32 %v6375_v53, %v2853_v54 }
0x1952   :  { %v2858_v63 = vsel %vm2857_vm9, %v6375_v53, %v2854_v23 }
0x1953   :  { %v2889_v58 = vmul.f32 %v2858_v63, %v2821_v45 }
0x1955   :  { %v2896_v51 = vmul.f32 %v7680_v26, %v2889_v58 }
0x1957   :  { %v2903_v25 = vadd.f32 %v7685_v3, %v2896_v51 }
0x1959   :  { %5924 = vmatmul.msk.f32.vlgmr.msrb.gmra.mxu0 %vm513_vm10, %v2903_v25 }
0x19b4   :  { %v2810_v29 = vpop.xlane.xlu0 %2809 }
0x19b5   :  { %v2818_v10 = vmul.f32 %v2810_v29, %v6859_v21 }
0x19b7   :  { %v7692_v55 = vsub.f32 %v7666_v9, %v2818_v10 }
0x19b9   :  { %v2826_v61 = vmul.f32 %v7692_v55, %v7692_v55 }
0x19bb   :  { %v2832_v56 = vsel %vm513_vm10, %v2826_v61, 0.0 }
0x19bc   :  { %2833 = vadd.xlane.f32.xlu1 %v2832_v56  ;;  %v2813_v2 = vpop.xlane.xlu2 %2812 }
0x19bd   :  { %v2819_v62 = vmul.f32 %v2813_v2, %v6859_v21 }
0x19bf   :  { %v7699_v15 = vsub.f32 %v7673_v4, %v2819_v62 }
0x19c1   :  { %v2827_v60 = vmul.f32 %v7699_v15, %v7699_v15 }
0x19c3   :  { %v2835_v13 = vsel %vm513_vm10, %v2827_v60, 0.0 }
0x19c4   :  { %v2785_v30 = vpop.f32.mrf.mxu3  ;;  %2836 = vadd.xlane.f32.xlu2 %v2835_v13 }
0x19c5   :  { %v2791_v27 = vadd.f32 %v2785_v30, %v7570_v37 }
0x19c7   :  { %v7706_v52 = vadd.f32 %v7637_v28, %v2791_v27 }
0x19c9   :  { %v2814_v31 = vsel %vm513_vm10, %v7706_v52, 0.0 }
0x19cc   :  { %2815 = vadd.xlane.f32.xlu2 %v2814_v31 }
0x19d6   :  { %v2946_v35 = vpop.f32.mrf.mxu0 }
0x19d7   :  { %v7713_v42 = vadd.f32 %v7710_v18, %v2946_v35 }
0x19d9   :  { %v7716_v44 = vmul.f32 0.70710677, %v7713_v42 }
0x19db   :  { %v2974_v12 = vand.u32 2147483647, %v7716_v44  ;;  %vm2966_vm6 = vcmp.ge.f32.partialorder %v7716_v44, 0.0 }
0x19dd   :  { %v2978_v49 = vmul.f32 0.3275911, %v2974_v12  ;;  %v3082_v8 = vsub.f32 0.0, %v2974_v12 }
0x19df   :  { %v2982_v37 = vadd.f32 1.0, %v2978_v49  ;;  %v3086_v63 = vmul.f32 %v3082_v8, %v2974_v12 }
0x19e1   :  { %6376 = vrcp.f32 %v2982_v37  ;;  %v2997_v59 = vand.u32 2147483648, %v2982_v37  ;;  %vm2991_vm0 = vweird.f32 %v2982_v37  ;;  %v2995_v7 = vand.u32 2147483647, %v2982_v37 }
0x19e2   :  { %v3090_v29 = vmul.f32 1.442695, %v3086_v63 }
0x19e3   :  { %v2998_v46 = vor.u32 1.1754944e-38, %v2997_v59  ;;  %vm2996_vm13 = vcmp.eq.f32.partialorder %v2995_v7, 8.507059e+37 }
0x19e7   :  { %v6377_v28 = vpop.eup %6376 }
0x19e8   :  { %v2987_v40 = vmul.f32 %v6377_v28, %v2982_v37  ;;  %vm2992_vm11 = vweird.f32 %v6377_v28 }
0x19e9   :  { %vm2993_vm12 = vmor %vm2991_vm0, %vm2992_vm11 }
0x19ea   :  { %v2988_v48 = vsub.f32 1.0, %v2987_v40 }
0x19ec   :  { %v2989_v47 = vmul.f32 %v6377_v28, %v2988_v48 }
0x19ee   :  { %v2990_v50 = vadd.f32 %v6377_v28, %v2989_v47 }
0x19f0   :  { %v2994_v19 = vsel %vm2993_vm12, %v6377_v28, %v2990_v50 }
0x19f1   :  { %v2999_v45 = vsel %vm2996_vm13, %v2998_v46, %v2994_v19 }
0x19f2   :  { %v3046_v33 = vmul.f32 1.0614054, %v2999_v45 }
0x19f4   :  { %v3050_v5 = vadd.f32 -1.4531521, %v3046_v33 }
0x19f6   :  { %v3054_v17 = vmul.f32 %v3050_v5, %v2999_v45  ;;  %v2970_v5 = vsel %vm2966_vm6, 1.0, %v6679_v43 }
0x19f8   :  { %v3058_v24 = vadd.f32 1.4214138, %v3054_v17 }
0x19fa   :  { %v3062_v0 = vmul.f32 %v3058_v24, %v2999_v45 }
0x19fc   :  { %v3066_v54 = vadd.f32 -0.28449672, %v3062_v0 }
0x19fe   :  { %v3070_v25 = vmul.f32 %v3066_v54, %v2999_v45 }
0x1a00   :  { %v3074_v60 = vadd.f32 0.2548296, %v3070_v25 }
0x1a02   :  { %v3078_v49 = vmul.f32 %v3074_v60, %v2999_v45 }
0x1a2f   :  { %v2834_v32 = vpop.xlane.xlu1 %2833 }
0x1a30   :  { %v2842_v16 = vmul.f32 %v2834_v32, %v6859_v21  ;;  %v2958_v32 = vmul.f32 0.5, %v7713_v42 }
0x1a32   :  { %v2846_v11 = vadd.f32 1e-05, %v2842_v16 }
0x1a34   :  { %6378 = vrsqrt.f32 %v2846_v11  ;;  %vm2865_vm15 = vweird.f32 %v2846_v11 }
0x1a37   :  { %v2837_v53 = vpop.xlane.xlu2 %2836 }
0x1a38   :  { %v2843_v14 = vmul.f32 %v2837_v53, %v6859_v21 }
0x1a3a   :  { %v6379_v22 = vpop.eup %6378  ;;  %v2847_v23 = vadd.f32 1e-05, %v2843_v14 }
0x1a3b   :  { %v2860_v58 = vmul.f32 %v6379_v22, %v2846_v11  ;;  %vm2866_vm14 = vweird.f32 %v6379_v22 }
0x1a3c   :  { %6380 = vrsqrt.f32 %v2847_v23  ;;  %vm2867_vm1 = vmor %vm2865_vm15, %vm2866_vm14  ;;  %vm2875_vm4 = vweird.f32 %v2847_v23 }
0x1a3d   :  { %v2861_v51 = vmul.f32 %v6379_v22, %v2860_v58  ;;  %6382 = vpow2.f32 %v3090_v29 }
0x1a3f   :  { %v2862_v10 = vmul.f32 0.5, %v2861_v51  ;;  %v2816_v61 = vpop.xlane.xlu2 %2815 }
0x1a40   :  { %v2820_v56 = vmul.f32 %v2816_v61, %v6859_v21 }
0x1a41   :  { %v2863_v2 = vsub.f32 1.5, %v2862_v10  ;;  %v7778_v10 = vld [vmem:[#allocation8 + $0x2] ss:$0 sm:$0xff] }
0x1a42   :  { %v6381_v62 = vpop.eup %6380  ;;  %v2824_v13 = vsub.f32 %v7706_v52, %v2820_v56 }
0x1a43   :  { %v2864_v30 = vmul.f32 %v6379_v22, %v2863_v2  ;;  %v2870_v27 = vmul.f32 %v6381_v62, %v2847_v23  ;;  %v6383_v47 = vpop.eup %6382  ;;  %vm2876_vm2 = vweird.f32 %v6381_v62 }
0x1a44   :  { %v2828_v31 = vmul.f32 %v2824_v13, %v2824_v13  ;;  %v3098_v59 = vmul.f32 %v6383_v47, %v3078_v49  ;;  %vm2877_vm5 = vmor %vm2875_vm4, %vm2876_vm2 }
0x1a45   :  { %v2868_v35 = vsel %vm2867_vm1, %v6379_v22, %v2864_v30  ;;  %v2871_v12 = vmul.f32 %v6381_v62, %v2870_v27 }
0x1a46   :  { %v2838_v37 = vsel %vm513_vm10, %v2828_v31, 0.0  ;;  %v2890_v28 = vmul.f32 %v2868_v35, %v7692_v55  ;;  %v3102_v45 = vsub.f32 1.0, %v3098_v59 }
0x1a47   :  { %v2872_v40 = vmul.f32 0.5, %v2871_v12  ;;  %2839 = vadd.xlane.f32.xlu2 %v2838_v37 }
0x1a48   :  { %v2897_v48 = vmul.f32 %v7680_v26, %v2890_v28  ;;  %v3106_v1 = vmul.f32 %v3102_v45, %v2970_v5 }
0x1a49   :  { %v2873_v50 = vsub.f32 1.5, %v2872_v40 }
0x1a4a   :  { %v2904_v7 = vadd.f32 %v7685_v3, %v2897_v48  ;;  %v3110_v17 = vadd.f32 1.0, %v3106_v1 }
0x1a4b   :  { %v2874_v19 = vmul.f32 %v6381_v62, %v2873_v50 }
0x1a4c   :  { %5925 = vmatmul.msk.f32.gmra.mxu0 %vm513_vm10, %v2904_v7  ;;  %v3114_v6 = vmul.f32 %v3110_v17, %v2958_v32 }
0x1a4d   :  { %v2878_v46 = vsel %vm2877_vm5, %v6381_v62, %v2874_v19 }
0x1a4e   :  { %v2891_v55 = vmul.f32 %v2878_v46, %v7699_v15 }
0x1a50   :  { %v2898_v33 = vmul.f32 %v7680_v26, %v2891_v55 }
0x1a52   :  { %v2905_v57 = vadd.f32 %v7685_v3, %v2898_v33 }
0x1a54   :  { %5926 = vmatmul.msk.f32.gmra.mxu0 %vm513_vm10, %v2905_v57 }
0x1a5c   :  { %5936 = vmatmul.msk.f32.vlgmr.msra.gmra.mxu0 %vm1415_vm7, %v3114_v6 }
0x1aba   :  { %v2840_v16 = vpop.xlane.xlu2 %2839 }
0x1abb   :  { %v2844_v44 = vmul.f32 %v2840_v16, %v6859_v21 }
0x1abd   :  { %v2848_v41 = vadd.f32 1e-05, %v2844_v44 }
0x1abf   :  { %6384 = vrsqrt.f32 %v2848_v41  ;;  %vm2885_vm9 = vweird.f32 %v2848_v41 }
0x1ac5   :  { %v6385_v15 = vpop.eup %6384 }
0x1ac6   :  { %v2880_v24 = vmul.f32 %v6385_v15, %v2848_v41  ;;  %vm2886_vm8 = vweird.f32 %v6385_v15 }
0x1ac7   :  { %vm2887_vm11 = vmor %vm2885_vm9, %vm2886_vm8 }
0x1ac8   :  { %v2881_v11 = vmul.f32 %v6385_v15, %v2880_v24 }
0x1ac9   :  { %v2949_v39 = vpop.f32.mrf.mxu0 }
0x1aca   :  { %v2882_v36 = vmul.f32 0.5, %v2881_v11  ;;  %v7762_v0 = vadd.f32 %v7710_v18, %v2949_v39 }
0x1acc   :  { %v2883_v8 = vsub.f32 1.5, %v2882_v36  ;;  %v7765_v42 = vmul.f32 0.70710677, %v7762_v0 }
0x1ace   :  { %v2884_v53 = vmul.f32 %v6385_v15, %v2883_v8  ;;  %v2975_v20 = vand.u32 2147483647, %v7765_v42  ;;  %vm2967_vm5 = vcmp.ge.f32.partialorder %v7765_v42, 0.0 }
0x1ad0   :  { %v2888_v14 = vsel %vm2887_vm11, %v6385_v15, %v2884_v53  ;;  %v2979_v38 = vmul.f32 0.3275911, %v2975_v20  ;;  %v3083_v28 = vsub.f32 0.0, %v2975_v20 }
0x1ad1   :  { %v2892_v22 = vmul.f32 %v2888_v14, %v2824_v13  ;;  %v2952_v54 = vpop.f32.mrf.mxu0 }
0x1ad2   :  { %v2983_v23 = vadd.f32 1.0, %v2979_v38  ;;  %v7769_v63 = vadd.f32 %v7710_v18, %v2952_v54  ;;  %v3087_v19 = vmul.f32 %v3083_v28, %v2975_v20 }
0x1ad3   :  { %v2899_v58 = vmul.f32 %v7680_v26, %v2892_v22 }
0x1ad4   :  { %6386 = vrcp.f32 %v2983_v23  ;;  %v7773_v51 = vmul.f32 0.70710677, %v7769_v63  ;;  %v3012_v27 = vand.u32 2147483648, %v2983_v23  ;;  %v3010_v35 = vand.u32 2147483647, %v2983_v23 }
0x1ad5   :  { %v2906_v25 = vadd.f32 %v7685_v3, %v2899_v58  ;;  %vm3006_vm12 = vweird.f32 %v2983_v23  ;;  %v3092_v57 = vmul.f32 1.442695, %v3087_v19  ;;  %v2971_v58 = vsel %vm2967_vm5, 1.0, %v6679_v43 }
0x1ad6   :  { %v2976_v29 = vand.u32 2147483647, %v7773_v51  ;;  %v3013_v49 = vor.u32 1.1754944e-38, %v3012_v27  ;;  %vm3011_vm14 = vcmp.eq.f32.partialorder %v3010_v35, 8.507059e+37  ;;  %vm2968_vm6 = vcmp.ge.f32.partialorder %v7773_v51, 0.0 }
0x1ad7   :  { %5927 = vmatmul.msk.f32.vlgmr.msra.gmra.mxu2 %vm513_vm10, %v2906_v25  ;;  %v2972_v27 = vsel %vm2968_vm6, 1.0, %v6679_v43 }
0x1ad8   :  { %v2980_v61 = vmul.f32 0.3275911, %v2976_v29  ;;  %v3084_v32 = vsub.f32 0.0, %v2976_v29 }
0x1ad9   :  { %v3156_v56 = vpop.f32.mrf.mxu0 }
0x1ada   :  { %v6387_v2 = vpop.eup %6386  ;;  %v3168_v62 = vadd.f32 %v3156_v56, %v7641_v34  ;;  %v2984_v13 = vadd.f32 1.0, %v2980_v61  ;;  %v3088_v24 = vmul.f32 %v3084_v32, %v2976_v29  ;;  %v2959_v29 = vmul.f32 0.5, %v7762_v0 }
0x1adb   :  { %v3002_v60 = vmul.f32 %v6387_v2, %v2983_v23  ;;  %vm3007_vm0 = vweird.f32 %v6387_v2 }
0x1adc   :  { %v7782_v26 = vadd.f32 %v7778_v10, %v3168_v62  ;;  %6388 = vrcp.f32 %v2984_v13  ;;  %vm3008_vm13 = vmor %vm3006_vm12, %vm3007_vm0  ;;  %v3027_v59 = vand.u32 2147483648, %v2984_v13  ;;  %v3025_v45 = vand.u32 2147483647, %v2984_v13 }
0x1add   :  { %v3003_v30 = vsub.f32 1.0, %v3002_v60  ;;  %vm3021_vm1 = vweird.f32 %v2984_v13  ;;  %6390 = vpow2.f32 %v3092_v57  ;;  %v3094_v53 = vmul.f32 1.442695, %v3088_v24 }
0x1ade   :  { %v3185_v3 = vsel %vm513_vm10, %v7782_v26, 0.0  ;;  %v3028_v1 = vor.u32 1.1754944e-38, %v3027_v59  ;;  %vm3026_vm4 = vcmp.eq.f32.partialorder %v3025_v45, 8.507059e+37 }
0x1adf   :  { %v3004_v31 = vmul.f32 %v6387_v2, %v3003_v30  ;;  %3186 = vadd.xlane.f32.xlu2 %v3185_v3  ;;  %6392 = vpow2.f32 %v3094_v53 }
0x1ae1   :  { %v3005_v12 = vadd.f32 %v6387_v2, %v3004_v31  ;;  %v2960_v31 = vmul.f32 0.5, %v7769_v63 }
0x1ae2   :  { %v6389_v34 = vpop.eup %6388 }
0x1ae3   :  { %v3009_v37 = vsel %vm3008_vm13, %v6387_v2, %v3005_v12  ;;  %v3017_v40 = vmul.f32 %v6389_v34, %v2984_v13  ;;  %vm3022_vm15 = vweird.f32 %v6389_v34  ;;  %v6391_v14 = vpop.eup %6390 }
0x1ae4   :  { %v3014_v48 = vsel %vm3011_vm14, %v3013_v49, %v3009_v37  ;;  %vm3023_vm2 = vmor %vm3021_vm1, %vm3022_vm15 }
0x1ae5   :  { %v3047_v47 = vmul.f32 1.0614054, %v3014_v48  ;;  %v3018_v50 = vsub.f32 1.0, %v3017_v40  ;;  %v6393_v60 = vpop.eup %6392 }
0x1ae7   :  { %v3051_v7 = vadd.f32 -1.4531521, %v3047_v47  ;;  %v3019_v46 = vmul.f32 %v6389_v34, %v3018_v50 }
0x1ae9   :  { %v3055_v55 = vmul.f32 %v3051_v7, %v3014_v48  ;;  %v3020_v33 = vadd.f32 %v6389_v34, %v3019_v46 }
0x1aeb   :  { %v3059_v5 = vadd.f32 1.4214138, %v3055_v55  ;;  %v3024_v17 = vsel %vm3023_vm2, %v6389_v34, %v3020_v33 }
0x1aec   :  { %v3029_v16 = vsel %vm3026_vm4, %v3028_v1, %v3024_v17 }
0x1aed   :  { %v3063_v6 = vmul.f32 %v3059_v5, %v3014_v48  ;;  %v3048_v44 = vmul.f32 1.0614054, %v3029_v16 }
0x1aef   :  { %v3067_v41 = vadd.f32 -0.28449672, %v3063_v6  ;;  %v3052_v15 = vadd.f32 -1.4531521, %v3048_v44 }
0x1af1   :  { %v3071_v11 = vmul.f32 %v3067_v41, %v3014_v48  ;;  %v3056_v39 = vmul.f32 %v3052_v15, %v3029_v16 }
0x1af3   :  { %v3075_v36 = vadd.f32 0.2548296, %v3071_v11  ;;  %v3060_v8 = vadd.f32 1.4214138, %v3056_v39 }
0x1af5   :  { %v3079_v20 = vmul.f32 %v3075_v36, %v3014_v48  ;;  %v3064_v38 = vmul.f32 %v3060_v8, %v3029_v16 }
0x1af7   :  { %v3099_v22 = vmul.f32 %v6391_v14, %v3079_v20  ;;  %v3068_v54 = vadd.f32 -0.28449672, %v3064_v38 }
0x1af9   :  { %v3103_v23 = vsub.f32 1.0, %v3099_v22  ;;  %v3072_v25 = vmul.f32 %v3068_v54, %v3029_v16 }
0x1afb   :  { %v3107_v61 = vmul.f32 %v3103_v23, %v2971_v58  ;;  %v3076_v56 = vadd.f32 0.2548296, %v3072_v25 }
0x1afd   :  { %v3111_v2 = vadd.f32 1.0, %v3107_v61  ;;  %v3080_v62 = vmul.f32 %v3076_v56, %v3029_v16 }
0x1aff   :  { %v3115_v13 = vmul.f32 %v3111_v2, %v2959_v29  ;;  %v3100_v30 = vmul.f32 %v6393_v60, %v3080_v62  ;;  %v5944_v60 = vld [vmem:[%s8635_s9 + $0x70] sm:$0xff] }
0x1b01   :  { %5937 = vmatmul.msk.f32.gmra.mxu0 %vm1415_vm7, %v3115_v13  ;;  %v3104_v42 = vsub.f32 1.0, %v3100_v30  ;;  %v5943_v13 = vld [vmem:[%s8635_s9 + $0x68] sm:$0xff]  ;;  %v5942_v30 = vld [vmem:[%s8635_s9 + $0x60] sm:$0xff] }
0x1b03   :  { %v3108_v3 = vmul.f32 %v3104_v42, %v2972_v27 }
0x1b05   :  { %v3112_v35 = vadd.f32 1.0, %v3108_v3 }
0x1b07   :  { %v3116_v12 = vmul.f32 %v3112_v35, %v2960_v31 }
0x1b09   :  { %5938 = vmatmul.msk.f32.gmra.mxu0 %vm1415_vm7, %v3116_v12 }
0x1b52   :  { %v3187_v0 = vpop.xlane.xlu2 %3186 }
0x1b53   :  { %v3197_v49 = vmul.f32 %v3187_v0, %v6859_v21 }
0x1b55   :  { %v7796_v34 = vsub.f32 %v7782_v26, %v3197_v49 }
0x1b57   :  { %v3205_v51 = vmul.f32 %v7796_v34, %v7796_v34 }
0x1b59   :  { %v3209_v37 = vsel %vm513_vm10, %v3205_v51, 0.0 }
0x1b5a   :  { %v2955_v28 = vpop.f32.mrf.mxu2  ;;  %3210 = vadd.xlane.f32.xlu0 %v3209_v37  ;;  %v7832_v37 = vld [vmem:[%s8633_s7 + $0x3] ss:$0 sm:$0xff] }
0x1b5b   :  { %v2956_v40 = vadd.f32 %v7710_v18, %v2955_v28 }
0x1b5d   :  { %v2965_v63 = vmul.f32 0.70710677, %v2956_v40  ;;  %v2961_v29 = vmul.f32 0.5, %v2956_v40 }
0x1b5f   :  { %v2977_v48 = vand.u32 2147483647, %v2965_v63  ;;  %vm2969_vm12 = vcmp.ge.f32.partialorder %v2965_v63, 0.0  ;;  %v7838_v63 = vld [vmem:[%s8634_s8 + $0x3] ss:$0 sm:$0xff] }
0x1b60   :  { %v2973_v25 = vsel %vm2969_vm12, 1.0, %v6679_v43 }
0x1b61   :  { %v2981_v47 = vmul.f32 0.3275911, %v2977_v48  ;;  %v3085_v18 = vsub.f32 0.0, %v2977_v48 }
0x1b63   :  { %v2985_v50 = vadd.f32 1.0, %v2981_v47  ;;  %v3089_v6 = vmul.f32 %v3085_v18, %v2977_v48 }
0x1b65   :  { %6394 = vrcp.f32 %v2985_v50  ;;  %v3042_v46 = vand.u32 2147483648, %v2985_v50  ;;  %v3040_v55 = vand.u32 2147483647, %v2985_v50  ;;  %vm3036_vm9 = vweird.f32 %v2985_v50 }
0x1b66   :  { %v3096_v41 = vmul.f32 1.442695, %v3089_v6 }
0x1b67   :  { %v3043_v5 = vor.u32 1.1754944e-38, %v3042_v46  ;;  %vm3041_vm0 = vcmp.eq.f32.partialorder %v3040_v55, 8.507059e+37 }
0x1b68   :  { %6396 = vpow2.f32 %v3096_v41 }
0x1b6b   :  { %v6395_v59 = vpop.eup %6394 }
0x1b6c   :  { %v3032_v7 = vmul.f32 %v6395_v59, %v2985_v50  ;;  %vm3037_vm8 = vweird.f32 %v6395_v59 }
0x1b6d   :  { %vm3038_vm11 = vmor %vm3036_vm9, %vm3037_vm8 }
0x1b6e   :  { %v3033_v19 = vsub.f32 1.0, %v3032_v7  ;;  %v6397_v38 = vpop.eup %6396 }
0x1b70   :  { %v3034_v45 = vmul.f32 %v6395_v59, %v3033_v19 }
0x1b72   :  { %v3035_v33 = vadd.f32 %v6395_v59, %v3034_v45 }
0x1b74   :  { %v3039_v1 = vsel %vm3038_vm11, %v6395_v59, %v3035_v33 }
0x1b75   :  { %v3044_v57 = vsel %vm3041_vm0, %v3043_v5, %v3039_v1 }
0x1b76   :  { %v3049_v17 = vmul.f32 1.0614054, %v3044_v57 }
0x1b78   :  { %v3053_v32 = vadd.f32 -1.4531521, %v3049_v17 }
0x1b7a   :  { %v3057_v16 = vmul.f32 %v3053_v32, %v3044_v57  ;;  %v7858_v32 = vld [vmem:[%s8636_s10 + $0x3] ss:$0 sm:$0xff] }
0x1b7c   :  { %v3061_v44 = vadd.f32 1.4214138, %v3057_v16 }
0x1b7e   :  { %v3065_v15 = vmul.f32 %v3061_v44, %v3044_v57  ;;  %v3159_v24 = vpop.f32.mrf.mxu0 }
0x1b7f   :  { %v3169_v11 = vadd.f32 %v3159_v24, %v7666_v9 }
0x1b80   :  { %v3069_v39 = vadd.f32 -0.28449672, %v3065_v15 }
0x1b81   :  { %v7804_v36 = vadd.f32 %v7778_v10, %v3169_v11 }
0x1b82   :  { %v3073_v8 = vmul.f32 %v3069_v39, %v3044_v57 }
0x1b83   :  { %v3188_v53 = vsel %vm513_vm10, %v7804_v36, 0.0 }
0x1b84   :  { %v3077_v20 = vadd.f32 0.2548296, %v3073_v8  ;;  %3189 = vadd.xlane.f32.xlu2 %v3188_v53 }
0x1b86   :  { %v3081_v14 = vmul.f32 %v3077_v20, %v3044_v57  ;;  %v3162_v22 = vpop.f32.mrf.mxu0 }
0x1b87   :  { %v3170_v23 = vadd.f32 %v3162_v22, %v7673_v4  ;;  %v5945_v4 = vld [vmem:[%s8635_s9 + $0x78] sm:$0xff] }
0x1b88   :  { %v3101_v54 = vmul.f32 %v6397_v38, %v3081_v14  ;;  %3321 = vmatpush.msra.mxu1 %v5945_v4 }
0x1b89   :  { %v7810_v9 = vadd.f32 %v7778_v10, %v3170_v23 }
0x1b8a   :  { %v3105_v58 = vsub.f32 1.0, %v3101_v54  ;;  %3322 = vmatpush.msra.mxu1 %v5944_v60 }
0x1b8b   :  { %v3191_v56 = vsel %vm513_vm10, %v7810_v9, 0.0 }
0x1b8c   :  { %v3109_v61 = vmul.f32 %v3105_v58, %v2973_v25  ;;  %3192 = vadd.xlane.f32.xlu2 %v3191_v56  ;;  %3323 = vmatpush.msra.mxu1 %v5943_v13 }
0x1b8e   :  { %v3113_v2 = vadd.f32 1.0, %v3109_v61  ;;  %3324 = vmatpush.msra.mxu1 %v5942_v30 }
0x1b90   :  { %v3117_v62 = vmul.f32 %v3113_v2, %v2961_v29 }
0x1b92   :  { %5939 = vmatmul.msk.f32.gmra.mxu0 %vm1415_vm7, %v3117_v62 }
0x1bcd   :  { %v3211_v42 = vpop.xlane.xlu0 %3210 }
0x1bce   :  { %v3221_v27 = vmul.f32 %v3211_v42, %v6859_v21 }
0x1bd0   :  { %v3225_v3 = vadd.f32 1e-05, %v3221_v27 }
0x1bd2   :  { %6398 = vrsqrt.f32 %v3225_v3  ;;  %vm3235_vm14 = vweird.f32 %v3225_v3 }
0x1bd8   :  { %v6399_v31 = vpop.eup %6398 }
0x1bd9   :  { %v3230_v35 = vmul.f32 %v6399_v31, %v3225_v3  ;;  %vm3236_vm13 = vweird.f32 %v6399_v31 }
0x1bda   :  { %vm3237_vm15 = vmor %vm3235_vm14, %vm3236_vm13 }
0x1bdb   :  { %v3231_v12 = vmul.f32 %v6399_v31, %v3230_v35 }
0x1bdd   :  { %v3232_v0 = vmul.f32 0.5, %v3231_v12 }
0x1bdf   :  { %v3233_v49 = vsub.f32 1.5, %v3232_v0 }
0x1be1   :  { %v3234_v51 = vmul.f32 %v6399_v31, %v3233_v49 }
0x1be3   :  { %v3238_v28 = vsel %vm3237_vm15, %v6399_v31, %v3234_v51 }
0x1be4   :  { %v3269_v40 = vmul.f32 %v3238_v28, %v7796_v34 }
0x1be6   :  { %v3276_v48 = vmul.f32 %v7832_v37, %v3269_v40 }
0x1be8   :  { %v3283_v47 = vadd.f32 %v7838_v63, %v3276_v48 }
0x1bea   :  { %5947 = vmatmul.msk.f32.vlgmr.msra.gmra.mxu1 %vm513_vm10, %v3283_v47 }
0x1bf7   :  { %v3190_v50 = vpop.xlane.xlu2 %3189 }
0x1bf8   :  { %v3198_v59 = vmul.f32 %v3190_v50, %v6859_v21 }
0x1bfa   :  { %v3202_v7 = vsub.f32 %v7804_v36, %v3198_v59 }
0x1bfc   :  { %v3206_v19 = vmul.f32 %v3202_v7, %v3202_v7 }
0x1bfe   :  { %v3212_v46 = vsel %vm513_vm10, %v3206_v19, 0.0 }
0x1bff   :  { %3213 = vadd.xlane.f32.xlu2 %v3212_v46  ;;  %v3193_v34 = vpop.xlane.xlu2 %3192 }
0x1c00   :  { %v3199_v55 = vmul.f32 %v3193_v34, %v6859_v21 }
0x1c02   :  { %v3203_v1 = vsub.f32 %v7810_v9, %v3199_v55 }
0x1c04   :  { %v3207_v18 = vmul.f32 %v3203_v1, %v3203_v1 }
0x1c06   :  { %v3215_v17 = vsel %vm513_vm10, %v3207_v18, 0.0 }
0x1c0f   :  { %v3165_v45 = vpop.f32.mrf.mxu0 }
0x1c10   :  { %v3171_v33 = vadd.f32 %v3165_v45, %v7706_v52 }
0x1c12   :  { %v7849_v5 = vadd.f32 %v7778_v10, %v3171_v33 }
0x1c14   :  { %v3194_v57 = vsel %vm513_vm10, %v7849_v5, 0.0 }
0x1c15   :  { %3195 = vadd.xlane.f32.xlu1 %v3194_v57 }
0x1c1d   :  { %3216 = vadd.xlane.f32.xlu1 %v3215_v17 }
0x1c67   :  { %v3326_v6 = vpop.f32.mrf.mxu1 }
0x1c68   :  { %v3327_v52 = vadd.f32 %v7858_v32, %v3326_v6 }
0x1c6a   :  { %3339 = vrot.lane.b32.xlu0 %v3327_v52, %s6681_s4  ;;  %3377 = vrot.lane.b32.xlu1 %v3327_v52, %s6682_s29 }
0x1c72   :  { %v3214_v10 = vpop.xlane.xlu2 %3213 }
0x1c73   :  { %v3222_v16 = vmul.f32 %v3214_v10, %v6859_v21 }
0x1c75   :  { %v3226_v44 = vadd.f32 1e-05, %v3222_v16 }
0x1c77   :  { %6400 = vrsqrt.f32 %v3226_v44  ;;  %vm3245_vm2 = vweird.f32 %v3226_v44 }
0x1c7d   :  { %v6401_v41 = vpop.eup %6400 }
0x1c7e   :  { %v3240_v15 = vmul.f32 %v6401_v41, %v3226_v44  ;;  %vm3246_vm1 = vweird.f32 %v6401_v41 }
0x1c7f   :  { %vm3247_vm4 = vmor %vm3245_vm2, %vm3246_vm1 }
0x1c80   :  { %v3241_v24 = vmul.f32 %v6401_v41, %v3240_v15 }
0x1c82   :  { %v3242_v11 = vmul.f32 0.5, %v3241_v24 }
0x1c84   :  { %v3243_v39 = vsub.f32 1.5, %v3242_v11 }
0x1c86   :  { %v3244_v8 = vmul.f32 %v6401_v41, %v3243_v39 }
0x1c88   :  { %v3248_v53 = vsel %vm3247_vm4, %v6401_v41, %v3244_v8  ;;  %v3196_v20 = vpop.xlane.xlu1 %3195 }
0x1c89   :  { %v3200_v14 = vmul.f32 %v3196_v20, %v6859_v21  ;;  %v3270_v38 = vmul.f32 %v3248_v53, %v3202_v7 }
0x1c8b   :  { %v3204_v22 = vsub.f32 %v7849_v5, %v3200_v14  ;;  %v3277_v54 = vmul.f32 %v7832_v37, %v3270_v38  ;;  %v5965_v38 = vld [vmem:[%s8637_s11 + $0x70] sm:$0xff] }
0x1c8d   :  { %v3284_v23 = vadd.f32 %v7838_v63, %v3277_v54  ;;  %v3208_v58 = vmul.f32 %v3204_v22, %v3204_v22  ;;  %v5963_v54 = vld [vmem:[%s8637_s11 + $0x60] sm:$0xff] }
0x1c8f   :  { %5948 = vmatmul.msk.f32.gmra.mxu1 %vm513_vm10, %v3284_v23  ;;  %v3218_v29 = vsel %vm513_vm10, %v3208_v58, 0.0 }
0x1c90   :  { %v3217_v25 = vpop.xlane.xlu1 %3216 }
0x1c91   :  { %v3223_v61 = vmul.f32 %v3217_v25, %v6859_v21 }
0x1c93   :  { %v3227_v56 = vadd.f32 1e-05, %v3223_v61 }
0x1c94   :  { %3219 = vadd.xlane.f32.xlu0 %v3218_v29 }
0x1c95   :  { %6402 = vrsqrt.f32 %v3227_v56  ;;  %vm3255_vm6 = vweird.f32 %v3227_v56 }
0x1c9b   :  { %v6403_v2 = vpop.eup %6402 }
0x1c9c   :  { %v3250_v62 = vmul.f32 %v6403_v2, %v3227_v56  ;;  %vm3256_vm5 = vweird.f32 %v6403_v2 }
0x1c9d   :  { %vm3257_vm8 = vmor %vm3255_vm6, %vm3256_vm5 }
0x1c9e   :  { %v3251_v4 = vmul.f32 %v6403_v2, %v3250_v62 }
0x1ca0   :  { %v3252_v60 = vmul.f32 0.5, %v3251_v4 }
0x1ca2   :  { %v3253_v13 = vsub.f32 1.5, %v3252_v60 }
0x1ca4   :  { %v3254_v30 = vmul.f32 %v6403_v2, %v3253_v13 }
0x1ca6   :  { %v3258_v42 = vsel %vm3257_vm8, %v6403_v2, %v3254_v30 }
0x1ca7   :  { %v3271_v27 = vmul.f32 %v3258_v42, %v3203_v1 }
0x1ca9   :  { %v3278_v3 = vmul.f32 %v7832_v37, %v3271_v27 }
0x1cab   :  { %v3285_v31 = vadd.f32 %v7838_v63, %v3278_v3 }
0x1cad   :  { %5949 = vmatmul.msk.f32.gmra.mxu1 %vm513_vm10, %v3285_v31 }
0x1cdc   :  { %v3340_v35 = vpop.permute.xlu0 %3339  ;;  %v3378_v12 = vpop.permute.xlu1 %3377 }
0x1cdd   :  { %5951 = vmatpush.xpose.msk.msrb.mxu3 %vm513_vm10, %v3340_v35  ;;  %3398 = vmatpush.msrb.mxu2 %v3378_v12 }
0x1ce0   :  { %5952 = vmatmul.msk.f32.vlgmr.msrb.gmra.mxu3 %vm513_vm10, %v3327_v52 }
0x1d07   :  { %v3220_v0 = vpop.xlane.xlu0 %3219 }
0x1d08   :  { %v3224_v49 = vmul.f32 %v3220_v0, %v6859_v21 }
0x1d0a   :  { %v3228_v51 = vadd.f32 1e-05, %v3224_v49 }
0x1d0c   :  { %6404 = vrsqrt.f32 %v3228_v51  ;;  %vm3265_vm11 = vweird.f32 %v3228_v51  ;;  %v3329_v1 = vpop.f32.mrf.mxu1 }
0x1d0d   :  { %v3330_v57 = vadd.f32 %v7858_v32, %v3329_v1 }
0x1d12   :  { %v6405_v28 = vpop.eup %6404 }
0x1d13   :  { %v3260_v40 = vmul.f32 %v6405_v28, %v3228_v51  ;;  %vm3266_vm9 = vweird.f32 %v6405_v28 }
0x1d14   :  { %vm3267_vm0 = vmor %vm3265_vm11, %vm3266_vm9 }
0x1d15   :  { %v3261_v48 = vmul.f32 %v6405_v28, %v3260_v40 }
0x1d17   :  { %v3262_v47 = vmul.f32 0.5, %v3261_v48 }
0x1d19   :  { %v3263_v50 = vsub.f32 1.5, %v3262_v47 }
0x1d1b   :  { %v3264_v59 = vmul.f32 %v6405_v28, %v3263_v50  ;;  %v7919_v50 = vld [vmem:[%s8638_s12 + $0x3] ss:$0 sm:$0xff] }
0x1d1d   :  { %v3268_v7 = vsel %vm3267_vm0, %v6405_v28, %v3264_v59 }
0x1d1e   :  { %v3272_v19 = vmul.f32 %v3268_v7, %v3204_v22  ;;  %v5964_v22 = vld [vmem:[%s8637_s11 + $0x68] sm:$0xff] }
0x1d20   :  { %v3279_v46 = vmul.f32 %v7832_v37, %v3272_v19 }
0x1d22   :  { %v3286_v34 = vadd.f32 %v7838_v63, %v3279_v46 }
0x1d24   :  { %5950 = vmatmul.msk.f32.gmra.mxu1 %vm513_vm10, %v3286_v34 }
0x1d2a   :  { %v3332_v18 = vpop.f32.mrf.mxu1 }
0x1d2b   :  { %v3333_v17 = vadd.f32 %v7858_v32, %v3332_v18 }
0x1d63   :  { %v3362_v45 = vpop.f32.mrf.mxu3 }
0x1d64   :  { %v3365_v55 = vmul.f32 0.17677669, %v3362_v45 }
0x1d66   :  { %v3366_v33 = vsel %vm804_vm3, %v3365_v55, -inf }
0x1d67   :  { %3367 = vmax.xlane.f32.xlu2 %v3366_v33 }
0x1d7f   :  { %3404 = vrot.lane.b32.xlu2 %v3330_v57, %s6681_s4 }
0x1d87   :  { %3469 = vrot.lane.b32.xlu2 %v3333_v17, %s6681_s4 }
0x1da1   :  { %v3335_v41 = vpop.f32.mrf.mxu1 }
0x1da2   :  { %v3336_v15 = vadd.f32 %v7858_v32, %v3335_v41  ;;  %v5966_v32 = vld [vmem:[%s8637_s11 + $0x78] sm:$0xff] }
0x1da4   :  { %v6147_v42 = vpack.i.bf16 %v3336_v15, %v3333_v17 }
0x1dda   :  { %v3368_v37 = vpop.xlane.xlu2 %3367 }
0x1ddb   :  { %v3369_v6 = vsub.f32 %v3365_v55, %v3368_v37 }
0x1ddd   :  { %v3370_v63 = vmul.f32 1.442695, %v3369_v6 }
0x1ddf   :  { %6406 = vpow2.f32 %v3370_v63 }
0x1de2   :  { %v3405_v52 = vpop.permute.xlu2 %3404 }
0x1de3   :  { %5954 = vmatpush.xpose.msk.msrb.mxu1 %vm513_vm10, %v3405_v52 }
0x1de5   :  { %v6407_v10 = vpop.eup %6406 }
0x1de6   :  { %5955 = vmatmul.msk.f32.vlgmr.msrb.gmra.mxu1 %vm513_vm10, %v3330_v57  ;;  %v3372_v16 = vsel %vm804_vm3, %v6407_v10, 0.0 }
0x1de7   :  { %3373 = vadd.xlane.f32.xlu1 %v3372_v16 }
0x1dea   :  { %v3470_v44 = vpop.permute.xlu2 %3469 }
0x1deb   :  { %5957 = vmatpush.xpose.msk.msra.mxu2 %vm513_vm10, %v3470_v44 }
0x1e00   :  { %3534 = vrot.lane.b32.xlu1 %v3336_v15, %s6681_s4 }
0x1e5a   :  { %v3374_v24 = vpop.xlane.xlu1 %3373 }
0x1e5b   :  { %6408 = vrcp.f32 %v3374_v24  ;;  %v5976_v24 = vld [vmem:[%s8641_s15 + $0x70] sm:$0xff] }
0x1e61   :  { %v6409_v11 = vpop.eup %6408 }
0x1e62   :  { %v3376_v39 = vmul.f32 %v6409_v11, %v6407_v10  ;;  %v5975_v11 = vld [vmem:[%s8641_s15 + $0x68] sm:$0xff] }
0x1e63   :  { %v3427_v8 = vpop.f32.mrf.mxu1 }
0x1e64   :  { %v3430_v53 = vmul.f32 0.17677669, %v3427_v8  ;;  %5953 = vmatmul.msk.f32.vlgmr.msrb.gmra.mxu2 %vm804_vm3, %v3376_v39  ;;  %v5974_v39 = vld [vmem:[%s8641_s15 + $0x60] sm:$0xff] }
0x1e65   :  { %3627 = vmatpush.msrb.mxu2 %v5966_v32 }
0x1e66   :  { %v3431_v20 = vsel %vm804_vm3, %v3430_v53, -inf }
0x1e67   :  { %3432 = vmax.xlane.f32.xlu2 %v3431_v20  ;;  %3628 = vmatpush.msrb.mxu2 %v5965_v38 }
0x1e69   :  { %3629 = vmatpush.msrb.mxu2 %v5964_v22 }
0x1e6b   :  { %3630 = vmatpush.msrb.mxu2 %v5963_v54 }
0x1e6c   :  { %5958 = vmatmul.msk.f32.vlgmr.msra.gmra.mxu2 %vm513_vm10, %v3333_v17 }
0x1e72   :  { %v3535_v14 = vpop.permute.xlu1 %3534 }
0x1e73   :  { %5960 = vmatpush.xpose.msk.msra.mxu1 %vm513_vm10, %v3535_v14 }
0x1e76   :  { %5961 = vmatmul.msk.f32.vlgmr.msra.gmra.mxu1 %vm513_vm10, %v3336_v15  ;;  %v5977_v15 = vld [vmem:[%s8641_s15 + $0x78] sm:$0xff] }
0x1eda   :  { %v3433_v23 = vpop.xlane.xlu2 %3432 }
0x1edb   :  { %v3434_v25 = vsub.f32 %v3430_v53, %v3433_v23 }
0x1edd   :  { %v3435_v61 = vmul.f32 1.442695, %v3434_v25 }
0x1edf   :  { %6410 = vpow2.f32 %v3435_v61  ;;  %v7952_v61 = vld [vmem:[%s8639_s13 + $0x3] ss:$0 sm:$0xff] }
0x1ee5   :  { %v6411_v13 = vpop.eup %6410 }
0x1ee6   :  { %v3437_v30 = vsel %vm804_vm3, %v6411_v13, 0.0 }
0x1ee7   :  { %v3400_v58 = vpop.f32.mrf.mxu2 }
0x1ee8   :  { %5967 = vmatmul.msk.f32.vlgmr.msrb.gmra.mxu2 %vm513_vm10, %v3400_v58 }
0x1eef   :  { %v3492_v56 = vpop.f32.mrf.mxu2 }
0x1ef0   :  { %v3495_v29 = vmul.f32 0.17677669, %v3492_v56 }
0x1ef2   :  { %v3496_v2 = vsel %vm804_vm3, %v3495_v29, -inf }
0x1ef3   :  { %v3557_v62 = vpop.f32.mrf.mxu1  ;;  %3497 = vmax.xlane.f32.xlu0 %v3496_v2 }
0x1ef4   :  { %v3560_v4 = vmul.f32 0.17677669, %v3557_v62 }
0x1ef6   :  { %v3561_v60 = vsel %vm804_vm3, %v3560_v4, -inf }
0x1ef7   :  { %3562 = vmax.xlane.f32.xlu1 %v3561_v60 }
0x1efb   :  { %3438 = vadd.xlane.f32.xlu0 %v3437_v30 }
0x1f0f   :  { %3442 = vrot.lane.b32.xlu0 %v3330_v57, %s6682_s29 }
0x1f10   :  { %6148 = vrot.lane.b32.xlu1 %v6147_v42, %s6682_s29 }
0x1f66   :  { %v3498_v27 = vpop.xlane.xlu0 %3497 }
0x1f67   :  { %v3499_v3 = vsub.f32 %v3495_v29, %v3498_v27  ;;  %v7957_v29 = vld [vmem:[%s8640_s14 + $0x3] ss:$0 sm:$0xff] }
0x1f69   :  { %v3500_v31 = vmul.f32 1.442695, %v3499_v3 }
0x1f6a   :  { %v3563_v35 = vpop.xlane.xlu1 %3562 }
0x1f6b   :  { %6412 = vpow2.f32 %v3500_v31  ;;  %v3564_v12 = vsub.f32 %v3560_v4, %v3563_v35  ;;  %v3632_v28 = vpop.f32.mrf.mxu2 }
0x1f6c   :  { %v3644_v47 = vadd.f32 %v3632_v28, %v7782_v26  ;;  %v7981_v28 = vld [vmem:[#allocation7 + $0x3] ss:$0 sm:$0xff] }
0x1f6d   :  { %v3565_v0 = vmul.f32 1.442695, %v3564_v12 }
0x1f6e   :  { %v3439_v48 = vpop.xlane.xlu0 %3438  ;;  %v7923_v7 = vadd.f32 %v7919_v50, %v3644_v47 }
0x1f6f   :  { %6414 = vpow2.f32 %v3565_v0 }
0x1f70   :  { %6416 = vrcp.f32 %v3439_v48  ;;  %v3661_v46 = vsel %vm513_vm10, %v7923_v7, 0.0 }
0x1f71   :  { %v6413_v49 = vpop.eup %6412 }
0x1f72   :  { %v3502_v51 = vsel %vm804_vm3, %v6413_v49, 0.0 }
0x1f73   :  { %3503 = vadd.xlane.f32.xlu0 %v3502_v51 }
0x1f75   :  { %v6415_v40 = vpop.eup %6414 }
0x1f76   :  { %v3567_v59 = vsel %vm804_vm3, %v6415_v40, 0.0  ;;  %v6417_v19 = vpop.eup %6416 }
0x1f77   :  { %3568 = vadd.xlane.f32.xlu2 %v3567_v59  ;;  %v3441_v34 = vmul.f32 %v6417_v19, %v6411_v13 }
0x1f7f   :  { %3662 = vadd.xlane.f32.xlu2 %v3661_v46 }
0x1f81   :  { %v3443_v45 = vpop.permute.xlu0 %3442 }
0x1f82   :  { %v6149_v26 = vpop.permute.xlu1 %6148  ;;  %3463 = vmatpush.msra.mxu3 %v3443_v45  ;;  %v5989_v45 = vld [vmem:[%s8643_s17 + $0xf8] sm:$0xff] }
0x1f83   :  { %v6151_v55 = vunpack.i.h.bf16 %v6149_v26  ;;  %v6150_v33 = vunpack.i.l.bf16 %v6149_v26  ;;  %5956 = vmatmul.msk.f32.vlgmr.msra.gmra.mxu3 %vm804_vm3, %v3441_v34  ;;  %4003 = vmatpush.msrb.mxu1 %v5989_v45  ;;  %v5988_v26 = vld [vmem:[%s8643_s17 + $0xf0] sm:$0xff] }
0x1f85   :  { %3528 = vmatpush.msrb.mxu0 %v6150_v33  ;;  %3593 = vmatpush.msrb.mxu3 %v6151_v55  ;;  %v5987_v55 = vld [vmem:[%s8643_s17 + $0xe8] sm:$0xff]  ;;  %v5986_v33 = vld [vmem:[%s8643_s17 + $0xe0] sm:$0xff] }
0x1f86   :  { %4004 = vmatpush.msrb.mxu1 %v5988_v26 }
0x1f87   :  { %3797 = vmatpush.msra.mxu0 %v5977_v15 }
0x1f88   :  { %4005 = vmatpush.msrb.mxu1 %v5987_v55 }
0x1f89   :  { %3798 = vmatpush.msra.mxu0 %v5976_v24 }
0x1f8a   :  { %4006 = vmatpush.msrb.mxu1 %v5986_v33 }
0x1f8b   :  { %3799 = vmatpush.msra.mxu0 %v5975_v11 }
0x1f8d   :  { %3800 = vmatpush.msra.mxu0 %v5974_v39 }
0x1fe6   :  { %v3504_v1 = vpop.xlane.xlu0 %3503 }
0x1fe7   :  { %6418 = vrcp.f32 %v3504_v1 }
0x1fea   :  { %v3569_v57 = vpop.xlane.xlu2 %3568 }
0x1feb   :  { %6420 = vrcp.f32 %v3569_v57 }
0x1fed   :  { %v6419_v18 = vpop.eup %6418 }
0x1fee   :  { %v3506_v17 = vmul.f32 %v6419_v18, %v6413_v49  ;;  %v5985_v18 = vld [vmem:[%s8643_s17 + $0xd8] sm:$0xff] }
0x1fef   :  { %4007 = vmatpush.msrb.mxu1 %v5985_v18 }
0x1ff0   :  { %5959 = vmatmul.msk.f32.vlgmr.msrb.gmra.mxu0 %vm804_vm3, %v3506_v17 }
0x1ff1   :  { %v6421_v37 = vpop.eup %6420 }
0x1ff2   :  { %v3571_v6 = vmul.f32 %v6421_v37, %v6415_v40  ;;  %v3663_v63 = vpop.xlane.xlu2 %3662  ;;  %v5984_v37 = vld [vmem:[%s8643_s17 + $0xd0] sm:$0xff] }
0x1ff3   :  { %v3673_v52 = vmul.f32 %v3663_v63, %v6859_v21  ;;  %4008 = vmatpush.msrb.mxu1 %v5984_v37 }
0x1ff4   :  { %5962 = vmatmul.msk.f32.vlgmr.msrb.gmra.mxu3 %vm804_vm3, %v3571_v6 }
0x1ff5   :  { %v3677_v10 = vsub.f32 %v7923_v7, %v3673_v52 }
0x1ff7   :  { %v3681_v16 = vmul.f32 %v3677_v10, %v3677_v10 }
0x1ff9   :  { %v3685_v44 = vsel %vm513_vm10, %v3681_v16, 0.0  ;;  %v5982_v16 = vld [vmem:[%s8643_s17 + $0xc0] sm:$0xff] }
0x1ffa   :  { %3686 = vadd.xlane.f32.xlu2 %v3685_v44 }
0x2006   :  { %v3465_v41 = vpop.f32.mrf.mxu3 }
0x2007   :  { %5968 = vmatmul.msk.f32.gmra.mxu2 %vm513_vm10, %v3465_v41 }
0x206d   :  { %v3530_v8 = vpop.f32.mrf.mxu0  ;;  %v3687_v53 = vpop.xlane.xlu2 %3686 }
0x206e   :  { %v3697_v20 = vmul.f32 %v3687_v53, %v6859_v21  ;;  %5969 = vmatmul.msk.f32.gmra.mxu2 %vm513_vm10, %v3530_v8 }
0x2070   :  { %v3701_v14 = vadd.f32 1e-05, %v3697_v20 }
0x2072   :  { %6422 = vrsqrt.f32 %v3701_v14  ;;  %vm3711_vm13 = vweird.f32 %v3701_v14 }
0x2077   :  { %v3595_v32 = vpop.f32.mrf.mxu3 }
0x2078   :  { %v6423_v38 = vpop.eup %6422  ;;  %5970 = vmatmul.msk.f32.gmra.mxu2 %vm513_vm10, %v3595_v32 }
0x2079   :  { %v3706_v22 = vmul.f32 %v6423_v38, %v3701_v14  ;;  %vm3712_vm12 = vweird.f32 %v6423_v38 }
0x207a   :  { %vm3713_vm14 = vmor %vm3711_vm13, %vm3712_vm12 }
0x207b   :  { %v3707_v54 = vmul.f32 %v6423_v38, %v3706_v22 }
0x207d   :  { %v3708_v23 = vmul.f32 0.5, %v3707_v54 }
0x207f   :  { %v3709_v58 = vsub.f32 1.5, %v3708_v23 }
0x2081   :  { %v3710_v25 = vmul.f32 %v6423_v38, %v3709_v58 }
0x2083   :  { %v3714_v56 = vsel %vm3713_vm14, %v6423_v38, %v3710_v25 }
0x2084   :  { %v3745_v2 = vmul.f32 %v3714_v56, %v3677_v10  ;;  %v5983_v10 = vld [vmem:[%s8643_s17 + $0xc8] sm:$0xff] }
0x2085   :  { %4009 = vmatpush.msrb.mxu1 %v5983_v10 }
0x2086   :  { %v3752_v62 = vmul.f32 %v7952_v61, %v3745_v2 }
0x2087   :  { %4010 = vmatpush.msrb.mxu1 %v5982_v16 }
0x2088   :  { %v3759_v4 = vadd.f32 %v7957_v29, %v3752_v62 }
0x208a   :  { %v3635_v60 = vpop.f32.mrf.mxu2  ;;  %5978 = vmatmul.msk.f32.vlgmr.msra.gmra.mxu0 %vm513_vm10, %v3759_v4 }
0x208b   :  { %v3645_v13 = vadd.f32 %v3635_v60, %v7804_v36 }
0x208d   :  { %v7964_v30 = vadd.f32 %v7919_v50, %v3645_v13 }
0x208f   :  { %v3664_v42 = vsel %vm513_vm10, %v7964_v30, 0.0 }
0x2090   :  { %3665 = vadd.xlane.f32.xlu2 %v3664_v42 }
0x20f1   :  { %v3638_v27 = vpop.f32.mrf.mxu2 }
0x20f2   :  { %v3646_v3 = vadd.f32 %v3638_v27, %v7810_v9 }
0x20f4   :  { %v7970_v31 = vadd.f32 %v7919_v50, %v3646_v3 }
0x20f6   :  { %v3667_v35 = vsel %vm513_vm10, %v7970_v31, 0.0 }
0x20f7   :  { %3668 = vadd.xlane.f32.xlu1 %v3667_v35 }
0x20fb   :  { %v3641_v12 = vpop.f32.mrf.mxu2 }
0x20fc   :  { %v3647_v36 = vadd.f32 %v3641_v12, %v7849_v5 }
0x20fe   :  { %v7976_v0 = vadd.f32 %v7919_v50, %v3647_v36 }
0x2100   :  { %v3670_v49 = vsel %vm513_vm10, %v7976_v0, 0.0 }
0x2101   :  { %3671 = vadd.xlane.f32.xlu2 %v3670_v49 }
0x2103   :  { %v3666_v51 = vpop.xlane.xlu2 %3665 }
0x2104   :  { %v3674_v9 = vmul.f32 %v3666_v51, %v6859_v21 }
0x2106   :  { %v7984_v40 = vsub.f32 %v7964_v30, %v3674_v9 }
0x2107   :  { %v3802_v48 = vpop.f32.mrf.mxu0 }
0x2108   :  { %v3803_v47 = vadd.f32 %v7981_v28, %v3802_v48  ;;  %v3682_v5 = vmul.f32 %v7984_v40, %v7984_v40 }
0x210a   :  { %v3818_v50 = vmul.f32 0.70710677, %v3803_v47  ;;  %v3688_v59 = vsel %vm513_vm10, %v3682_v5, 0.0  ;;  %v3814_v60 = vmul.f32 0.5, %v3803_v47 }
0x210b   :  { %3689 = vadd.xlane.f32.xlu0 %v3688_v59 }
0x210c   :  { %v3830_v19 = vand.u32 2147483647, %v3818_v50  ;;  %vm3822_vm5 = vcmp.ge.f32.partialorder %v3818_v50, 0.0 }
0x210d   :  { %v3826_v62 = vsel %vm3822_vm5, 1.0, %v6679_v43 }
0x210e   :  { %v3834_v46 = vmul.f32 0.3275911, %v3830_v19  ;;  %v3938_v11 = vsub.f32 0.0, %v3830_v19 }
0x2110   :  { %v3838_v34 = vadd.f32 1.0, %v3834_v46  ;;  %v3942_v53 = vmul.f32 %v3938_v11, %v3830_v19 }
0x2112   :  { %6424 = vrcp.f32 %v3838_v34  ;;  %v3853_v6 = vand.u32 2147483648, %v3838_v34  ;;  %v3851_v52 = vand.u32 2147483647, %v3838_v34  ;;  %vm3847_vm1 = vweird.f32 %v3838_v34 }
0x2113   :  { %v3946_v32 = vmul.f32 1.442695, %v3942_v53 }
0x2114   :  { %v3854_v41 = vor.u32 1.1754944e-38, %v3853_v6  ;;  %vm3852_vm4 = vcmp.eq.f32.partialorder %v3851_v52, 8.507059e+37 }
0x2115   :  { %6426 = vpow2.f32 %v3946_v32 }
0x2118   :  { %v6425_v1 = vpop.eup %6424 }
0x2119   :  { %v3843_v57 = vmul.f32 %v6425_v1, %v3838_v34  ;;  %vm3848_vm15 = vweird.f32 %v6425_v1 }
0x211a   :  { %vm3849_vm2 = vmor %vm3847_vm1, %vm3848_vm15 }
0x211b   :  { %v3844_v17 = vsub.f32 1.0, %v3843_v57  ;;  %v6427_v25 = vpop.eup %6426 }
0x211d   :  { %v3845_v63 = vmul.f32 %v6425_v1, %v3844_v17  ;;  %v8027_v17 = vld [vmem:[#allocation8 + $0x3] ss:$0 sm:$0xff] }
0x211f   :  { %v3846_v44 = vadd.f32 %v6425_v1, %v3845_v63 }
0x2121   :  { %v3850_v15 = vsel %vm3849_vm2, %v6425_v1, %v3846_v44 }
0x2122   :  { %v3855_v24 = vsel %vm3852_vm4, %v3854_v41, %v3850_v15 }
0x2123   :  { %v3902_v39 = vmul.f32 1.0614054, %v3855_v24 }
0x2125   :  { %v3906_v8 = vadd.f32 -1.4531521, %v3902_v39 }
0x2127   :  { %v3910_v20 = vmul.f32 %v3906_v8, %v3855_v24 }
0x2129   :  { %v3914_v14 = vadd.f32 1.4214138, %v3910_v20 }
0x212b   :  { %v3918_v38 = vmul.f32 %v3914_v14, %v3855_v24 }
0x212d   :  { %v3922_v22 = vadd.f32 -0.28449672, %v3918_v38 }
0x212f   :  { %v3926_v54 = vmul.f32 %v3922_v22, %v3855_v24 }
0x2131   :  { %v3930_v23 = vadd.f32 0.2548296, %v3926_v54 }
0x2133   :  { %v3934_v58 = vmul.f32 %v3930_v23, %v3855_v24 }
0x2135   :  { %v3954_v56 = vmul.f32 %v6427_v25, %v3934_v58 }
0x2137   :  { %v3958_v2 = vsub.f32 1.0, %v3954_v56 }
0x2139   :  { %v3962_v4 = vmul.f32 %v3958_v2, %v3826_v62 }
0x213b   :  { %v3966_v13 = vadd.f32 1.0, %v3962_v4 }
0x213d   :  { %v3970_v42 = vmul.f32 %v3966_v13, %v3814_v60 }
0x213f   :  { %5990 = vmatmul.msk.f32.vlgmr.msrb.gmra.mxu1 %vm1415_vm7, %v3970_v42 }
0x216a   :  { %v3669_v27 = vpop.xlane.xlu1 %3668 }
0x216b   :  { %v3675_v3 = vmul.f32 %v3669_v27, %v6859_v21 }
0x216d   :  { %v3679_v35 = vsub.f32 %v7970_v31, %v3675_v3 }
0x216f   :  { %v3683_v12 = vmul.f32 %v3679_v35, %v3679_v35 }
0x2171   :  { %v3691_v36 = vsel %vm513_vm10, %v3683_v12, 0.0 }
0x2172   :  { %3692 = vadd.xlane.f32.xlu2 %v3691_v36 }
0x2174   :  { %v3672_v49 = vpop.xlane.xlu2 %3671 }
0x2175   :  { %v3676_v51 = vmul.f32 %v3672_v49, %v6859_v21 }
0x2177   :  { %v3680_v9 = vsub.f32 %v7976_v0, %v3676_v51 }
0x2179   :  { %v3684_v48 = vmul.f32 %v3680_v9, %v3680_v9 }
0x217b   :  { %v3694_v47 = vsel %vm513_vm10, %v3684_v48, 0.0 }
0x217c   :  { %3695 = vadd.xlane.f32.xlu0 %v3694_v47 }
0x217e   :  { %v3690_v5 = vpop.xlane.xlu0 %3689 }
0x217f   :  { %v3698_v50 = vmul.f32 %v3690_v5, %v6859_v21 }
0x2181   :  { %v3702_v59 = vadd.f32 1e-05, %v3698_v50 }
0x2183   :  { %6428 = vrsqrt.f32 %v3702_v59  ;;  %vm3721_vm8 = vweird.f32 %v3702_v59 }
0x2189   :  { %v6429_v19 = vpop.eup %6428 }
0x218a   :  { %v3716_v46 = vmul.f32 %v6429_v19, %v3702_v59  ;;  %vm3722_vm6 = vweird.f32 %v6429_v19 }
0x218b   :  { %vm3723_vm9 = vmor %vm3721_vm8, %vm3722_vm6 }
0x218c   :  { %v3717_v34 = vmul.f32 %v6429_v19, %v3716_v46 }
0x218e   :  { %v3718_v45 = vmul.f32 0.5, %v3717_v34 }
0x2190   :  { %v3719_v26 = vsub.f32 1.5, %v3718_v45 }
0x2192   :  { %v3720_v55 = vmul.f32 %v6429_v19, %v3719_v26 }
0x2194   :  { %v3724_v33 = vsel %vm3723_vm9, %v6429_v19, %v3720_v55 }
0x2195   :  { %v3746_v1 = vmul.f32 %v3724_v33, %v7984_v40 }
0x2197   :  { %v3753_v57 = vmul.f32 %v7952_v61, %v3746_v1 }
0x2199   :  { %v3760_v18 = vadd.f32 %v7957_v29, %v3753_v57 }
0x219b   :  { %5979 = vmatmul.msk.f32.gmra.mxu0 %vm513_vm10, %v3760_v18 }
0x21bc   :  { %v4012_v37 = vpop.f32.mrf.mxu1 }
0x21bd   :  { %v4024_v6 = vadd.f32 %v4012_v37, %v7923_v7 }
0x21bf   :  { %v8031_v63 = vadd.f32 %v8027_v17, %v4024_v6 }
0x21c1   :  { %v4041_v52 = vsel %vm513_vm10, %v8031_v63, 0.0 }
0x21c2   :  { %4042 = vadd.xlane.f32.xlu2 %v4041_v52 }
0x21e5   :  { %v3693_v10 = vpop.xlane.xlu2 %3692 }
0x21e6   :  { %v3699_v40 = vmul.f32 %v3693_v10, %v6859_v21 }
0x21e8   :  { %v3703_v16 = vadd.f32 1e-05, %v3699_v40 }
0x21ea   :  { %6430 = vrsqrt.f32 %v3703_v16  ;;  %vm3731_vm0 = vweird.f32 %v3703_v16 }
0x21ef   :  { %v3696_v44 = vpop.xlane.xlu0 %3695 }
0x21f0   :  { %v6431_v41 = vpop.eup %6430  ;;  %v3700_v15 = vmul.f32 %v3696_v44, %v6859_v21 }
0x21f1   :  { %v3726_v24 = vmul.f32 %v6431_v41, %v3703_v16  ;;  %vm3732_vm11 = vweird.f32 %v6431_v41 }
0x21f2   :  { %v3704_v11 = vadd.f32 1e-05, %v3700_v15  ;;  %vm3733_vm12 = vmor %vm3731_vm0, %vm3732_vm11 }
0x21f3   :  { %v3727_v39 = vmul.f32 %v6431_v41, %v3726_v24 }
0x21f4   :  { %6432 = vrsqrt.f32 %v3704_v11  ;;  %vm3741_vm14 = vweird.f32 %v3704_v11 }
0x21f5   :  { %v3728_v7 = vmul.f32 0.5, %v3727_v39 }
0x21f7   :  { %v3729_v8 = vsub.f32 1.5, %v3728_v7 }
0x21f9   :  { %v3730_v53 = vmul.f32 %v6431_v41, %v3729_v8 }
0x21fa   :  { %v6433_v20 = vpop.eup %6432 }
0x21fb   :  { %v3734_v14 = vsel %vm3733_vm12, %v6431_v41, %v3730_v53  ;;  %v3736_v32 = vmul.f32 %v6433_v20, %v3704_v11  ;;  %vm3742_vm13 = vweird.f32 %v6433_v20 }
0x21fc   :  { %v3747_v38 = vmul.f32 %v3734_v14, %v3679_v35  ;;  %vm3743_vm15 = vmor %vm3741_vm14, %vm3742_vm13 }
0x21fd   :  { %v3737_v22 = vmul.f32 %v6433_v20, %v3736_v32 }
0x21fe   :  { %v3754_v54 = vmul.f32 %v7952_v61, %v3747_v38 }
0x21ff   :  { %v3738_v23 = vmul.f32 0.5, %v3737_v22 }
0x2200   :  { %v3761_v58 = vadd.f32 %v7957_v29, %v3754_v54 }
0x2201   :  { %v3739_v25 = vsub.f32 1.5, %v3738_v23 }
0x2202   :  { %5980 = vmatmul.msk.f32.gmra.mxu0 %vm513_vm10, %v3761_v58 }
0x2203   :  { %v3740_v56 = vmul.f32 %v6433_v20, %v3739_v25 }
0x2205   :  { %v3744_v2 = vsel %vm3743_vm15, %v6433_v20, %v3740_v56 }
0x2206   :  { %v3748_v62 = vmul.f32 %v3744_v2, %v3680_v9 }
0x2208   :  { %v3755_v4 = vmul.f32 %v7952_v61, %v3748_v62 }
0x220a   :  { %v3762_v60 = vadd.f32 %v7957_v29, %v3755_v4 }
0x220c   :  { %5981 = vmatmul.msk.f32.gmra.mxu0 %vm513_vm10, %v3762_v60 }
0x2218   :  { %v3805_v13 = vpop.f32.mrf.mxu0 }
0x2219   :  { %v3806_v42 = vadd.f32 %v7981_v28, %v3805_v13 }
0x221b   :  { %v3819_v27 = vmul.f32 0.70710677, %v3806_v42  ;;  %v3815_v39 = vmul.f32 0.5, %v3806_v42 }
0x221d   :  { %v3831_v3 = vand.u32 2147483647, %v3819_v27  ;;  %vm3823_vm6 = vcmp.ge.f32.partialorder %v3819_v27, 0.0 }
0x221e   :  { %v3827_v24 = vsel %vm3823_vm6, 1.0, %v6679_v43 }
0x221f   :  { %v3835_v35 = vmul.f32 0.3275911, %v3831_v3  ;;  %v3939_v59 = vsub.f32 0.0, %v3831_v3 }
0x2221   :  { %v3839_v12 = vadd.f32 1.0, %v3835_v35  ;;  %v3943_v26 = vmul.f32 %v3939_v59, %v3831_v3 }
0x2223   :  { %6434 = vrcp.f32 %v3839_v12  ;;  %v3868_v48 = vand.u32 2147483648, %v3839_v12  ;;  %v3866_v9 = vand.u32 2147483647, %v3839_v12  ;;  %vm3862_vm2 = vweird.f32 %v3839_v12 }
0x2224   :  { %v3948_v18 = vmul.f32 1.442695, %v3943_v26 }
0x2225   :  { %v3869_v29 = vor.u32 1.1754944e-38, %v3868_v48  ;;  %vm3867_vm5 = vcmp.eq.f32.partialorder %v3866_v9, 8.507059e+37 }
0x2226   :  { %6436 = vpow2.f32 %v3948_v18 }
0x2229   :  { %v6435_v36 = vpop.eup %6434 }
0x222a   :  { %v3858_v49 = vmul.f32 %v6435_v36, %v3839_v12  ;;  %vm3863_vm1 = vweird.f32 %v6435_v36 }
0x222b   :  { %vm3864_vm4 = vmor %vm3862_vm2, %vm3863_vm1 }
0x222c   :  { %v3859_v51 = vsub.f32 1.0, %v3858_v49  ;;  %v6437_v44 = vpop.eup %6436 }
0x222e   :  { %v3860_v47 = vmul.f32 %v6435_v36, %v3859_v51 }
0x2230   :  { %v3861_v61 = vadd.f32 %v6435_v36, %v3860_v47 }
0x2232   :  { %v3865_v5 = vsel %vm3864_vm4, %v6435_v36, %v3861_v61 }
0x2233   :  { %v3870_v50 = vsel %vm3867_vm5, %v3869_v29, %v3865_v5 }
0x2234   :  { %v3903_v19 = vmul.f32 1.0614054, %v3870_v50 }
0x2235   :  { %v4043_v46 = vpop.xlane.xlu2 %4042 }
0x2236   :  { %v3907_v34 = vadd.f32 -1.4531521, %v3903_v19  ;;  %v4053_v45 = vmul.f32 %v4043_v46, %v6859_v21 }
0x2238   :  { %v3911_v55 = vmul.f32 %v3907_v34, %v3870_v50  ;;  %v8046_v33 = vsub.f32 %v8031_v63, %v4053_v45 }
0x223a   :  { %v3915_v1 = vadd.f32 1.4214138, %v3911_v55  ;;  %v4061_v57 = vmul.f32 %v8046_v33, %v8046_v33 }
0x223c   :  { %v3919_v37 = vmul.f32 %v3915_v1, %v3870_v50  ;;  %v4065_v6 = vsel %vm513_vm10, %v4061_v57, 0.0 }
0x223d   :  { %4066 = vadd.xlane.f32.xlu0 %v4065_v6 }
0x223e   :  { %v3923_v52 = vadd.f32 -0.28449672, %v3919_v37 }
0x2240   :  { %v3927_v10 = vmul.f32 %v3923_v52, %v3870_v50  ;;  %v5999_v52 = vld [vmem:[%s8635_s9 + $0x98] sm:$0xff] }
0x2241   :  { %4177 = vmatpush.msra.mxu3 %v5999_v52 }
0x2242   :  { %v3931_v40 = vadd.f32 0.2548296, %v3927_v10 }
0x2244   :  { %v3935_v16 = vmul.f32 %v3931_v40, %v3870_v50 }
0x2246   :  { %v3955_v41 = vmul.f32 %v6437_v44, %v3935_v16  ;;  %v5998_v44 = vld [vmem:[%s8635_s9 + $0x90] sm:$0xff] }
0x2247   :  { %4178 = vmatpush.msra.mxu3 %v5998_v44 }
0x2248   :  { %v3959_v15 = vsub.f32 1.0, %v3955_v41  ;;  %v5997_v41 = vld [vmem:[%s8635_s9 + $0x88] sm:$0xff] }
0x2249   :  { %4179 = vmatpush.msra.mxu3 %v5997_v41  ;;  %v8126_v41 = vld [vmem:[%s8636_s10 + $0x4] ss:$0 sm:$0xff] }
0x224a   :  { %v3963_v11 = vmul.f32 %v3959_v15, %v3827_v24 }
0x224c   :  { %v3967_v7 = vadd.f32 1.0, %v3963_v11  ;;  %v5996_v11 = vld [vmem:[%s8635_s9 + $0x80] sm:$0xff] }
0x224d   :  { %4180 = vmatpush.msra.mxu3 %v5996_v11 }
0x224e   :  { %v3971_v8 = vmul.f32 %v3967_v7, %v3815_v39 }
0x2250   :  { %5991 = vmatmul.msk.f32.gmra.mxu1 %vm1415_vm7, %v3971_v8 }
0x227f   :  { %v3808_v53 = vpop.f32.mrf.mxu0 }
0x2280   :  { %v8054_v20 = vadd.f32 %v7981_v28, %v3808_v53 }
0x2282   :  { %v8057_v14 = vmul.f32 0.70710677, %v8054_v20 }
0x2284   :  { %v3832_v32 = vand.u32 2147483647, %v8057_v14  ;;  %vm3824_vm1 = vcmp.ge.f32.partialorder %v8057_v14, 0.0 }
0x2286   :  { %v3836_v38 = vmul.f32 0.3275911, %v3832_v32  ;;  %v3940_v36 = vsub.f32 0.0, %v3832_v32 }
0x2288   :  { %v3840_v22 = vadd.f32 1.0, %v3836_v38  ;;  %v3944_v9 = vmul.f32 %v3940_v36, %v3832_v32 }
0x2289   :  { %v3811_v54 = vpop.f32.mrf.mxu0 }
0x228a   :  { %6438 = vrcp.f32 %v3840_v22  ;;  %v8061_v23 = vadd.f32 %v7981_v28, %v3811_v54  ;;  %v3883_v13 = vand.u32 2147483648, %v3840_v22  ;;  %v3881_v27 = vand.u32 2147483647, %v3840_v22 }
0x228b   :  { %vm3877_vm9 = vweird.f32 %v3840_v22  ;;  %v3950_v46 = vmul.f32 1.442695, %v3944_v9 }
0x228c   :  { %v8064_v58 = vmul.f32 0.70710677, %v8061_v23  ;;  %v3884_v28 = vor.u32 1.1754944e-38, %v3883_v13  ;;  %vm3882_vm0 = vcmp.eq.f32.partialorder %v3881_v27, 8.507059e+37 }
0x228e   :  { %v3833_v25 = vand.u32 2147483647, %v8064_v58  ;;  %vm3825_vm2 = vcmp.ge.f32.partialorder %v8064_v58, 0.0  ;;  %v8091_v58 = vld [vmem:[%s8633_s7 + $0x4] ss:$0 sm:$0xff] }
0x228f   :  { %v3829_v36 = vsel %vm3825_vm2, 1.0, %v6679_v43 }
0x2290   :  { %v6439_v56 = vpop.eup %6438  ;;  %v3837_v62 = vmul.f32 0.3275911, %v3833_v25  ;;  %v3941_v18 = vsub.f32 0.0, %v3833_v25 }
0x2291   :  { %v3873_v2 = vmul.f32 %v6439_v56, %v3840_v22  ;;  %vm3878_vm8 = vweird.f32 %v6439_v56  ;;  %v3828_v22 = vsel %vm3824_vm1, 1.0, %v6679_v43 }
0x2292   :  { %v3841_v60 = vadd.f32 1.0, %v3837_v62  ;;  %vm3879_vm11 = vmor %vm3877_vm9, %vm3878_vm8  ;;  %v3945_v16 = vmul.f32 %v3941_v18, %v3833_v25 }
0x2293   :  { %v3874_v4 = vsub.f32 1.0, %v3873_v2 }
0x2294   :  { %6440 = vrcp.f32 %v3841_v60  ;;  %v3898_v5 = vand.u32 2147483648, %v3841_v60  ;;  %v3896_v59 = vand.u32 2147483647, %v3841_v60  ;;  %vm3892_vm13 = vweird.f32 %v3841_v60 }
0x2295   :  { %v3875_v42 = vmul.f32 %v6439_v56, %v3874_v4  ;;  %6442 = vpow2.f32 %v3950_v46  ;;  %v3952_v53 = vmul.f32 1.442695, %v3945_v16  ;;  %v3816_v4 = vmul.f32 0.5, %v8054_v20 }
0x2296   :  { %v3899_v26 = vor.u32 1.1754944e-38, %v3898_v5  ;;  %vm3897_vm15 = vcmp.eq.f32.partialorder %v3896_v59, 8.507059e+37  ;;  %v3817_v20 = vmul.f32 0.5, %v8061_v23  ;;  %v8097_v23 = vld [vmem:[%s8634_s8 + $0x4] ss:$0 sm:$0xff] }
0x2297   :  { %v3876_v3 = vadd.f32 %v6439_v56, %v3875_v42  ;;  %6444 = vpow2.f32 %v3952_v53 }
0x2299   :  { %v3880_v35 = vsel %vm3879_vm11, %v6439_v56, %v3876_v3 }
0x229a   :  { %v3885_v12 = vsel %vm3882_vm0, %v3884_v28, %v3880_v35  ;;  %v6441_v49 = vpop.eup %6440 }
0x229b   :  { %v3904_v51 = vmul.f32 1.0614054, %v3885_v12  ;;  %v3888_v48 = vmul.f32 %v6441_v49, %v3841_v60  ;;  %vm3893_vm12 = vweird.f32 %v6441_v49  ;;  %v6443_v39 = vpop.eup %6442 }
0x229c   :  { %vm3894_vm14 = vmor %vm3892_vm13, %vm3893_vm12 }
0x229d   :  { %v3908_v47 = vadd.f32 -1.4531521, %v3904_v51  ;;  %v3889_v61 = vsub.f32 1.0, %v3888_v48  ;;  %v6445_v3 = vpop.eup %6444 }
0x229f   :  { %v3912_v29 = vmul.f32 %v3908_v47, %v3885_v12  ;;  %v3890_v50 = vmul.f32 %v6441_v49, %v3889_v61 }
0x22a1   :  { %v3916_v19 = vadd.f32 1.4214138, %v3912_v29  ;;  %v3891_v34 = vadd.f32 %v6441_v49, %v3890_v50 }
0x22a3   :  { %v3920_v45 = vmul.f32 %v3916_v19, %v3885_v12  ;;  %v3895_v55 = vsel %vm3894_vm14, %v6441_v49, %v3891_v34 }
0x22a4   :  { %v3900_v57 = vsel %vm3897_vm15, %v3899_v26, %v3895_v55 }
0x22a5   :  { %v3924_v1 = vadd.f32 -0.28449672, %v3920_v45  ;;  %v3905_v37 = vmul.f32 1.0614054, %v3900_v57 }
0x22a7   :  { %v3928_v6 = vmul.f32 %v3924_v1, %v3885_v12  ;;  %v3909_v10 = vadd.f32 -1.4531521, %v3905_v37 }
0x22a9   :  { %v3932_v40 = vadd.f32 0.2548296, %v3928_v6  ;;  %v3913_v15 = vmul.f32 %v3909_v10, %v3900_v57 }
0x22ab   :  { %v3936_v24 = vmul.f32 %v3932_v40, %v3885_v12  ;;  %v3917_v7 = vadd.f32 1.4214138, %v3913_v15 }
0x22ad   :  { %v3956_v8 = vmul.f32 %v6443_v39, %v3936_v24  ;;  %v3921_v32 = vmul.f32 %v3917_v7, %v3900_v57 }
0x22af   :  { %v3960_v38 = vsub.f32 1.0, %v3956_v8  ;;  %v3925_v54 = vadd.f32 -0.28449672, %v3921_v32 }
0x22b0   :  { %v4067_v25 = vpop.xlane.xlu0 %4066 }
0x22b1   :  { %v3964_v56 = vmul.f32 %v3960_v38, %v3828_v22  ;;  %v4077_v2 = vmul.f32 %v4067_v25, %v6859_v21  ;;  %v3929_v62 = vmul.f32 %v3925_v54, %v3900_v57 }
0x22b3   :  { %v3968_v60 = vadd.f32 1.0, %v3964_v56  ;;  %v4081_v13 = vadd.f32 1e-05, %v4077_v2  ;;  %v3933_v42 = vadd.f32 0.2548296, %v3929_v62 }
0x22b5   :  { %v3972_v14 = vmul.f32 %v3968_v60, %v3816_v4  ;;  %6446 = vrsqrt.f32 %v4081_v13  ;;  %v3937_v27 = vmul.f32 %v3933_v42, %v3900_v57  ;;  %vm4091_vm5 = vweird.f32 %v4081_v13 }
0x22b7   :  { %5992 = vmatmul.msk.f32.gmra.mxu1 %vm1415_vm7, %v3972_v14  ;;  %v3957_v28 = vmul.f32 %v6445_v3, %v3937_v27 }
0x22b9   :  { %v3961_v35 = vsub.f32 1.0, %v3957_v28 }
0x22bb   :  { %v6447_v12 = vpop.eup %6446  ;;  %v3965_v49 = vmul.f32 %v3961_v35, %v3829_v36 }
0x22bc   :  { %v4086_v51 = vmul.f32 %v6447_v12, %v4081_v13  ;;  %vm4092_vm4 = vweird.f32 %v6447_v12 }
0x22bd   :  { %v3969_v48 = vadd.f32 1.0, %v3965_v49  ;;  %vm4093_vm6 = vmor %vm4091_vm5, %vm4092_vm4 }
0x22be   :  { %v4087_v47 = vmul.f32 %v6447_v12, %v4086_v51 }
0x22bf   :  { %v3973_v9 = vmul.f32 %v3969_v48, %v3817_v20 }
0x22c0   :  { %v4088_v61 = vmul.f32 0.5, %v4087_v47 }
0x22c1   :  { %5993 = vmatmul.msk.f32.gmra.mxu1 %vm1415_vm7, %v3973_v9 }
0x22c2   :  { %v4089_v29 = vsub.f32 1.5, %v4088_v61 }
0x22c4   :  { %v4090_v5 = vmul.f32 %v6447_v12, %v4089_v29 }
0x22c6   :  { %v4094_v50 = vsel %vm4093_vm6, %v6447_v12, %v4090_v5 }
0x22c7   :  { %v4125_v59 = vmul.f32 %v4094_v50, %v8046_v33 }
0x22c9   :  { %v4132_v19 = vmul.f32 %v8091_v58, %v4125_v59 }
0x22cb   :  { %v4139_v46 = vadd.f32 %v8097_v23, %v4132_v19 }
0x22cd   :  { %v4015_v34 = vpop.f32.mrf.mxu1  ;;  %6001 = vmatmul.msk.f32.vlgmr.msra.gmra.mxu3 %vm513_vm10, %v4139_v46 }
0x22ce   :  { %v4025_v45 = vadd.f32 %v4015_v34, %v7964_v30 }
0x22d0   :  { %v8104_v26 = vadd.f32 %v8027_v17, %v4025_v45 }
0x22d2   :  { %v4044_v33 = vsel %vm513_vm10, %v8104_v26, 0.0 }
0x22d3   :  { %4045 = vadd.xlane.f32.xlu2 %v4044_v33 }
0x2334   :  { %v4018_v55 = vpop.f32.mrf.mxu1 }
0x2335   :  { %v4026_v1 = vadd.f32 %v4018_v55, %v7970_v31 }
0x2337   :  { %v8110_v57 = vadd.f32 %v8027_v17, %v4026_v1 }
0x2339   :  { %v4047_v18 = vsel %vm513_vm10, %v8110_v57, 0.0 }
0x233a   :  { %4048 = vadd.xlane.f32.xlu0 %v4047_v18 }
0x233e   :  { %v4021_v37 = vpop.f32.mrf.mxu1 }
0x233f   :  { %v4027_v30 = vadd.f32 %v4021_v37, %v7976_v0 }
0x2341   :  { %v8116_v6 = vadd.f32 %v8027_v17, %v4027_v30 }
0x2343   :  { %v4050_v52 = vsel %vm513_vm10, %v8116_v6, 0.0 }
0x2344   :  { %4051 = vadd.xlane.f32.xlu2 %v4050_v52 }
0x2346   :  { %v4046_v10 = vpop.xlane.xlu2 %4045 }
0x2347   :  { %v4054_v31 = vmul.f32 %v4046_v10, %v6859_v21 }
0x2349   :  { %v4058_v40 = vsub.f32 %v8104_v26, %v4054_v31 }
0x234b   :  { %v4062_v16 = vmul.f32 %v4058_v40, %v4058_v40 }
0x234d   :  { %v4068_v44 = vsel %vm513_vm10, %v4062_v16, 0.0 }
0x234e   :  { %4069 = vadd.xlane.f32.xlu0 %v4068_v44 }
0x2350   :  { %v4182_v0 = vpop.f32.mrf.mxu3 }
0x2351   :  { %v4183_v17 = vadd.f32 %v8126_v41, %v4182_v0 }
0x2353   :  { %4195 = vrot.lane.b32.xlu1 %v4183_v17, %s6681_s4 }
0x235b   :  { %4233 = vrot.lane.b32.xlu1 %v4183_v17, %s6682_s29 }
0x23ad   :  { %v4049_v15 = vpop.xlane.xlu0 %4048 }
0x23ae   :  { %v4055_v24 = vmul.f32 %v4049_v15, %v6859_v21 }
0x23b0   :  { %v4059_v11 = vsub.f32 %v8110_v57, %v4055_v24 }
0x23b2   :  { %v4063_v39 = vmul.f32 %v4059_v11, %v4059_v11 }
0x23b4   :  { %v4071_v7 = vsel %vm513_vm10, %v4063_v39, 0.0 }
0x23b5   :  { %4072 = vadd.xlane.f32.xlu2 %v4071_v7 }
0x23b7   :  { %v4052_v8 = vpop.xlane.xlu2 %4051 }
0x23b8   :  { %v4056_v53 = vmul.f32 %v4052_v8, %v6859_v21 }
0x23ba   :  { %v4060_v32 = vsub.f32 %v8116_v6, %v4056_v53 }
0x23bc   :  { %v4064_v38 = vmul.f32 %v4060_v32, %v4060_v32 }
0x23be   :  { %v4074_v22 = vsel %vm513_vm10, %v4064_v38, 0.0 }
0x23bf   :  { %4075 = vadd.xlane.f32.xlu0 %v4074_v22 }
0x23c1   :  { %v4070_v54 = vpop.xlane.xlu0 %4069 }
0x23c2   :  { %v4078_v25 = vmul.f32 %v4070_v54, %v6859_v21 }
0x23c4   :  { %v4082_v56 = vadd.f32 1e-05, %v4078_v25 }
0x23c5   :  { %v4196_v2 = vpop.permute.xlu1 %4195 }
0x23c6   :  { %6448 = vrsqrt.f32 %v4082_v56  ;;  %6005 = vmatpush.xpose.msk.msra.mxu2 %vm513_vm10, %v4196_v2  ;;  %vm4101_vm9 = vweird.f32 %v4082_v56 }
0x23c9   :  { %6006 = vmatmul.msk.f32.vlgmr.msra.gmra.mxu2 %vm513_vm10, %v4183_v17 }
0x23cc   :  { %v6449_v62 = vpop.eup %6448 }
0x23cd   :  { %v4096_v4 = vmul.f32 %v6449_v62, %v4082_v56  ;;  %v4234_v60 = vpop.permute.xlu1 %4233  ;;  %vm4102_vm8 = vweird.f32 %v6449_v62 }
0x23ce   :  { %4254 = vmatpush.msrb.mxu0 %v4234_v60  ;;  %vm4103_vm11 = vmor %vm4101_vm9, %vm4102_vm8 }
0x23cf   :  { %v4097_v13 = vmul.f32 %v6449_v62, %v4096_v4  ;;  %v6018_v4 = vld [vmem:[%s8637_s11 + $0x88] sm:$0xff] }
0x23d1   :  { %v4098_v42 = vmul.f32 0.5, %v4097_v13 }
0x23d3   :  { %v4099_v14 = vsub.f32 1.5, %v4098_v42 }
0x23d5   :  { %v4100_v27 = vmul.f32 %v6449_v62, %v4099_v14  ;;  %v6017_v14 = vld [vmem:[%s8637_s11 + $0x80] sm:$0xff] }
0x23d7   :  { %v4104_v3 = vsel %vm4103_vm11, %v6449_v62, %v4100_v27  ;;  %v6020_v62 = vld [vmem:[%s8637_s11 + $0x98] sm:$0xff] }
0x23d8   :  { %v4126_v28 = vmul.f32 %v4104_v3, %v4058_v40 }
0x23da   :  { %v4133_v35 = vmul.f32 %v8091_v58, %v4126_v28 }
0x23dc   :  { %v4140_v12 = vadd.f32 %v8097_v23, %v4133_v35 }
0x23de   :  { %6002 = vmatmul.msk.f32.gmra.mxu3 %vm513_vm10, %v4140_v12 }
0x2428   :  { %v4073_v36 = vpop.xlane.xlu2 %4072 }
0x2429   :  { %v4079_v49 = vmul.f32 %v4073_v36, %v6859_v21 }
0x242b   :  { %v4083_v51 = vadd.f32 1e-05, %v4079_v49 }
0x242d   :  { %6450 = vrsqrt.f32 %v4083_v51  ;;  %vm4111_vm12 = vweird.f32 %v4083_v51 }
0x2432   :  { %v4076_v48 = vpop.xlane.xlu0 %4075 }
0x2433   :  { %v6451_v20 = vpop.eup %6450  ;;  %v4080_v9 = vmul.f32 %v4076_v48, %v6859_v21 }
0x2434   :  { %v4106_v47 = vmul.f32 %v6451_v20, %v4083_v51  ;;  %vm4112_vm0 = vweird.f32 %v6451_v20 }
0x2435   :  { %v4084_v29 = vadd.f32 1e-05, %v4080_v9  ;;  %vm4113_vm13 = vmor %vm4111_vm12, %vm4112_vm0 }
0x2436   :  { %v4107_v61 = vmul.f32 %v6451_v20, %v4106_v47 }
0x2437   :  { %6452 = vrsqrt.f32 %v4084_v29  ;;  %vm4121_vm15 = vweird.f32 %v4084_v29 }
0x2438   :  { %v4108_v5 = vmul.f32 0.5, %v4107_v61 }
0x243a   :  { %v4109_v50 = vsub.f32 1.5, %v4108_v5 }
0x243c   :  { %v4110_v59 = vmul.f32 %v6451_v20, %v4109_v50 }
0x243d   :  { %v6453_v19 = vpop.eup %6452 }
0x243e   :  { %v4114_v46 = vsel %vm4113_vm13, %v6451_v20, %v4110_v59  ;;  %v4116_v45 = vmul.f32 %v6453_v19, %v4084_v29  ;;  %vm4122_vm14 = vweird.f32 %v6453_v19 }
0x243f   :  { %v4127_v34 = vmul.f32 %v4114_v46, %v4059_v11  ;;  %vm4123_vm1 = vmor %vm4121_vm15, %vm4122_vm14 }
0x2440   :  { %v4117_v33 = vmul.f32 %v6453_v19, %v4116_v45 }
0x2441   :  { %v4134_v55 = vmul.f32 %v8091_v58, %v4127_v34 }
0x2442   :  { %v4118_v1 = vmul.f32 0.5, %v4117_v33 }
0x2443   :  { %v4141_v18 = vadd.f32 %v8097_v23, %v4134_v55 }
0x2444   :  { %v4119_v37 = vsub.f32 1.5, %v4118_v1 }
0x2445   :  { %6003 = vmatmul.msk.f32.gmra.mxu3 %vm513_vm10, %v4141_v18  ;;  %v8197_v18 = vld [vmem:[%s8638_s12 + $0x4] ss:$0 sm:$0xff] }
0x2446   :  { %v4120_v30 = vmul.f32 %v6453_v19, %v4119_v37 }
0x2448   :  { %v4124_v52 = vsel %vm4123_vm1, %v6453_v19, %v4120_v30 }
0x2449   :  { %v4128_v10 = vmul.f32 %v4124_v52, %v4060_v32 }
0x244b   :  { %v4135_v40 = vmul.f32 %v8091_v58, %v4128_v10 }
0x244c   :  { %v4218_v31 = vpop.f32.mrf.mxu2 }
0x244d   :  { %v4221_v16 = vmul.f32 0.17677669, %v4218_v31  ;;  %v4142_v44 = vadd.f32 %v8097_v23, %v4135_v40 }
0x244f   :  { %v4222_v0 = vsel %vm804_vm3, %v4221_v16, -inf  ;;  %6004 = vmatmul.msk.f32.gmra.mxu3 %vm513_vm10, %v4142_v44 }
0x2450   :  { %4223 = vmax.xlane.f32.xlu2 %v4222_v0 }
0x2461   :  { %v4185_v17 = vpop.f32.mrf.mxu3 }
0x2462   :  { %v4186_v15 = vadd.f32 %v8126_v41, %v4185_v17 }
0x2464   :  { %4260 = vrot.lane.b32.xlu0 %v4186_v15, %s6681_s4 }
0x24c3   :  { %v4224_v24 = vpop.xlane.xlu2 %4223 }
0x24c4   :  { %v4225_v11 = vsub.f32 %v4221_v16, %v4224_v24 }
0x24c6   :  { %v4226_v39 = vmul.f32 1.442695, %v4225_v11 }
0x24c8   :  { %6454 = vpow2.f32 %v4226_v39  ;;  %v4188_v7 = vpop.f32.mrf.mxu3 }
0x24c9   :  { %v8155_v58 = vadd.f32 %v8126_v41, %v4188_v7 }
0x24cb   :  { %4325 = vrot.lane.b32.xlu1 %v8155_v58, %s6681_s4 }
0x24ce   :  { %v6455_v23 = vpop.eup %6454 }
0x24cf   :  { %v4228_v8 = vsel %vm804_vm3, %v6455_v23, 0.0 }
0x24d0   :  { %4229 = vadd.xlane.f32.xlu2 %v4228_v8 }
0x24d2   :  { %v4191_v32 = vpop.f32.mrf.mxu3 }
0x24d3   :  { %v8163_v38 = vadd.f32 %v8126_v41, %v4191_v32  ;;  %v6019_v41 = vld [vmem:[%s8637_s11 + $0x90] sm:$0xff] }
0x24d5   :  { %v6152_v40 = vpack.i.bf16 %v8163_v38, %v8155_v58 }
0x24d6   :  { %v4261_v53 = vpop.permute.xlu0 %4260 }
0x24d7   :  { %6008 = vmatpush.xpose.msk.msrb.mxu3 %vm513_vm10, %v4261_v53 }
0x24da   :  { %6009 = vmatmul.msk.f32.vlgmr.msrb.gmra.mxu3 %vm513_vm10, %v4186_v15 }
0x24e8   :  { %4390 = vrot.lane.b32.xlu2 %v8163_v38, %s6681_s4 }
0x253d   :  { %v4326_v22 = vpop.permute.xlu1 %4325 }
0x253e   :  { %6011 = vmatpush.xpose.msk.msra.mxu0 %vm513_vm10, %v4326_v22  ;;  %v6031_v22 = vld [vmem:[%s8641_s15 + $0x98] sm:$0xff] }
0x2543   :  { %v4230_v54 = vpop.xlane.xlu2 %4229 }
0x2544   :  { %6456 = vrcp.f32 %v4230_v54  ;;  %v6030_v54 = vld [vmem:[%s8641_s15 + $0x90] sm:$0xff] }
0x254a   :  { %v6457_v25 = vpop.eup %6456 }
0x254b   :  { %v4232_v56 = vmul.f32 %v6457_v25, %v6455_v23  ;;  %v4391_v2 = vpop.permute.xlu2 %4390  ;;  %v6029_v25 = vld [vmem:[%s8641_s15 + $0x88] sm:$0xff] }
0x254c   :  { %6014 = vmatpush.xpose.msk.msra.mxu3 %vm513_vm10, %v4391_v2 }
0x254d   :  { %6007 = vmatmul.msk.f32.vlgmr.msrb.gmra.mxu0 %vm804_vm3, %v4232_v56  ;;  %v6028_v56 = vld [vmem:[%s8641_s15 + $0x80] sm:$0xff] }
0x254e   :  { %4483 = vmatpush.msrb.mxu0 %v6020_v62 }
0x254f   :  { %6015 = vmatmul.msk.f32.vlgmr.msra.gmra.mxu3 %vm513_vm10, %v8163_v38 }
0x2550   :  { %4484 = vmatpush.msrb.mxu0 %v6019_v41 }
0x2552   :  { %4485 = vmatpush.msrb.mxu0 %v6018_v4 }
0x2554   :  { %4486 = vmatpush.msrb.mxu0 %v6017_v14 }
0x2555   :  { %6012 = vmatmul.msk.f32.vlgmr.msra.gmra.mxu0 %vm513_vm10, %v8155_v58 }
0x255d   :  { %v4283_v60 = vpop.f32.mrf.mxu3 }
0x255e   :  { %v4286_v13 = vmul.f32 0.17677669, %v4283_v60 }
0x2560   :  { %v4287_v42 = vsel %vm804_vm3, %v4286_v13, -inf }
0x2561   :  { %4288 = vmax.xlane.f32.xlu0 %v4287_v42 }
0x25ca   :  { %v4256_v27 = vpop.f32.mrf.mxu0 }
0x25cb   :  { %6021 = vmatmul.msk.f32.vlgmr.msrb.gmra.mxu0 %vm513_vm10, %v4256_v27 }
0x25d2   :  { %v4348_v3 = vpop.f32.mrf.mxu0  ;;  %v4413_v28 = vpop.f32.mrf.mxu3 }
0x25d3   :  { %v4351_v35 = vmul.f32 0.17677669, %v4348_v3  ;;  %v4416_v12 = vmul.f32 0.17677669, %v4413_v28  ;;  %v8232_v28 = vld [vmem:[%s8639_s13 + $0x4] ss:$0 sm:$0xff] }
0x25d4   :  { %v4289_v36 = vpop.xlane.xlu0 %4288 }
0x25d5   :  { %v4290_v49 = vsub.f32 %v4286_v13, %v4289_v36  ;;  %v4352_v51 = vsel %vm804_vm3, %v4351_v35, -inf  ;;  %v4417_v20 = vsel %vm804_vm3, %v4416_v12, -inf }
0x25d6   :  { %4353 = vmax.xlane.f32.xlu1 %v4352_v51  ;;  %4418 = vmax.xlane.f32.xlu2 %v4417_v20 }
0x25d7   :  { %v4291_v48 = vmul.f32 1.442695, %v4290_v49 }
0x25d9   :  { %6458 = vpow2.f32 %v4291_v48 }
0x25df   :  { %v6459_v47 = vpop.eup %6458 }
0x25e0   :  { %v4293_v9 = vsel %vm804_vm3, %v6459_v47, 0.0 }
0x25e1   :  { %4294 = vadd.xlane.f32.xlu0 %v4293_v9 }
0x25ef   :  { %4298 = vrot.lane.b32.xlu1 %v4186_v15, %s6682_s29 }
0x2648   :  { %v4488_v46 = vpop.f32.mrf.mxu0 }
0x2649   :  { %v4354_v61 = vpop.xlane.xlu1 %4353  ;;  %v4419_v29 = vpop.xlane.xlu2 %4418  ;;  %v4500_v1 = vadd.f32 %v4488_v46, %v8031_v63 }
0x264a   :  { %v4355_v5 = vsub.f32 %v4351_v35, %v4354_v61  ;;  %v4420_v50 = vsub.f32 %v4416_v12, %v4419_v29  ;;  %v8237_v12 = vld [vmem:[%s8640_s14 + $0x4] ss:$0 sm:$0xff] }
0x264b   :  { %v8201_v30 = vadd.f32 %v8197_v18, %v4500_v1 }
0x264c   :  { %v4356_v59 = vmul.f32 1.442695, %v4355_v5  ;;  %v4421_v19 = vmul.f32 1.442695, %v4420_v50 }
0x264d   :  { %v4517_v10 = vsel %vm513_vm10, %v8201_v30, 0.0 }
0x264e   :  { %6460 = vpow2.f32 %v4356_v59 }
0x264f   :  { %6462 = vpow2.f32 %v4421_v19 }
0x2654   :  { %v6461_v34 = vpop.eup %6460  ;;  %v4295_v33 = vpop.xlane.xlu0 %4294 }
0x2655   :  { %v6463_v45 = vpop.eup %6462  ;;  %v4358_v55 = vsel %vm804_vm3, %v6461_v34, 0.0  ;;  %6464 = vrcp.f32 %v4295_v33 }
0x2656   :  { %4359 = vadd.xlane.f32.xlu0 %v4358_v55  ;;  %v4423_v37 = vsel %vm804_vm3, %v6463_v45, 0.0 }
0x2657   :  { %4424 = vadd.xlane.f32.xlu2 %v4423_v37 }
0x265b   :  { %v6465_v52 = vpop.eup %6464 }
0x265c   :  { %v4297_v31 = vmul.f32 %v6465_v52, %v6459_v47 }
0x265f   :  { %4518 = vadd.xlane.f32.xlu2 %v4517_v10 }
0x2661   :  { %v4299_v63 = vpop.permute.xlu1 %4298 }
0x2662   :  { %4319 = vmatpush.msrb.mxu2 %v4299_v63 }
0x2663   :  { %6010 = vmatmul.msk.f32.vlgmr.msrb.gmra.mxu2 %vm804_vm3, %v4297_v31 }
0x266a   :  { %6153 = vrot.lane.b32.xlu0 %v6152_v40, %s6682_s29  ;;  %v6043_v40 = vld [vmem:[%s8643_s17 + $0x138] sm:$0xff] }
0x266b   :  { %4859 = vmatpush.msrb.mxu3 %v6043_v40 }
0x26c9   :  { %v4360_v44 = vpop.xlane.xlu0 %4359 }
0x26ca   :  { %v4425_v16 = vpop.xlane.xlu2 %4424  ;;  %6466 = vrcp.f32 %v4360_v44  ;;  %v6041_v44 = vld [vmem:[%s8643_s17 + $0x128] sm:$0xff] }
0x26cb   :  { %6468 = vrcp.f32 %v4425_v16  ;;  %v6042_v16 = vld [vmem:[%s8643_s17 + $0x130] sm:$0xff] }
0x26cc   :  { %4860 = vmatpush.msrb.mxu3 %v6042_v16 }
0x26ce   :  { %4861 = vmatpush.msrb.mxu3 %v6041_v44 }
0x26d0   :  { %v6467_v39 = vpop.eup %6466 }
0x26d1   :  { %v6469_v7 = vpop.eup %6468  ;;  %v4362_v53 = vmul.f32 %v6467_v39, %v6461_v34 }
0x26d2   :  { %v4519_v0 = vpop.xlane.xlu2 %4518  ;;  %v4427_v32 = vmul.f32 %v6469_v7, %v6463_v45  ;;  %v8257_v45 = vld [vmem:[#allocation7 + $0x4] ss:$0 sm:$0xff] }
0x26d3   :  { %v4529_v17 = vmul.f32 %v4519_v0, %v6859_v21  ;;  %v6040_v0 = vld [vmem:[%s8643_s17 + $0x120] sm:$0xff] }
0x26d4   :  { %4862 = vmatpush.msrb.mxu3 %v6040_v0 }
0x26d5   :  { %v4533_v15 = vsub.f32 %v8201_v30, %v4529_v17 }
0x26d7   :  { %v4537_v24 = vmul.f32 %v4533_v15, %v4533_v15 }
0x26d9   :  { %v4541_v11 = vsel %vm513_vm10, %v4537_v24, 0.0 }
0x26da   :  { %4542 = vadd.xlane.f32.xlu2 %v4541_v11  ;;  %v6038_v11 = vld [vmem:[%s8643_s17 + $0x110] sm:$0xff] }
0x26dc   :  { %v6154_v23 = vpop.permute.xlu0 %6153 }
0x26dd   :  { %v6156_v8 = vunpack.i.h.bf16 %v6154_v23  ;;  %v6155_v58 = vunpack.i.l.bf16 %v6154_v23  ;;  %v6037_v23 = vld [vmem:[%s8643_s17 + $0x108] sm:$0xff] }
0x26df   :  { %4384 = vmatpush.msra.mxu1 %v6155_v58  ;;  %4449 = vmatpush.msra.mxu2 %v6156_v8 }
0x26e0   :  { %6013 = vmatmul.msk.f32.vlgmr.msra.gmra.mxu1 %vm804_vm3, %v4362_v53  ;;  %6016 = vmatmul.msk.f32.vlgmr.msra.gmra.mxu2 %vm804_vm3, %v4427_v32  ;;  %v6036_v53 = vld [vmem:[%s8643_s17 + $0x100] sm:$0xff] }
0x26e1   :  { %4653 = vmatpush.msrb.mxu1 %v6031_v22 }
0x26e3   :  { %4654 = vmatpush.msrb.mxu1 %v6030_v54 }
0x26e5   :  { %4655 = vmatpush.msrb.mxu1 %v6029_v25 }
0x26e6   :  { %v4321_v38 = vpop.f32.mrf.mxu2 }
0x26e7   :  { %6022 = vmatmul.msk.f32.gmra.mxu0 %vm513_vm10, %v4321_v38  ;;  %4656 = vmatpush.msrb.mxu1 %v6028_v56 }
0x274d   :  { %v4543_v2 = vpop.xlane.xlu2 %4542 }
0x274e   :  { %v4553_v62 = vmul.f32 %v4543_v2, %v6859_v21 }
0x2750   :  { %v4557_v41 = vadd.f32 1e-05, %v4553_v62 }
0x2752   :  { %6470 = vrsqrt.f32 %v4557_v41  ;;  %vm4567_vm4 = vweird.f32 %v4557_v41 }
0x2758   :  { %v6471_v4 = vpop.eup %6470 }
0x2759   :  { %v4562_v60 = vmul.f32 %v6471_v4, %v4557_v41  ;;  %vm4568_vm2 = vweird.f32 %v6471_v4 }
0x275a   :  { %vm4569_vm5 = vmor %vm4567_vm4, %vm4568_vm2 }
0x275b   :  { %v4563_v13 = vmul.f32 %v6471_v4, %v4562_v60 }
0x275d   :  { %v4564_v42 = vmul.f32 0.5, %v4563_v13  ;;  %v4386_v14 = vpop.f32.mrf.mxu1 }
0x275e   :  { %6023 = vmatmul.msk.f32.gmra.mxu0 %vm513_vm10, %v4386_v14 }
0x275f   :  { %v4565_v27 = vsub.f32 1.5, %v4564_v42 }
0x2761   :  { %v4566_v3 = vmul.f32 %v6471_v4, %v4565_v27 }
0x2763   :  { %v4570_v35 = vsel %vm4569_vm5, %v6471_v4, %v4566_v3  ;;  %v4451_v51 = vpop.f32.mrf.mxu2 }
0x2764   :  { %v4601_v36 = vmul.f32 %v4570_v35, %v4533_v15  ;;  %v4491_v49 = vpop.f32.mrf.mxu0  ;;  %v6039_v15 = vld [vmem:[%s8643_s17 + $0x118] sm:$0xff] }
0x2765   :  { %v4501_v20 = vadd.f32 %v4491_v49, %v8104_v26  ;;  %4863 = vmatpush.msrb.mxu3 %v6039_v15 }
0x2766   :  { %v4608_v48 = vmul.f32 %v8232_v28, %v4601_v36  ;;  %6024 = vmatmul.msk.f32.gmra.mxu0 %vm513_vm10, %v4451_v51 }
0x2767   :  { %v8243_v47 = vadd.f32 %v8197_v18, %v4501_v20  ;;  %4864 = vmatpush.msrb.mxu3 %v6038_v11  ;;  %v8308_v11 = vld [vmem:[#allocation8 + $0x4] ss:$0 sm:$0xff] }
0x2768   :  { %v4615_v9 = vadd.f32 %v8237_v12, %v4608_v48 }
0x2769   :  { %v4520_v61 = vsel %vm513_vm10, %v8243_v47, 0.0  ;;  %4865 = vmatpush.msrb.mxu3 %v6037_v23 }
0x276a   :  { %6032 = vmatmul.msk.f32.vlgmr.msrb.gmra.mxu1 %vm513_vm10, %v4615_v9  ;;  %4521 = vadd.xlane.f32.xlu1 %v4520_v61 }
0x276b   :  { %4866 = vmatpush.msrb.mxu3 %v6036_v53 }
0x27db   :  { %v4494_v29 = vpop.f32.mrf.mxu0 }
0x27dc   :  { %v4502_v5 = vadd.f32 %v4494_v29, %v8110_v57 }
0x27dd   :  { %v4522_v59 = vpop.xlane.xlu1 %4521 }
0x27de   :  { %v8251_v26 = vadd.f32 %v8197_v18, %v4502_v5  ;;  %v4530_v46 = vmul.f32 %v4522_v59, %v6859_v21 }
0x27e0   :  { %v4523_v50 = vsel %vm513_vm10, %v8251_v26, 0.0  ;;  %v8263_v57 = vsub.f32 %v8243_v47, %v4530_v46 }
0x27e1   :  { %4524 = vadd.xlane.f32.xlu0 %v4523_v50 }
0x27e3   :  { %v4497_v19 = vpop.f32.mrf.mxu0 }
0x27e4   :  { %v4503_v34 = vadd.f32 %v4497_v19, %v8116_v6  ;;  %v4538_v6 = vmul.f32 %v8263_v57, %v8263_v57 }
0x27e6   :  { %v8260_v33 = vadd.f32 %v8197_v18, %v4503_v34  ;;  %v4544_v18 = vsel %vm513_vm10, %v4538_v6, 0.0 }
0x27e7   :  { %v4658_v55 = vpop.f32.mrf.mxu1 }
0x27e8   :  { %v4659_v1 = vadd.f32 %v8257_v45, %v4658_v55  ;;  %v4526_v37 = vsel %vm513_vm10, %v8260_v33, 0.0 }
0x27e9   :  { %4527 = vadd.xlane.f32.xlu2 %v4526_v37 }
0x27ea   :  { %v4674_v52 = vmul.f32 0.70710677, %v4659_v1  ;;  %v4670_v48 = vmul.f32 0.5, %v4659_v1 }
0x27ec   :  { %v4686_v10 = vand.u32 2147483647, %v4674_v52  ;;  %vm4678_vm0 = vcmp.ge.f32.partialorder %v4674_v52, 0.0 }
0x27ed   :  { %v4682_v51 = vsel %vm4678_vm0, 1.0, %v6679_v43 }
0x27ee   :  { %v4690_v31 = vmul.f32 0.3275911, %v4686_v10  ;;  %v4794_v25 = vsub.f32 0.0, %v4686_v10 }
0x27f0   :  { %v4694_v63 = vadd.f32 1.0, %v4690_v31  ;;  %v4798_v62 = vmul.f32 %v4794_v25, %v4686_v10 }
0x27f1   :  { %4545 = vadd.xlane.f32.xlu2 %v4544_v18 }
0x27f2   :  { %6472 = vrcp.f32 %v4694_v63  ;;  %v4709_v7 = vand.u32 2147483648, %v4694_v63  ;;  %v4707_v58 = vand.u32 2147483647, %v4694_v63  ;;  %vm4703_vm8 = vweird.f32 %v4694_v63 }
0x27f3   :  { %v4802_v60 = vmul.f32 1.442695, %v4798_v62 }
0x27f4   :  { %v4710_v38 = vor.u32 1.1754944e-38, %v4709_v7  ;;  %vm4708_vm11 = vcmp.eq.f32.partialorder %v4707_v58, 8.507059e+37 }
0x27f5   :  { %6474 = vpow2.f32 %v4802_v60 }
0x27f8   :  { %v6473_v17 = vpop.eup %6472 }
0x27f9   :  { %v4699_v24 = vmul.f32 %v6473_v17, %v4694_v63  ;;  %vm4704_vm6 = vweird.f32 %v6473_v17 }
0x27fa   :  { %vm4705_vm9 = vmor %vm4703_vm8, %vm4704_vm6 }
0x27fb   :  { %v4700_v39 = vsub.f32 1.0, %v4699_v24  ;;  %v6475_v35 = vpop.eup %6474 }
0x27fd   :  { %v4701_v8 = vmul.f32 %v6473_v17, %v4700_v39 }
0x27ff   :  { %v4702_v32 = vadd.f32 %v6473_v17, %v4701_v8 }
0x2801   :  { %v4706_v22 = vsel %vm4705_vm9, %v6473_v17, %v4702_v32 }
0x2802   :  { %v4711_v54 = vsel %vm4708_vm11, %v4710_v38, %v4706_v22 }
0x2803   :  { %v4758_v56 = vmul.f32 1.0614054, %v4711_v54 }
0x2805   :  { %v4762_v2 = vadd.f32 -1.4531521, %v4758_v56 }
0x2807   :  { %v4766_v41 = vmul.f32 %v4762_v2, %v4711_v54 }
0x2809   :  { %v4770_v4 = vadd.f32 1.4214138, %v4766_v41 }
0x280b   :  { %v4774_v13 = vmul.f32 %v4770_v4, %v4711_v54 }
0x280d   :  { %v4778_v42 = vadd.f32 -0.28449672, %v4774_v13 }
0x280f   :  { %v4782_v14 = vmul.f32 %v4778_v42, %v4711_v54 }
0x2811   :  { %v4786_v27 = vadd.f32 0.2548296, %v4782_v14 }
0x2813   :  { %v4790_v3 = vmul.f32 %v4786_v27, %v4711_v54 }
0x2815   :  { %v4810_v36 = vmul.f32 %v6475_v35, %v4790_v3 }
0x2817   :  { %v4814_v49 = vsub.f32 1.0, %v4810_v36 }
0x2819   :  { %v4818_v20 = vmul.f32 %v4814_v49, %v4682_v51 }
0x281b   :  { %v4822_v9 = vadd.f32 1.0, %v4818_v20 }
0x281d   :  { %v4826_v61 = vmul.f32 %v4822_v9, %v4670_v48 }
0x281f   :  { %6044 = vmatmul.msk.f32.vlgmr.msrb.gmra.mxu3 %vm1415_vm7, %v4826_v61 }
0x2854   :  { %v4525_v29 = vpop.xlane.xlu0 %4524 }
0x2855   :  { %v4531_v5 = vmul.f32 %v4525_v29, %v6859_v21 }
0x2857   :  { %v4535_v50 = vsub.f32 %v8251_v26, %v4531_v5 }
0x2859   :  { %v4539_v59 = vmul.f32 %v4535_v50, %v4535_v50 }
0x285b   :  { %v4547_v19 = vsel %vm513_vm10, %v4539_v59, 0.0 }
0x285c   :  { %4548 = vadd.xlane.f32.xlu2 %v4547_v19  ;;  %v4528_v46 = vpop.xlane.xlu2 %4527 }
0x285d   :  { %v4532_v34 = vmul.f32 %v4528_v46, %v6859_v21 }
0x285f   :  { %v4536_v55 = vsub.f32 %v8260_v33, %v4532_v34 }
0x2861   :  { %v4540_v37 = vmul.f32 %v4536_v55, %v4536_v55 }
0x2863   :  { %v4550_v1 = vsel %vm513_vm10, %v4540_v37, 0.0 }
0x2864   :  { %4551 = vadd.xlane.f32.xlu2 %v4550_v1  ;;  %v4546_v52 = vpop.xlane.xlu2 %4545 }
0x2865   :  { %v4554_v10 = vmul.f32 %v4546_v52, %v6859_v21 }
0x2867   :  { %v4558_v6 = vadd.f32 1e-05, %v4554_v10 }
0x2869   :  { %6476 = vrsqrt.f32 %v4558_v6  ;;  %vm4577_vm13 = vweird.f32 %v4558_v6 }
0x286f   :  { %v6477_v31 = vpop.eup %6476 }
0x2870   :  { %v4572_v63 = vmul.f32 %v6477_v31, %v4558_v6  ;;  %vm4578_vm12 = vweird.f32 %v6477_v31 }
0x2871   :  { %vm4579_vm14 = vmor %vm4577_vm13, %vm4578_vm12 }
0x2872   :  { %v4573_v18 = vmul.f32 %v6477_v31, %v4572_v63 }
0x2874   :  { %v4574_v40 = vmul.f32 0.5, %v4573_v18 }
0x2876   :  { %v4575_v16 = vsub.f32 1.5, %v4574_v40 }
0x2878   :  { %v4576_v44 = vmul.f32 %v6477_v31, %v4575_v16 }
0x287a   :  { %v4580_v0 = vsel %vm4579_vm14, %v6477_v31, %v4576_v44 }
0x287b   :  { %v4602_v17 = vmul.f32 %v4580_v0, %v8263_v57 }
0x287d   :  { %v4609_v15 = vmul.f32 %v8232_v28, %v4602_v17 }
0x287f   :  { %v4616_v24 = vadd.f32 %v8237_v12, %v4609_v15 }
0x2881   :  { %6033 = vmatmul.msk.f32.gmra.mxu1 %vm513_vm10, %v4616_v24 }
0x28a2   :  { %v4868_v39 = vpop.f32.mrf.mxu3 }
0x28a3   :  { %v4880_v7 = vadd.f32 %v4868_v39, %v8201_v30 }
0x28a5   :  { %v8312_v23 = vadd.f32 %v8308_v11, %v4880_v7 }
0x28a7   :  { %v4897_v8 = vsel %vm513_vm10, %v8312_v23, 0.0 }
0x28a8   :  { %4898 = vadd.xlane.f32.xlu2 %v4897_v8 }
0x28cf   :  { %v4549_v58 = vpop.xlane.xlu2 %4548 }
0x28d0   :  { %v4555_v57 = vmul.f32 %v4549_v58, %v6859_v21 }
0x28d2   :  { %v4559_v53 = vadd.f32 1e-05, %v4555_v57 }
0x28d4   :  { %6478 = vrsqrt.f32 %v4559_v53  ;;  %vm4587_vm1 = vweird.f32 %v4559_v53 }
0x28d7   :  { %v4552_v32 = vpop.xlane.xlu2 %4551 }
0x28d8   :  { %v4556_v38 = vmul.f32 %v4552_v32, %v6859_v21 }
0x28da   :  { %v6479_v22 = vpop.eup %6478  ;;  %v4560_v54 = vadd.f32 1e-05, %v4556_v38 }
0x28db   :  { %v4582_v25 = vmul.f32 %v6479_v22, %v4559_v53  ;;  %vm4588_vm15 = vweird.f32 %v6479_v22 }
0x28dc   :  { %6480 = vrsqrt.f32 %v4560_v54  ;;  %vm4589_vm2 = vmor %vm4587_vm1, %vm4588_vm15  ;;  %vm4597_vm5 = vweird.f32 %v4560_v54 }
0x28dd   :  { %v4583_v30 = vmul.f32 %v6479_v22, %v4582_v25 }
0x28df   :  { %v4584_v56 = vmul.f32 0.5, %v4583_v30 }
0x28e1   :  { %v4585_v2 = vsub.f32 1.5, %v4584_v56 }
0x28e2   :  { %v6481_v62 = vpop.eup %6480 }
0x28e3   :  { %v4586_v41 = vmul.f32 %v6479_v22, %v4585_v2  ;;  %v4592_v4 = vmul.f32 %v6481_v62, %v4560_v54  ;;  %vm4598_vm4 = vweird.f32 %v6481_v62 }
0x28e4   :  { %vm4599_vm6 = vmor %vm4597_vm5, %vm4598_vm4 }
0x28e5   :  { %v4590_v60 = vsel %vm4589_vm2, %v6479_v22, %v4586_v41  ;;  %v4593_v13 = vmul.f32 %v6481_v62, %v4592_v4 }
0x28e6   :  { %v4603_v42 = vmul.f32 %v4590_v60, %v4535_v50 }
0x28e7   :  { %v4594_v14 = vmul.f32 0.5, %v4593_v13 }
0x28e8   :  { %v4610_v27 = vmul.f32 %v8232_v28, %v4603_v42 }
0x28e9   :  { %v4595_v3 = vsub.f32 1.5, %v4594_v14 }
0x28ea   :  { %v4617_v35 = vadd.f32 %v8237_v12, %v4610_v27 }
0x28eb   :  { %v4596_v36 = vmul.f32 %v6481_v62, %v4595_v3 }
0x28ec   :  { %6034 = vmatmul.msk.f32.gmra.mxu1 %vm513_vm10, %v4617_v35 }
0x28ed   :  { %v4600_v49 = vsel %vm4599_vm6, %v6481_v62, %v4596_v36 }
0x28ee   :  { %v4604_v51 = vmul.f32 %v4600_v49, %v4536_v55 }
0x28f0   :  { %v4611_v20 = vmul.f32 %v8232_v28, %v4604_v51 }
0x28f2   :  { %v4618_v48 = vadd.f32 %v8237_v12, %v4611_v20 }
0x28f4   :  { %6035 = vmatmul.msk.f32.gmra.mxu1 %vm513_vm10, %v4618_v48 }
0x28fe   :  { %v4661_v9 = vpop.f32.mrf.mxu1 }
0x28ff   :  { %v4662_v61 = vadd.f32 %v8257_v45, %v4661_v9 }
0x2901   :  { %v4675_v29 = vmul.f32 0.70710677, %v4662_v61  ;;  %v4671_v30 = vmul.f32 0.5, %v4662_v61 }
0x2903   :  { %v4687_v5 = vand.u32 2147483647, %v4675_v29  ;;  %vm4679_vm12 = vcmp.ge.f32.partialorder %v4675_v29, 0.0 }
0x2904   :  { %v4683_v54 = vsel %vm4679_vm12, 1.0, %v6679_v43 }
0x2905   :  { %v4691_v50 = vmul.f32 0.3275911, %v4687_v5  ;;  %v4795_v6 = vsub.f32 0.0, %v4687_v5 }
0x2907   :  { %v4695_v59 = vadd.f32 1.0, %v4691_v50  ;;  %v4799_v16 = vmul.f32 %v4795_v6, %v4687_v5 }
0x2909   :  { %6482 = vrcp.f32 %v4695_v59  ;;  %v4724_v37 = vand.u32 2147483648, %v4695_v59  ;;  %v4722_v55 = vand.u32 2147483647, %v4695_v59  ;;  %vm4718_vm9 = vweird.f32 %v4695_v59 }
0x290a   :  { %v4804_v24 = vmul.f32 1.442695, %v4799_v16 }
0x290b   :  { %v4725_v12 = vor.u32 1.1754944e-38, %v4724_v37  ;;  %vm4723_vm0 = vcmp.eq.f32.partialorder %v4722_v55, 8.507059e+37 }
0x290c   :  { %6484 = vpow2.f32 %v4804_v24 }
0x290f   :  { %v6483_v19 = vpop.eup %6482 }
0x2910   :  { %v4714_v46 = vmul.f32 %v6483_v19, %v4695_v59  ;;  %vm4719_vm8 = vweird.f32 %v6483_v19 }
0x2911   :  { %vm4720_vm11 = vmor %vm4718_vm9, %vm4719_vm8 }
0x2912   :  { %v4715_v34 = vsub.f32 1.0, %v4714_v46  ;;  %v6485_v32 = vpop.eup %6484 }
0x2914   :  { %v4716_v1 = vmul.f32 %v6483_v19, %v4715_v34 }
0x2916   :  { %v4717_v28 = vadd.f32 %v6483_v19, %v4716_v1 }
0x2918   :  { %v4721_v52 = vsel %vm4720_vm11, %v6483_v19, %v4717_v28 }
0x2919   :  { %v4726_v10 = vsel %vm4723_vm0, %v4725_v12, %v4721_v52 }
0x291a   :  { %v4759_v31 = vmul.f32 1.0614054, %v4726_v10 }
0x291b   :  { %v4899_v63 = vpop.xlane.xlu2 %4898 }
0x291c   :  { %v4763_v18 = vadd.f32 -1.4531521, %v4759_v31  ;;  %v4909_v40 = vmul.f32 %v4899_v63, %v6859_v21 }
0x291e   :  { %v4767_v44 = vmul.f32 %v4763_v18, %v4726_v10  ;;  %v8327_v0 = vsub.f32 %v8312_v23, %v4909_v40 }
0x2920   :  { %v4771_v17 = vadd.f32 1.4214138, %v4767_v44  ;;  %v4917_v15 = vmul.f32 %v8327_v0, %v8327_v0  ;;  %v6053_v44 = vld [vmem:[%s8635_s9 + $0xb8] sm:$0xff] }
0x2921   :  { %5033 = vmatpush.msrb.mxu2 %v6053_v44 }
0x2922   :  { %v4775_v39 = vmul.f32 %v4771_v17, %v4726_v10  ;;  %v4921_v7 = vsel %vm513_vm10, %v4917_v15, 0.0 }
0x2923   :  { %4922 = vadd.xlane.f32.xlu1 %v4921_v7  ;;  %v6052_v7 = vld [vmem:[%s8635_s9 + $0xb0] sm:$0xff] }
0x2924   :  { %v4779_v8 = vadd.f32 -0.28449672, %v4775_v39  ;;  %5034 = vmatpush.msrb.mxu2 %v6052_v7 }
0x2926   :  { %v4783_v58 = vmul.f32 %v4779_v8, %v4726_v10 }
0x2928   :  { %v4787_v57 = vadd.f32 0.2548296, %v4783_v58 }
0x292a   :  { %v4791_v53 = vmul.f32 %v4787_v57, %v4726_v10  ;;  %v6051_v57 = vld [vmem:[%s8635_s9 + $0xa8] sm:$0xff] }
0x292b   :  { %5035 = vmatpush.msrb.mxu2 %v6051_v57  ;;  %v8405_v57 = vld [vmem:[%s8636_s10 + $0x5] ss:$0 sm:$0xff] }
0x292c   :  { %v4811_v38 = vmul.f32 %v6485_v32, %v4791_v53 }
0x292e   :  { %v4815_v22 = vsub.f32 1.0, %v4811_v38  ;;  %v6050_v38 = vld [vmem:[%s8635_s9 + $0xa0] sm:$0xff] }
0x292f   :  { %5036 = vmatpush.msrb.mxu2 %v6050_v38 }
0x2930   :  { %v4819_v25 = vmul.f32 %v4815_v22, %v4683_v54 }
0x2932   :  { %v4823_v56 = vadd.f32 1.0, %v4819_v25 }
0x2934   :  { %v4827_v2 = vmul.f32 %v4823_v56, %v4671_v30 }
0x2936   :  { %6045 = vmatmul.msk.f32.gmra.mxu3 %vm1415_vm7, %v4827_v2 }
0x2969   :  { %v4664_v62 = vpop.f32.mrf.mxu1 }
0x296a   :  { %v8335_v41 = vadd.f32 %v8257_v45, %v4664_v62 }
0x296c   :  { %v8338_v4 = vmul.f32 0.70710677, %v8335_v41 }
0x296e   :  { %v4688_v60 = vand.u32 2147483647, %v8338_v4  ;;  %vm4680_vm8 = vcmp.ge.f32.partialorder %v8338_v4, 0.0 }
0x2970   :  { %v4692_v13 = vmul.f32 0.3275911, %v4688_v60  ;;  %v4796_v46 = vsub.f32 0.0, %v4688_v60 }
0x2971   :  { %v4667_v42 = vpop.f32.mrf.mxu1 }
0x2972   :  { %v4696_v14 = vadd.f32 1.0, %v4692_v13  ;;  %v8342_v27 = vadd.f32 %v8257_v45, %v4667_v42  ;;  %v4800_v12 = vmul.f32 %v4796_v46, %v4688_v60 }
0x2974   :  { %6486 = vrcp.f32 %v4696_v14  ;;  %v8345_v3 = vmul.f32 0.70710677, %v8342_v27  ;;  %v4739_v9 = vand.u32 2147483648, %v4696_v14  ;;  %v4737_v29 = vand.u32 2147483647, %v4696_v14 }
0x2975   :  { %vm4733_vm14 = vweird.f32 %v4696_v14  ;;  %v4806_v40 = vmul.f32 1.442695, %v4800_v12 }
0x2976   :  { %v4689_v35 = vand.u32 2147483647, %v8345_v3  ;;  %v4740_v45 = vor.u32 1.1754944e-38, %v4739_v9  ;;  %vm4738_vm1 = vcmp.eq.f32.partialorder %v4737_v29, 8.507059e+37  ;;  %v4672_v9 = vmul.f32 0.5, %v8335_v41 }
0x2977   :  { %vm4681_vm9 = vcmp.ge.f32.partialorder %v8345_v3, 0.0  ;;  %v8372_v3 = vld [vmem:[%s8633_s7 + $0x5] ss:$0 sm:$0xff] }
0x2978   :  { %v4693_v36 = vmul.f32 0.3275911, %v4689_v35  ;;  %v4797_v24 = vsub.f32 0.0, %v4689_v35  ;;  %v4685_v46 = vsel %vm4681_vm9, 1.0, %v6679_v43 }
0x297a   :  { %v6487_v49 = vpop.eup %6486  ;;  %v4697_v20 = vadd.f32 1.0, %v4693_v36  ;;  %v4801_v32 = vmul.f32 %v4797_v24, %v4689_v35 }
0x297b   :  { %v4729_v51 = vmul.f32 %v6487_v49, %v4696_v14  ;;  %vm4734_vm13 = vweird.f32 %v6487_v49 }
0x297c   :  { %6488 = vrcp.f32 %v4697_v20  ;;  %vm4735_vm15 = vmor %vm4733_vm14, %vm4734_vm13  ;;  %v4754_v28 = vand.u32 2147483648, %v4697_v20  ;;  %v4752_v10 = vand.u32 2147483647, %v4697_v20  ;;  %vm4748_vm4 = vweird.f32 %v4697_v20 }
0x297d   :  { %v4730_v48 = vsub.f32 1.0, %v4729_v51  ;;  %6490 = vpow2.f32 %v4806_v40  ;;  %v4808_v56 = vmul.f32 1.442695, %v4801_v32 }
0x297e   :  { %v4755_v18 = vor.u32 1.1754944e-38, %v4754_v28  ;;  %vm4753_vm6 = vcmp.eq.f32.partialorder %v4752_v10, 8.507059e+37 }
0x297f   :  { %v4731_v61 = vmul.f32 %v6487_v49, %v4730_v48  ;;  %6492 = vpow2.f32 %v4808_v56 }
0x2981   :  { %v4732_v5 = vadd.f32 %v6487_v49, %v4731_v61 }
0x2982   :  { %v6489_v50 = vpop.eup %6488 }
0x2983   :  { %v4736_v59 = vsel %vm4735_vm15, %v6487_v49, %v4732_v5  ;;  %v4744_v34 = vmul.f32 %v6489_v50, %v4697_v20  ;;  %vm4749_vm2 = vweird.f32 %v6489_v50  ;;  %v6491_v2 = vpop.eup %6490  ;;  %v4684_v49 = vsel %vm4680_vm8, 1.0, %v6679_v43 }
0x2984   :  { %v4741_v19 = vsel %vm4738_vm1, %v4740_v45, %v4736_v59  ;;  %vm4750_vm5 = vmor %vm4748_vm4, %vm4749_vm2 }
0x2985   :  { %v4760_v37 = vmul.f32 1.0614054, %v4741_v19  ;;  %v4745_v1 = vsub.f32 1.0, %v4744_v34  ;;  %v6493_v5 = vpop.eup %6492 }
0x2987   :  { %v4764_v55 = vadd.f32 -1.4531521, %v4760_v37  ;;  %v4746_v52 = vmul.f32 %v6489_v50, %v4745_v1  ;;  %v4673_v1 = vmul.f32 0.5, %v8342_v27  ;;  %v8377_v27 = vld [vmem:[%s8634_s8 + $0x5] ss:$0 sm:$0xff] }
0x2989   :  { %v4768_v6 = vmul.f32 %v4764_v55, %v4741_v19  ;;  %v4747_v31 = vadd.f32 %v6489_v50, %v4746_v52 }
0x298b   :  { %v4772_v63 = vadd.f32 1.4214138, %v4768_v6  ;;  %v4751_v16 = vsel %vm4750_vm5, %v6489_v50, %v4747_v31 }
0x298c   :  { %v4756_v15 = vsel %vm4753_vm6, %v4755_v18, %v4751_v16 }
0x298d   :  { %v4776_v17 = vmul.f32 %v4772_v63, %v4741_v19  ;;  %v4761_v39 = vmul.f32 1.0614054, %v4756_v15 }
0x298f   :  { %v4780_v8 = vadd.f32 -0.28449672, %v4776_v17  ;;  %v4765_v58 = vadd.f32 -1.4531521, %v4761_v39 }
0x2991   :  { %v4784_v53 = vmul.f32 %v4780_v8, %v4741_v19  ;;  %v4769_v22 = vmul.f32 %v4765_v58, %v4756_v15 }
0x2993   :  { %v4788_v54 = vadd.f32 0.2548296, %v4784_v53  ;;  %v4773_v25 = vadd.f32 1.4214138, %v4769_v22 }
0x2995   :  { %v4792_v30 = vmul.f32 %v4788_v54, %v4741_v19  ;;  %v4777_v62 = vmul.f32 %v4773_v25, %v4756_v15 }
0x2996   :  { %v4923_v60 = vpop.xlane.xlu1 %4922 }
0x2997   :  { %v4812_v13 = vmul.f32 %v6491_v2, %v4792_v30  ;;  %v4933_v42 = vmul.f32 %v4923_v60, %v6859_v21  ;;  %v4781_v14 = vadd.f32 -0.28449672, %v4777_v62 }
0x2999   :  { %v4816_v35 = vsub.f32 1.0, %v4812_v13  ;;  %v4937_v36 = vadd.f32 1e-05, %v4933_v42  ;;  %v4785_v51 = vmul.f32 %v4781_v14, %v4756_v15 }
0x299b   :  { %v4820_v20 = vmul.f32 %v4816_v35, %v4684_v49  ;;  %6494 = vrsqrt.f32 %v4937_v36  ;;  %v4789_v48 = vadd.f32 0.2548296, %v4785_v51  ;;  %vm4947_vm0 = vweird.f32 %v4937_v36 }
0x299d   :  { %v4824_v61 = vadd.f32 1.0, %v4820_v20  ;;  %v4793_v29 = vmul.f32 %v4789_v48, %v4756_v15 }
0x299f   :  { %v4828_v45 = vmul.f32 %v4824_v61, %v4672_v9  ;;  %v4813_v4 = vmul.f32 %v6493_v5, %v4793_v29 }
0x29a1   :  { %v6495_v50 = vpop.eup %6494  ;;  %6046 = vmatmul.msk.f32.gmra.mxu3 %vm1415_vm7, %v4828_v45  ;;  %v4817_v59 = vsub.f32 1.0, %v4813_v4 }
0x29a2   :  { %v4942_v19 = vmul.f32 %v6495_v50, %v4937_v36  ;;  %vm4948_vm11 = vweird.f32 %v6495_v50 }
0x29a3   :  { %v4821_v34 = vmul.f32 %v4817_v59, %v4685_v46  ;;  %vm4949_vm12 = vmor %vm4947_vm0, %vm4948_vm11 }
0x29a4   :  { %v4943_v37 = vmul.f32 %v6495_v50, %v4942_v19 }
0x29a5   :  { %v4825_v55 = vadd.f32 1.0, %v4821_v34 }
0x29a6   :  { %v4944_v41 = vmul.f32 0.5, %v4943_v37 }
0x29a7   :  { %v4829_v28 = vmul.f32 %v4825_v55, %v4673_v1 }
0x29a8   :  { %v4945_v12 = vsub.f32 1.5, %v4944_v41 }
0x29a9   :  { %6047 = vmatmul.msk.f32.gmra.mxu3 %vm1415_vm7, %v4829_v28 }
0x29aa   :  { %v4946_v52 = vmul.f32 %v6495_v50, %v4945_v12 }
0x29ac   :  { %v4950_v10 = vsel %vm4949_vm12, %v6495_v50, %v4946_v52 }
0x29ad   :  { %v4981_v6 = vmul.f32 %v4950_v10, %v8327_v0 }
0x29af   :  { %v4988_v31 = vmul.f32 %v8372_v3, %v4981_v6 }
0x29b1   :  { %v4995_v63 = vadd.f32 %v8377_v27, %v4988_v31 }
0x29b3   :  { %6055 = vmatmul.msk.f32.vlgmr.msrb.gmra.mxu2 %vm513_vm10, %v4995_v63 }
0x29b9   :  { %v4871_v18 = vpop.f32.mrf.mxu3 }
0x29ba   :  { %v4881_v40 = vadd.f32 %v4871_v18, %v8243_v47 }
0x29bc   :  { %v8385_v16 = vadd.f32 %v8308_v11, %v4881_v40 }
0x29be   :  { %v4900_v44 = vsel %vm513_vm10, %v8385_v16, 0.0 }
0x29bf   :  { %4901 = vadd.xlane.f32.xlu2 %v4900_v44 }
0x2a24   :  { %v4874_v17 = vpop.f32.mrf.mxu3 }
0x2a25   :  { %v4882_v15 = vadd.f32 %v4874_v17, %v8251_v26 }
0x2a27   :  { %v8391_v0 = vadd.f32 %v8308_v11, %v4882_v15 }
0x2a29   :  { %v4903_v24 = vsel %vm513_vm10, %v8391_v0, 0.0 }
0x2a2a   :  { %4904 = vadd.xlane.f32.xlu0 %v4903_v24 }
0x2a2c   :  { %v4877_v39 = vpop.f32.mrf.mxu3 }
0x2a2d   :  { %v4883_v47 = vadd.f32 %v4877_v39, %v8260_v33 }
0x2a2f   :  { %v8397_v7 = vadd.f32 %v8308_v11, %v4883_v47 }
0x2a31   :  { %v4906_v8 = vsel %vm513_vm10, %v8397_v7, 0.0 }
0x2a32   :  { %v4902_v58 = vpop.xlane.xlu2 %4901  ;;  %4907 = vadd.xlane.f32.xlu1 %v4906_v8 }
0x2a33   :  { %v4910_v26 = vmul.f32 %v4902_v58, %v6859_v21 }
0x2a35   :  { %v4914_v53 = vsub.f32 %v8385_v16, %v4910_v26 }
0x2a36   :  { %v5038_v32 = vpop.f32.mrf.mxu2 }
0x2a37   :  { %v5039_v33 = vadd.f32 %v8405_v57, %v5038_v32  ;;  %v4918_v38 = vmul.f32 %v4914_v53, %v4914_v53 }
0x2a39   :  { %5051 = vrot.lane.b32.xlu2 %v5039_v33, %s6681_s4  ;;  %v4924_v11 = vsel %vm513_vm10, %v4918_v38, 0.0 }
0x2a3a   :  { %4925 = vadd.xlane.f32.xlu0 %v4924_v11 }
0x2a41   :  { %5089 = vrot.lane.b32.xlu2 %v5039_v33, %s6682_s29 }
0x2a93   :  { %v5052_v22 = vpop.permute.xlu2 %5051 }
0x2a94   :  { %6059 = vmatpush.xpose.msk.msra.mxu0 %vm513_vm10, %v5052_v22 }
0x2a97   :  { %6060 = vmatmul.msk.f32.vlgmr.msra.gmra.mxu0 %vm513_vm10, %v5039_v33 }
0x2a9b   :  { %v5090_v54 = vpop.permute.xlu2 %5089 }
0x2a9c   :  { %5110 = vmatpush.msra.mxu1 %v5090_v54 }
0x2a9d   :  { %v4905_v25 = vpop.xlane.xlu0 %4904 }
0x2a9e   :  { %v4911_v30 = vmul.f32 %v4905_v25, %v6859_v21 }
0x2aa0   :  { %v4915_v56 = vsub.f32 %v8391_v0, %v4911_v30 }
0x2aa2   :  { %v4919_v2 = vmul.f32 %v4915_v56, %v4915_v56 }
0x2aa4   :  { %v4927_v62 = vsel %vm513_vm10, %v4919_v2, 0.0 }
0x2aa5   :  { %4928 = vadd.xlane.f32.xlu1 %v4927_v62  ;;  %v4908_v60 = vpop.xlane.xlu1 %4907 }
0x2aa6   :  { %v4912_v13 = vmul.f32 %v4908_v60, %v6859_v21 }
0x2aa8   :  { %v4916_v42 = vsub.f32 %v8397_v7, %v4912_v13 }
0x2aaa   :  { %v4920_v14 = vmul.f32 %v4916_v42, %v4916_v42 }
0x2aac   :  { %v4930_v35 = vsel %vm513_vm10, %v4920_v14, 0.0 }
0x2aad   :  { %v4926_v36 = vpop.xlane.xlu0 %4925  ;;  %4931 = vadd.xlane.f32.xlu0 %v4930_v35 }
0x2aae   :  { %v4934_v49 = vmul.f32 %v4926_v36, %v6859_v21 }
0x2ab0   :  { %v4938_v51 = vadd.f32 1e-05, %v4934_v49  ;;  %v6074_v49 = vld [vmem:[%s8637_s11 + $0xb8] sm:$0xff] }
0x2ab2   :  { %6496 = vrsqrt.f32 %v4938_v51  ;;  %vm4957_vm14 = vweird.f32 %v4938_v51 }
0x2ab8   :  { %v6497_v20 = vpop.eup %6496 }
0x2ab9   :  { %v4952_v48 = vmul.f32 %v6497_v20, %v4938_v51  ;;  %vm4958_vm13 = vweird.f32 %v6497_v20  ;;  %v6073_v51 = vld [vmem:[%s8637_s11 + $0xb0] sm:$0xff] }
0x2aba   :  { %vm4959_vm15 = vmor %vm4957_vm14, %vm4958_vm13 }
0x2abb   :  { %v4953_v9 = vmul.f32 %v6497_v20, %v4952_v48 }
0x2abd   :  { %v4954_v61 = vmul.f32 0.5, %v4953_v9 }
0x2abf   :  { %v4955_v29 = vsub.f32 1.5, %v4954_v61 }
0x2ac1   :  { %v4956_v5 = vmul.f32 %v6497_v20, %v4955_v29  ;;  %v6071_v29 = vld [vmem:[%s8637_s11 + $0xa0] sm:$0xff] }
0x2ac3   :  { %v4960_v45 = vsel %vm4959_vm15, %v6497_v20, %v4956_v5  ;;  %v6072_v20 = vld [vmem:[%s8637_s11 + $0xa8] sm:$0xff] }
0x2ac4   :  { %v4982_v4 = vmul.f32 %v4960_v45, %v4914_v53 }
0x2ac6   :  { %v4989_v50 = vmul.f32 %v8372_v3, %v4982_v4 }
0x2ac8   :  { %v4996_v59 = vadd.f32 %v8377_v27, %v4989_v50 }
0x2aca   :  { %6056 = vmatmul.msk.f32.gmra.mxu2 %vm513_vm10, %v4996_v59 }
0x2b14   :  { %v5074_v19 = vpop.f32.mrf.mxu0 }
0x2b15   :  { %v5077_v46 = vmul.f32 0.17677669, %v5074_v19 }
0x2b17   :  { %v5078_v34 = vsel %vm804_vm3, %v5077_v46, -inf }
0x2b18   :  { %5079 = vmax.xlane.f32.xlu1 %v5078_v34  ;;  %v4929_v37 = vpop.xlane.xlu1 %4928 }
0x2b19   :  { %v4935_v1 = vmul.f32 %v4929_v37, %v6859_v21 }
0x2b1b   :  { %v4939_v55 = vadd.f32 1e-05, %v4935_v1 }
0x2b1d   :  { %6498 = vrsqrt.f32 %v4939_v55  ;;  %vm4967_vm2 = vweird.f32 %v4939_v55 }
0x2b20   :  { %v4932_v41 = vpop.xlane.xlu0 %4931 }
0x2b21   :  { %v4936_v28 = vmul.f32 %v4932_v41, %v6859_v21 }
0x2b23   :  { %v6499_v12 = vpop.eup %6498  ;;  %v4940_v10 = vadd.f32 1e-05, %v4936_v28 }
0x2b24   :  { %v4962_v52 = vmul.f32 %v6499_v12, %v4939_v55  ;;  %vm4968_vm1 = vweird.f32 %v6499_v12 }
0x2b25   :  { %6500 = vrsqrt.f32 %v4940_v10  ;;  %vm4969_vm4 = vmor %vm4967_vm2, %vm4968_vm1  ;;  %vm4977_vm6 = vweird.f32 %v4940_v10 }
0x2b26   :  { %v4963_v6 = vmul.f32 %v6499_v12, %v4962_v52 }
0x2b28   :  { %v4964_v31 = vmul.f32 0.5, %v4963_v6 }
0x2b2a   :  { %v4965_v63 = vsub.f32 1.5, %v4964_v31 }
0x2b2b   :  { %v6501_v18 = vpop.eup %6500 }
0x2b2c   :  { %v4966_v40 = vmul.f32 %v6499_v12, %v4965_v63  ;;  %v4972_v44 = vmul.f32 %v6501_v18, %v4940_v10  ;;  %vm4978_vm5 = vweird.f32 %v6501_v18 }
0x2b2d   :  { %vm4979_vm8 = vmor %vm4977_vm6, %vm4978_vm5 }
0x2b2e   :  { %v4970_v17 = vsel %vm4969_vm4, %v6499_v12, %v4966_v40  ;;  %v4973_v24 = vmul.f32 %v6501_v18, %v4972_v44  ;;  %v8473_v44 = vld [vmem:[%s8638_s12 + $0x5] ss:$0 sm:$0xff] }
0x2b2f   :  { %v4983_v15 = vmul.f32 %v4970_v17, %v4915_v56 }
0x2b30   :  { %v4974_v39 = vmul.f32 0.5, %v4973_v24 }
0x2b31   :  { %v4990_v47 = vmul.f32 %v8372_v3, %v4983_v15 }
0x2b32   :  { %v4975_v8 = vsub.f32 1.5, %v4974_v39 }
0x2b33   :  { %v4997_v58 = vadd.f32 %v8377_v27, %v4990_v47 }
0x2b34   :  { %v4976_v26 = vmul.f32 %v6501_v18, %v4975_v8 }
0x2b35   :  { %6057 = vmatmul.msk.f32.gmra.mxu2 %vm513_vm10, %v4997_v58 }
0x2b36   :  { %v4980_v53 = vsel %vm4979_vm8, %v6501_v18, %v4976_v26 }
0x2b37   :  { %v4984_v32 = vmul.f32 %v4980_v53, %v4916_v42 }
0x2b39   :  { %v4991_v33 = vmul.f32 %v8372_v3, %v4984_v32 }
0x2b3b   :  { %v4998_v38 = vadd.f32 %v8377_v27, %v4991_v33 }
0x2b3d   :  { %6058 = vmatmul.msk.f32.gmra.mxu2 %vm513_vm10, %v4998_v38 }
0x2b4d   :  { %v5041_v11 = vpop.f32.mrf.mxu2 }
0x2b4e   :  { %v5042_v22 = vadd.f32 %v8405_v57, %v5041_v11 }
0x2b50   :  { %5116 = vrot.lane.b32.xlu1 %v5042_v22, %s6681_s4 }
0x2b8b   :  { %v5080_v54 = vpop.xlane.xlu1 %5079 }
0x2b8c   :  { %v5081_v25 = vsub.f32 %v5077_v46, %v5080_v54 }
0x2b8e   :  { %v5082_v30 = vmul.f32 1.442695, %v5081_v25 }
0x2b90   :  { %6502 = vpow2.f32 %v5082_v30 }
0x2b96   :  { %v6503_v56 = vpop.eup %6502 }
0x2b97   :  { %v5084_v2 = vsel %vm804_vm3, %v6503_v56, 0.0 }
0x2b98   :  { %5085 = vadd.xlane.f32.xlu0 %v5084_v2 }
0x2bb8   :  { %v5044_v62 = vpop.f32.mrf.mxu2 }
0x2bb9   :  { %v5045_v3 = vadd.f32 %v8405_v57, %v5044_v62 }
0x2bbb   :  { %5181 = vrot.lane.b32.xlu0 %v5045_v3, %s6681_s4  ;;  %v6157_v34 = vpack.i.bf16 %v5045_v3, %v5042_v22 }
0x2bc0   :  { %v5047_v27 = vpop.f32.mrf.mxu2 }
0x2bc1   :  { %v8439_v60 = vadd.f32 %v8405_v57, %v5047_v27 }
0x2bc2   :  { %v5117_v13 = vpop.permute.xlu1 %5116 }
0x2bc3   :  { %6062 = vmatpush.xpose.msk.msra.mxu2 %vm513_vm10, %v5117_v13  ;;  %5246 = vrot.lane.b32.xlu2 %v8439_v60, %s6681_s4 }
0x2bc6   :  { %6063 = vmatmul.msk.f32.vlgmr.msra.gmra.mxu2 %vm513_vm10, %v5042_v22 }
0x2c0b   :  { %v5086_v42 = vpop.xlane.xlu0 %5085 }
0x2c0c   :  { %6504 = vrcp.f32 %v5086_v42  ;;  %v6085_v42 = vld [vmem:[%s8641_s15 + $0xb8] sm:$0xff] }
0x2c12   :  { %v6505_v14 = vpop.eup %6504 }
0x2c13   :  { %v5088_v35 = vmul.f32 %v6505_v14, %v6503_v56  ;;  %v6084_v14 = vld [vmem:[%s8641_s15 + $0xb0] sm:$0xff] }
0x2c15   :  { %6061 = vmatmul.msk.f32.vlgmr.msra.gmra.mxu1 %vm804_vm3, %v5088_v35  ;;  %v6083_v35 = vld [vmem:[%s8641_s15 + $0xa8] sm:$0xff] }
0x2c1d   :  { %v5247_v36 = vpop.permute.xlu2 %5246 }
0x2c1e   :  { %6068 = vmatpush.xpose.msk.msrb.mxu2 %vm513_vm10, %v5247_v36  ;;  %v6082_v36 = vld [vmem:[%s8641_s15 + $0xa0] sm:$0xff] }
0x2c21   :  { %6069 = vmatmul.msk.f32.vlgmr.msrb.gmra.mxu2 %vm513_vm10, %v8439_v60 }
0x2c2d   :  { %v5182_v57 = vpop.permute.xlu0 %5181 }
0x2c2e   :  { %6065 = vmatpush.xpose.msk.msrb.mxu1 %vm513_vm10, %v5182_v57 }
0x2c31   :  { %6066 = vmatmul.msk.f32.vlgmr.msrb.gmra.mxu1 %vm513_vm10, %v5045_v3 }
0x2c32   :  { %5339 = vmatpush.msra.mxu1 %v6074_v49 }
0x2c34   :  { %5340 = vmatpush.msra.mxu1 %v6073_v51 }
0x2c36   :  { %5341 = vmatpush.msra.mxu1 %v6072_v20 }
0x2c38   :  { %5342 = vmatpush.msra.mxu1 %v6071_v29 }
0x2c49   :  { %v5139_v48 = vpop.f32.mrf.mxu2 }
0x2c4a   :  { %v5142_v9 = vmul.f32 0.17677669, %v5139_v48 }
0x2c4c   :  { %v5143_v61 = vsel %vm804_vm3, %v5142_v9, -inf }
0x2c4d   :  { %5144 = vmax.xlane.f32.xlu2 %v5143_v61 }
0x2c92   :  { %v5112_v5 = vpop.f32.mrf.mxu1 }
0x2c93   :  { %6075 = vmatmul.msk.f32.vlgmr.msra.gmra.mxu1 %vm513_vm10, %v5112_v5 }
0x2ca4   :  { %v5269_v45 = vpop.f32.mrf.mxu2 }
0x2ca5   :  { %v5272_v4 = vmul.f32 0.17677669, %v5269_v45 }
0x2ca7   :  { %v5273_v50 = vsel %vm804_vm3, %v5272_v4, -inf }
0x2ca8   :  { %5274 = vmax.xlane.f32.xlu0 %v5273_v50 }
0x2cae   :  { %v5204_v59 = vpop.f32.mrf.mxu1 }
0x2caf   :  { %v5207_v19 = vmul.f32 0.17677669, %v5204_v59  ;;  %v8513_v59 = vld [vmem:[%s8640_s14 + $0x5] ss:$0 sm:$0xff] }
0x2cb1   :  { %v5208_v46 = vsel %vm804_vm3, %v5207_v19, -inf }
0x2cb2   :  { %5209 = vmax.xlane.f32.xlu1 %v5208_v46 }
0x2cbc   :  { %6158 = vrot.lane.b32.xlu0 %v6157_v34, %s6682_s29 }
0x2cc0   :  { %v5145_v37 = vpop.xlane.xlu2 %5144 }
0x2cc1   :  { %v5146_v1 = vsub.f32 %v5142_v9, %v5145_v37 }
0x2cc3   :  { %v5147_v55 = vmul.f32 1.442695, %v5146_v1 }
0x2cc5   :  { %6506 = vpow2.f32 %v5147_v55 }
0x2ccb   :  { %v6507_v41 = vpop.eup %6506 }
0x2ccc   :  { %v5149_v28 = vsel %vm804_vm3, %v6507_v41, 0.0 }
0x2ccd   :  { %5150 = vadd.xlane.f32.xlu2 %v5149_v28 }
0x2d10   :  { %v5344_v6 = vpop.f32.mrf.mxu1 }
0x2d11   :  { %v5356_v40 = vadd.f32 %v5344_v6, %v8312_v23 }
0x2d13   :  { %v8477_v24 = vadd.f32 %v8473_v44, %v5356_v40 }
0x2d15   :  { %v5373_v23 = vsel %vm513_vm10, %v8477_v24, 0.0 }
0x2d1b   :  { %v5275_v12 = vpop.xlane.xlu0 %5274 }
0x2d1c   :  { %v5276_v52 = vsub.f32 %v5272_v4, %v5275_v12  ;;  %v8507_v4 = vld [vmem:[%s8639_s13 + $0x5] ss:$0 sm:$0xff] }
0x2d1e   :  { %v5277_v10 = vmul.f32 1.442695, %v5276_v52 }
0x2d20   :  { %6508 = vpow2.f32 %v5277_v10 }
0x2d25   :  { %v5210_v31 = vpop.xlane.xlu1 %5209 }
0x2d26   :  { %v5211_v63 = vsub.f32 %v5207_v19, %v5210_v31  ;;  %v6509_v18 = vpop.eup %6508 }
0x2d27   :  { %v5279_v15 = vsel %vm804_vm3, %v6509_v18, 0.0 }
0x2d28   :  { %v5212_v17 = vmul.f32 1.442695, %v5211_v63  ;;  %5280 = vadd.xlane.f32.xlu2 %v5279_v15  ;;  %v8532_v63 = vld [vmem:[#allocation7 + $0x5] ss:$0 sm:$0xff] }
0x2d2a   :  { %6510 = vpow2.f32 %v5212_v17 }
0x2d2e   :  { %v6159_v39 = vpop.permute.xlu0 %6158 }
0x2d2f   :  { %v6161_v8 = vunpack.i.h.bf16 %v6159_v39  ;;  %v6160_v58 = vunpack.i.l.bf16 %v6159_v39 }
0x2d30   :  { %v6511_v47 = vpop.eup %6510  ;;  %5374 = vadd.xlane.f32.xlu2 %v5373_v23 }
0x2d31   :  { %v5214_v26 = vsel %vm804_vm3, %v6511_v47, 0.0  ;;  %5175 = vmatpush.msrb.mxu0 %v6160_v58  ;;  %5240 = vmatpush.msra.mxu3 %v6161_v8 }
0x2d32   :  { %5215 = vadd.xlane.f32.xlu1 %v5214_v26 }
0x2d33   :  { %5509 = vmatpush.msrb.mxu3 %v6085_v42 }
0x2d35   :  { %5510 = vmatpush.msrb.mxu3 %v6084_v14 }
0x2d37   :  { %5511 = vmatpush.msrb.mxu3 %v6083_v35 }
0x2d39   :  { %5512 = vmatpush.msrb.mxu3 %v6082_v36 }
0x2d40   :  { %v5151_v53 = vpop.xlane.xlu2 %5150 }
0x2d41   :  { %6512 = vrcp.f32 %v5151_v53  ;;  %v6097_v53 = vld [vmem:[%s8643_s17 + $0x178] sm:$0xff] }
0x2d42   :  { %5715 = vmatpush.msra.mxu2 %v6097_v53 }
0x2d47   :  { %v6513_v32 = vpop.eup %6512 }
0x2d48   :  { %v5153_v33 = vmul.f32 %v6513_v32, %v6507_v41  ;;  %v6096_v32 = vld [vmem:[%s8643_s17 + $0x170] sm:$0xff] }
0x2d49   :  { %5716 = vmatpush.msra.mxu2 %v6096_v32 }
0x2d4a   :  { %6064 = vmatmul.msk.f32.vlgmr.msrb.gmra.mxu0 %vm804_vm3, %v5153_v33  ;;  %v6095_v33 = vld [vmem:[%s8643_s17 + $0x168] sm:$0xff] }
0x2d4b   :  { %5284 = vrot.lane.b32.xlu1 %v8439_v60, %s6682_s29  ;;  %5717 = vmatpush.msra.mxu2 %v6095_v33 }
0x2d9b   :  { %v5281_v38 = vpop.xlane.xlu2 %5280 }
0x2da3   :  { %v5375_v11 = vpop.xlane.xlu2 %5374 }
0x2da4   :  { %v5385_v22 = vmul.f32 %v5375_v11, %v6859_v21 }
0x2da5   :  { %v5216_v54 = vpop.xlane.xlu1 %5215 }
0x2da6   :  { %v5389_v25 = vsub.f32 %v8477_v24, %v5385_v22  ;;  %6514 = vrcp.f32 %v5216_v54  ;;  %v6093_v22 = vld [vmem:[%s8643_s17 + $0x158] sm:$0xff] }
0x2da7   :  { %6516 = vrcp.f32 %v5281_v38  ;;  %v6094_v38 = vld [vmem:[%s8643_s17 + $0x160] sm:$0xff] }
0x2da8   :  { %v5393_v30 = vmul.f32 %v5389_v25, %v5389_v25  ;;  %5718 = vmatpush.msra.mxu2 %v6094_v38 }
0x2daa   :  { %v5397_v56 = vsel %vm513_vm10, %v5393_v30, 0.0  ;;  %5719 = vmatpush.msra.mxu2 %v6093_v22 }
0x2dab   :  { %5398 = vadd.xlane.f32.xlu1 %v5397_v56 }
0x2dac   :  { %v6515_v2 = vpop.eup %6514 }
0x2dad   :  { %v5218_v62 = vmul.f32 %v6515_v2, %v6511_v47  ;;  %v6517_v3 = vpop.eup %6516  ;;  %v6091_v2 = vld [vmem:[%s8643_s17 + $0x148] sm:$0xff] }
0x2dae   :  { %v5283_v27 = vmul.f32 %v6517_v3, %v6509_v18 }
0x2daf   :  { %6067 = vmatmul.msk.f32.vlgmr.msra.gmra.mxu3 %vm804_vm3, %v5218_v62 }
0x2dbd   :  { %v5285_v60 = vpop.permute.xlu1 %5284 }
0x2dbe   :  { %5305 = vmatpush.msra.mxu0 %v5285_v60 }
0x2dbf   :  { %6070 = vmatmul.msk.f32.vlgmr.msra.gmra.mxu0 %vm804_vm3, %v5283_v27  ;;  %v6090_v27 = vld [vmem:[%s8643_s17 + $0x140] sm:$0xff] }
0x2dc7   :  { %v5177_v13 = vpop.f32.mrf.mxu0 }
0x2dc8   :  { %6076 = vmatmul.msk.f32.gmra.mxu1 %vm513_vm10, %v5177_v13 }
0x2e1e   :  { %v5399_v57 = vpop.xlane.xlu1 %5398 }
0x2e1f   :  { %v5409_v49 = vmul.f32 %v5399_v57, %v6859_v21 }
0x2e21   :  { %v5413_v51 = vadd.f32 1e-05, %v5409_v49 }
0x2e23   :  { %6518 = vrsqrt.f32 %v5413_v51  ;;  %vm5423_vm9 = vweird.f32 %v5413_v51 }
0x2e29   :  { %v6519_v20 = vpop.eup %6518 }
0x2e2a   :  { %v5418_v48 = vmul.f32 %v6519_v20, %v5413_v51  ;;  %vm5424_vm3 = vweird.f32 %v6519_v20 }
0x2e2b   :  { %vm5425_vm11 = vmor %vm5423_vm9, %vm5424_vm3 }
0x2e2c   :  { %v5419_v9 = vmul.f32 %v6519_v20, %v5418_v48 }
0x2e2e   :  { %v5420_v61 = vmul.f32 0.5, %v5419_v9 }
0x2e30   :  { %v5421_v29 = vsub.f32 1.5, %v5420_v61 }
0x2e32   :  { %v5422_v5 = vmul.f32 %v6519_v20, %v5421_v29  ;;  %v5242_v45 = vpop.f32.mrf.mxu3 }
0x2e33   :  { %6077 = vmatmul.msk.f32.gmra.mxu1 %vm513_vm10, %v5242_v45 }
0x2e34   :  { %v5426_v50 = vsel %vm5425_vm11, %v6519_v20, %v5422_v5 }
0x2e35   :  { %v5457_v19 = vmul.f32 %v5426_v50, %v5389_v25  ;;  %v6092_v25 = vld [vmem:[%s8643_s17 + $0x150] sm:$0xff]  ;;  %s6684_s17 = smov [#allocation10]  }
0x2e36   :  { %5720 = vmatpush.msra.mxu2 %v6092_v25  ;;  %s5782_s24 = sshll.u32 %s6684_s17, 4  ;;  %s5783_s24 = int_to_ptr.vmem [resolvable:$true] %s5782_s24 }
0x2e37   :  { %v5464_v46 = vmul.f32 %v8507_v4, %v5457_v19 }
0x2e38   :  { %5721 = vmatpush.msra.mxu2 %v6091_v2 }
0x2e39   :  { %v5471_v34 = vadd.f32 %v8513_v59, %v5464_v46 }
0x2e3a   :  { %5722 = vmatpush.msra.mxu2 %v6090_v27 }
0x2e3b   :  { %6086 = vmatmul.msk.f32.vlgmr.msrb.gmra.mxu3 %vm513_vm10, %v5471_v34 }
0x2e3c   :  { %v5307_v37 = vpop.f32.mrf.mxu0 }
0x2e3d   :  { %6078 = vmatmul.msk.f32.gmra.mxu1 %vm513_vm10, %v5307_v37 }
0x2e45   :  { %v5347_v1 = vpop.f32.mrf.mxu1 }
0x2e46   :  { %v5357_v55 = vadd.f32 %v5347_v1, %v8385_v16 }
0x2e48   :  { %v8521_v41 = vadd.f32 %v8473_v44, %v5357_v55 }
0x2e4a   :  { %v5376_v28 = vsel %vm513_vm10, %v8521_v41, 0.0 }
0x2e4b   :  { %5377 = vadd.xlane.f32.xlu2 %v5376_v28 }
0x2eb0   :  { %v5350_v12 = vpop.f32.mrf.mxu1 }
0x2eb1   :  { %v5358_v52 = vadd.f32 %v5350_v12, %v8391_v0 }
0x2eb3   :  { %v8527_v10 = vadd.f32 %v8473_v44, %v5358_v52 }
0x2eb5   :  { %v5379_v6 = vsel %vm513_vm10, %v8527_v10, 0.0 }
0x2eb6   :  { %5380 = vadd.xlane.f32.xlu0 %v5379_v6 }
0x2eba   :  { %v5353_v31 = vpop.f32.mrf.mxu1 }
0x2ebb   :  { %v5359_v16 = vadd.f32 %v5353_v31, %v8397_v7 }
0x2ebd   :  { %v8535_v18 = vadd.f32 %v8473_v44, %v5359_v16 }
0x2ebe   :  { %v5378_v40 = vpop.xlane.xlu2 %5377  ;;  %v5514_v17 = vpop.f32.mrf.mxu3 }
0x2ebf   :  { %v5386_v15 = vmul.f32 %v5378_v40, %v6859_v21  ;;  %v5515_v0 = vadd.f32 %v8532_v63, %v5514_v17  ;;  %v5382_v39 = vsel %vm513_vm10, %v8535_v18, 0.0 }
0x2ec0   :  { %5383 = vadd.xlane.f32.xlu2 %v5382_v39 }
0x2ec1   :  { %v8542_v47 = vsub.f32 %v8521_v41, %v5386_v15  ;;  %v5530_v8 = vmul.f32 0.70710677, %v5515_v0  ;;  %v5526_v1 = vmul.f32 0.5, %v5515_v0 }
0x2ec3   :  { %v5542_v7 = vand.u32 2147483647, %v5530_v8  ;;  %v5394_v58 = vmul.f32 %v8542_v47, %v8542_v47  ;;  %vm5534_vm15 = vcmp.ge.f32.partialorder %v5530_v8, 0.0 }
0x2ec4   :  { %v5538_v34 = vsel %vm5534_vm15, 1.0, %v6679_v43 }
0x2ec5   :  { %v5546_v44 = vmul.f32 0.3275911, %v5542_v7  ;;  %v5400_v26 = vsel %vm513_vm10, %v5394_v58, 0.0  ;;  %v5650_v35 = vsub.f32 0.0, %v5542_v7 }
0x2ec7   :  { %v5550_v23 = vadd.f32 1.0, %v5546_v44  ;;  %v5654_v49 = vmul.f32 %v5650_v35, %v5542_v7 }
0x2ec8   :  { %5401 = vadd.xlane.f32.xlu2 %v5400_v26 }
0x2ec9   :  { %6520 = vrcp.f32 %v5550_v23  ;;  %v5565_v56 = vand.u32 2147483648, %v5550_v23  ;;  %v5563_v3 = vand.u32 2147483647, %v5550_v23  ;;  %vm5559_vm12 = vweird.f32 %v5550_v23 }
0x2eca   :  { %v5658_v48 = vmul.f32 1.442695, %v5654_v49 }
0x2ecb   :  { %v5566_v13 = vor.u32 1.1754944e-38, %v5565_v56  ;;  %vm5564_vm14 = vcmp.eq.f32.partialorder %v5563_v3, 8.507059e+37 }
0x2ecc   :  { %6522 = vpow2.f32 %v5658_v48 }
0x2ecf   :  { %v6521_v11 = vpop.eup %6520 }
0x2ed0   :  { %v5555_v54 = vmul.f32 %v6521_v11, %v5550_v23  ;;  %vm5560_vm0 = vweird.f32 %v6521_v11 }
0x2ed1   :  { %vm5561_vm13 = vmor %vm5559_vm12, %vm5560_vm0 }
0x2ed2   :  { %v5556_v30 = vsub.f32 1.0, %v5555_v54  ;;  %v6523_v50 = vpop.eup %6522 }
0x2ed4   :  { %v5557_v62 = vmul.f32 %v6521_v11, %v5556_v30 }
0x2ed6   :  { %v5558_v60 = vadd.f32 %v6521_v11, %v5557_v62 }
0x2ed8   :  { %v5562_v42 = vsel %vm5561_vm13, %v6521_v11, %v5558_v60 }
0x2ed9   :  { %v5567_v14 = vsel %vm5564_vm14, %v5566_v13, %v5562_v42 }
0x2eda   :  { %v5614_v36 = vmul.f32 1.0614054, %v5567_v14 }
0x2edc   :  { %v5618_v57 = vadd.f32 -1.4531521, %v5614_v36 }
0x2ede   :  { %v5622_v51 = vmul.f32 %v5618_v57, %v5567_v14 }
0x2ee0   :  { %v5626_v20 = vadd.f32 1.4214138, %v5622_v51 }
0x2ee2   :  { %v5630_v9 = vmul.f32 %v5626_v20, %v5567_v14 }
0x2ee4   :  { %v5634_v61 = vadd.f32 -0.28449672, %v5630_v9 }
0x2ee6   :  { %v5638_v29 = vmul.f32 %v5634_v61, %v5567_v14 }
0x2ee8   :  { %v5642_v5 = vadd.f32 0.2548296, %v5638_v29 }
0x2eea   :  { %v5646_v45 = vmul.f32 %v5642_v5, %v5567_v14 }
0x2eec   :  { %v5666_v19 = vmul.f32 %v6523_v50, %v5646_v45 }
0x2eee   :  { %v5670_v46 = vsub.f32 1.0, %v5666_v19 }
0x2ef0   :  { %v5674_v37 = vmul.f32 %v5670_v46, %v5538_v34 }
0x2ef2   :  { %v5678_v55 = vadd.f32 1.0, %v5674_v37 }
0x2ef4   :  { %v5682_v28 = vmul.f32 %v5678_v55, %v5526_v1 }
0x2ef6   :  { %6098 = vmatmul.msk.f32.vlgmr.msra.gmra.mxu2 %vm1415_vm7, %v5682_v28 }
0x2f29   :  { %v5381_v12 = vpop.xlane.xlu0 %5380 }
0x2f2a   :  { %v5387_v52 = vmul.f32 %v5381_v12, %v6859_v21 }
0x2f2c   :  { %v5391_v6 = vsub.f32 %v8527_v10, %v5387_v52 }
0x2f2e   :  { %v5395_v31 = vmul.f32 %v5391_v6, %v5391_v6 }
0x2f30   :  { %v5403_v16 = vsel %vm513_vm10, %v5395_v31, 0.0 }
0x2f31   :  { %5404 = vadd.xlane.f32.xlu2 %v5403_v16 }
0x2f33   :  { %v5384_v40 = vpop.xlane.xlu2 %5383 }
0x2f34   :  { %v5388_v17 = vmul.f32 %v5384_v40, %v6859_v21 }
0x2f36   :  { %v5392_v15 = vsub.f32 %v8535_v18, %v5388_v17 }
0x2f38   :  { %v5396_v39 = vmul.f32 %v5392_v15, %v5392_v15 }
0x2f3a   :  { %v5406_v0 = vsel %vm513_vm10, %v5396_v39, 0.0 }
0x2f3b   :  { %5407 = vadd.xlane.f32.xlu2 %v5406_v0  ;;  %v5402_v8 = vpop.xlane.xlu2 %5401 }
0x2f3c   :  { %v5410_v7 = vmul.f32 %v5402_v8, %v6859_v21 }
0x2f3e   :  { %v5414_v58 = vadd.f32 1e-05, %v5410_v7 }
0x2f40   :  { %6524 = vrsqrt.f32 %v5414_v58  ;;  %vm5433_vm2 = vweird.f32 %v5414_v58 }
0x2f46   :  { %v6525_v44 = vpop.eup %6524 }
0x2f47   :  { %v5428_v23 = vmul.f32 %v6525_v44, %v5414_v58  ;;  %vm5434_vm1 = vweird.f32 %v6525_v44 }
0x2f48   :  { %vm5435_vm4 = vmor %vm5433_vm2, %vm5434_vm1 }
0x2f49   :  { %v5429_v26 = vmul.f32 %v6525_v44, %v5428_v23 }
0x2f4b   :  { %v5430_v53 = vmul.f32 0.5, %v5429_v26 }
0x2f4d   :  { %v5431_v32 = vsub.f32 1.5, %v5430_v53 }
0x2f4f   :  { %v5432_v33 = vmul.f32 %v6525_v44, %v5431_v32 }
0x2f51   :  { %v5436_v38 = vsel %vm5435_vm4, %v6525_v44, %v5432_v33 }
0x2f52   :  { %v5458_v11 = vmul.f32 %v5436_v38, %v8542_v47 }
0x2f54   :  { %v5465_v22 = vmul.f32 %v8507_v4, %v5458_v11 }
0x2f56   :  { %v5472_v54 = vadd.f32 %v8513_v59, %v5465_v22 }
0x2f58   :  { %6087 = vmatmul.msk.f32.gmra.mxu3 %vm513_vm10, %v5472_v54 }
0x2fa4   :  { %v5405_v25 = vpop.xlane.xlu2 %5404 }
0x2fa5   :  { %v5411_v30 = vmul.f32 %v5405_v25, %v6859_v21 }
0x2fa7   :  { %v5415_v56 = vadd.f32 1e-05, %v5411_v30 }
0x2fa9   :  { %6526 = vrsqrt.f32 %v5415_v56  ;;  %vm5443_vm6 = vweird.f32 %v5415_v56 }
0x2fae   :  { %v5408_v2 = vpop.xlane.xlu2 %5407 }
0x2faf   :  { %v6527_v62 = vpop.eup %6526  ;;  %v5412_v3 = vmul.f32 %v5408_v2, %v6859_v21 }
0x2fb0   :  { %v5438_v27 = vmul.f32 %v6527_v62, %v5415_v56  ;;  %vm5444_vm5 = vweird.f32 %v6527_v62 }
0x2fb1   :  { %v5416_v60 = vadd.f32 1e-05, %v5412_v3  ;;  %vm5445_vm8 = vmor %vm5443_vm6, %vm5444_vm5 }
0x2fb2   :  { %v5439_v13 = vmul.f32 %v6527_v62, %v5438_v27 }
0x2fb3   :  { %6528 = vrsqrt.f32 %v5416_v60  ;;  %vm5453_vm9 = vweird.f32 %v5416_v60 }
0x2fb4   :  { %v5440_v47 = vmul.f32 0.5, %v5439_v13 }
0x2fb6   :  { %v5441_v42 = vsub.f32 1.5, %v5440_v47 }
0x2fb8   :  { %v5442_v14 = vmul.f32 %v6527_v62, %v5441_v42 }
0x2fb9   :  { %v6529_v35 = vpop.eup %6528 }
0x2fba   :  { %v5446_v36 = vsel %vm5445_vm8, %v6527_v62, %v5442_v14  ;;  %v5448_v57 = vmul.f32 %v6529_v35, %v5416_v60  ;;  %vm5454_vm3 = vweird.f32 %v6529_v35 }
0x2fbb   :  { %v5459_v49 = vmul.f32 %v5446_v36, %v5391_v6  ;;  %vm5455_vm11 = vmor %vm5453_vm9, %vm5454_vm3 }
0x2fbc   :  { %v5449_v51 = vmul.f32 %v6529_v35, %v5448_v57 }
0x2fbd   :  { %v5466_v20 = vmul.f32 %v8507_v4, %v5459_v49 }
0x2fbe   :  { %v5450_v48 = vmul.f32 0.5, %v5449_v51 }
0x2fbf   :  { %v5473_v21 = vadd.f32 %v8513_v59, %v5466_v20 }
0x2fc0   :  { %v5451_v9 = vsub.f32 1.5, %v5450_v48 }
0x2fc1   :  { %6088 = vmatmul.msk.f32.gmra.mxu3 %vm513_vm10, %v5473_v21 }
0x2fc2   :  { %v5452_v61 = vmul.f32 %v6529_v35, %v5451_v9 }
0x2fc4   :  { %v5456_v29 = vsel %vm5455_vm11, %v6529_v35, %v5452_v61 }
0x2fc5   :  { %v5460_v5 = vmul.f32 %v5456_v29, %v5392_v15 }
0x2fc7   :  { %v5467_v45 = vmul.f32 %v8507_v4, %v5460_v5 }
0x2fc9   :  { %v5474_v50 = vadd.f32 %v8513_v59, %v5467_v45 }
0x2fcb   :  { %6089 = vmatmul.msk.f32.gmra.mxu3 %vm513_vm10, %v5474_v50 }
0x2fdb   :  { %v5517_v19 = vpop.f32.mrf.mxu3 }
0x2fdc   :  { %v5518_v46 = vadd.f32 %v8532_v63, %v5517_v19 }
0x2fde   :  { %v5531_v34 = vmul.f32 0.70710677, %v5518_v46  ;;  %v5527_v30 = vmul.f32 0.5, %v5518_v46 }
0x2fe0   :  { %v5543_v37 = vand.u32 2147483647, %v5531_v34  ;;  %vm5535_vm15 = vcmp.ge.f32.partialorder %v5531_v34, 0.0 }
0x2fe1   :  { %v5539_v54 = vsel %vm5535_vm15, 1.0, %v6679_v43 }
0x2fe2   :  { %v5547_v1 = vmul.f32 0.3275911, %v5543_v37  ;;  %v5651_v15 = vsub.f32 0.0, %v5543_v37 }
0x2fe4   :  { %v5551_v55 = vadd.f32 1.0, %v5547_v1  ;;  %v5655_v8 = vmul.f32 %v5651_v15, %v5543_v37 }
0x2fe6   :  { %6530 = vrcp.f32 %v5551_v55  ;;  %v5580_v6 = vand.u32 2147483648, %v5551_v55  ;;  %v5578_v16 = vand.u32 2147483647, %v5551_v55  ;;  %vm5574_vm12 = vweird.f32 %v5551_v55 }
0x2fe7   :  { %v5660_v44 = vmul.f32 1.442695, %v5655_v8 }
0x2fe8   :  { %v5581_v59 = vor.u32 1.1754944e-38, %v5580_v6  ;;  %vm5579_vm14 = vcmp.eq.f32.partialorder %v5578_v16, 8.507059e+37 }
0x2fe9   :  { %6532 = vpow2.f32 %v5660_v44 }
0x2fec   :  { %v6531_v28 = vpop.eup %6530 }
0x2fed   :  { %v5570_v12 = vmul.f32 %v6531_v28, %v5551_v55  ;;  %vm5575_vm0 = vweird.f32 %v6531_v28 }
0x2fee   :  { %vm5576_vm13 = vmor %vm5574_vm12, %vm5575_vm0 }
0x2fef   :  { %v5571_v52 = vsub.f32 1.0, %v5570_v12  ;;  %v6533_v38 = vpop.eup %6532 }
0x2ff1   :  { %v5572_v31 = vmul.f32 %v6531_v28, %v5571_v52 }
0x2ff3   :  { %v5573_v4 = vadd.f32 %v6531_v28, %v5572_v31 }
0x2ff5   :  { %v5577_v40 = vsel %vm5576_vm13, %v6531_v28, %v5573_v4 }
0x2ff6   :  { %v5582_v17 = vsel %vm5579_vm14, %v5581_v59, %v5577_v40 }
0x2ff7   :  { %v5615_v39 = vmul.f32 1.0614054, %v5582_v17 }
0x2ff9   :  { %v5619_v0 = vadd.f32 -1.4531521, %v5615_v39 }
0x2ffb   :  { %v5623_v7 = vmul.f32 %v5619_v0, %v5582_v17 }
0x2ffd   :  { %v5627_v58 = vadd.f32 1.4214138, %v5623_v7 }
0x2fff   :  { %v5631_v23 = vmul.f32 %v5627_v58, %v5582_v17 }
0x3001   :  { %v5635_v26 = vadd.f32 -0.28449672, %v5631_v23 }
0x3003   :  { %v5639_v53 = vmul.f32 %v5635_v26, %v5582_v17 }
0x3005   :  { %v5643_v32 = vadd.f32 0.2548296, %v5639_v53 }
0x3007   :  { %v5647_v33 = vmul.f32 %v5643_v32, %v5582_v17 }
0x3009   :  { %v5667_v11 = vmul.f32 %v6533_v38, %v5647_v33 }
0x300b   :  { %v5671_v22 = vsub.f32 1.0, %v5667_v11 }
0x300d   :  { %v5675_v25 = vmul.f32 %v5671_v22, %v5539_v54 }
0x300f   :  { %v5679_v56 = vadd.f32 1.0, %v5675_v25 }
0x3011   :  { %v5683_v2 = vmul.f32 %v5679_v56, %v5527_v30 }
0x3013   :  { %6099 = vmatmul.msk.f32.gmra.mxu2 %vm1415_vm7, %v5683_v2 }
0x3044   :  { %v5520_v62 = vpop.f32.mrf.mxu3 }
0x3045   :  { %v8596_v3 = vadd.f32 %v8532_v63, %v5520_v62 }
0x3047   :  { %v8599_v27 = vmul.f32 0.70710677, %v8596_v3  ;;  %v5528_v62 = vmul.f32 0.5, %v8596_v3  ;;  %v5724_v3 = vpop.f32.mrf.mxu2 }
0x3049   :  { %v5544_v60 = vand.u32 2147483647, %v8599_v27  ;;  %vm5536_vm11 = vcmp.ge.f32.partialorder %v8599_v27, 0.0 }
0x304a   :  { %v5540_v25 = vsel %vm5536_vm11, 1.0, %v6679_v43 }
0x304b   :  { %v5548_v13 = vmul.f32 0.3275911, %v5544_v60  ;;  %v5652_v50 = vsub.f32 0.0, %v5544_v60 }
0x304d   :  { %v5552_v47 = vadd.f32 1.0, %v5548_v13  ;;  %v5656_v1 = vmul.f32 %v5652_v50, %v5544_v60 }
0x304e   :  { %v5523_v42 = vpop.f32.mrf.mxu3 }
0x304f   :  { %6534 = vrcp.f32 %v5552_v47  ;;  %v8603_v14 = vadd.f32 %v8532_v63, %v5523_v42  ;;  %v5595_v21 = vand.u32 2147483648, %v5552_v47  ;;  %v5593_v61 = vand.u32 2147483647, %v5552_v47 }
0x3050   :  { %vm5589_vm2 = vweird.f32 %v5552_v47  ;;  %v5662_v16 = vmul.f32 1.442695, %v5656_v1 }
0x3051   :  { %v8606_v35 = vmul.f32 0.70710677, %v8603_v14  ;;  %v5596_v63 = vor.u32 1.1754944e-38, %v5595_v21  ;;  %vm5594_vm5 = vcmp.eq.f32.partialorder %v5593_v61, 8.507059e+37 }
0x3053   :  { %v5545_v36 = vand.u32 2147483647, %v8606_v35  ;;  %vm5537_vm0 = vcmp.ge.f32.partialorder %v8606_v35, 0.0 }
0x3055   :  { %v6535_v57 = vpop.eup %6534  ;;  %v5549_v51 = vmul.f32 0.3275911, %v5545_v36  ;;  %v5653_v0 = vsub.f32 0.0, %v5545_v36 }
0x3056   :  { %v5585_v49 = vmul.f32 %v6535_v57, %v5552_v47  ;;  %vm5590_vm1 = vweird.f32 %v6535_v57 }
0x3057   :  { %v5553_v48 = vadd.f32 1.0, %v5549_v51  ;;  %vm5591_vm4 = vmor %vm5589_vm2, %vm5590_vm1  ;;  %v5657_v23 = vmul.f32 %v5653_v0, %v5545_v36 }
0x3058   :  { %v5586_v20 = vsub.f32 1.0, %v5585_v49  ;;  %v5541_v49 = vsel %vm5537_vm0, 1.0, %v6679_v43 }
0x3059   :  { %6536 = vrcp.f32 %v5553_v48  ;;  %v5610_v12 = vand.u32 2147483648, %v5553_v48  ;;  %v5608_v6 = vand.u32 2147483647, %v5553_v48  ;;  %vm5604_vm8 = vweird.f32 %v5553_v48 }
0x305a   :  { %v5587_v9 = vmul.f32 %v6535_v57, %v5586_v20  ;;  %6538 = vpow2.f32 %v5662_v16  ;;  %v5664_v11 = vmul.f32 1.442695, %v5657_v23  ;;  %v5529_v20 = vmul.f32 0.5, %v8603_v14 }
0x305b   :  { %v5611_v40 = vor.u32 1.1754944e-38, %v5610_v12  ;;  %vm5609_vm9 = vcmp.eq.f32.partialorder %v5608_v6, 8.507059e+37 }
0x305c   :  { %v5588_v29 = vadd.f32 %v6535_v57, %v5587_v9  ;;  %6540 = vpow2.f32 %v5664_v11 }
0x305e   :  { %v5592_v5 = vsel %vm5591_vm4, %v6535_v57, %v5588_v29 }
0x305f   :  { %v5597_v45 = vsel %vm5594_vm5, %v5596_v63, %v5592_v5  ;;  %v6537_v19 = vpop.eup %6536  ;;  %v5736_v63 = vadd.f32 %v5724_v3, %v8477_v24  ;;  %v6213_v5 = vld [vmem:[#allocation8 + $0x5] ss:$0 sm:$0xff]  ;;  %v6683_v24 = vmov 512.0  }
0x3060   :  { %v5616_v46 = vmul.f32 1.0614054, %v5597_v45  ;;  %v5600_v34 = vmul.f32 %v6537_v19, %v5553_v48  ;;  %vm5605_vm6 = vweird.f32 %v6537_v19  ;;  %v6539_v32 = vpop.eup %6538  ;;  %6542 = vrcp.f32 %v6683_v24 }
0x3061   :  { %vm5606_vm3 = vmor %vm5604_vm8, %vm5605_vm6 }
0x3062   :  { %v5620_v37 = vadd.f32 -1.4531521, %v5616_v46  ;;  %v5601_v55 = vsub.f32 1.0, %v5600_v34  ;;  %v6541_v36 = vpop.eup %6540 }
0x3064   :  { %v5624_v28 = vmul.f32 %v5620_v37, %v5597_v45  ;;  %v5602_v52 = vmul.f32 %v6537_v19, %v5601_v55 }
0x3066   :  { %v5628_v31 = vadd.f32 1.4214138, %v5624_v28  ;;  %v5603_v4 = vadd.f32 %v6537_v19, %v5602_v52  ;;  %v6543_v52 = vpop.eup %6542 }
0x3067   :  { %v5766_v6 = vmul.f32 512.0, %v6543_v52 }
0x3068   :  { %v5632_v59 = vmul.f32 %v5628_v31, %v5597_v45  ;;  %v5607_v17 = vsel %vm5606_vm3, %v6537_v19, %v5603_v4 }
0x3069   :  { %v5612_v39 = vsel %vm5609_vm9, %v5611_v40, %v5607_v17 }
0x306a   :  { %v5636_v15 = vadd.f32 -0.28449672, %v5632_v59  ;;  %v5617_v8 = vmul.f32 1.0614054, %v5612_v39 }
0x306c   :  { %v5640_v7 = vmul.f32 %v5636_v15, %v5597_v45  ;;  %v5621_v58 = vadd.f32 -1.4531521, %v5617_v8 }
0x306e   :  { %v5644_v44 = vadd.f32 0.2548296, %v5640_v7  ;;  %v5625_v26 = vmul.f32 %v5621_v58, %v5612_v39 }
0x3070   :  { %v5648_v53 = vmul.f32 %v5644_v44, %v5597_v45  ;;  %v5629_v33 = vadd.f32 1.4214138, %v5625_v26  ;;  %v5745_v45 = vadd.f32 %v6213_v5, %v5736_v63 }
0x3072   :  { %v5668_v38 = vmul.f32 %v6539_v32, %v5648_v53  ;;  %v5633_v22 = vmul.f32 %v5629_v33, %v5612_v39 }
0x3074   :  { %v5672_v54 = vsub.f32 1.0, %v5668_v38  ;;  %v5637_v30 = vadd.f32 -0.28449672, %v5633_v22 }
0x3076   :  { %v5676_v56 = vmul.f32 %v5672_v54, %v5540_v25  ;;  %v5641_v2 = vmul.f32 %v5637_v30, %v5612_v39 }
0x3078   :  { %v5680_v60 = vadd.f32 1.0, %v5676_v56  ;;  %v5645_v13 = vadd.f32 0.2548296, %v5641_v2 }
0x307a   :  { %v5684_v47 = vmul.f32 %v5680_v60, %v5528_v62  ;;  %v5649_v42 = vmul.f32 %v5645_v13, %v5612_v39 }
0x307c   :  { %6100 = vmatmul.msk.f32.gmra.mxu2 %vm1415_vm7, %v5684_v47  ;;  %v5669_v27 = vmul.f32 %v6541_v36, %v5649_v42 }
0x307e   :  { %v5673_v57 = vsub.f32 1.0, %v5669_v27 }
0x3080   :  { %v5677_v51 = vmul.f32 %v5673_v57, %v5541_v49 }
0x3082   :  { %v5681_v48 = vadd.f32 1.0, %v5677_v51 }
0x3084   :  { %v5685_v21 = vmul.f32 %v5681_v48, %v5529_v20 }
0x3086   :  { %6101 = vmatmul.msk.f32.gmra.mxu2 %vm1415_vm7, %v5685_v21  ;;  %vm5770_vm7 = vweird.f32 %v6543_v52 }
0x3096   :  { %v5727_v9 = vpop.f32.mrf.mxu2 }
0x3097   :  { %v5737_v50 = vadd.f32 %v5727_v9, %v8521_v41  ;;  %v5767_v41 = vsub.f32 1.0, %v5766_v6 }
0x3099   :  { %v5746_v46 = vadd.f32 %v6213_v5, %v5737_v50 }
0x30ff   :  { %v5730_v61 = vpop.f32.mrf.mxu2 }
0x3100   :  { %v5738_v29 = vadd.f32 %v5730_v61, %v8527_v10 }
0x3102   :  { %v5747_v35 = vadd.f32 %v6213_v5, %v5738_v29 }
0x3104   :  { %v5749_v19 = vsub.f32 %v5745_v45, %v5747_v35 }
0x3106   :  { %v5751_v37 = vmul.f32 %v5749_v19, %v5749_v19 }
0x3108   :  { %v5753_v28 = vsel %vm513_vm10, %v5751_v37, 0.0 }
0x3109   :  { %v5733_v43 = vpop.f32.mrf.mxu2 }
0x310a   :  { %v5739_v14 = vadd.f32 %v5733_v43, %v8535_v18  ;;  %v5768_v18 = vmul.f32 %v6543_v52, %v5767_v41 }
0x310c   :  { %v5748_v34 = vadd.f32 %v6213_v5, %v5739_v14  ;;  %v5769_v17 = vadd.f32 %v6543_v52, %v5768_v18 }
0x310e   :  { %v5750_v1 = vsub.f32 %v5746_v46, %v5748_v34  ;;  %v5771_v0 = vsel %vm5770_vm7, %v6543_v52, %v5769_v17 }
0x3110   :  { %v5752_v55 = vmul.f32 %v5750_v1, %v5750_v1 }
0x3112   :  { %v5754_v10 = vsel %vm513_vm10, %v5752_v55, 0.0  ;;  %vm5775_vm10 = vcmask 0  }
0x3113   :  { %v5755_v12 = vadd.f32 %v5754_v10, %v5753_v28 }
0x3115   :  { %5756 = vadd.xlane.f32.xlu2 %v5755_v12 }
0x3188   :  { %v5757_v31 = vpop.xlane.xlu2 %5756 }
0x3189   :  { %v5758_v16 = vrot.slane %v5757_v31, 4 }
0x318b   :  { %v5759_v4 = vadd.f32 %v5758_v16, %v5757_v31 }
0x318d   :  { %v5760_v59 = vrot.slane %v5759_v4, 2 }
0x318f   :  { %v5761_v40 = vadd.f32 %v5760_v59, %v5759_v4 }
0x3191   :  { %v5762_v15 = vrot.slane %v5761_v40, 1 }
0x3193   :  { %v5763_v39 = vadd.f32 %v5762_v15, %v5761_v40 }
0x3195   :  { %6120 = vpush %v5763_v39 }
0x3196   :  { %6122 = vpush %v5771_v0 }
0x31c6   :  { %s6121_s12 = spop %6120 }
0x31c7   :  { %s6123_s26 = spop %6122 }
0x31c8   :  { %s5773_s27 = smul.f32 %s6123_s26, %s6121_s12 }
0x31ca   :  { %v5774_v8 = vstv %s5773_s27 }
0x31cb   :  { %5776 = vst.msk [vmem:[#allocation10] sm:$0x1] %vm5775_vm10, %v5774_v8 }
0x31cc   :  { %5787 = dma.vmem_to_hbm [thread:$0]  %s5783_s24, 16, %s5785_s3, [#allocation4]  }
0x31cd   :  { %6670 = dma.done.wait [#allocation4], 16  }
0x31ce   :  { %6671 = vsyncadd [#allocation4], 4294967280 }
0x31cf   :  { %5792 = vsyncpa [#allocation3], 1 }
0x31d0   :  { %5793 = vsyncpa [#allocation6], 1 }
0x31d1   :  { %5794 = vsyncpa [#allocation9], 1 }
0x31d2   :  { %5795 = vsyncpa [#allocation4], 1 }

</bundles_post_ra>
